<compile_context>
chip_gen: v5e
topology: v5e:2x2
jax: 0.10.0
libtpu: 0.0.40
codegen_flags: <defaults>
</compile_context>

<pallas_src>
import functools

import numpy as np
import jax
import jax.numpy as jnp
from jax.experimental import pallas as pl
from jax.experimental.pallas import tpu as pltpu


CPAD = 128                      # all channel dims padded to one lane-dense tile
MAX_ACC_ROWS = 256              # f32 conv accumulator rows -> stays in vregs

# toy backbone config (widths scaled 1/16, 2 blocks/layer instead of 3/4/23)
STEM = 4
PLANES = (4, 8, 16)
WIDTH_MULT = 2
BLOCKS = 2
OUT_CHANNELS = 24
STEM_K = 7
STEM_KPAD = 256                 # 7*7*3 = 147 im2col lanes padded to 2 lane tiles


def _pick_vmem_limit():
    """Generation-aware scoped-VMEM limit (v7x: 64 MiB phys, v5e/v6e: 128)."""
    try:
        cap = int(pltpu.get_tpu_info().vmem_capacity_bytes)
        return max(32 * 1024 * 1024, min(96 * 1024 * 1024, (cap * 3) // 4))
    except Exception:
        return 32 * 1024 * 1024  # conservative fallback that works everywhere


VMEM_LIMIT = _pick_vmem_limit()


# ----------------------------------------------------------------------------
# small static helpers
# ----------------------------------------------------------------------------
def _round_up(a, b):
    return (a + b - 1) // b * b


def _row_tile(ho, wo_pad, target_rows=MAX_ACC_ROWS):
    """Largest divisor of ho whose row-block (tho*wo_pad) keeps the f32
    accumulator small enough to stay register-resident."""
    best = 1
    for d in range(1, ho + 1):
        if ho % d == 0 and d * wo_pad <= target_rows:
            best = d
    return best


def _make_tap_groups(ksize, stride):
    """Conv taps grouped by (phase, row-offset) so each band is loaded once and
    the column shifts are derived from it (feedback: hoist per-tap loads)."""
    groups = {}
    for di in range(ksize):
        for dj in range(ksize):
            phase = (di % stride) * stride + (dj % stride)
            key = (phase, di // stride)
            groups.setdefault(key, []).append((dj // stride, di * ksize + dj))
    return tuple((k, tuple(v)) for k, v in groups.items())


# ----------------------------------------------------------------------------
# Pallas kernels
# ----------------------------------------------------------------------------
def _mm_kernel(x_ref, w_ref, o_ref, *, relu):
    acc = jnp.dot(x_ref[...], w_ref[...], preferred_element_type=jnp.float32)
    if relu:
        acc = jnp.maximum(acc, 0.0)
    o_ref[...] = acc.astype(o_ref.dtype)


def _mm_bias_kernel(x_ref, w_ref, b_ref, o_ref, *, relu):
    acc = jnp.dot(x_ref[...], w_ref[...], preferred_element_type=jnp.float32)
    acc = acc + b_ref[...]
    if relu:
        acc = jnp.maximum(acc, 0.0)
    o_ref[...] = acc.astype(o_ref.dtype)


def _mm_bias_res_kernel(x_ref, w_ref, b_ref, r_ref, o_ref, *, relu):
    acc = jnp.dot(x_ref[...], w_ref[...], preferred_element_type=jnp.float32)
    acc = acc + b_ref[...] + r_ref[...].astype(jnp.float32)
    if relu:
        acc = jnp.maximum(acc, 0.0)
    o_ref[...] = acc.astype(o_ref.dtype)


def _direct_conv_kernel(x_ref, w_ref, b_ref, o_ref, *, groups, hn, tho, wo_pad, relu):
    """Direct KxK conv on phase-split bf16 input: one band load per
    (phase, row-offset), column shifts as static slices, f32 accumulator."""
    r0 = pl.program_id(1) * tho
    cin = w_ref.shape[1]
    cout = w_ref.shape[2]
    acc = jnp.zeros((tho * wo_pad, cout), jnp.float32)
    for (phase, qi), col_taps in groups:
        band = x_ref[0, pl.ds(phase * hn + qi + r0, tho), :, :]        # bf16
        for qj, t in col_taps:
            lhs = band[:, qj:qj + wo_pad, :].reshape(tho * wo_pad, cin)
            acc = acc + jnp.dot(lhs, w_ref[t], preferred_element_type=jnp.float32)
    out = acc.reshape(tho, wo_pad, cout) + b_ref[0]
    if relu:
        out = jnp.maximum(out, 0.0)
    o_ref[0] = out.astype(o_ref.dtype)


def _conv3x3_s1_kernel(x_ref, w_ref, b_ref, o_ref, pad_ref, *, h, w, wp8, relu):
    """Stride-1 3x3 conv with the 1-pixel zero border built inside the kernel
    (VMEM scratch) -> no wrapper-side padded HBM copy of the activation."""
    pad_ref[...] = jnp.zeros_like(pad_ref)
    pad_ref[pl.ds(1, h), pl.ds(1, w), :] = x_ref[0]
    acc = jnp.zeros((h * wp8, CPAD), jnp.float32)
    for di in range(3):
        band = pad_ref[pl.ds(di, h), :, :]                              # (h, wp8+2, C)
        for dj in range(3):
            lhs = band[:, dj:dj + wp8, :].reshape(h * wp8, CPAD)
            acc = acc + jnp.dot(lhs, w_ref[di * 3 + dj],
                                preferred_element_type=jnp.float32)
    out = acc.reshape(h, wp8, CPAD) + b_ref[0]
    if relu:
        out = jnp.maximum(out, 0.0)
    o_ref[0] = out[:, :w, :].astype(o_ref.dtype)


def _maxpool_kernel(x_ref, o_ref, *, groups, hn, tho, wo_pad):
    """3x3/s2 max pool, compared in bf16 (exact for max, halves VALU work)."""
    r0 = pl.program_id(1) * tho
    c = o_ref.shape[-1]
    acc = jnp.full((tho, wo_pad, c), -jnp.inf, jnp.bfloat16)
    for (phase, qi), col_taps in groups:
        band = x_ref[0, pl.ds(phase * hn + qi + r0, tho), :, :]
        for qj, _t in col_taps:
            acc = jnp.maximum(acc, band[:, qj:qj + wo_pad, :])
    o_ref[0] = acc.astype(o_ref.dtype)


def _head_kernel(x2_ref, rh_ref, m_ref, a_ref, o_ref):
    """Fused bilinear-resize + adaptive-pool + add: H-resize as one matmul,
    W-resize folded together with the channel-pool matrix (they commute),
    residual add of the already-pooled layer2 map.  No concat / transpose /
    upsampled intermediate ever reaches HBM."""
    t = jnp.dot(rh_ref[...], x2_ref[0], preferred_element_type=jnp.float32)   # (h2, w3*C)
    up = jnp.dot(t.astype(jnp.bfloat16), m_ref[...],
                 preferred_element_type=jnp.float32)                          # (h2, w2*C)
    o_ref[0] = up + a_ref[0]


# ----------------------------------------------------------------------------
# Pallas wrappers
# ----------------------------------------------------------------------------
def fused_matmul(x, w, bias=None, residual=None, relu=False, out_dtype=jnp.bfloat16):
    """(X @ W) [+ bias] [+ residual], optional ReLU; bf16 MXU inputs, f32 acc."""
    m, k = x.shape
    n = w.shape[1]
    xb = x.astype(jnp.bfloat16)
    wb = w.astype(jnp.bfloat16)

    # >= 2 grid steps whenever possible so both v7x TensorCores get work.
    tm = min(512, max(8, _round_up(pl.cdiv(m, 2), 8)))
    mp = _round_up(m, tm)
    if mp != m:
        xb = jnp.pad(xb, ((0, mp - m), (0, 0)))
        if residual is not None:
            residual = jnp.pad(residual, ((0, mp - m), (0, 0)))

    grid = (mp // tm,)
    x_spec = pl.BlockSpec((tm, k), lambda i: (i, 0))
    w_spec = pl.BlockSpec((k, n), lambda i: (0, 0))
    v_spec = pl.BlockSpec((1, n), lambda i: (0, 0))
    mo_spec = pl.BlockSpec((tm, n), lambda i: (i, 0))
    out_shape = jax.ShapeDtypeStruct((mp, n), out_dtype)
    cparams = pltpu.CompilerParams(dimension_semantics=("parallel",),
                                   vmem_limit_bytes=VMEM_LIMIT)
    cost = pl.CostEstimate(
        flops=2 * mp * k * n, transcendentals=0,
        bytes_accessed=mp * k * 2 + k * n * 2
        + mp * n * jnp.dtype(out_dtype).itemsize)

    if bias is None:
        out = pl.pallas_call(
            functools.partial(_mm_kernel, relu=relu),
            out_shape=out_shape, grid=grid,
            in_specs=[x_spec, w_spec], out_specs=mo_spec,
            compiler_params=cparams, cost_estimate=cost)(xb, wb)
    elif residual is None:
        out = pl.pallas_call(
            functools.partial(_mm_bias_kernel, relu=relu),
            out_shape=out_shape, grid=grid,
            in_specs=[x_spec, w_spec, v_spec], out_specs=mo_spec,
            compiler_params=cparams, cost_estimate=cost)(xb, wb, bias)
    else:
        out = pl.pallas_call(
            functools.partial(_mm_bias_res_kernel, relu=relu),
            out_shape=out_shape, grid=grid,
            in_specs=[x_spec, w_spec, v_spec, mo_spec], out_specs=mo_spec,
            compiler_params=cparams, cost_estimate=cost)(xb, wb, bias, residual)
    return out[:m] if mp != m else out


def _phase_split(x, ksize, stride, pad, ho, wo_pad, fill, dtype):
    """Spatially pad x, de-interleave into stride*stride phases and stack them
    along H so every conv/pool tap is a contiguous window in the kernel.
    Built in bf16 (feedback) -> ~1x read + 0.5x write of the activation."""
    q = (ksize - 1) // stride
    hn, wn = ho + q, wo_pad + q
    xp = jnp.pad(x.astype(dtype), ((0, 0), (pad, pad), (pad, pad), (0, 0)),
                 constant_values=fill)
    phases = []
    for pi in range(stride):
        for pj in range(stride):
            ph = xp[:, pi::stride, pj::stride, :]
            ph = ph[:, :hn, :wn, :]
            dh, dw = hn - ph.shape[1], wn - ph.shape[2]
            if dh or dw:
                ph = jnp.pad(ph, ((0, 0), (0, dh), (0, dw), (0, 0)),
                             constant_values=fill)
            phases.append(ph)
    return jnp.concatenate(phases, axis=1), hn, wn


def direct_conv_bn_act(x, p, stride, relu=True):
    """KxK conv + folded-BN bias + optional ReLU (phase-split, no im2col)."""
    ksize = p["k"]
    b, h, w, _ = x.shape
    pad = ksize // 2
    ho = (h + 2 * pad - ksize) // stride + 1
    wo = (w + 2 * pad - ksize) // stride + 1
    wo_pad = _round_up(wo, 8)
    xs, hn, wn = _phase_split(x, ksize, stride, pad, ho, wo_pad, 0.0, jnp.bfloat16)
    tho = _row_tile(ho, wo_pad)
    groups = _make_tap_groups(ksize, stride)
    s2 = stride * stride
    kk = ksize * ksize

    kernel = functools.partial(_direct_conv_kernel, groups=groups, hn=hn,
                               tho=tho, wo_pad=wo_pad, relu=relu)
    cost = pl.CostEstimate(
        flops=2 * b * ho * wo_pad * kk * CPAD * CPAD, transcendentals=0,
        bytes_accessed=int(xs.size) * 2 + kk * CPAD * CPAD * 2
        + b * ho * wo_pad * CPAD * 2)
    out = pl.pallas_call(
        kernel,
        out_shape=jax.ShapeDtypeStruct((b, ho, wo_pad, CPAD), jnp.bfloat16),
        grid=(b, ho // tho),
        in_specs=[pl.BlockSpec((1, s2 * hn, wn, CPAD), lambda bi, r: (bi, 0, 0, 0)),
                  pl.BlockSpec((kk, CPAD, CPAD), lambda bi, r: (0, 0, 0)),
                  pl.BlockSpec((1, CPAD), lambda bi, r: (0, 0))],
        out_specs=pl.BlockSpec((1, tho, wo_pad, CPAD), lambda bi, r: (bi, r, 0, 0)),
        compiler_params=pltpu.CompilerParams(
            dimension_semantics=("parallel", "parallel"),
            vmem_limit_bytes=VMEM_LIMIT),
        cost_estimate=cost,
    )(xs, p["w"], p["b"])
    return out[:, :, :wo, :] if wo_pad != wo else out


def conv3x3_s1_bn_act(x, p, relu=True):
    """Stride-1 3x3 conv: border padding done in-kernel (VMEM scratch)."""
    b, h, w, _ = x.shape
    wp8 = _round_up(w, 8)
    kernel = functools.partial(_conv3x3_s1_kernel, h=h, w=w, wp8=wp8, relu=relu)
    cost = pl.CostEstimate(
        flops=2 * b * h * wp8 * 9 * CPAD * CPAD, transcendentals=0,
        bytes_accessed=2 * b * h * w * CPAD * 2 + 9 * CPAD * CPAD * 2)
    return pl.pallas_call(
        kernel,
        out_shape=jax.ShapeDtypeStruct((b, h, w, CPAD), jnp.bfloat16),
        grid=(b,),
        in_specs=[pl.BlockSpec((1, h, w, CPAD), lambda bi: (bi, 0, 0, 0)),
                  pl.BlockSpec((9, CPAD, CPAD), lambda bi: (0, 0, 0)),
                  pl.BlockSpec((1, CPAD), lambda bi: (0, 0))],
        out_specs=pl.BlockSpec((1, h, w, CPAD), lambda bi: (bi, 0, 0, 0)),
        scratch_shapes=[pltpu.VMEM((h + 2, wp8 + 2, CPAD), jnp.bfloat16)],
        compiler_params=pltpu.CompilerParams(
            dimension_semantics=("parallel",),
            vmem_limit_bytes=VMEM_LIMIT),
        cost_estimate=cost,
    )(x.astype(jnp.bfloat16), p["w"], p["b"])


def conv3x3_bn_act(x, p, stride, relu=True):
    b, h, w, _ = x.shape
    if stride == 1 and h * _round_up(w, 8) <= MAX_ACC_ROWS:
        return conv3x3_s1_bn_act(x, p, relu=relu)
    return direct_conv_bn_act(x, p, stride, relu=relu)


def conv1x1_bn_act(x, p, stride, relu=True, residual=None):
    if stride != 1:
        x = x[:, ::stride, ::stride, :]          # 1x1 stride-s == subsample + 1x1
    b, h, w, _ = x.shape
    res2d = residual.reshape(-1, CPAD) if residual is not None else None
    out = fused_matmul(x.reshape(-1, CPAD), p["w"][0], bias=p["b"],
                       residual=res2d, relu=relu)
    return out.reshape(b, h, w, CPAD)


def maxpool_3x3_s2_p1(x):
    """3x3, stride 2, pad 1 max pool on NHWC, windows reduced inside Pallas."""
    b, h, w, c = x.shape
    ksize, stride, pad = 3, 2, 1
    ho = (h + 2 * pad - ksize) // stride + 1
    wo = (w + 2 * pad - ksize) // stride + 1
    wo_pad = _round_up(wo, 8)
    xs, hn, wn = _phase_split(x, ksize, stride, pad, ho, wo_pad,
                              -jnp.inf, jnp.bfloat16)
    tho = _row_tile(ho, wo_pad)
    groups = _make_tap_groups(ksize, stride)
    s2 = stride * stride

    kernel = functools.partial(_maxpool_kernel, groups=groups, hn=hn,
                               tho=tho, wo_pad=wo_pad)
    cost = pl.CostEstimate(flops=9 * b * ho * wo_pad * c, transcendentals=0,
                           bytes_accessed=int(xs.size) * 2 + b * ho * wo_pad * c * 2)
    out = pl.pallas_call(
        kernel,
        out_shape=jax.ShapeDtypeStruct((b, ho, wo_pad, c), jnp.bfloat16),
        grid=(b, ho // tho),
        in_specs=[pl.BlockSpec((1, s2 * hn, wn, c), lambda bi, r: (bi, 0, 0, 0))],
        out_specs=pl.BlockSpec((1, tho, wo_pad, c), lambda bi, r: (bi, r, 0, 0)),
        compiler_params=pltpu.CompilerParams(
            dimension_semantics=("parallel", "parallel"),
            vmem_limit_bytes=VMEM_LIMIT),
        cost_estimate=cost,
    )(xs)
    return out[:, :, :wo, :] if wo_pad != wo else out


def stem_conv_bn_relu(x, p):
    """7x7/s2 stem as an im2col matmul with K=256: all 49 taps x 3 real input
    channels packed into the contraction instead of 49 matmuls with 3/128
    real K lanes (feedback: raise stem MXU utilization, use 256-wide K)."""
    ksize, stride, pad = STEM_K, 2, STEM_K // 2
    b, h, w, cin = x.shape
    ho = (h + 2 * pad - ksize) // stride + 1
    wo = (w + 2 * pad - ksize) // stride + 1
    xp = jnp.pad(x, ((0, 0), (pad, pad), (pad, pad), (0, 0)))
    cols = []
    for di in range(ksize):
        for dj in range(ksize):
            cols.append(xp[:, di:di + stride * ho:stride,
                           dj:dj + stride * wo:stride, :])
    patches = jnp.concatenate(cols, axis=-1)                  # (B, ho, wo, 147)
    patches = jnp.pad(patches,
                      ((0, 0), (0, 0), (0, 0), (0, STEM_KPAD - ksize * ksize * cin)))
    out = fused_matmul(patches.reshape(-1, STEM_KPAD), p["w"], bias=p["b"],
                       relu=True)
    return out.reshape(b, ho, wo, CPAD)


# ----------------------------------------------------------------------------
# bilinear / adaptive-pool helper matrices (numpy, trace-time constants)
# ----------------------------------------------------------------------------
def bilinear_matrix(in_size, out_size):
    """PyTorch F.interpolate(mode='bilinear', align_corners=False) row matrix."""
    scale = in_size / out_size
    r = np.zeros((out_size, in_size), np.float32)
    for i in range(out_size):
        real = max((i + 0.5) * scale - 0.5, 0.0)
        i0 = min(int(np.floor(real)), in_size - 1)
        i1 = min(i0 + 1, in_size - 1)
        lam = real - i0
        r[i, i0] += 1.0 - lam
        r[i, i1] += lam
    return r


def adaptive_pool_matrix(length, out_size):
    """Matrix implementing F.adaptive_avg_pool1d over a length-`length` axis."""
    p = np.zeros((length, out_size), np.float32)
    for o in range(out_size):
        s = (o * length) // out_size
        e = -((-(o + 1) * length) // out_size)  # ceil
        p[s:e, o] = 1.0 / (e - s)
    return p


def build_pool_split(c1, c2, out_channels):
    """Adaptive-pool matrix split into the out1-channel and out2-channel halves
    so the channel concat never needs to be materialized."""
    pool = adaptive_pool_matrix(c1 + c2, out_channels)
    phi = np.zeros((CPAD, CPAD), np.float32)
    plo = np.zeros((CPAD, CPAD), np.float32)
    phi[:c1, :out_channels] = pool[:c1]
    plo[:c2, :out_channels] = pool[c1:]
    return phi, plo


def fused_head(out1, out2, out_channels):
    """pooled = adaptive_pool(concat(out1, bilinear_up(out2))) with no concat,
    no transposes and no upsampled intermediate in HBM."""
    bsz, h2, w2, _ = out1.shape
    _, h3, w3, _ = out2.shape
    c1 = PLANES[1] * 4
    c2 = PLANES[2] * 4
    phi, plo = build_pool_split(c1, c2, out_channels)
    rh = bilinear_matrix(h3, h2)                               # (h2, h3)
    rw = bilinear_matrix(w3, w2)                               # (w2, w3)
    # bilinear resize and the channel pool commute -> fold P_lo into the
    # W-resize matrix (rw^T (x) P_lo), applied right of the H-resized map.
    # TODO(synk): at real widths replace the kron matrix with a 2-tap VPU
    #             stencil per output column (kron form is O(C) larger).
    m = np.kron(rw.T, plo)                                     # (w3*C, w2*C)

    # pad the tiny H-contraction to 8 so the MXU sees a standard K
    h3p = _round_up(h3, 8)
    rh_p = np.zeros((h2, h3p), np.float32)
    rh_p[:, :h3] = rh

    a = fused_matmul(out1.reshape(-1, CPAD), jnp.asarray(phi),
                     relu=False, out_dtype=jnp.float32)         # (B*h2*w2, C)
    a = a.reshape(bsz, h2, w2 * CPAD)
    x2 = out2.reshape(bsz, h3, w3 * CPAD)
    x2 = jnp.pad(x2, ((0, 0), (0, h3p - h3), (0, 0)))

    cost = pl.CostEstimate(
        flops=2 * bsz * (h2 * h3p * w3 * CPAD + h2 * (w3 * CPAD) * (w2 * CPAD)),
        transcendentals=0,
        bytes_accessed=int(x2.size) * 2 + int(m.size) * 2 + int(a.size) * 4
        + bsz * h2 * w2 * CPAD * 4)
    pooled = pl.pallas_call(
        _head_kernel,
        out_shape=jax.ShapeDtypeStruct((bsz, h2, w2 * CPAD), jnp.float32),
        grid=(bsz,),
        in_specs=[pl.BlockSpec((1, h3p, w3 * CPAD), lambda bi: (bi, 0, 0)),
                  pl.BlockSpec((h2, h3p), lambda bi: (0, 0)),
                  pl.BlockSpec((w3 * CPAD, w2 * CPAD), lambda bi: (0, 0)),
                  pl.BlockSpec((1, h2, w2 * CPAD), lambda bi: (bi, 0, 0))],
        out_specs=pl.BlockSpec((1, h2, w2 * CPAD), lambda bi: (bi, 0, 0)),
        compiler_params=pltpu.CompilerParams(
            dimension_semantics=("parallel",),
            vmem_limit_bytes=VMEM_LIMIT),
        cost_estimate=cost,
    )(x2, jnp.asarray(rh_p, jnp.bfloat16), jnp.asarray(m, jnp.bfloat16), a)
    return pooled.reshape(bsz, h2, w2, CPAD)


# ----------------------------------------------------------------------------
# Synthetic Wide-ResNet-ish backbone (deterministic params, folded BN)
# ----------------------------------------------------------------------------
def _fold_bn(key, cin, cout, ksize):
    k1, k2, k3, k4, k5 = jax.random.split(key, 5)
    fan_in = cin * ksize * ksize
    w = jax.random.normal(k1, (cout, cin, ksize, ksize), jnp.float32) / np.sqrt(fan_in)
    gamma = 1.0 + 0.1 * jax.random.normal(k2, (cout,), jnp.float32)
    beta = 0.1 * jax.random.normal(k3, (cout,), jnp.float32)
    mean = 0.1 * jax.random.normal(k4, (cout,), jnp.float32)
    var = 1.0 + 0.1 * jax.random.uniform(k5, (cout,), jnp.float32)
    scale = gamma / jnp.sqrt(var + 1e-5)                 # eval-mode BatchNorm
    bias = beta - mean * scale
    return w * scale[:, None, None, None], bias          # fold BN scale into W


def make_conv_bn_params(key, cin, cout, ksize):
    w, bias = _fold_bn(key, cin, cout, ksize)
    # OIHW -> (Kh*Kw, Cin, Cout), zero-padded to lane-dense 128-wide channels.
    wt = jnp.transpose(w, (2, 3, 1, 0)).reshape(ksize * ksize, cin, cout)
    wt = jnp.pad(wt, ((0, 0), (0, CPAD - cin), (0, CPAD - cout)))
    b = jnp.pad(bias, (0, CPAD - cout)).reshape(1, CPAD)
    return {"w": wt.astype(jnp.bfloat16), "b": b.astype(jnp.float32), "k": ksize}


def make_stem_params(key):
    w, bias = _fold_bn(key, 3, STEM, STEM_K)
    # OIHW -> im2col packing: rows = (kh*kw*cin)=147 padded to 256, cols = 128.
    wt = jnp.transpose(w, (2, 3, 1, 0)).reshape(STEM_K * STEM_K * 3, STEM)
    wt = jnp.pad(wt, ((0, STEM_KPAD - STEM_K * STEM_K * 3), (0, CPAD - STEM)))
    b = jnp.pad(bias, (0, CPAD - STEM)).reshape(1, CPAD)
    return {"w": wt.astype(jnp.bfloat16), "b": b.astype(jnp.float32), "k": STEM_K}


def make_bottleneck_params(key, cin, planes, stride):
    width = planes * WIDTH_MULT
    cout = planes * 4
    ks = jax.random.split(key, 4)
    p = {
        "conv1": make_conv_bn_params(ks[0], cin, width, 1),
        "conv2": make_conv_bn_params(ks[1], width, width, 3),
        "conv3": make_conv_bn_params(ks[2], width, cout, 1),
    }
    if stride != 1 or cin != cout:
        p["down"] = make_conv_bn_params(ks[3], cin, cout, 1)
    return p, cout


def make_layer(key, cin, planes, blocks, stride):
    keys = jax.random.split(key, blocks)
    layer = []
    for blk in range(blocks):
        s = stride if blk == 0 else 1
        p, cin = make_bottleneck_params(keys[blk], cin, planes, s)
        layer.append((p, s))
    return layer, cin


def init_params(key):
    k0, k1, k2, k3 = jax.random.split(key, 4)
    params = {"conv1": make_stem_params(k0)}
    cin = STEM
    params["layer1"], cin = make_layer(k1, cin, PLANES[0], BLOCKS, 1)
    params["layer2"], cin = make_layer(k2, cin, PLANES[1], BLOCKS, 2)
    params["layer3"], cin = make_layer(k3, cin, PLANES[2], BLOCKS, 2)
    return params


def bottleneck(x, p, stride):
    identity = x
    out = conv1x1_bn_act(x, p["conv1"], 1, relu=True)
    out = conv3x3_bn_act(out, p["conv2"], stride, relu=True)
    if "down" in p:
        identity = conv1x1_bn_act(x, p["down"], stride, relu=False)
    # conv3 + folded-BN bias + residual add + ReLU fused in one Pallas matmul.
    return conv1x1_bn_act(out, p["conv3"], 1, relu=True, residual=identity)


def feature_extractor(x_nchw, params, out_channels=OUT_CHANNELS):
    x = jnp.transpose(x_nchw.astype(jnp.float32), (0, 2, 3, 1))    # NCHW -> NHWC

    # stem: 7x7/2 conv + BN + ReLU (im2col matmul), then 3x3/2 maxpool
    x = stem_conv_bn_relu(x, params["conv1"])
    x = maxpool_3x3_s2_p1(x)

    # residual layers
    for bp, s in params["layer1"]:
        x = bottleneck(x, bp, s)
    for bp, s in params["layer2"]:
        x = bottleneck(x, bp, s)
    out1 = x                                          # layer2 output
    for bp, s in params["layer3"]:
        x = bottleneck(x, bp, s)
    out2 = x                                          # layer3 output

    # fused: bilinear upsample of layer3 + adaptive_avg_pool1d over channels
    # of the (virtual) concat, with the layer2 contribution added in-kernel.
    pooled = fused_head(out1, out2, out_channels)     # (B, h2, w2, CPAD) f32
    pooled = pooled[..., :out_channels]               # slice BEFORE transpose
    return jnp.transpose(pooled, (0, 3, 1, 2))        # back to NCHW


# ----------------------------------------------------------------------------
if __name__ == "__main__":
    key = jax.random.PRNGKey(0)
    kp, kx = jax.random.split(key)
    params = init_params(kp)
    x = jax.random.normal(kx, (2, 3, 32, 32), jnp.float32)         # NCHW input

    fwd = jax.jit(lambda inp: feature_extractor(inp, params, OUT_CHANNELS))
    out = jax.block_until_ready(fwd(x))

    assert out.shape == (2, OUT_CHANNELS, 4, 4), out.shape
    assert out.dtype == jnp.float32
    assert bool(jnp.isfinite(out).all())
    print("KERNEL_OK")
</pallas_src>

<mosaic_0001>
module attributes {stable_mosaic.version = 11 : i64} {
  func.func @_mm_bias_kernel(%arg0: i32, %arg1: memref<256x256xbf16, #tpu.memory_space<vmem>>, %arg2: memref<256x128xbf16, #tpu.memory_space<vmem>>, %arg3: memref<1x128xf32, #tpu.memory_space<vmem>>, %arg4: memref<256x128xbf16, #tpu.memory_space<vmem>>) attributes {dimension_semantics = [#tpu.dimension_semantics<parallel>], iteration_bounds = array<i64: 2>, scalar_prefetch = 0 : i64, scratch_operands = 0 : i64, tpu.core_type = #tpu.core_type<tc>, window_params = [{transform_indices = @transform_0, window_bounds = array<i64: 256, 256>}, {pipeline_mode = #tpu.pipeline_mode<synchronous>, transform_indices = @transform_1, window_bounds = array<i64: 256, 128>}, {pipeline_mode = #tpu.pipeline_mode<synchronous>, transform_indices = @transform_2, window_bounds = array<i64: 1, 128>}, {transform_indices = @transform_3, window_bounds = array<i64: 256, 128>}]} {
    %c0 = arith.constant 0 : index
    %c0_0 = arith.constant 0 : index
    %0 = vector.load %arg1[%c0, %c0_0] : memref<256x256xbf16, #tpu.memory_space<vmem>>, vector<256x256xbf16>
    %c0_1 = arith.constant 0 : index
    %c0_2 = arith.constant 0 : index
    %1 = vector.load %arg2[%c0_1, %c0_2] : memref<256x128xbf16, #tpu.memory_space<vmem>>, vector<256x128xbf16>
    %cst = arith.constant dense<0.000000e+00> : vector<256x128xf32>
    %2 = tpu.matmul %0, %1, %cst {dimension_numbers = #tpu.dot_dimension_numbers<[1], [0], [0], [1], [0, 0, 1, 1], [], []>} : vector<256x256xbf16>, vector<256x128xbf16>, vector<256x128xf32> -> vector<256x128xf32>
    %c0_3 = arith.constant 0 : index
    %c0_4 = arith.constant 0 : index
    %3 = vector.load %arg3[%c0_3, %c0_4] : memref<1x128xf32, #tpu.memory_space<vmem>>, vector<1x128xf32>
    %4 = vector.broadcast %3 : vector<1x128xf32> to vector<256x128xf32>
    %5 = arith.addf %2, %4 : vector<256x128xf32>
    %cst_5 = arith.constant 0.000000e+00 : f32
    %6 = vector.broadcast %cst_5 : f32 to vector<256x128xf32>
    %7 = arith.maximumf %5, %6 : vector<256x128xf32>
    %8 = arith.truncf %7 : vector<256x128xf32> to vector<256x128xbf16>
    %c0_6 = arith.constant 0 : index
    %c0_7 = arith.constant 0 : index
    %9 = vector.load %arg4[%c0_6, %c0_7] : memref<256x128xbf16, #tpu.memory_space<vmem>>, vector<256x128xbf16>
    tpu.vector_store %arg4[%c0_6, %c0_7], %8 {strides = array<i32>} : memref<256x128xbf16, #tpu.memory_space<vmem>>, vector<256x128xbf16>,
    return
  }
  func.func @transform_0(%arg0: i32) -> (i32, i32) {
    %c0_i32 = arith.constant 0 : i32
    %c0_i32_0 = arith.constant 0 : i32
    return %arg0, %c0_i32 : i32, i32
  }
  func.func @transform_1(%arg0: i32) -> (i32, i32) {
    %c0_i32 = arith.constant 0 : i32
    %c0_i32_0 = arith.constant 0 : i32
    %c0_i32_1 = arith.constant 0 : i32
    return %c0_i32, %c0_i32_0 : i32, i32
  }
  func.func @transform_2(%arg0: i32) -> (i32, i32) {
    %c0_i32 = arith.constant 0 : i32
    %c0_i32_0 = arith.constant 0 : i32
    %c0_i32_1 = arith.constant 0 : i32
    return %c0_i32, %c0_i32_0 : i32, i32
  }
  func.func @transform_3(%arg0: i32) -> (i32, i32) {
    %c0_i32 = arith.constant 0 : i32
    %c0_i32_0 = arith.constant 0 : i32
    return %arg0, %c0_i32 : i32, i32
  }
}

module attributes {stable_mosaic.version = 11 : i64} {
  func.func @_maxpool_kernel(%arg0: i32, %arg1: i32, %arg2: memref<1x36x9x128xbf16, #tpu.memory_space<vmem>>, %arg3: memref<1x8x8x128xbf16, #tpu.memory_space<vmem>>) attributes {dimension_semantics = [#tpu.dimension_semantics<parallel>, #tpu.dimension_semantics<parallel>], iteration_bounds = array<i64: 2, 1>, scalar_prefetch = 0 : i64, scratch_operands = 0 : i64, tpu.core_type = #tpu.core_type<tc>, window_params = [{transform_indices = @transform_0, window_bounds = array<i64: 1, 36, 9, 128>}, {transform_indices = @transform_1, window_bounds = array<i64: 1, 8, 8, 128>}]} {
    %c8_i32 = arith.constant 8 : i32
    %0 = arith.muli %arg1, %c8_i32 : i32
    %cst = arith.constant 0xFF80 : bf16
    %1 = vector.broadcast %cst : bf16 to vector<8x8x128xbf16>
    %c0_i32 = arith.constant 0 : i32
    %2 = arith.addi %c0_i32, %0 : i32
    %c0 = arith.constant 0 : index
    %3 = arith.index_cast %2 : i32 to index
    %c0_0 = arith.constant 0 : index
    %c0_1 = arith.constant 0 : index
    %4 = vector.load %arg2[%c0, %3, %c0_0, %c0_1] : memref<1x36x9x128xbf16, #tpu.memory_space<vmem>>, vector<1x8x9x128xbf16>
    %5 = vector.shape_cast %4 : vector<1x8x9x128xbf16> to vector<8x9x128xbf16>
    %6 = vector.extract_strided_slice %5 {offsets = [0, 0, 0], sizes = [8, 8, 128], strides = [1, 1, 1]} : vector<8x9x128xbf16> to vector<8x8x128xbf16>
    %7 = arith.maximumf %1, %6 : vector<8x8x128xbf16>
    %8 = vector.extract_strided_slice %5 {offsets = [0, 1, 0], sizes = [8, 8, 128], strides = [1, 1, 1]} : vector<8x9x128xbf16> to vector<8x8x128xbf16>
    %9 = arith.maximumf %7, %8 : vector<8x8x128xbf16>
    %c9_i32 = arith.constant 9 : i32
    %10 = arith.addi %c9_i32, %0 : i32
    %c0_2 = arith.constant 0 : index
    %11 = arith.index_cast %10 : i32 to index
    %c0_3 = arith.constant 0 : index
    %c0_4 = arith.constant 0 : index
    %12 = vector.load %arg2[%c0_2, %11, %c0_3, %c0_4] : memref<1x36x9x128xbf16, #tpu.memory_space<vmem>>, vector<1x8x9x128xbf16>
    %13 = vector.shape_cast %12 : vector<1x8x9x128xbf16> to vector<8x9x128xbf16>
    %14 = vector.extract_strided_slice %13 {offsets = [0, 0, 0], sizes = [8, 8, 128], strides = [1, 1, 1]} : vector<8x9x128xbf16> to vector<8x8x128xbf16>
    %15 = arith.maximumf %9, %14 : vector<8x8x128xbf16>
    %c18_i32 = arith.constant 18 : i32
    %16 = arith.addi %c18_i32, %0 : i32
    %c0_5 = arith.constant 0 : index
    %17 = arith.index_cast %16 : i32 to index
    %c0_6 = arith.constant 0 : index
    %c0_7 = arith.constant 0 : index
    %18 = vector.load %arg2[%c0_5, %17, %c0_6, %c0_7] : memref<1x36x9x128xbf16, #tpu.memory_space<vmem>>, vector<1x8x9x128xbf16>
    %19 = vector.shape_cast %18 : vector<1x8x9x128xbf16> to vector<8x9x128xbf16>
    %20 = vector.extract_strided_slice %19 {offsets = [0, 0, 0], sizes = [8, 8, 128], strides = [1, 1, 1]} : vector<8x9x128xbf16> to vector<8x8x128xbf16>
    %21 = arith.maximumf %15, %20 : vector<8x8x128xbf16>
    %22 = vector.extract_strided_slice %19 {offsets = [0, 1, 0], sizes = [8, 8, 128], strides = [1, 1, 1]} : vector<8x9x128xbf16> to vector<8x8x128xbf16>
    %23 = arith.maximumf %21, %22 : vector<8x8x128xbf16>
    %c27_i32 = arith.constant 27 : i32
    %24 = arith.addi %c27_i32, %0 : i32
    %c0_8 = arith.constant 0 : index
    %25 = arith.index_cast %24 : i32 to index
    %c0_9 = arith.constant 0 : index
    %c0_10 = arith.constant 0 : index
    %26 = vector.load %arg2[%c0_8, %25, %c0_9, %c0_10] : memref<1x36x9x128xbf16, #tpu.memory_space<vmem>>, vector<1x8x9x128xbf16>
    %27 = vector.shape_cast %26 : vector<1x8x9x128xbf16> to vector<8x9x128xbf16>
    %28 = vector.extract_strided_slice %27 {offsets = [0, 0, 0], sizes = [8, 8, 128], strides = [1, 1, 1]} : vector<8x9x128xbf16> to vector<8x8x128xbf16>
    %29 = arith.maximumf %23, %28 : vector<8x8x128xbf16>
    %c1_i32 = arith.constant 1 : i32
    %30 = arith.addi %c1_i32, %0 : i32
    %c0_11 = arith.constant 0 : index
    %31 = arith.index_cast %30 : i32 to index
    %c0_12 = arith.constant 0 : index
    %c0_13 = arith.constant 0 : index
    %32 = vector.load %arg2[%c0_11, %31, %c0_12, %c0_13] : memref<1x36x9x128xbf16, #tpu.memory_space<vmem>>, vector<1x8x9x128xbf16>
    %33 = vector.shape_cast %32 : vector<1x8x9x128xbf16> to vector<8x9x128xbf16>
    %34 = vector.extract_strided_slice %33 {offsets = [0, 0, 0], sizes = [8, 8, 128], strides = [1, 1, 1]} : vector<8x9x128xbf16> to vector<8x8x128xbf16>
    %35 = arith.maximumf %29, %34 : vector<8x8x128xbf16>
    %36 = vector.extract_strided_slice %33 {offsets = [0, 1, 0], sizes = [8, 8, 128], strides = [1, 1, 1]} : vector<8x9x128xbf16> to vector<8x8x128xbf16>
    %37 = arith.maximumf %35, %36 : vector<8x8x128xbf16>
    %c10_i32 = arith.constant 10 : i32
    %38 = arith.addi %c10_i32, %0 : i32
    %c0_14 = arith.constant 0 : index
    %39 = arith.index_cast %38 : i32 to index
    %c0_15 = arith.constant 0 : index
    %c0_16 = arith.constant 0 : index
    %40 = vector.load %arg2[%c0_14, %39, %c0_15, %c0_16] : memref<1x36x9x128xbf16, #tpu.memory_space<vmem>>, vector<1x8x9x128xbf16>
    %41 = vector.shape_cast %40 : vector<1x8x9x128xbf16> to vector<8x9x128xbf16>
    %42 = vector.extract_strided_slice %41 {offsets = [0, 0, 0], sizes = [8, 8, 128], strides = [1, 1, 1]} : vector<8x9x128xbf16> to vector<8x8x128xbf16>
    %43 = arith.maximumf %37, %42 : vector<8x8x128xbf16>
    %c0_17 = arith.constant 0 : index
    %c0_18 = arith.constant 0 : index
    %c0_19 = arith.constant 0 : index
    %c0_20 = arith.constant 0 : index
    %44 = vector.load %arg3[%c0_17, %c0_18, %c0_19, %c0_20] : memref<1x8x8x128xbf16, #tpu.memory_space<vmem>>, vector<1x8x8x128xbf16>
    %45 = vector.shape_cast %44 : vector<1x8x8x128xbf16> to vector<8x8x128xbf16>
    %46 = vector.shape_cast %43 : vector<8x8x128xbf16> to vector<1x8x8x128xbf16>
    tpu.vector_store %arg3[%c0_17, %c0_18, %c0_19, %c0_20], %46 {strides = array<i32>} : memref<1x8x8x128xbf16, #tpu.memory_space<vmem>>, vector<1x8x8x128xbf16>,
    return
  }
  func.func @transform_0(%arg0: i32, %arg1: i32) -> (i32, i32, i32, i32) {
    %c0_i32 = arith.constant 0 : i32
    %c0_i32_0 = arith.constant 0 : i32
    %c0_i32_1 = arith.constant 0 : i32
    %c0_i32_2 = arith.constant 0 : i32
    return %arg0, %c0_i32, %c0_i32_0, %c0_i32_1 : i32, i32, i32, i32
  }
  func.func @transform_1(%arg0: i32, %arg1: i32) -> (i32, i32, i32, i32) {
    %c0_i32 = arith.constant 0 : i32
    %c0_i32_0 = arith.constant 0 : i32
    %c0_i32_1 = arith.constant 0 : i32
    return %arg0, %arg1, %c0_i32, %c0_i32_0 : i32, i32, i32, i32
  }
}

module attributes {stable_mosaic.version = 11 : i64} {
  func.func @_mm_bias_kernel(%arg0: i32, %arg1: memref<64x128xbf16, #tpu.memory_space<vmem>>, %arg2: memref<128x128xbf16, #tpu.memory_space<vmem>>, %arg3: memref<1x128xf32, #tpu.memory_space<vmem>>, %arg4: memref<64x128xbf16, #tpu.memory_space<vmem>>) attributes {dimension_semantics = [#tpu.dimension_semantics<parallel>], iteration_bounds = array<i64: 2>, scalar_prefetch = 0 : i64, scratch_operands = 0 : i64, tpu.core_type = #tpu.core_type<tc>, window_params = [{transform_indices = @transform_0, window_bounds = array<i64: 64, 128>}, {pipeline_mode = #tpu.pipeline_mode<synchronous>, transform_indices = @transform_1, window_bounds = array<i64: 128, 128>}, {pipeline_mode = #tpu.pipeline_mode<synchronous>, transform_indices = @transform_2, window_bounds = array<i64: 1, 128>}, {transform_indices = @transform_3, window_bounds = array<i64: 64, 128>}]} {
    %c0 = arith.constant 0 : index
    %c0_0 = arith.constant 0 : index
    %0 = vector.load %arg1[%c0, %c0_0] : memref<64x128xbf16, #tpu.memory_space<vmem>>, vector<64x128xbf16>
    %c0_1 = arith.constant 0 : index
    %c0_2 = arith.constant 0 : index
    %1 = vector.load %arg2[%c0_1, %c0_2] : memref<128x128xbf16, #tpu.memory_space<vmem>>, vector<128x128xbf16>
    %cst = arith.constant dense<0.000000e+00> : vector<64x128xf32>
    %2 = tpu.matmul %0, %1, %cst {dimension_numbers = #tpu.dot_dimension_numbers<[1], [0], [0], [1], [0, 0, 1, 1], [], []>} : vector<64x128xbf16>, vector<128x128xbf16>, vector<64x128xf32> -> vector<64x128xf32>
    %c0_3 = arith.constant 0 : index
    %c0_4 = arith.constant 0 : index
    %3 = vector.load %arg3[%c0_3, %c0_4] : memref<1x128xf32, #tpu.memory_space<vmem>>, vector<1x128xf32>
    %4 = vector.broadcast %3 : vector<1x128xf32> to vector<64x128xf32>
    %5 = arith.addf %2, %4 : vector<64x128xf32>
    %6 = arith.truncf %5 : vector<64x128xf32> to vector<64x128xbf16>
    %c0_5 = arith.constant 0 : index
    %c0_6 = arith.constant 0 : index
    %7 = vector.load %arg4[%c0_5, %c0_6] : memref<64x128xbf16, #tpu.memory_space<vmem>>, vector<64x128xbf16>
    tpu.vector_store %arg4[%c0_5, %c0_6], %6 {strides = array<i32>} : memref<64x128xbf16, #tpu.memory_space<vmem>>, vector<64x128xbf16>,
    return
  }
  func.func @transform_0(%arg0: i32) -> (i32, i32) {
    %c0_i32 = arith.constant 0 : i32
    %c0_i32_0 = arith.constant 0 : i32
    return %arg0, %c0_i32 : i32, i32
  }
  func.func @transform_1(%arg0: i32) -> (i32, i32) {
    %c0_i32 = arith.constant 0 : i32
    %c0_i32_0 = arith.constant 0 : i32
    %c0_i32_1 = arith.constant 0 : i32
    return %c0_i32, %c0_i32_0 : i32, i32
  }
  func.func @transform_2(%arg0: i32) -> (i32, i32) {
    %c0_i32 = arith.constant 0 : i32
    %c0_i32_0 = arith.constant 0 : i32
    %c0_i32_1 = arith.constant 0 : i32
    return %c0_i32, %c0_i32_0 : i32, i32
  }
  func.func @transform_3(%arg0: i32) -> (i32, i32) {
    %c0_i32 = arith.constant 0 : i32
    %c0_i32_0 = arith.constant 0 : i32
    return %arg0, %c0_i32 : i32, i32
  }
}

module attributes {stable_mosaic.version = 11 : i64} {
  func.func @_mm_bias_kernel(%arg0: i32, %arg1: memref<64x128xbf16, #tpu.memory_space<vmem>>, %arg2: memref<128x128xbf16, #tpu.memory_space<vmem>>, %arg3: memref<1x128xf32, #tpu.memory_space<vmem>>, %arg4: memref<64x128xbf16, #tpu.memory_space<vmem>>) attributes {dimension_semantics = [#tpu.dimension_semantics<parallel>], iteration_bounds = array<i64: 2>, scalar_prefetch = 0 : i64, scratch_operands = 0 : i64, tpu.core_type = #tpu.core_type<tc>, window_params = [{transform_indices = @transform_0, window_bounds = array<i64: 64, 128>}, {pipeline_mode = #tpu.pipeline_mode<synchronous>, transform_indices = @transform_1, window_bounds = array<i64: 128, 128>}, {pipeline_mode = #tpu.pipeline_mode<synchronous>, transform_indices = @transform_2, window_bounds = array<i64: 1, 128>}, {transform_indices = @transform_3, window_bounds = array<i64: 64, 128>}]} {
    %c0 = arith.constant 0 : index
    %c0_0 = arith.constant 0 : index
    %0 = vector.load %arg1[%c0, %c0_0] : memref<64x128xbf16, #tpu.memory_space<vmem>>, vector<64x128xbf16>
    %c0_1 = arith.constant 0 : index
    %c0_2 = arith.constant 0 : index
    %1 = vector.load %arg2[%c0_1, %c0_2] : memref<128x128xbf16, #tpu.memory_space<vmem>>, vector<128x128xbf16>
    %cst = arith.constant dense<0.000000e+00> : vector<64x128xf32>
    %2 = tpu.matmul %0, %1, %cst {dimension_numbers = #tpu.dot_dimension_numbers<[1], [0], [0], [1], [0, 0, 1, 1], [], []>} : vector<64x128xbf16>, vector<128x128xbf16>, vector<64x128xf32> -> vector<64x128xf32>
    %c0_3 = arith.constant 0 : index
    %c0_4 = arith.constant 0 : index
    %3 = vector.load %arg3[%c0_3, %c0_4] : memref<1x128xf32, #tpu.memory_space<vmem>>, vector<1x128xf32>
    %4 = vector.broadcast %3 : vector<1x128xf32> to vector<64x128xf32>
    %5 = arith.addf %2, %4 : vector<64x128xf32>
    %cst_5 = arith.constant 0.000000e+00 : f32
    %6 = vector.broadcast %cst_5 : f32 to vector<64x128xf32>
    %7 = arith.maximumf %5, %6 : vector<64x128xf32>
    %8 = arith.truncf %7 : vector<64x128xf32> to vector<64x128xbf16>
    %c0_6 = arith.constant 0 : index
    %c0_7 = arith.constant 0 : index
    %9 = vector.load %arg4[%c0_6, %c0_7] : memref<64x128xbf16, #tpu.memory_space<vmem>>, vector<64x128xbf16>
    tpu.vector_store %arg4[%c0_6, %c0_7], %8 {strides = array<i32>} : memref<64x128xbf16, #tpu.memory_space<vmem>>, vector<64x128xbf16>,
    return
  }
  func.func @transform_0(%arg0: i32) -> (i32, i32) {
    %c0_i32 = arith.constant 0 : i32
    %c0_i32_0 = arith.constant 0 : i32
    return %arg0, %c0_i32 : i32, i32
  }
  func.func @transform_1(%arg0: i32) -> (i32, i32) {
    %c0_i32 = arith.constant 0 : i32
    %c0_i32_0 = arith.constant 0 : i32
    %c0_i32_1 = arith.constant 0 : i32
    return %c0_i32, %c0_i32_0 : i32, i32
  }
  func.func @transform_2(%arg0: i32) -> (i32, i32) {
    %c0_i32 = arith.constant 0 : i32
    %c0_i32_0 = arith.constant 0 : i32
    %c0_i32_1 = arith.constant 0 : i32
    return %c0_i32, %c0_i32_0 : i32, i32
  }
  func.func @transform_3(%arg0: i32) -> (i32, i32) {
    %c0_i32 = arith.constant 0 : i32
    %c0_i32_0 = arith.constant 0 : i32
    return %arg0, %c0_i32 : i32, i32
  }
}

module attributes {stable_mosaic.version = 11 : i64} {
  func.func @_conv3x3_s1_kernel(%arg0: i32, %arg1: memref<1x8x8x128xbf16, #tpu.memory_space<vmem>>, %arg2: memref<9x128x128xbf16, #tpu.memory_space<vmem>>, %arg3: memref<1x128xf32, #tpu.memory_space<vmem>>, %arg4: memref<1x8x8x128xbf16, #tpu.memory_space<vmem>>, %arg5: memref<10x10x128xbf16, #tpu.memory_space<vmem>>) attributes {dimension_semantics = [#tpu.dimension_semantics<parallel>], iteration_bounds = array<i64: 2>, scalar_prefetch = 0 : i64, scratch_operands = 1 : i64, tpu.core_type = #tpu.core_type<tc>, window_params = [{transform_indices = @transform_0, window_bounds = array<i64: 1, 8, 8, 128>}, {pipeline_mode = #tpu.pipeline_mode<synchronous>, transform_indices = @transform_1, window_bounds = array<i64: 9, 128, 128>}, {pipeline_mode = #tpu.pipeline_mode<synchronous>, transform_indices = @transform_2, window_bounds = array<i64: 1, 128>}, {transform_indices = @transform_3, window_bounds = array<i64: 1, 8, 8, 128>}]} {
    %cst = arith.constant 0.000000e+00 : bf16
    %0 = vector.broadcast %cst : bf16 to vector<10x10x128xbf16>
    %c0 = arith.constant 0 : index
    %c0_0 = arith.constant 0 : index
    %c0_1 = arith.constant 0 : index
    %1 = vector.load %arg5[%c0, %c0_0, %c0_1] : memref<10x10x128xbf16, #tpu.memory_space<vmem>>, vector<10x10x128xbf16>
    tpu.vector_store %arg5[%c0, %c0_0, %c0_1], %0 {strides = array<i32>} : memref<10x10x128xbf16, #tpu.memory_space<vmem>>, vector<10x10x128xbf16>,
    %c0_2 = arith.constant 0 : index
    %c0_3 = arith.constant 0 : index
    %c0_4 = arith.constant 0 : index
    %c0_5 = arith.constant 0 : index
    %2 = vector.load %arg1[%c0_2, %c0_3, %c0_4, %c0_5] : memref<1x8x8x128xbf16, #tpu.memory_space<vmem>>, vector<1x8x8x128xbf16>
    %3 = vector.shape_cast %2 : vector<1x8x8x128xbf16> to vector<8x8x128xbf16>
    %c1 = arith.constant 1 : index
    %c1_6 = arith.constant 1 : index
    %c0_7 = arith.constant 0 : index
    %4 = vector.load %arg5[%c1, %c1_6, %c0_7] : memref<10x10x128xbf16, #tpu.memory_space<vmem>>, vector<8x8x128xbf16>
    tpu.vector_store %arg5[%c1, %c1_6, %c0_7], %3 {strides = array<i32>} : memref<10x10x128xbf16, #tpu.memory_space<vmem>>, vector<8x8x128xbf16>,
    %cst_8 = arith.constant 0.000000e+00 : f32
    %5 = vector.broadcast %cst_8 : f32 to vector<64x128xf32>
    %c0_9 = arith.constant 0 : index
    %c0_10 = arith.constant 0 : index
    %c0_11 = arith.constant 0 : index
    %6 = vector.load %arg5[%c0_9, %c0_10, %c0_11] : memref<10x10x128xbf16, #tpu.memory_space<vmem>>, vector<8x10x128xbf16>
    %7 = vector.extract_strided_slice %6 {offsets = [0, 0, 0], sizes = [8, 8, 128], strides = [1, 1, 1]} : vector<8x10x128xbf16> to vector<8x8x128xbf16>
    %8 = vector.shape_cast %7 : vector<8x8x128xbf16> to vector<64x128xbf16>
    %c0_12 = arith.constant 0 : index
    %c0_13 = arith.constant 0 : index
    %c0_14 = arith.constant 0 : index
    %9 = vector.load %arg2[%c0_12, %c0_13, %c0_14] : memref<9x128x128xbf16, #tpu.memory_space<vmem>>, vector<1x128x128xbf16>
    %10 = vector.shape_cast %9 : vector<1x128x128xbf16> to vector<128x128xbf16>
    %cst_15 = arith.constant dense<0.000000e+00> : vector<64x128xf32>
    %11 = tpu.matmul %8, %10, %cst_15 {dimension_numbers = #tpu.dot_dimension_numbers<[1], [0], [0], [1], [0, 0, 1, 1], [], []>} : vector<64x128xbf16>, vector<128x128xbf16>, vector<64x128xf32> -> vector<64x128xf32>
    %12 = arith.addf %5, %11 : vector<64x128xf32>
    %13 = vector.extract_strided_slice %6 {offsets = [0, 1, 0], sizes = [8, 8, 128], strides = [1, 1, 1]} : vector<8x10x128xbf16> to vector<8x8x128xbf16>
    %14 = vector.shape_cast %13 : vector<8x8x128xbf16> to vector<64x128xbf16>
    %c1_16 = arith.constant 1 : index
    %c0_17 = arith.constant 0 : index
    %c0_18 = arith.constant 0 : index
    %15 = vector.load %arg2[%c1_16, %c0_17, %c0_18] : memref<9x128x128xbf16, #tpu.memory_space<vmem>>, vector<1x128x128xbf16>
    %16 = vector.shape_cast %15 : vector<1x128x128xbf16> to vector<128x128xbf16>
    %cst_19 = arith.constant dense<0.000000e+00> : vector<64x128xf32>
    %17 = tpu.matmul %14, %16, %cst_19 {dimension_numbers = #tpu.dot_dimension_numbers<[1], [0], [0], [1], [0, 0, 1, 1], [], []>} : vector<64x128xbf16>, vector<128x128xbf16>, vector<64x128xf32> -> vector<64x128xf32>
    %18 = arith.addf %12, %17 : vector<64x128xf32>
    %19 = vector.extract_strided_slice %6 {offsets = [0, 2, 0], sizes = [8, 8, 128], strides = [1, 1, 1]} : vector<8x10x128xbf16> to vector<8x8x128xbf16>
    %20 = vector.shape_cast %19 : vector<8x8x128xbf16> to vector<64x128xbf16>
    %c2 = arith.constant 2 : index
    %c0_20 = arith.constant 0 : index
    %c0_21 = arith.constant 0 : index
    %21 = vector.load %arg2[%c2, %c0_20, %c0_21] : memref<9x128x128xbf16, #tpu.memory_space<vmem>>, vector<1x128x128xbf16>
    %22 = vector.shape_cast %21 : vector<1x128x128xbf16> to vector<128x128xbf16>
    %cst_22 = arith.constant dense<0.000000e+00> : vector<64x128xf32>
    %23 = tpu.matmul %20, %22, %cst_22 {dimension_numbers = #tpu.dot_dimension_numbers<[1], [0], [0], [1], [0, 0, 1, 1], [], []>} : vector<64x128xbf16>, vector<128x128xbf16>, vector<64x128xf32> -> vector<64x128xf32>
    %24 = arith.addf %18, %23 : vector<64x128xf32>
    %c1_23 = arith.constant 1 : index
    %c0_24 = arith.constant 0 : index
    %c0_25 = arith.constant 0 : index
    %25 = vector.load %arg5[%c1_23, %c0_24, %c0_25] : memref<10x10x128xbf16, #tpu.memory_space<vmem>>, vector<8x10x128xbf16>
    %26 = vector.extract_strided_slice %25 {offsets = [0, 0, 0], sizes = [8, 8, 128], strides = [1, 1, 1]} : vector<8x10x128xbf16> to vector<8x8x128xbf16>
    %27 = vector.shape_cast %26 : vector<8x8x128xbf16> to vector<64x128xbf16>
    %c3 = arith.constant 3 : index
    %c0_26 = arith.constant 0 : index
    %c0_27 = arith.constant 0 : index
    %28 = vector.load %arg2[%c3, %c0_26, %c0_27] : memref<9x128x128xbf16, #tpu.memory_space<vmem>>, vector<1x128x128xbf16>
    %29 = vector.shape_cast %28 : vector<1x128x128xbf16> to vector<128x128xbf16>
    %cst_28 = arith.constant dense<0.000000e+00> : vector<64x128xf32>
    %30 = tpu.matmul %27, %29, %cst_28 {dimension_numbers = #tpu.dot_dimension_numbers<[1], [0], [0], [1], [0, 0, 1, 1], [], []>} : vector<64x128xbf16>, vector<128x128xbf16>, vector<64x128xf32> -> vector<64x128xf32>
    %31 = arith.addf %24, %30 : vector<64x128xf32>
    %32 = vector.extract_strided_slice %25 {offsets = [0, 1, 0], sizes = [8, 8, 128], strides = [1, 1, 1]} : vector<8x10x128xbf16> to vector<8x8x128xbf16>
    %33 = vector.shape_cast %32 : vector<8x8x128xbf16> to vector<64x128xbf16>
    %c4 = arith.constant 4 : index
    %c0_29 = arith.constant 0 : index
    %c0_30 = arith.constant 0 : index
    %34 = vector.load %arg2[%c4, %c0_29, %c0_30] : memref<9x128x128xbf16, #tpu.memory_space<vmem>>, vector<1x128x128xbf16>
    %35 = vector.shape_cast %34 : vector<1x128x128xbf16> to vector<128x128xbf16>
    %cst_31 = arith.constant dense<0.000000e+00> : vector<64x128xf32>
    %36 = tpu.matmul %33, %35, %cst_31 {dimension_numbers = #tpu.dot_dimension_numbers<[1], [0], [0], [1], [0, 0, 1, 1], [], []>} : vector<64x128xbf16>, vector<128x128xbf16>, vector<64x128xf32> -> vector<64x128xf32>
    %37 = arith.addf %31, %36 : vector<64x128xf32>
    %38 = vector.extract_strided_slice %25 {offsets = [0, 2, 0], sizes = [8, 8, 128], strides = [1, 1, 1]} : vector<8x10x128xbf16> to vector<8x8x128xbf16>
    %39 = vector.shape_cast %38 : vector<8x8x128xbf16> to vector<64x128xbf16>
    %c5 = arith.constant 5 : index
    %c0_32 = arith.constant 0 : index
    %c0_33 = arith.constant 0 : index
    %40 = vector.load %arg2[%c5, %c0_32, %c0_33] : memref<9x128x128xbf16, #tpu.memory_space<vmem>>, vector<1x128x128xbf16>
    %41 = vector.shape_cast %40 : vector<1x128x128xbf16> to vector<128x128xbf16>
    %cst_34 = arith.constant dense<0.000000e+00> : vector<64x128xf32>
    %42 = tpu.matmul %39, %41, %cst_34 {dimension_numbers = #tpu.dot_dimension_numbers<[1], [0], [0], [1], [0, 0, 1, 1], [], []>} : vector<64x128xbf16>, vector<128x128xbf16>, vector<64x128xf32> -> vector<64x128xf32>
    %43 = arith.addf %37, %42 : vector<64x128xf32>
    %c2_35 = arith.constant 2 : index
    %c0_36 = arith.constant 0 : index
    %c0_37 = arith.constant 0 : index
    %44 = vector.load %arg5[%c2_35, %c0_36, %c0_37] : memref<10x10x128xbf16, #tpu.memory_space<vmem>>, vector<8x10x128xbf16>
    %45 = vector.extract_strided_slice %44 {offsets = [0, 0, 0], sizes = [8, 8, 128], strides = [1, 1, 1]} : vector<8x10x128xbf16> to vector<8x8x128xbf16>
    %46 = vector.shape_cast %45 : vector<8x8x128xbf16> to vector<64x128xbf16>
    %c6 = arith.constant 6 : index
    %c0_38 = arith.constant 0 : index
    %c0_39 = arith.constant 0 : index
    %47 = vector.load %arg2[%c6, %c0_38, %c0_39] : memref<9x128x128xbf16, #tpu.memory_space<vmem>>, vector<1x128x128xbf16>
    %48 = vector.shape_cast %47 : vector<1x128x128xbf16> to vector<128x128xbf16>
    %cst_40 = arith.constant dense<0.000000e+00> : vector<64x128xf32>
    %49 = tpu.matmul %46, %48, %cst_40 {dimension_numbers = #tpu.dot_dimension_numbers<[1], [0], [0], [1], [0, 0, 1, 1], [], []>} : vector<64x128xbf16>, vector<128x128xbf16>, vector<64x128xf32> -> vector<64x128xf32>
    %50 = arith.addf %43, %49 : vector<64x128xf32>
    %51 = vector.extract_strided_slice %44 {offsets = [0, 1, 0], sizes = [8, 8, 128], strides = [1, 1, 1]} : vector<8x10x128xbf16> to vector<8x8x128xbf16>
    %52 = vector.shape_cast %51 : vector<8x8x128xbf16> to vector<64x128xbf16>
    %c7 = arith.constant 7 : index
    %c0_41 = arith.constant 0 : index
    %c0_42 = arith.constant 0 : index
    %53 = vector.load %arg2[%c7, %c0_41, %c0_42] : memref<9x128x128xbf16, #tpu.memory_space<vmem>>, vector<1x128x128xbf16>
    %54 = vector.shape_cast %53 : vector<1x128x128xbf16> to vector<128x128xbf16>
    %cst_43 = arith.constant dense<0.000000e+00> : vector<64x128xf32>
    %55 = tpu.matmul %52, %54, %cst_43 {dimension_numbers = #tpu.dot_dimension_numbers<[1], [0], [0], [1], [0, 0, 1, 1], [], []>} : vector<64x128xbf16>, vector<128x128xbf16>, vector<64x128xf32> -> vector<64x128xf32>
    %56 = arith.addf %50, %55 : vector<64x128xf32>
    %57 = vector.extract_strided_slice %44 {offsets = [0, 2, 0], sizes = [8, 8, 128], strides = [1, 1, 1]} : vector<8x10x128xbf16> to vector<8x8x128xbf16>
    %58 = vector.shape_cast %57 : vector<8x8x128xbf16> to vector<64x128xbf16>
    %c8 = arith.constant 8 : index
    %c0_44 = arith.constant 0 : index
    %c0_45 = arith.constant 0 : index
    %59 = vector.load %arg2[%c8, %c0_44, %c0_45] : memref<9x128x128xbf16, #tpu.memory_space<vmem>>, vector<1x128x128xbf16>
    %60 = vector.shape_cast %59 : vector<1x128x128xbf16> to vector<128x128xbf16>
    %cst_46 = arith.constant dense<0.000000e+00> : vector<64x128xf32>
    %61 = tpu.matmul %58, %60, %cst_46 {dimension_numbers = #tpu.dot_dimension_numbers<[1], [0], [0], [1], [0, 0, 1, 1], [], []>} : vector<64x128xbf16>, vector<128x128xbf16>, vector<64x128xf32> -> vector<64x128xf32>
    %62 = arith.addf %56, %61 : vector<64x128xf32>
    %63 = vector.shape_cast %62 : vector<64x128xf32> to vector<8x8x128xf32>
    %c0_47 = arith.constant 0 : index
    %c0_48 = arith.constant 0 : index
    %64 = vector.load %arg3[%c0_47, %c0_48] : memref<1x128xf32, #tpu.memory_space<vmem>>, vector<1x128xf32>
    %65 = vector.shape_cast %64 : vector<1x128xf32> to vector<128xf32>
    %66 = vector.shape_cast %65 : vector<128xf32> to vector<1x1x128xf32>
    %67 = vector.broadcast %66 : vector<1x1x128xf32> to vector<8x8x128xf32>
    %68 = arith.addf %63, %67 : vector<8x8x128xf32>
    %cst_49 = arith.constant 0.000000e+00 : f32
    %69 = vector.broadcast %cst_49 : f32 to vector<8x8x128xf32>
    %70 = arith.maximumf %68, %69 : vector<8x8x128xf32>
    %71 = arith.truncf %70 : vector<8x8x128xf32> to vector<8x8x128xbf16>
    %c0_50 = arith.constant 0 : index
    %c0_51 = arith.constant 0 : index
    %c0_52 = arith.constant 0 : index
    %c0_53 = arith.constant 0 : index
    %72 = vector.load %arg4[%c0_50, %c0_51, %c0_52, %c0_53] : memref<1x8x8x128xbf16, #tpu.memory_space<vmem>>, vector<1x8x8x128xbf16>
    %73 = vector.shape_cast %72 : vector<1x8x8x128xbf16> to vector<8x8x128xbf16>
    %74 = vector.shape_cast %71 : vector<8x8x128xbf16> to vector<1x8x8x128xbf16>
    tpu.vector_store %arg4[%c0_50, %c0_51, %c0_52, %c0_53], %74 {strides = array<i32>} : memref<1x8x8x128xbf16, #tpu.memory_space<vmem>>, vector<1x8x8x128xbf16>,
    return
  }
  func.func @transform_0(%arg0: i32) -> (i32, i32, i32, i32) {
    %c0_i32 = arith.constant 0 : i32
    %c0_i32_0 = arith.constant 0 : i32
    %c0_i32_1 = arith.constant 0 : i32
    %c0_i32_2 = arith.constant 0 : i32
    return %arg0, %c0_i32, %c0_i32_0, %c0_i32_1 : i32, i32, i32, i32
  }
  func.func @transform_1(%arg0: i32) -> (i32, i32, i32) {
    %c0_i32 = arith.constant 0 : i32
    %c0_i32_0 = arith.constant 0 : i32
    %c0_i32_1 = arith.constant 0 : i32
    %c0_i32_2 = arith.constant 0 : i32
    return %c0_i32, %c0_i32_0, %c0_i32_1 : i32, i32, i32
  }
  func.func @transform_2(%arg0: i32) -> (i32, i32) {
    %c0_i32 = arith.constant 0 : i32
    %c0_i32_0 = arith.constant 0 : i32
    %c0_i32_1 = arith.constant 0 : i32
    return %c0_i32, %c0_i32_0 : i32, i32
  }
  func.func @transform_3(%arg0: i32) -> (i32, i32, i32, i32) {
    %c0_i32 = arith.constant 0 : i32
    %c0_i32_0 = arith.constant 0 : i32
    %c0_i32_1 = arith.constant 0 : i32
    %c0_i32_2 = arith.constant 0 : i32
    return %arg0, %c0_i32, %c0_i32_0, %c0_i32_1 : i32, i32, i32, i32
  }
}

module attributes {stable_mosaic.version = 11 : i64} {
  func.func @_mm_bias_res_kernel(%arg0: i32, %arg1: memref<64x128xbf16, #tpu.memory_space<vmem>>, %arg2: memref<128x128xbf16, #tpu.memory_space<vmem>>, %arg3: memref<1x128xf32, #tpu.memory_space<vmem>>, %arg4: memref<64x128xbf16, #tpu.memory_space<vmem>>, %arg5: memref<64x128xbf16, #tpu.memory_space<vmem>>) attributes {dimension_semantics = [#tpu.dimension_semantics<parallel>], iteration_bounds = array<i64: 2>, scalar_prefetch = 0 : i64, scratch_operands = 0 : i64, tpu.core_type = #tpu.core_type<tc>, window_params = [{transform_indices = @transform_0, window_bounds = array<i64: 64, 128>}, {pipeline_mode = #tpu.pipeline_mode<synchronous>, transform_indices = @transform_1, window_bounds = array<i64: 128, 128>}, {pipeline_mode = #tpu.pipeline_mode<synchronous>, transform_indices = @transform_2, window_bounds = array<i64: 1, 128>}, {transform_indices = @transform_3, window_bounds = array<i64: 64, 128>}, {transform_indices = @transform_4, window_bounds = array<i64: 64, 128>}]} {
    %c0 = arith.constant 0 : index
    %c0_0 = arith.constant 0 : index
    %0 = vector.load %arg1[%c0, %c0_0] : memref<64x128xbf16, #tpu.memory_space<vmem>>, vector<64x128xbf16>
    %c0_1 = arith.constant 0 : index
    %c0_2 = arith.constant 0 : index
    %1 = vector.load %arg2[%c0_1, %c0_2] : memref<128x128xbf16, #tpu.memory_space<vmem>>, vector<128x128xbf16>
    %cst = arith.constant dense<0.000000e+00> : vector<64x128xf32>
    %2 = tpu.matmul %0, %1, %cst {dimension_numbers = #tpu.dot_dimension_numbers<[1], [0], [0], [1], [0, 0, 1, 1], [], []>} : vector<64x128xbf16>, vector<128x128xbf16>, vector<64x128xf32> -> vector<64x128xf32>
    %c0_3 = arith.constant 0 : index
    %c0_4 = arith.constant 0 : index
    %3 = vector.load %arg3[%c0_3, %c0_4] : memref<1x128xf32, #tpu.memory_space<vmem>>, vector<1x128xf32>
    %4 = vector.broadcast %3 : vector<1x128xf32> to vector<64x128xf32>
    %5 = arith.addf %2, %4 : vector<64x128xf32>
    %c0_5 = arith.constant 0 : index
    %c0_6 = arith.constant 0 : index
    %6 = vector.load %arg4[%c0_5, %c0_6] : memref<64x128xbf16, #tpu.memory_space<vmem>>, vector<64x128xbf16>
    %7 = arith.extf %6 : vector<64x128xbf16> to vector<64x128xf32>
    %8 = arith.addf %5, %7 : vector<64x128xf32>
    %cst_7 = arith.constant 0.000000e+00 : f32
    %9 = vector.broadcast %cst_7 : f32 to vector<64x128xf32>
    %10 = arith.maximumf %8, %9 : vector<64x128xf32>
    %11 = arith.truncf %10 : vector<64x128xf32> to vector<64x128xbf16>
    %c0_8 = arith.constant 0 : index
    %c0_9 = arith.constant 0 : index
    %12 = vector.load %arg5[%c0_8, %c0_9] : memref<64x128xbf16, #tpu.memory_space<vmem>>, vector<64x128xbf16>
    tpu.vector_store %arg5[%c0_8, %c0_9], %11 {strides = array<i32>} : memref<64x128xbf16, #tpu.memory_space<vmem>>, vector<64x128xbf16>,
    return
  }
  func.func @transform_0(%arg0: i32) -> (i32, i32) {
    %c0_i32 = arith.constant 0 : i32
    %c0_i32_0 = arith.constant 0 : i32
    return %arg0, %c0_i32 : i32, i32
  }
  func.func @transform_1(%arg0: i32) -> (i32, i32) {
    %c0_i32 = arith.constant 0 : i32
    %c0_i32_0 = arith.constant 0 : i32
    %c0_i32_1 = arith.constant 0 : i32
    return %c0_i32, %c0_i32_0 : i32, i32
  }
  func.func @transform_2(%arg0: i32) -> (i32, i32) {
    %c0_i32 = arith.constant 0 : i32
    %c0_i32_0 = arith.constant 0 : i32
    %c0_i32_1 = arith.constant 0 : i32
    return %c0_i32, %c0_i32_0 : i32, i32
  }
  func.func @transform_3(%arg0: i32) -> (i32, i32) {
    %c0_i32 = arith.constant 0 : i32
    %c0_i32_0 = arith.constant 0 : i32
    return %arg0, %c0_i32 : i32, i32
  }
  func.func @transform_4(%arg0: i32) -> (i32, i32) {
    %c0_i32 = arith.constant 0 : i32
    %c0_i32_0 = arith.constant 0 : i32
    return %arg0, %c0_i32 : i32, i32
  }
}

module attributes {stable_mosaic.version = 11 : i64} {
  func.func @_mm_bias_kernel(%arg0: i32, %arg1: memref<16x128xbf16, #tpu.memory_space<vmem>>, %arg2: memref<128x128xbf16, #tpu.memory_space<vmem>>, %arg3: memref<1x128xf32, #tpu.memory_space<vmem>>, %arg4: memref<16x128xbf16, #tpu.memory_space<vmem>>) attributes {dimension_semantics = [#tpu.dimension_semantics<parallel>], iteration_bounds = array<i64: 2>, scalar_prefetch = 0 : i64, scratch_operands = 0 : i64, tpu.core_type = #tpu.core_type<tc>, window_params = [{transform_indices = @transform_0, window_bounds = array<i64: 16, 128>}, {pipeline_mode = #tpu.pipeline_mode<synchronous>, transform_indices = @transform_1, window_bounds = array<i64: 128, 128>}, {pipeline_mode = #tpu.pipeline_mode<synchronous>, transform_indices = @transform_2, window_bounds = array<i64: 1, 128>}, {transform_indices = @transform_3, window_bounds = array<i64: 16, 128>}]} {
    %c0 = arith.constant 0 : index
    %c0_0 = arith.constant 0 : index
    %0 = vector.load %arg1[%c0, %c0_0] : memref<16x128xbf16, #tpu.memory_space<vmem>>, vector<16x128xbf16>
    %c0_1 = arith.constant 0 : index
    %c0_2 = arith.constant 0 : index
    %1 = vector.load %arg2[%c0_1, %c0_2] : memref<128x128xbf16, #tpu.memory_space<vmem>>, vector<128x128xbf16>
    %cst = arith.constant dense<0.000000e+00> : vector<16x128xf32>
    %2 = tpu.matmul %0, %1, %cst {dimension_numbers = #tpu.dot_dimension_numbers<[1], [0], [0], [1], [0, 0, 1, 1], [], []>} : vector<16x128xbf16>, vector<128x128xbf16>, vector<16x128xf32> -> vector<16x128xf32>
    %c0_3 = arith.constant 0 : index
    %c0_4 = arith.constant 0 : index
    %3 = vector.load %arg3[%c0_3, %c0_4] : memref<1x128xf32, #tpu.memory_space<vmem>>, vector<1x128xf32>
    %4 = vector.broadcast %3 : vector<1x128xf32> to vector<16x128xf32>
    %5 = arith.addf %2, %4 : vector<16x128xf32>
    %6 = arith.truncf %5 : vector<16x128xf32> to vector<16x128xbf16>
    %c0_5 = arith.constant 0 : index
    %c0_6 = arith.constant 0 : index
    %7 = vector.load %arg4[%c0_5, %c0_6] : memref<16x128xbf16, #tpu.memory_space<vmem>>, vector<16x128xbf16>
    tpu.vector_store %arg4[%c0_5, %c0_6], %6 {strides = array<i32>} : memref<16x128xbf16, #tpu.memory_space<vmem>>, vector<16x128xbf16>,
    return
  }
  func.func @transform_0(%arg0: i32) -> (i32, i32) {
    %c0_i32 = arith.constant 0 : i32
    %c0_i32_0 = arith.constant 0 : i32
    return %arg0, %c0_i32 : i32, i32
  }
  func.func @transform_1(%arg0: i32) -> (i32, i32) {
    %c0_i32 = arith.constant 0 : i32
    %c0_i32_0 = arith.constant 0 : i32
    %c0_i32_1 = arith.constant 0 : i32
    return %c0_i32, %c0_i32_0 : i32, i32
  }
  func.func @transform_2(%arg0: i32) -> (i32, i32) {
    %c0_i32 = arith.constant 0 : i32
    %c0_i32_0 = arith.constant 0 : i32
    %c0_i32_1 = arith.constant 0 : i32
    return %c0_i32, %c0_i32_0 : i32, i32
  }
  func.func @transform_3(%arg0: i32) -> (i32, i32) {
    %c0_i32 = arith.constant 0 : i32
    %c0_i32_0 = arith.constant 0 : i32
    return %arg0, %c0_i32 : i32, i32
  }
}

module attributes {stable_mosaic.version = 11 : i64} {
  func.func @_direct_conv_kernel(%arg0: i32, %arg1: i32, %arg2: memref<1x20x9x128xbf16, #tpu.memory_space<vmem>>, %arg3: memref<9x128x128xbf16, #tpu.memory_space<vmem>>, %arg4: memref<1x128xf32, #tpu.memory_space<vmem>>, %arg5: memref<1x4x8x128xbf16, #tpu.memory_space<vmem>>) attributes {dimension_semantics = [#tpu.dimension_semantics<parallel>, #tpu.dimension_semantics<parallel>], iteration_bounds = array<i64: 2, 1>, scalar_prefetch = 0 : i64, scratch_operands = 0 : i64, tpu.core_type = #tpu.core_type<tc>, window_params = [{transform_indices = @transform_0, window_bounds = array<i64: 1, 20, 9, 128>}, {pipeline_mode = #tpu.pipeline_mode<synchronous>, transform_indices = @transform_1, window_bounds = array<i64: 9, 128, 128>}, {pipeline_mode = #tpu.pipeline_mode<synchronous>, transform_indices = @transform_2, window_bounds = array<i64: 1, 128>}, {transform_indices = @transform_3, window_bounds = array<i64: 1, 4, 8, 128>}]} {
    %c4_i32 = arith.constant 4 : i32
    %0 = arith.muli %arg1, %c4_i32 : i32
    %cst = arith.constant 0.000000e+00 : f32
    %1 = vector.broadcast %cst : f32 to vector<32x128xf32>
    %c0_i32 = arith.constant 0 : i32
    %2 = arith.addi %c0_i32, %0 : i32
    %c0 = arith.constant 0 : index
    %3 = arith.index_cast %2 : i32 to index
    %c0_0 = arith.constant 0 : index
    %c0_1 = arith.constant 0 : index
    %4 = vector.load %arg2[%c0, %3, %c0_0, %c0_1] : memref<1x20x9x128xbf16, #tpu.memory_space<vmem>>, vector<1x4x9x128xbf16>
    %5 = vector.shape_cast %4 : vector<1x4x9x128xbf16> to vector<4x9x128xbf16>
    %6 = vector.extract_strided_slice %5 {offsets = [0, 0, 0], sizes = [4, 8, 128], strides = [1, 1, 1]} : vector<4x9x128xbf16> to vector<4x8x128xbf16>
    %7 = vector.shape_cast %6 : vector<4x8x128xbf16> to vector<32x128xbf16>
    %c0_2 = arith.constant 0 : index
    %c0_3 = arith.constant 0 : index
    %c0_4 = arith.constant 0 : index
    %8 = vector.load %arg3[%c0_2, %c0_3, %c0_4] : memref<9x128x128xbf16, #tpu.memory_space<vmem>>, vector<1x128x128xbf16>
    %9 = vector.shape_cast %8 : vector<1x128x128xbf16> to vector<128x128xbf16>
    %cst_5 = arith.constant dense<0.000000e+00> : vector<32x128xf32>
    %10 = tpu.matmul %7, %9, %cst_5 {dimension_numbers = #tpu.dot_dimension_numbers<[1], [0], [0], [1], [0, 0, 1, 1], [], []>} : vector<32x128xbf16>, vector<128x128xbf16>, vector<32x128xf32> -> vector<32x128xf32>
    %11 = arith.addf %1, %10 : vector<32x128xf32>
    %12 = vector.extract_strided_slice %5 {offsets = [0, 1, 0], sizes = [4, 8, 128], strides = [1, 1, 1]} : vector<4x9x128xbf16> to vector<4x8x128xbf16>
    %13 = vector.shape_cast %12 : vector<4x8x128xbf16> to vector<32x128xbf16>
    %c2 = arith.constant 2 : index
    %c0_6 = arith.constant 0 : index
    %c0_7 = arith.constant 0 : index
    %14 = vector.load %arg3[%c2, %c0_6, %c0_7] : memref<9x128x128xbf16, #tpu.memory_space<vmem>>, vector<1x128x128xbf16>
    %15 = vector.shape_cast %14 : vector<1x128x128xbf16> to vector<128x128xbf16>
    %cst_8 = arith.constant dense<0.000000e+00> : vector<32x128xf32>
    %16 = tpu.matmul %13, %15, %cst_8 {dimension_numbers = #tpu.dot_dimension_numbers<[1], [0], [0], [1], [0, 0, 1, 1], [], []>} : vector<32x128xbf16>, vector<128x128xbf16>, vector<32x128xf32> -> vector<32x128xf32>
    %17 = arith.addf %11, %16 : vector<32x128xf32>
    %c5_i32 = arith.constant 5 : i32
    %18 = arith.addi %c5_i32, %0 : i32
    %c0_9 = arith.constant 0 : index
    %19 = arith.index_cast %18 : i32 to index
    %c0_10 = arith.constant 0 : index
    %c0_11 = arith.constant 0 : index
    %20 = vector.load %arg2[%c0_9, %19, %c0_10, %c0_11] : memref<1x20x9x128xbf16, #tpu.memory_space<vmem>>, vector<1x4x9x128xbf16>
    %21 = vector.shape_cast %20 : vector<1x4x9x128xbf16> to vector<4x9x128xbf16>
    %22 = vector.extract_strided_slice %21 {offsets = [0, 0, 0], sizes = [4, 8, 128], strides = [1, 1, 1]} : vector<4x9x128xbf16> to vector<4x8x128xbf16>
    %23 = vector.shape_cast %22 : vector<4x8x128xbf16> to vector<32x128xbf16>
    %c1 = arith.constant 1 : index
    %c0_12 = arith.constant 0 : index
    %c0_13 = arith.constant 0 : index
    %24 = vector.load %arg3[%c1, %c0_12, %c0_13] : memref<9x128x128xbf16, #tpu.memory_space<vmem>>, vector<1x128x128xbf16>
    %25 = vector.shape_cast %24 : vector<1x128x128xbf16> to vector<128x128xbf16>
    %cst_14 = arith.constant dense<0.000000e+00> : vector<32x128xf32>
    %26 = tpu.matmul %23, %25, %cst_14 {dimension_numbers = #tpu.dot_dimension_numbers<[1], [0], [0], [1], [0, 0, 1, 1], [], []>} : vector<32x128xbf16>, vector<128x128xbf16>, vector<32x128xf32> -> vector<32x128xf32>
    %27 = arith.addf %17, %26 : vector<32x128xf32>
    %c10_i32 = arith.constant 10 : i32
    %28 = arith.addi %c10_i32, %0 : i32
    %c0_15 = arith.constant 0 : index
    %29 = arith.index_cast %28 : i32 to index
    %c0_16 = arith.constant 0 : index
    %c0_17 = arith.constant 0 : index
    %30 = vector.load %arg2[%c0_15, %29, %c0_16, %c0_17] : memref<1x20x9x128xbf16, #tpu.memory_space<vmem>>, vector<1x4x9x128xbf16>
    %31 = vector.shape_cast %30 : vector<1x4x9x128xbf16> to vector<4x9x128xbf16>
    %32 = vector.extract_strided_slice %31 {offsets = [0, 0, 0], sizes = [4, 8, 128], strides = [1, 1, 1]} : vector<4x9x128xbf16> to vector<4x8x128xbf16>
    %33 = vector.shape_cast %32 : vector<4x8x128xbf16> to vector<32x128xbf16>
    %c3 = arith.constant 3 : index
    %c0_18 = arith.constant 0 : index
    %c0_19 = arith.constant 0 : index
    %34 = vector.load %arg3[%c3, %c0_18, %c0_19] : memref<9x128x128xbf16, #tpu.memory_space<vmem>>, vector<1x128x128xbf16>
    %35 = vector.shape_cast %34 : vector<1x128x128xbf16> to vector<128x128xbf16>
    %cst_20 = arith.constant dense<0.000000e+00> : vector<32x128xf32>
    %36 = tpu.matmul %33, %35, %cst_20 {dimension_numbers = #tpu.dot_dimension_numbers<[1], [0], [0], [1], [0, 0, 1, 1], [], []>} : vector<32x128xbf16>, vector<128x128xbf16>, vector<32x128xf32> -> vector<32x128xf32>
    %37 = arith.addf %27, %36 : vector<32x128xf32>
    %38 = vector.extract_strided_slice %31 {offsets = [0, 1, 0], sizes = [4, 8, 128], strides = [1, 1, 1]} : vector<4x9x128xbf16> to vector<4x8x128xbf16>
    %39 = vector.shape_cast %38 : vector<4x8x128xbf16> to vector<32x128xbf16>
    %c5 = arith.constant 5 : index
    %c0_21 = arith.constant 0 : index
    %c0_22 = arith.constant 0 : index
    %40 = vector.load %arg3[%c5, %c0_21, %c0_22] : memref<9x128x128xbf16, #tpu.memory_space<vmem>>, vector<1x128x128xbf16>
    %41 = vector.shape_cast %40 : vector<1x128x128xbf16> to vector<128x128xbf16>
    %cst_23 = arith.constant dense<0.000000e+00> : vector<32x128xf32>
    %42 = tpu.matmul %39, %41, %cst_23 {dimension_numbers = #tpu.dot_dimension_numbers<[1], [0], [0], [1], [0, 0, 1, 1], [], []>} : vector<32x128xbf16>, vector<128x128xbf16>, vector<32x128xf32> -> vector<32x128xf32>
    %43 = arith.addf %37, %42 : vector<32x128xf32>
    %c15_i32 = arith.constant 15 : i32
    %44 = arith.addi %c15_i32, %0 : i32
    %c0_24 = arith.constant 0 : index
    %45 = arith.index_cast %44 : i32 to index
    %c0_25 = arith.constant 0 : index
    %c0_26 = arith.constant 0 : index
    %46 = vector.load %arg2[%c0_24, %45, %c0_25, %c0_26] : memref<1x20x9x128xbf16, #tpu.memory_space<vmem>>, vector<1x4x9x128xbf16>
    %47 = vector.shape_cast %46 : vector<1x4x9x128xbf16> to vector<4x9x128xbf16>
    %48 = vector.extract_strided_slice %47 {offsets = [0, 0, 0], sizes = [4, 8, 128], strides = [1, 1, 1]} : vector<4x9x128xbf16> to vector<4x8x128xbf16>
    %49 = vector.shape_cast %48 : vector<4x8x128xbf16> to vector<32x128xbf16>
    %c4 = arith.constant 4 : index
    %c0_27 = arith.constant 0 : index
    %c0_28 = arith.constant 0 : index
    %50 = vector.load %arg3[%c4, %c0_27, %c0_28] : memref<9x128x128xbf16, #tpu.memory_space<vmem>>, vector<1x128x128xbf16>
    %51 = vector.shape_cast %50 : vector<1x128x128xbf16> to vector<128x128xbf16>
    %cst_29 = arith.constant dense<0.000000e+00> : vector<32x128xf32>
    %52 = tpu.matmul %49, %51, %cst_29 {dimension_numbers = #tpu.dot_dimension_numbers<[1], [0], [0], [1], [0, 0, 1, 1], [], []>} : vector<32x128xbf16>, vector<128x128xbf16>, vector<32x128xf32> -> vector<32x128xf32>
    %53 = arith.addf %43, %52 : vector<32x128xf32>
    %c1_i32 = arith.constant 1 : i32
    %54 = arith.addi %c1_i32, %0 : i32
    %c0_30 = arith.constant 0 : index
    %55 = arith.index_cast %54 : i32 to index
    %c0_31 = arith.constant 0 : index
    %c0_32 = arith.constant 0 : index
    %56 = vector.load %arg2[%c0_30, %55, %c0_31, %c0_32] : memref<1x20x9x128xbf16, #tpu.memory_space<vmem>>, vector<1x4x9x128xbf16>
    %57 = vector.shape_cast %56 : vector<1x4x9x128xbf16> to vector<4x9x128xbf16>
    %58 = vector.extract_strided_slice %57 {offsets = [0, 0, 0], sizes = [4, 8, 128], strides = [1, 1, 1]} : vector<4x9x128xbf16> to vector<4x8x128xbf16>
    %59 = vector.shape_cast %58 : vector<4x8x128xbf16> to vector<32x128xbf16>
    %c6 = arith.constant 6 : index
    %c0_33 = arith.constant 0 : index
    %c0_34 = arith.constant 0 : index
    %60 = vector.load %arg3[%c6, %c0_33, %c0_34] : memref<9x128x128xbf16, #tpu.memory_space<vmem>>, vector<1x128x128xbf16>
    %61 = vector.shape_cast %60 : vector<1x128x128xbf16> to vector<128x128xbf16>
    %cst_35 = arith.constant dense<0.000000e+00> : vector<32x128xf32>
    %62 = tpu.matmul %59, %61, %cst_35 {dimension_numbers = #tpu.dot_dimension_numbers<[1], [0], [0], [1], [0, 0, 1, 1], [], []>} : vector<32x128xbf16>, vector<128x128xbf16>, vector<32x128xf32> -> vector<32x128xf32>
    %63 = arith.addf %53, %62 : vector<32x128xf32>
    %64 = vector.extract_strided_slice %57 {offsets = [0, 1, 0], sizes = [4, 8, 128], strides = [1, 1, 1]} : vector<4x9x128xbf16> to vector<4x8x128xbf16>
    %65 = vector.shape_cast %64 : vector<4x8x128xbf16> to vector<32x128xbf16>
    %c8 = arith.constant 8 : index
    %c0_36 = arith.constant 0 : index
    %c0_37 = arith.constant 0 : index
    %66 = vector.load %arg3[%c8, %c0_36, %c0_37] : memref<9x128x128xbf16, #tpu.memory_space<vmem>>, vector<1x128x128xbf16>
    %67 = vector.shape_cast %66 : vector<1x128x128xbf16> to vector<128x128xbf16>
    %cst_38 = arith.constant dense<0.000000e+00> : vector<32x128xf32>
    %68 = tpu.matmul %65, %67, %cst_38 {dimension_numbers = #tpu.dot_dimension_numbers<[1], [0], [0], [1], [0, 0, 1, 1], [], []>} : vector<32x128xbf16>, vector<128x128xbf16>, vector<32x128xf32> -> vector<32x128xf32>
    %69 = arith.addf %63, %68 : vector<32x128xf32>
    %c6_i32 = arith.constant 6 : i32
    %70 = arith.addi %c6_i32, %0 : i32
    %c0_39 = arith.constant 0 : index
    %71 = arith.index_cast %70 : i32 to index
    %c0_40 = arith.constant 0 : index
    %c0_41 = arith.constant 0 : index
    %72 = vector.load %arg2[%c0_39, %71, %c0_40, %c0_41] : memref<1x20x9x128xbf16, #tpu.memory_space<vmem>>, vector<1x4x9x128xbf16>
    %73 = vector.shape_cast %72 : vector<1x4x9x128xbf16> to vector<4x9x128xbf16>
    %74 = vector.extract_strided_slice %73 {offsets = [0, 0, 0], sizes = [4, 8, 128], strides = [1, 1, 1]} : vector<4x9x128xbf16> to vector<4x8x128xbf16>
    %75 = vector.shape_cast %74 : vector<4x8x128xbf16> to vector<32x128xbf16>
    %c7 = arith.constant 7 : index
    %c0_42 = arith.constant 0 : index
    %c0_43 = arith.constant 0 : index
    %76 = vector.load %arg3[%c7, %c0_42, %c0_43] : memref<9x128x128xbf16, #tpu.memory_space<vmem>>, vector<1x128x128xbf16>
    %77 = vector.shape_cast %76 : vector<1x128x128xbf16> to vector<128x128xbf16>
    %cst_44 = arith.constant dense<0.000000e+00> : vector<32x128xf32>
    %78 = tpu.matmul %75, %77, %cst_44 {dimension_numbers = #tpu.dot_dimension_numbers<[1], [0], [0], [1], [0, 0, 1, 1], [], []>} : vector<32x128xbf16>, vector<128x128xbf16>, vector<32x128xf32> -> vector<32x128xf32>
    %79 = arith.addf %69, %78 : vector<32x128xf32>
    %80 = vector.shape_cast %79 : vector<32x128xf32> to vector<4x8x128xf32>
    %c0_45 = arith.constant 0 : index
    %c0_46 = arith.constant 0 : index
    %81 = vector.load %arg4[%c0_45, %c0_46] : memref<1x128xf32, #tpu.memory_space<vmem>>, vector<1x128xf32>
    %82 = vector.shape_cast %81 : vector<1x128xf32> to vector<128xf32>
    %83 = vector.shape_cast %82 : vector<128xf32> to vector<1x1x128xf32>
    %84 = vector.broadcast %83 : vector<1x1x128xf32> to vector<4x8x128xf32>
    %85 = arith.addf %80, %84 : vector<4x8x128xf32>
    %cst_47 = arith.constant 0.000000e+00 : f32
    %86 = vector.broadcast %cst_47 : f32 to vector<4x8x128xf32>
    %87 = arith.maximumf %85, %86 : vector<4x8x128xf32>
    %88 = arith.truncf %87 : vector<4x8x128xf32> to vector<4x8x128xbf16>
    %c0_48 = arith.constant 0 : index
    %c0_49 = arith.constant 0 : index
    %c0_50 = arith.constant 0 : index
    %c0_51 = arith.constant 0 : index
    %89 = vector.load %arg5[%c0_48, %c0_49, %c0_50, %c0_51] : memref<1x4x8x128xbf16, #tpu.memory_space<vmem>>, vector<1x4x8x128xbf16>
    %90 = vector.shape_cast %89 : vector<1x4x8x128xbf16> to vector<4x8x128xbf16>
    %91 = vector.shape_cast %88 : vector<4x8x128xbf16> to vector<1x4x8x128xbf16>
    tpu.vector_store %arg5[%c0_48, %c0_49, %c0_50, %c0_51], %91 {strides = array<i32>} : memref<1x4x8x128xbf16, #tpu.memory_space<vmem>>, vector<1x4x8x128xbf16>,
    return
  }
  func.func @transform_0(%arg0: i32, %arg1: i32) -> (i32, i32, i32, i32) {
    %c0_i32 = arith.constant 0 : i32
    %c0_i32_0 = arith.constant 0 : i32
    %c0_i32_1 = arith.constant 0 : i32
    %c0_i32_2 = arith.constant 0 : i32
    return %arg0, %c0_i32, %c0_i32_0, %c0_i32_1 : i32, i32, i32, i32
  }
  func.func @transform_1(%arg0: i32, %arg1: i32) -> (i32, i32, i32) {
    %c0_i32 = arith.constant 0 : i32
    %c0_i32_0 = arith.constant 0 : i32
    %c0_i32_1 = arith.constant 0 : i32
    %c0_i32_2 = arith.constant 0 : i32
    return %c0_i32, %c0_i32_0, %c0_i32_1 : i32, i32, i32
  }
  func.func @transform_2(%arg0: i32, %arg1: i32) -> (i32, i32) {
    %c0_i32 = arith.constant 0 : i32
    %c0_i32_0 = arith.constant 0 : i32
    %c0_i32_1 = arith.constant 0 : i32
    return %c0_i32, %c0_i32_0 : i32, i32
  }
  func.func @transform_3(%arg0: i32, %arg1: i32) -> (i32, i32, i32, i32) {
    %c0_i32 = arith.constant 0 : i32
    %c0_i32_0 = arith.constant 0 : i32
    %c0_i32_1 = arith.constant 0 : i32
    return %arg0, %arg1, %c0_i32, %c0_i32_0 : i32, i32, i32, i32
  }
}

module attributes {stable_mosaic.version = 11 : i64} {
  func.func @_mm_bias_res_kernel(%arg0: i32, %arg1: memref<16x128xbf16, #tpu.memory_space<vmem>>, %arg2: memref<128x128xbf16, #tpu.memory_space<vmem>>, %arg3: memref<1x128xf32, #tpu.memory_space<vmem>>, %arg4: memref<16x128xbf16, #tpu.memory_space<vmem>>, %arg5: memref<16x128xbf16, #tpu.memory_space<vmem>>) attributes {dimension_semantics = [#tpu.dimension_semantics<parallel>], iteration_bounds = array<i64: 2>, scalar_prefetch = 0 : i64, scratch_operands = 0 : i64, tpu.core_type = #tpu.core_type<tc>, window_params = [{transform_indices = @transform_0, window_bounds = array<i64: 16, 128>}, {pipeline_mode = #tpu.pipeline_mode<synchronous>, transform_indices = @transform_1, window_bounds = array<i64: 128, 128>}, {pipeline_mode = #tpu.pipeline_mode<synchronous>, transform_indices = @transform_2, window_bounds = array<i64: 1, 128>}, {transform_indices = @transform_3, window_bounds = array<i64: 16, 128>}, {transform_indices = @transform_4, window_bounds = array<i64: 16, 128>}]} {
    %c0 = arith.constant 0 : index
    %c0_0 = arith.constant 0 : index
    %0 = vector.load %arg1[%c0, %c0_0] : memref<16x128xbf16, #tpu.memory_space<vmem>>, vector<16x128xbf16>
    %c0_1 = arith.constant 0 : index
    %c0_2 = arith.constant 0 : index
    %1 = vector.load %arg2[%c0_1, %c0_2] : memref<128x128xbf16, #tpu.memory_space<vmem>>, vector<128x128xbf16>
    %cst = arith.constant dense<0.000000e+00> : vector<16x128xf32>
    %2 = tpu.matmul %0, %1, %cst {dimension_numbers = #tpu.dot_dimension_numbers<[1], [0], [0], [1], [0, 0, 1, 1], [], []>} : vector<16x128xbf16>, vector<128x128xbf16>, vector<16x128xf32> -> vector<16x128xf32>
    %c0_3 = arith.constant 0 : index
    %c0_4 = arith.constant 0 : index
    %3 = vector.load %arg3[%c0_3, %c0_4] : memref<1x128xf32, #tpu.memory_space<vmem>>, vector<1x128xf32>
    %4 = vector.broadcast %3 : vector<1x128xf32> to vector<16x128xf32>
    %5 = arith.addf %2, %4 : vector<16x128xf32>
    %c0_5 = arith.constant 0 : index
    %c0_6 = arith.constant 0 : index
    %6 = vector.load %arg4[%c0_5, %c0_6] : memref<16x128xbf16, #tpu.memory_space<vmem>>, vector<16x128xbf16>
    %7 = arith.extf %6 : vector<16x128xbf16> to vector<16x128xf32>
    %8 = arith.addf %5, %7 : vector<16x128xf32>
    %cst_7 = arith.constant 0.000000e+00 : f32
    %9 = vector.broadcast %cst_7 : f32 to vector<16x128xf32>
    %10 = arith.maximumf %8, %9 : vector<16x128xf32>
    %11 = arith.truncf %10 : vector<16x128xf32> to vector<16x128xbf16>
    %c0_8 = arith.constant 0 : index
    %c0_9 = arith.constant 0 : index
    %12 = vector.load %arg5[%c0_8, %c0_9] : memref<16x128xbf16, #tpu.memory_space<vmem>>, vector<16x128xbf16>
    tpu.vector_store %arg5[%c0_8, %c0_9], %11 {strides = array<i32>} : memref<16x128xbf16, #tpu.memory_space<vmem>>, vector<16x128xbf16>,
    return
  }
  func.func @transform_0(%arg0: i32) -> (i32, i32) {
    %c0_i32 = arith.constant 0 : i32
    %c0_i32_0 = arith.constant 0 : i32
    return %arg0, %c0_i32 : i32, i32
  }
  func.func @transform_1(%arg0: i32) -> (i32, i32) {
    %c0_i32 = arith.constant 0 : i32
    %c0_i32_0 = arith.constant 0 : i32
    %c0_i32_1 = arith.constant 0 : i32
    return %c0_i32, %c0_i32_0 : i32, i32
  }
  func.func @transform_2(%arg0: i32) -> (i32, i32) {
    %c0_i32 = arith.constant 0 : i32
    %c0_i32_0 = arith.constant 0 : i32
    %c0_i32_1 = arith.constant 0 : i32
    return %c0_i32, %c0_i32_0 : i32, i32
  }
  func.func @transform_3(%arg0: i32) -> (i32, i32) {
    %c0_i32 = arith.constant 0 : i32
    %c0_i32_0 = arith.constant 0 : i32
    return %arg0, %c0_i32 : i32, i32
  }
  func.func @transform_4(%arg0: i32) -> (i32, i32) {
    %c0_i32 = arith.constant 0 : i32
    %c0_i32_0 = arith.constant 0 : i32
    return %arg0, %c0_i32 : i32, i32
  }
}

module attributes {stable_mosaic.version = 11 : i64} {
  func.func @_mm_bias_kernel(%arg0: i32, %arg1: memref<16x128xbf16, #tpu.memory_space<vmem>>, %arg2: memref<128x128xbf16, #tpu.memory_space<vmem>>, %arg3: memref<1x128xf32, #tpu.memory_space<vmem>>, %arg4: memref<16x128xbf16, #tpu.memory_space<vmem>>) attributes {dimension_semantics = [#tpu.dimension_semantics<parallel>], iteration_bounds = array<i64: 2>, scalar_prefetch = 0 : i64, scratch_operands = 0 : i64, tpu.core_type = #tpu.core_type<tc>, window_params = [{transform_indices = @transform_0, window_bounds = array<i64: 16, 128>}, {pipeline_mode = #tpu.pipeline_mode<synchronous>, transform_indices = @transform_1, window_bounds = array<i64: 128, 128>}, {pipeline_mode = #tpu.pipeline_mode<synchronous>, transform_indices = @transform_2, window_bounds = array<i64: 1, 128>}, {transform_indices = @transform_3, window_bounds = array<i64: 16, 128>}]} {
    %c0 = arith.constant 0 : index
    %c0_0 = arith.constant 0 : index
    %0 = vector.load %arg1[%c0, %c0_0] : memref<16x128xbf16, #tpu.memory_space<vmem>>, vector<16x128xbf16>
    %c0_1 = arith.constant 0 : index
    %c0_2 = arith.constant 0 : index
    %1 = vector.load %arg2[%c0_1, %c0_2] : memref<128x128xbf16, #tpu.memory_space<vmem>>, vector<128x128xbf16>
    %cst = arith.constant dense<0.000000e+00> : vector<16x128xf32>
    %2 = tpu.matmul %0, %1, %cst {dimension_numbers = #tpu.dot_dimension_numbers<[1], [0], [0], [1], [0, 0, 1, 1], [], []>} : vector<16x128xbf16>, vector<128x128xbf16>, vector<16x128xf32> -> vector<16x128xf32>
    %c0_3 = arith.constant 0 : index
    %c0_4 = arith.constant 0 : index
    %3 = vector.load %arg3[%c0_3, %c0_4] : memref<1x128xf32, #tpu.memory_space<vmem>>, vector<1x128xf32>
    %4 = vector.broadcast %3 : vector<1x128xf32> to vector<16x128xf32>
    %5 = arith.addf %2, %4 : vector<16x128xf32>
    %cst_5 = arith.constant 0.000000e+00 : f32
    %6 = vector.broadcast %cst_5 : f32 to vector<16x128xf32>
    %7 = arith.maximumf %5, %6 : vector<16x128xf32>
    %8 = arith.truncf %7 : vector<16x128xf32> to vector<16x128xbf16>
    %c0_6 = arith.constant 0 : index
    %c0_7 = arith.constant 0 : index
    %9 = vector.load %arg4[%c0_6, %c0_7] : memref<16x128xbf16, #tpu.memory_space<vmem>>, vector<16x128xbf16>
    tpu.vector_store %arg4[%c0_6, %c0_7], %8 {strides = array<i32>} : memref<16x128xbf16, #tpu.memory_space<vmem>>, vector<16x128xbf16>,
    return
  }
  func.func @transform_0(%arg0: i32) -> (i32, i32) {
    %c0_i32 = arith.constant 0 : i32
    %c0_i32_0 = arith.constant 0 : i32
    return %arg0, %c0_i32 : i32, i32
  }
  func.func @transform_1(%arg0: i32) -> (i32, i32) {
    %c0_i32 = arith.constant 0 : i32
    %c0_i32_0 = arith.constant 0 : i32
    %c0_i32_1 = arith.constant 0 : i32
    return %c0_i32, %c0_i32_0 : i32, i32
  }
  func.func @transform_2(%arg0: i32) -> (i32, i32) {
    %c0_i32 = arith.constant 0 : i32
    %c0_i32_0 = arith.constant 0 : i32
    %c0_i32_1 = arith.constant 0 : i32
    return %c0_i32, %c0_i32_0 : i32, i32
  }
  func.func @transform_3(%arg0: i32) -> (i32, i32) {
    %c0_i32 = arith.constant 0 : i32
    %c0_i32_0 = arith.constant 0 : i32
    return %arg0, %c0_i32 : i32, i32
  }
}

module attributes {stable_mosaic.version = 11 : i64} {
  func.func @_mm_kernel(%arg0: i32, %arg1: memref<16x128xbf16, #tpu.memory_space<vmem>>, %arg2: memref<128x128xbf16, #tpu.memory_space<vmem>>, %arg3: memref<16x128xf32, #tpu.memory_space<vmem>>) attributes {dimension_semantics = [#tpu.dimension_semantics<parallel>], iteration_bounds = array<i64: 2>, scalar_prefetch = 0 : i64, scratch_operands = 0 : i64, tpu.core_type = #tpu.core_type<tc>, window_params = [{transform_indices = @transform_0, window_bounds = array<i64: 16, 128>}, {pipeline_mode = #tpu.pipeline_mode<synchronous>, transform_indices = @transform_1, window_bounds = array<i64: 128, 128>}, {transform_indices = @transform_2, window_bounds = array<i64: 16, 128>}]} {
    %c0 = arith.constant 0 : index
    %c0_0 = arith.constant 0 : index
    %0 = vector.load %arg1[%c0, %c0_0] : memref<16x128xbf16, #tpu.memory_space<vmem>>, vector<16x128xbf16>
    %c0_1 = arith.constant 0 : index
    %c0_2 = arith.constant 0 : index
    %1 = vector.load %arg2[%c0_1, %c0_2] : memref<128x128xbf16, #tpu.memory_space<vmem>>, vector<128x128xbf16>
    %cst = arith.constant dense<0.000000e+00> : vector<16x128xf32>
    %2 = tpu.matmul %0, %1, %cst {dimension_numbers = #tpu.dot_dimension_numbers<[1], [0], [0], [1], [0, 0, 1, 1], [], []>} : vector<16x128xbf16>, vector<128x128xbf16>, vector<16x128xf32> -> vector<16x128xf32>
    %c0_3 = arith.constant 0 : index
    %c0_4 = arith.constant 0 : index
    %3 = vector.load %arg3[%c0_3, %c0_4] : memref<16x128xf32, #tpu.memory_space<vmem>>, vector<16x128xf32>
    tpu.vector_store %arg3[%c0_3, %c0_4], %2 {strides = array<i32>} : memref<16x128xf32, #tpu.memory_space<vmem>>, vector<16x128xf32>,
    return
  }
  func.func @transform_0(%arg0: i32) -> (i32, i32) {
    %c0_i32 = arith.constant 0 : i32
    %c0_i32_0 = arith.constant 0 : i32
    return %arg0, %c0_i32 : i32, i32
  }
  func.func @transform_1(%arg0: i32) -> (i32, i32) {
    %c0_i32 = arith.constant 0 : i32
    %c0_i32_0 = arith.constant 0 : i32
    %c0_i32_1 = arith.constant 0 : i32
    return %c0_i32, %c0_i32_0 : i32, i32
  }
  func.func @transform_2(%arg0: i32) -> (i32, i32) {
    %c0_i32 = arith.constant 0 : i32
    %c0_i32_0 = arith.constant 0 : i32
    return %arg0, %c0_i32 : i32, i32
  }
}

module attributes {stable_mosaic.version = 11 : i64} {
  func.func @_conv3x3_s1_kernel(%arg0: i32, %arg1: memref<1x4x4x128xbf16, #tpu.memory_space<vmem>>, %arg2: memref<9x128x128xbf16, #tpu.memory_space<vmem>>, %arg3: memref<1x128xf32, #tpu.memory_space<vmem>>, %arg4: memref<1x4x4x128xbf16, #tpu.memory_space<vmem>>, %arg5: memref<6x10x128xbf16, #tpu.memory_space<vmem>>) attributes {dimension_semantics = [#tpu.dimension_semantics<parallel>], iteration_bounds = array<i64: 2>, scalar_prefetch = 0 : i64, scratch_operands = 1 : i64, tpu.core_type = #tpu.core_type<tc>, window_params = [{transform_indices = @transform_0, window_bounds = array<i64: 1, 4, 4, 128>}, {pipeline_mode = #tpu.pipeline_mode<synchronous>, transform_indices = @transform_1, window_bounds = array<i64: 9, 128, 128>}, {pipeline_mode = #tpu.pipeline_mode<synchronous>, transform_indices = @transform_2, window_bounds = array<i64: 1, 128>}, {transform_indices = @transform_3, window_bounds = array<i64: 1, 4, 4, 128>}]} {
    %cst = arith.constant 0.000000e+00 : bf16
    %0 = vector.broadcast %cst : bf16 to vector<6x10x128xbf16>
    %c0 = arith.constant 0 : index
    %c0_0 = arith.constant 0 : index
    %c0_1 = arith.constant 0 : index
    %1 = vector.load %arg5[%c0, %c0_0, %c0_1] : memref<6x10x128xbf16, #tpu.memory_space<vmem>>, vector<6x10x128xbf16>
    tpu.vector_store %arg5[%c0, %c0_0, %c0_1], %0 {strides = array<i32>} : memref<6x10x128xbf16, #tpu.memory_space<vmem>>, vector<6x10x128xbf16>,
    %c0_2 = arith.constant 0 : index
    %c0_3 = arith.constant 0 : index
    %c0_4 = arith.constant 0 : index
    %c0_5 = arith.constant 0 : index
    %2 = vector.load %arg1[%c0_2, %c0_3, %c0_4, %c0_5] : memref<1x4x4x128xbf16, #tpu.memory_space<vmem>>, vector<1x4x4x128xbf16>
    %3 = vector.shape_cast %2 : vector<1x4x4x128xbf16> to vector<4x4x128xbf16>
    %c1 = arith.constant 1 : index
    %c1_6 = arith.constant 1 : index
    %c0_7 = arith.constant 0 : index
    %4 = vector.load %arg5[%c1, %c1_6, %c0_7] : memref<6x10x128xbf16, #tpu.memory_space<vmem>>, vector<4x4x128xbf16>
    tpu.vector_store %arg5[%c1, %c1_6, %c0_7], %3 {strides = array<i32>} : memref<6x10x128xbf16, #tpu.memory_space<vmem>>, vector<4x4x128xbf16>,
    %cst_8 = arith.constant 0.000000e+00 : f32
    %5 = vector.broadcast %cst_8 : f32 to vector<32x128xf32>
    %c0_9 = arith.constant 0 : index
    %c0_10 = arith.constant 0 : index
    %c0_11 = arith.constant 0 : index
    %6 = vector.load %arg5[%c0_9, %c0_10, %c0_11] : memref<6x10x128xbf16, #tpu.memory_space<vmem>>, vector<4x10x128xbf16>
    %7 = vector.extract_strided_slice %6 {offsets = [0, 0, 0], sizes = [4, 8, 128], strides = [1, 1, 1]} : vector<4x10x128xbf16> to vector<4x8x128xbf16>
    %8 = vector.shape_cast %7 : vector<4x8x128xbf16> to vector<32x128xbf16>
    %c0_12 = arith.constant 0 : index
    %c0_13 = arith.constant 0 : index
    %c0_14 = arith.constant 0 : index
    %9 = vector.load %arg2[%c0_12, %c0_13, %c0_14] : memref<9x128x128xbf16, #tpu.memory_space<vmem>>, vector<1x128x128xbf16>
    %10 = vector.shape_cast %9 : vector<1x128x128xbf16> to vector<128x128xbf16>
    %cst_15 = arith.constant dense<0.000000e+00> : vector<32x128xf32>
    %11 = tpu.matmul %8, %10, %cst_15 {dimension_numbers = #tpu.dot_dimension_numbers<[1], [0], [0], [1], [0, 0, 1, 1], [], []>} : vector<32x128xbf16>, vector<128x128xbf16>, vector<32x128xf32> -> vector<32x128xf32>
    %12 = arith.addf %5, %11 : vector<32x128xf32>
    %13 = vector.extract_strided_slice %6 {offsets = [0, 1, 0], sizes = [4, 8, 128], strides = [1, 1, 1]} : vector<4x10x128xbf16> to vector<4x8x128xbf16>
    %14 = vector.shape_cast %13 : vector<4x8x128xbf16> to vector<32x128xbf16>
    %c1_16 = arith.constant 1 : index
    %c0_17 = arith.constant 0 : index
    %c0_18 = arith.constant 0 : index
    %15 = vector.load %arg2[%c1_16, %c0_17, %c0_18] : memref<9x128x128xbf16, #tpu.memory_space<vmem>>, vector<1x128x128xbf16>
    %16 = vector.shape_cast %15 : vector<1x128x128xbf16> to vector<128x128xbf16>
    %cst_19 = arith.constant dense<0.000000e+00> : vector<32x128xf32>
    %17 = tpu.matmul %14, %16, %cst_19 {dimension_numbers = #tpu.dot_dimension_numbers<[1], [0], [0], [1], [0, 0, 1, 1], [], []>} : vector<32x128xbf16>, vector<128x128xbf16>, vector<32x128xf32> -> vector<32x128xf32>
    %18 = arith.addf %12, %17 : vector<32x128xf32>
    %19 = vector.extract_strided_slice %6 {offsets = [0, 2, 0], sizes = [4, 8, 128], strides = [1, 1, 1]} : vector<4x10x128xbf16> to vector<4x8x128xbf16>
    %20 = vector.shape_cast %19 : vector<4x8x128xbf16> to vector<32x128xbf16>
    %c2 = arith.constant 2 : index
    %c0_20 = arith.constant 0 : index
    %c0_21 = arith.constant 0 : index
    %21 = vector.load %arg2[%c2, %c0_20, %c0_21] : memref<9x128x128xbf16, #tpu.memory_space<vmem>>, vector<1x128x128xbf16>
    %22 = vector.shape_cast %21 : vector<1x128x128xbf16> to vector<128x128xbf16>
    %cst_22 = arith.constant dense<0.000000e+00> : vector<32x128xf32>
    %23 = tpu.matmul %20, %22, %cst_22 {dimension_numbers = #tpu.dot_dimension_numbers<[1], [0], [0], [1], [0, 0, 1, 1], [], []>} : vector<32x128xbf16>, vector<128x128xbf16>, vector<32x128xf32> -> vector<32x128xf32>
    %24 = arith.addf %18, %23 : vector<32x128xf32>
    %c1_23 = arith.constant 1 : index
    %c0_24 = arith.constant 0 : index
    %c0_25 = arith.constant 0 : index
    %25 = vector.load %arg5[%c1_23, %c0_24, %c0_25] : memref<6x10x128xbf16, #tpu.memory_space<vmem>>, vector<4x10x128xbf16>
    %26 = vector.extract_strided_slice %25 {offsets = [0, 0, 0], sizes = [4, 8, 128], strides = [1, 1, 1]} : vector<4x10x128xbf16> to vector<4x8x128xbf16>
    %27 = vector.shape_cast %26 : vector<4x8x128xbf16> to vector<32x128xbf16>
    %c3 = arith.constant 3 : index
    %c0_26 = arith.constant 0 : index
    %c0_27 = arith.constant 0 : index
    %28 = vector.load %arg2[%c3, %c0_26, %c0_27] : memref<9x128x128xbf16, #tpu.memory_space<vmem>>, vector<1x128x128xbf16>
    %29 = vector.shape_cast %28 : vector<1x128x128xbf16> to vector<128x128xbf16>
    %cst_28 = arith.constant dense<0.000000e+00> : vector<32x128xf32>
    %30 = tpu.matmul %27, %29, %cst_28 {dimension_numbers = #tpu.dot_dimension_numbers<[1], [0], [0], [1], [0, 0, 1, 1], [], []>} : vector<32x128xbf16>, vector<128x128xbf16>, vector<32x128xf32> -> vector<32x128xf32>
    %31 = arith.addf %24, %30 : vector<32x128xf32>
    %32 = vector.extract_strided_slice %25 {offsets = [0, 1, 0], sizes = [4, 8, 128], strides = [1, 1, 1]} : vector<4x10x128xbf16> to vector<4x8x128xbf16>
    %33 = vector.shape_cast %32 : vector<4x8x128xbf16> to vector<32x128xbf16>
    %c4 = arith.constant 4 : index
    %c0_29 = arith.constant 0 : index
    %c0_30 = arith.constant 0 : index
    %34 = vector.load %arg2[%c4, %c0_29, %c0_30] : memref<9x128x128xbf16, #tpu.memory_space<vmem>>, vector<1x128x128xbf16>
    %35 = vector.shape_cast %34 : vector<1x128x128xbf16> to vector<128x128xbf16>
    %cst_31 = arith.constant dense<0.000000e+00> : vector<32x128xf32>
    %36 = tpu.matmul %33, %35, %cst_31 {dimension_numbers = #tpu.dot_dimension_numbers<[1], [0], [0], [1], [0, 0, 1, 1], [], []>} : vector<32x128xbf16>, vector<128x128xbf16>, vector<32x128xf32> -> vector<32x128xf32>
    %37 = arith.addf %31, %36 : vector<32x128xf32>
    %38 = vector.extract_strided_slice %25 {offsets = [0, 2, 0], sizes = [4, 8, 128], strides = [1, 1, 1]} : vector<4x10x128xbf16> to vector<4x8x128xbf16>
    %39 = vector.shape_cast %38 : vector<4x8x128xbf16> to vector<32x128xbf16>
    %c5 = arith.constant 5 : index
    %c0_32 = arith.constant 0 : index
    %c0_33 = arith.constant 0 : index
    %40 = vector.load %arg2[%c5, %c0_32, %c0_33] : memref<9x128x128xbf16, #tpu.memory_space<vmem>>, vector<1x128x128xbf16>
    %41 = vector.shape_cast %40 : vector<1x128x128xbf16> to vector<128x128xbf16>
    %cst_34 = arith.constant dense<0.000000e+00> : vector<32x128xf32>
    %42 = tpu.matmul %39, %41, %cst_34 {dimension_numbers = #tpu.dot_dimension_numbers<[1], [0], [0], [1], [0, 0, 1, 1], [], []>} : vector<32x128xbf16>, vector<128x128xbf16>, vector<32x128xf32> -> vector<32x128xf32>
    %43 = arith.addf %37, %42 : vector<32x128xf32>
    %c2_35 = arith.constant 2 : index
    %c0_36 = arith.constant 0 : index
    %c0_37 = arith.constant 0 : index
    %44 = vector.load %arg5[%c2_35, %c0_36, %c0_37] : memref<6x10x128xbf16, #tpu.memory_space<vmem>>, vector<4x10x128xbf16>
    %45 = vector.extract_strided_slice %44 {offsets = [0, 0, 0], sizes = [4, 8, 128], strides = [1, 1, 1]} : vector<4x10x128xbf16> to vector<4x8x128xbf16>
    %46 = vector.shape_cast %45 : vector<4x8x128xbf16> to vector<32x128xbf16>
    %c6 = arith.constant 6 : index
    %c0_38 = arith.constant 0 : index
    %c0_39 = arith.constant 0 : index
    %47 = vector.load %arg2[%c6, %c0_38, %c0_39] : memref<9x128x128xbf16, #tpu.memory_space<vmem>>, vector<1x128x128xbf16>
    %48 = vector.shape_cast %47 : vector<1x128x128xbf16> to vector<128x128xbf16>
    %cst_40 = arith.constant dense<0.000000e+00> : vector<32x128xf32>
    %49 = tpu.matmul %46, %48, %cst_40 {dimension_numbers = #tpu.dot_dimension_numbers<[1], [0], [0], [1], [0, 0, 1, 1], [], []>} : vector<32x128xbf16>, vector<128x128xbf16>, vector<32x128xf32> -> vector<32x128xf32>
    %50 = arith.addf %43, %49 : vector<32x128xf32>
    %51 = vector.extract_strided_slice %44 {offsets = [0, 1, 0], sizes = [4, 8, 128], strides = [1, 1, 1]} : vector<4x10x128xbf16> to vector<4x8x128xbf16>
    %52 = vector.shape_cast %51 : vector<4x8x128xbf16> to vector<32x128xbf16>
    %c7 = arith.constant 7 : index
    %c0_41 = arith.constant 0 : index
    %c0_42 = arith.constant 0 : index
    %53 = vector.load %arg2[%c7, %c0_41, %c0_42] : memref<9x128x128xbf16, #tpu.memory_space<vmem>>, vector<1x128x128xbf16>
    %54 = vector.shape_cast %53 : vector<1x128x128xbf16> to vector<128x128xbf16>
    %cst_43 = arith.constant dense<0.000000e+00> : vector<32x128xf32>
    %55 = tpu.matmul %52, %54, %cst_43 {dimension_numbers = #tpu.dot_dimension_numbers<[1], [0], [0], [1], [0, 0, 1, 1], [], []>} : vector<32x128xbf16>, vector<128x128xbf16>, vector<32x128xf32> -> vector<32x128xf32>
    %56 = arith.addf %50, %55 : vector<32x128xf32>
    %57 = vector.extract_strided_slice %44 {offsets = [0, 2, 0], sizes = [4, 8, 128], strides = [1, 1, 1]} : vector<4x10x128xbf16> to vector<4x8x128xbf16>
    %58 = vector.shape_cast %57 : vector<4x8x128xbf16> to vector<32x128xbf16>
    %c8 = arith.constant 8 : index
    %c0_44 = arith.constant 0 : index
    %c0_45 = arith.constant 0 : index
    %59 = vector.load %arg2[%c8, %c0_44, %c0_45] : memref<9x128x128xbf16, #tpu.memory_space<vmem>>, vector<1x128x128xbf16>
    %60 = vector.shape_cast %59 : vector<1x128x128xbf16> to vector<128x128xbf16>
    %cst_46 = arith.constant dense<0.000000e+00> : vector<32x128xf32>
    %61 = tpu.matmul %58, %60, %cst_46 {dimension_numbers = #tpu.dot_dimension_numbers<[1], [0], [0], [1], [0, 0, 1, 1], [], []>} : vector<32x128xbf16>, vector<128x128xbf16>, vector<32x128xf32> -> vector<32x128xf32>
    %62 = arith.addf %56, %61 : vector<32x128xf32>
    %63 = vector.shape_cast %62 : vector<32x128xf32> to vector<4x8x128xf32>
    %c0_47 = arith.constant 0 : index
    %c0_48 = arith.constant 0 : index
    %64 = vector.load %arg3[%c0_47, %c0_48] : memref<1x128xf32, #tpu.memory_space<vmem>>, vector<1x128xf32>
    %65 = vector.shape_cast %64 : vector<1x128xf32> to vector<128xf32>
    %66 = vector.shape_cast %65 : vector<128xf32> to vector<1x1x128xf32>
    %67 = vector.broadcast %66 : vector<1x1x128xf32> to vector<4x8x128xf32>
    %68 = arith.addf %63, %67 : vector<4x8x128xf32>
    %cst_49 = arith.constant 0.000000e+00 : f32
    %69 = vector.broadcast %cst_49 : f32 to vector<4x8x128xf32>
    %70 = arith.maximumf %68, %69 : vector<4x8x128xf32>
    %71 = vector.extract_strided_slice %70 {offsets = [0, 0, 0], sizes = [4, 4, 128], strides = [1, 1, 1]} : vector<4x8x128xf32> to vector<4x4x128xf32>
    %72 = arith.truncf %71 : vector<4x4x128xf32> to vector<4x4x128xbf16>
    %c0_50 = arith.constant 0 : index
    %c0_51 = arith.constant 0 : index
    %c0_52 = arith.constant 0 : index
    %c0_53 = arith.constant 0 : index
    %73 = vector.load %arg4[%c0_50, %c0_51, %c0_52, %c0_53] : memref<1x4x4x128xbf16, #tpu.memory_space<vmem>>, vector<1x4x4x128xbf16>
    %74 = vector.shape_cast %73 : vector<1x4x4x128xbf16> to vector<4x4x128xbf16>
    %75 = vector.shape_cast %72 : vector<4x4x128xbf16> to vector<1x4x4x128xbf16>
    tpu.vector_store %arg4[%c0_50, %c0_51, %c0_52, %c0_53], %75 {strides = array<i32>} : memref<1x4x4x128xbf16, #tpu.memory_space<vmem>>, vector<1x4x4x128xbf16>,
    return
  }
  func.func @transform_0(%arg0: i32) -> (i32, i32, i32, i32) {
    %c0_i32 = arith.constant 0 : i32
    %c0_i32_0 = arith.constant 0 : i32
    %c0_i32_1 = arith.constant 0 : i32
    %c0_i32_2 = arith.constant 0 : i32
    return %arg0, %c0_i32, %c0_i32_0, %c0_i32_1 : i32, i32, i32, i32
  }
  func.func @transform_1(%arg0: i32) -> (i32, i32, i32) {
    %c0_i32 = arith.constant 0 : i32
    %c0_i32_0 = arith.constant 0 : i32
    %c0_i32_1 = arith.constant 0 : i32
    %c0_i32_2 = arith.constant 0 : i32
    return %c0_i32, %c0_i32_0, %c0_i32_1 : i32, i32, i32
  }
  func.func @transform_2(%arg0: i32) -> (i32, i32) {
    %c0_i32 = arith.constant 0 : i32
    %c0_i32_0 = arith.constant 0 : i32
    %c0_i32_1 = arith.constant 0 : i32
    return %c0_i32, %c0_i32_0 : i32, i32
  }
  func.func @transform_3(%arg0: i32) -> (i32, i32, i32, i32) {
    %c0_i32 = arith.constant 0 : i32
    %c0_i32_0 = arith.constant 0 : i32
    %c0_i32_1 = arith.constant 0 : i32
    %c0_i32_2 = arith.constant 0 : i32
    return %arg0, %c0_i32, %c0_i32_0, %c0_i32_1 : i32, i32, i32, i32
  }
}

module attributes {stable_mosaic.version = 11 : i64} {
  func.func @_mm_bias_kernel(%arg0: i32, %arg1: memref<8x128xbf16, #tpu.memory_space<vmem>>, %arg2: memref<128x128xbf16, #tpu.memory_space<vmem>>, %arg3: memref<1x128xf32, #tpu.memory_space<vmem>>, %arg4: memref<8x128xbf16, #tpu.memory_space<vmem>>) attributes {dimension_semantics = [#tpu.dimension_semantics<parallel>], iteration_bounds = array<i64: 1>, scalar_prefetch = 0 : i64, scratch_operands = 0 : i64, tpu.core_type = #tpu.core_type<tc>, window_params = [{transform_indices = @transform_0, window_bounds = array<i64: 8, 128>}, {pipeline_mode = #tpu.pipeline_mode<synchronous>, transform_indices = @transform_1, window_bounds = array<i64: 128, 128>}, {pipeline_mode = #tpu.pipeline_mode<synchronous>, transform_indices = @transform_2, window_bounds = array<i64: 1, 128>}, {transform_indices = @transform_3, window_bounds = array<i64: 8, 128>}]} {
    %c0 = arith.constant 0 : index
    %c0_0 = arith.constant 0 : index
    %0 = vector.load %arg1[%c0, %c0_0] : memref<8x128xbf16, #tpu.memory_space<vmem>>, vector<8x128xbf16>
    %c0_1 = arith.constant 0 : index
    %c0_2 = arith.constant 0 : index
    %1 = vector.load %arg2[%c0_1, %c0_2] : memref<128x128xbf16, #tpu.memory_space<vmem>>, vector<128x128xbf16>
    %cst = arith.constant dense<0.000000e+00> : vector<8x128xf32>
    %2 = tpu.matmul %0, %1, %cst {dimension_numbers = #tpu.dot_dimension_numbers<[1], [0], [0], [1], [0, 0, 1, 1], [], []>} : vector<8x128xbf16>, vector<128x128xbf16>, vector<8x128xf32> -> vector<8x128xf32>
    %c0_3 = arith.constant 0 : index
    %c0_4 = arith.constant 0 : index
    %3 = vector.load %arg3[%c0_3, %c0_4] : memref<1x128xf32, #tpu.memory_space<vmem>>, vector<1x128xf32>
    %4 = vector.broadcast %3 : vector<1x128xf32> to vector<8x128xf32>
    %5 = arith.addf %2, %4 : vector<8x128xf32>
    %6 = arith.truncf %5 : vector<8x128xf32> to vector<8x128xbf16>
    %c0_5 = arith.constant 0 : index
    %c0_6 = arith.constant 0 : index
    %7 = vector.load %arg4[%c0_5, %c0_6] : memref<8x128xbf16, #tpu.memory_space<vmem>>, vector<8x128xbf16>
    tpu.vector_store %arg4[%c0_5, %c0_6], %6 {strides = array<i32>} : memref<8x128xbf16, #tpu.memory_space<vmem>>, vector<8x128xbf16>,
    return
  }
  func.func @transform_0(%arg0: i32) -> (i32, i32) {
    %c0_i32 = arith.constant 0 : i32
    %c0_i32_0 = arith.constant 0 : i32
    return %arg0, %c0_i32 : i32, i32
  }
  func.func @transform_1(%arg0: i32) -> (i32, i32) {
    %c0_i32 = arith.constant 0 : i32
    %c0_i32_0 = arith.constant 0 : i32
    %c0_i32_1 = arith.constant 0 : i32
    return %c0_i32, %c0_i32_0 : i32, i32
  }
  func.func @transform_2(%arg0: i32) -> (i32, i32) {
    %c0_i32 = arith.constant 0 : i32
    %c0_i32_0 = arith.constant 0 : i32
    %c0_i32_1 = arith.constant 0 : i32
    return %c0_i32, %c0_i32_0 : i32, i32
  }
  func.func @transform_3(%arg0: i32) -> (i32, i32) {
    %c0_i32 = arith.constant 0 : i32
    %c0_i32_0 = arith.constant 0 : i32
    return %arg0, %c0_i32 : i32, i32
  }
}

module attributes {stable_mosaic.version = 11 : i64} {
  func.func @_direct_conv_kernel(%arg0: i32, %arg1: i32, %arg2: memref<1x12x9x128xbf16, #tpu.memory_space<vmem>>, %arg3: memref<9x128x128xbf16, #tpu.memory_space<vmem>>, %arg4: memref<1x128xf32, #tpu.memory_space<vmem>>, %arg5: memref<1x2x8x128xbf16, #tpu.memory_space<vmem>>) attributes {dimension_semantics = [#tpu.dimension_semantics<parallel>, #tpu.dimension_semantics<parallel>], iteration_bounds = array<i64: 2, 1>, scalar_prefetch = 0 : i64, scratch_operands = 0 : i64, tpu.core_type = #tpu.core_type<tc>, window_params = [{transform_indices = @transform_0, window_bounds = array<i64: 1, 12, 9, 128>}, {pipeline_mode = #tpu.pipeline_mode<synchronous>, transform_indices = @transform_1, window_bounds = array<i64: 9, 128, 128>}, {pipeline_mode = #tpu.pipeline_mode<synchronous>, transform_indices = @transform_2, window_bounds = array<i64: 1, 128>}, {transform_indices = @transform_3, window_bounds = array<i64: 1, 2, 8, 128>}]} {
    %c2_i32 = arith.constant 2 : i32
    %0 = arith.muli %arg1, %c2_i32 : i32
    %cst = arith.constant 0.000000e+00 : f32
    %1 = vector.broadcast %cst : f32 to vector<16x128xf32>
    %c0_i32 = arith.constant 0 : i32
    %2 = arith.addi %c0_i32, %0 : i32
    %c0 = arith.constant 0 : index
    %3 = arith.index_cast %2 : i32 to index
    %c0_0 = arith.constant 0 : index
    %c0_1 = arith.constant 0 : index
    %4 = vector.load %arg2[%c0, %3, %c0_0, %c0_1] : memref<1x12x9x128xbf16, #tpu.memory_space<vmem>>, vector<1x2x9x128xbf16>
    %5 = vector.shape_cast %4 : vector<1x2x9x128xbf16> to vector<2x9x128xbf16>
    %6 = vector.extract_strided_slice %5 {offsets = [0, 0, 0], sizes = [2, 8, 128], strides = [1, 1, 1]} : vector<2x9x128xbf16> to vector<2x8x128xbf16>
    %7 = vector.shape_cast %6 : vector<2x8x128xbf16> to vector<16x128xbf16>
    %c0_2 = arith.constant 0 : index
    %c0_3 = arith.constant 0 : index
    %c0_4 = arith.constant 0 : index
    %8 = vector.load %arg3[%c0_2, %c0_3, %c0_4] : memref<9x128x128xbf16, #tpu.memory_space<vmem>>, vector<1x128x128xbf16>
    %9 = vector.shape_cast %8 : vector<1x128x128xbf16> to vector<128x128xbf16>
    %cst_5 = arith.constant dense<0.000000e+00> : vector<16x128xf32>
    %10 = tpu.matmul %7, %9, %cst_5 {dimension_numbers = #tpu.dot_dimension_numbers<[1], [0], [0], [1], [0, 0, 1, 1], [], []>} : vector<16x128xbf16>, vector<128x128xbf16>, vector<16x128xf32> -> vector<16x128xf32>
    %11 = arith.addf %1, %10 : vector<16x128xf32>
    %12 = vector.extract_strided_slice %5 {offsets = [0, 1, 0], sizes = [2, 8, 128], strides = [1, 1, 1]} : vector<2x9x128xbf16> to vector<2x8x128xbf16>
    %13 = vector.shape_cast %12 : vector<2x8x128xbf16> to vector<16x128xbf16>
    %c2 = arith.constant 2 : index
    %c0_6 = arith.constant 0 : index
    %c0_7 = arith.constant 0 : index
    %14 = vector.load %arg3[%c2, %c0_6, %c0_7] : memref<9x128x128xbf16, #tpu.memory_space<vmem>>, vector<1x128x128xbf16>
    %15 = vector.shape_cast %14 : vector<1x128x128xbf16> to vector<128x128xbf16>
    %cst_8 = arith.constant dense<0.000000e+00> : vector<16x128xf32>
    %16 = tpu.matmul %13, %15, %cst_8 {dimension_numbers = #tpu.dot_dimension_numbers<[1], [0], [0], [1], [0, 0, 1, 1], [], []>} : vector<16x128xbf16>, vector<128x128xbf16>, vector<16x128xf32> -> vector<16x128xf32>
    %17 = arith.addf %11, %16 : vector<16x128xf32>
    %c3_i32 = arith.constant 3 : i32
    %18 = arith.addi %c3_i32, %0 : i32
    %c0_9 = arith.constant 0 : index
    %19 = arith.index_cast %18 : i32 to index
    %c0_10 = arith.constant 0 : index
    %c0_11 = arith.constant 0 : index
    %20 = vector.load %arg2[%c0_9, %19, %c0_10, %c0_11] : memref<1x12x9x128xbf16, #tpu.memory_space<vmem>>, vector<1x2x9x128xbf16>
    %21 = vector.shape_cast %20 : vector<1x2x9x128xbf16> to vector<2x9x128xbf16>
    %22 = vector.extract_strided_slice %21 {offsets = [0, 0, 0], sizes = [2, 8, 128], strides = [1, 1, 1]} : vector<2x9x128xbf16> to vector<2x8x128xbf16>
    %23 = vector.shape_cast %22 : vector<2x8x128xbf16> to vector<16x128xbf16>
    %c1 = arith.constant 1 : index
    %c0_12 = arith.constant 0 : index
    %c0_13 = arith.constant 0 : index
    %24 = vector.load %arg3[%c1, %c0_12, %c0_13] : memref<9x128x128xbf16, #tpu.memory_space<vmem>>, vector<1x128x128xbf16>
    %25 = vector.shape_cast %24 : vector<1x128x128xbf16> to vector<128x128xbf16>
    %cst_14 = arith.constant dense<0.000000e+00> : vector<16x128xf32>
    %26 = tpu.matmul %23, %25, %cst_14 {dimension_numbers = #tpu.dot_dimension_numbers<[1], [0], [0], [1], [0, 0, 1, 1], [], []>} : vector<16x128xbf16>, vector<128x128xbf16>, vector<16x128xf32> -> vector<16x128xf32>
    %27 = arith.addf %17, %26 : vector<16x128xf32>
    %c6_i32 = arith.constant 6 : i32
    %28 = arith.addi %c6_i32, %0 : i32
    %c0_15 = arith.constant 0 : index
    %29 = arith.index_cast %28 : i32 to index
    %c0_16 = arith.constant 0 : index
    %c0_17 = arith.constant 0 : index
    %30 = vector.load %arg2[%c0_15, %29, %c0_16, %c0_17] : memref<1x12x9x128xbf16, #tpu.memory_space<vmem>>, vector<1x2x9x128xbf16>
    %31 = vector.shape_cast %30 : vector<1x2x9x128xbf16> to vector<2x9x128xbf16>
    %32 = vector.extract_strided_slice %31 {offsets = [0, 0, 0], sizes = [2, 8, 128], strides = [1, 1, 1]} : vector<2x9x128xbf16> to vector<2x8x128xbf16>
    %33 = vector.shape_cast %32 : vector<2x8x128xbf16> to vector<16x128xbf16>
    %c3 = arith.constant 3 : index
    %c0_18 = arith.constant 0 : index
    %c0_19 = arith.constant 0 : index
    %34 = vector.load %arg3[%c3, %c0_18, %c0_19] : memref<9x128x128xbf16, #tpu.memory_space<vmem>>, vector<1x128x128xbf16>
    %35 = vector.shape_cast %34 : vector<1x128x128xbf16> to vector<128x128xbf16>
    %cst_20 = arith.constant dense<0.000000e+00> : vector<16x128xf32>
    %36 = tpu.matmul %33, %35, %cst_20 {dimension_numbers = #tpu.dot_dimension_numbers<[1], [0], [0], [1], [0, 0, 1, 1], [], []>} : vector<16x128xbf16>, vector<128x128xbf16>, vector<16x128xf32> -> vector<16x128xf32>
    %37 = arith.addf %27, %36 : vector<16x128xf32>
    %38 = vector.extract_strided_slice %31 {offsets = [0, 1, 0], sizes = [2, 8, 128], strides = [1, 1, 1]} : vector<2x9x128xbf16> to vector<2x8x128xbf16>
    %39 = vector.shape_cast %38 : vector<2x8x128xbf16> to vector<16x128xbf16>
    %c5 = arith.constant 5 : index
    %c0_21 = arith.constant 0 : index
    %c0_22 = arith.constant 0 : index
    %40 = vector.load %arg3[%c5, %c0_21, %c0_22] : memref<9x128x128xbf16, #tpu.memory_space<vmem>>, vector<1x128x128xbf16>
    %41 = vector.shape_cast %40 : vector<1x128x128xbf16> to vector<128x128xbf16>
    %cst_23 = arith.constant dense<0.000000e+00> : vector<16x128xf32>
    %42 = tpu.matmul %39, %41, %cst_23 {dimension_numbers = #tpu.dot_dimension_numbers<[1], [0], [0], [1], [0, 0, 1, 1], [], []>} : vector<16x128xbf16>, vector<128x128xbf16>, vector<16x128xf32> -> vector<16x128xf32>
    %43 = arith.addf %37, %42 : vector<16x128xf32>
    %c9_i32 = arith.constant 9 : i32
    %44 = arith.addi %c9_i32, %0 : i32
    %c0_24 = arith.constant 0 : index
    %45 = arith.index_cast %44 : i32 to index
    %c0_25 = arith.constant 0 : index
    %c0_26 = arith.constant 0 : index
    %46 = vector.load %arg2[%c0_24, %45, %c0_25, %c0_26] : memref<1x12x9x128xbf16, #tpu.memory_space<vmem>>, vector<1x2x9x128xbf16>
    %47 = vector.shape_cast %46 : vector<1x2x9x128xbf16> to vector<2x9x128xbf16>
    %48 = vector.extract_strided_slice %47 {offsets = [0, 0, 0], sizes = [2, 8, 128], strides = [1, 1, 1]} : vector<2x9x128xbf16> to vector<2x8x128xbf16>
    %49 = vector.shape_cast %48 : vector<2x8x128xbf16> to vector<16x128xbf16>
    %c4 = arith.constant 4 : index
    %c0_27 = arith.constant 0 : index
    %c0_28 = arith.constant 0 : index
    %50 = vector.load %arg3[%c4, %c0_27, %c0_28] : memref<9x128x128xbf16, #tpu.memory_space<vmem>>, vector<1x128x128xbf16>
    %51 = vector.shape_cast %50 : vector<1x128x128xbf16> to vector<128x128xbf16>
    %cst_29 = arith.constant dense<0.000000e+00> : vector<16x128xf32>
    %52 = tpu.matmul %49, %51, %cst_29 {dimension_numbers = #tpu.dot_dimension_numbers<[1], [0], [0], [1], [0, 0, 1, 1], [], []>} : vector<16x128xbf16>, vector<128x128xbf16>, vector<16x128xf32> -> vector<16x128xf32>
    %53 = arith.addf %43, %52 : vector<16x128xf32>
    %c1_i32 = arith.constant 1 : i32
    %54 = arith.addi %c1_i32, %0 : i32
    %c0_30 = arith.constant 0 : index
    %55 = arith.index_cast %54 : i32 to index
    %c0_31 = arith.constant 0 : index
    %c0_32 = arith.constant 0 : index
    %56 = vector.load %arg2[%c0_30, %55, %c0_31, %c0_32] : memref<1x12x9x128xbf16, #tpu.memory_space<vmem>>, vector<1x2x9x128xbf16>
    %57 = vector.shape_cast %56 : vector<1x2x9x128xbf16> to vector<2x9x128xbf16>
    %58 = vector.extract_strided_slice %57 {offsets = [0, 0, 0], sizes = [2, 8, 128], strides = [1, 1, 1]} : vector<2x9x128xbf16> to vector<2x8x128xbf16>
    %59 = vector.shape_cast %58 : vector<2x8x128xbf16> to vector<16x128xbf16>
    %c6 = arith.constant 6 : index
    %c0_33 = arith.constant 0 : index
    %c0_34 = arith.constant 0 : index
    %60 = vector.load %arg3[%c6, %c0_33, %c0_34] : memref<9x128x128xbf16, #tpu.memory_space<vmem>>, vector<1x128x128xbf16>
    %61 = vector.shape_cast %60 : vector<1x128x128xbf16> to vector<128x128xbf16>
    %cst_35 = arith.constant dense<0.000000e+00> : vector<16x128xf32>
    %62 = tpu.matmul %59, %61, %cst_35 {dimension_numbers = #tpu.dot_dimension_numbers<[1], [0], [0], [1], [0, 0, 1, 1], [], []>} : vector<16x128xbf16>, vector<128x128xbf16>, vector<16x128xf32> -> vector<16x128xf32>
    %63 = arith.addf %53, %62 : vector<16x128xf32>
    %64 = vector.extract_strided_slice %57 {offsets = [0, 1, 0], sizes = [2, 8, 128], strides = [1, 1, 1]} : vector<2x9x128xbf16> to vector<2x8x128xbf16>
    %65 = vector.shape_cast %64 : vector<2x8x128xbf16> to vector<16x128xbf16>
    %c8 = arith.constant 8 : index
    %c0_36 = arith.constant 0 : index
    %c0_37 = arith.constant 0 : index
    %66 = vector.load %arg3[%c8, %c0_36, %c0_37] : memref<9x128x128xbf16, #tpu.memory_space<vmem>>, vector<1x128x128xbf16>
    %67 = vector.shape_cast %66 : vector<1x128x128xbf16> to vector<128x128xbf16>
    %cst_38 = arith.constant dense<0.000000e+00> : vector<16x128xf32>
    %68 = tpu.matmul %65, %67, %cst_38 {dimension_numbers = #tpu.dot_dimension_numbers<[1], [0], [0], [1], [0, 0, 1, 1], [], []>} : vector<16x128xbf16>, vector<128x128xbf16>, vector<16x128xf32> -> vector<16x128xf32>
    %69 = arith.addf %63, %68 : vector<16x128xf32>
    %c4_i32 = arith.constant 4 : i32
    %70 = arith.addi %c4_i32, %0 : i32
    %c0_39 = arith.constant 0 : index
    %71 = arith.index_cast %70 : i32 to index
    %c0_40 = arith.constant 0 : index
    %c0_41 = arith.constant 0 : index
    %72 = vector.load %arg2[%c0_39, %71, %c0_40, %c0_41] : memref<1x12x9x128xbf16, #tpu.memory_space<vmem>>, vector<1x2x9x128xbf16>
    %73 = vector.shape_cast %72 : vector<1x2x9x128xbf16> to vector<2x9x128xbf16>
    %74 = vector.extract_strided_slice %73 {offsets = [0, 0, 0], sizes = [2, 8, 128], strides = [1, 1, 1]} : vector<2x9x128xbf16> to vector<2x8x128xbf16>
    %75 = vector.shape_cast %74 : vector<2x8x128xbf16> to vector<16x128xbf16>
    %c7 = arith.constant 7 : index
    %c0_42 = arith.constant 0 : index
    %c0_43 = arith.constant 0 : index
    %76 = vector.load %arg3[%c7, %c0_42, %c0_43] : memref<9x128x128xbf16, #tpu.memory_space<vmem>>, vector<1x128x128xbf16>
    %77 = vector.shape_cast %76 : vector<1x128x128xbf16> to vector<128x128xbf16>
    %cst_44 = arith.constant dense<0.000000e+00> : vector<16x128xf32>
    %78 = tpu.matmul %75, %77, %cst_44 {dimension_numbers = #tpu.dot_dimension_numbers<[1], [0], [0], [1], [0, 0, 1, 1], [], []>} : vector<16x128xbf16>, vector<128x128xbf16>, vector<16x128xf32> -> vector<16x128xf32>
    %79 = arith.addf %69, %78 : vector<16x128xf32>
    %80 = vector.shape_cast %79 : vector<16x128xf32> to vector<2x8x128xf32>
    %c0_45 = arith.constant 0 : index
    %c0_46 = arith.constant 0 : index
    %81 = vector.load %arg4[%c0_45, %c0_46] : memref<1x128xf32, #tpu.memory_space<vmem>>, vector<1x128xf32>
    %82 = vector.shape_cast %81 : vector<1x128xf32> to vector<128xf32>
    %83 = vector.shape_cast %82 : vector<128xf32> to vector<1x1x128xf32>
    %84 = vector.broadcast %83 : vector<1x1x128xf32> to vector<2x8x128xf32>
    %85 = arith.addf %80, %84 : vector<2x8x128xf32>
    %cst_47 = arith.constant 0.000000e+00 : f32
    %86 = vector.broadcast %cst_47 : f32 to vector<2x8x128xf32>
    %87 = arith.maximumf %85, %86 : vector<2x8x128xf32>
    %88 = arith.truncf %87 : vector<2x8x128xf32> to vector<2x8x128xbf16>
    %c0_48 = arith.constant 0 : index
    %c0_49 = arith.constant 0 : index
    %c0_50 = arith.constant 0 : index
    %c0_51 = arith.constant 0 : index
    %89 = vector.load %arg5[%c0_48, %c0_49, %c0_50, %c0_51] : memref<1x2x8x128xbf16, #tpu.memory_space<vmem>>, vector<1x2x8x128xbf16>
    %90 = vector.shape_cast %89 : vector<1x2x8x128xbf16> to vector<2x8x128xbf16>
    %91 = vector.shape_cast %88 : vector<2x8x128xbf16> to vector<1x2x8x128xbf16>
    tpu.vector_store %arg5[%c0_48, %c0_49, %c0_50, %c0_51], %91 {strides = array<i32>} : memref<1x2x8x128xbf16, #tpu.memory_space<vmem>>, vector<1x2x8x128xbf16>,
    return
  }
  func.func @transform_0(%arg0: i32, %arg1: i32) -> (i32, i32, i32, i32) {
    %c0_i32 = arith.constant 0 : i32
    %c0_i32_0 = arith.constant 0 : i32
    %c0_i32_1 = arith.constant 0 : i32
    %c0_i32_2 = arith.constant 0 : i32
    return %arg0, %c0_i32, %c0_i32_0, %c0_i32_1 : i32, i32, i32, i32
  }
  func.func @transform_1(%arg0: i32, %arg1: i32) -> (i32, i32, i32) {
    %c0_i32 = arith.constant 0 : i32
    %c0_i32_0 = arith.constant 0 : i32
    %c0_i32_1 = arith.constant 0 : i32
    %c0_i32_2 = arith.constant 0 : i32
    return %c0_i32, %c0_i32_0, %c0_i32_1 : i32, i32, i32
  }
  func.func @transform_2(%arg0: i32, %arg1: i32) -> (i32, i32) {
    %c0_i32 = arith.constant 0 : i32
    %c0_i32_0 = arith.constant 0 : i32
    %c0_i32_1 = arith.constant 0 : i32
    return %c0_i32, %c0_i32_0 : i32, i32
  }
  func.func @transform_3(%arg0: i32, %arg1: i32) -> (i32, i32, i32, i32) {
    %c0_i32 = arith.constant 0 : i32
    %c0_i32_0 = arith.constant 0 : i32
    %c0_i32_1 = arith.constant 0 : i32
    return %arg0, %arg1, %c0_i32, %c0_i32_0 : i32, i32, i32, i32
  }
}

module attributes {stable_mosaic.version = 11 : i64} {
  func.func @_mm_bias_res_kernel(%arg0: i32, %arg1: memref<8x128xbf16, #tpu.memory_space<vmem>>, %arg2: memref<128x128xbf16, #tpu.memory_space<vmem>>, %arg3: memref<1x128xf32, #tpu.memory_space<vmem>>, %arg4: memref<8x128xbf16, #tpu.memory_space<vmem>>, %arg5: memref<8x128xbf16, #tpu.memory_space<vmem>>) attributes {dimension_semantics = [#tpu.dimension_semantics<parallel>], iteration_bounds = array<i64: 1>, scalar_prefetch = 0 : i64, scratch_operands = 0 : i64, tpu.core_type = #tpu.core_type<tc>, window_params = [{transform_indices = @transform_0, window_bounds = array<i64: 8, 128>}, {pipeline_mode = #tpu.pipeline_mode<synchronous>, transform_indices = @transform_1, window_bounds = array<i64: 128, 128>}, {pipeline_mode = #tpu.pipeline_mode<synchronous>, transform_indices = @transform_2, window_bounds = array<i64: 1, 128>}, {transform_indices = @transform_3, window_bounds = array<i64: 8, 128>}, {transform_indices = @transform_4, window_bounds = array<i64: 8, 128>}]} {
    %c0 = arith.constant 0 : index
    %c0_0 = arith.constant 0 : index
    %0 = vector.load %arg1[%c0, %c0_0] : memref<8x128xbf16, #tpu.memory_space<vmem>>, vector<8x128xbf16>
    %c0_1 = arith.constant 0 : index
    %c0_2 = arith.constant 0 : index
    %1 = vector.load %arg2[%c0_1, %c0_2] : memref<128x128xbf16, #tpu.memory_space<vmem>>, vector<128x128xbf16>
    %cst = arith.constant dense<0.000000e+00> : vector<8x128xf32>
    %2 = tpu.matmul %0, %1, %cst {dimension_numbers = #tpu.dot_dimension_numbers<[1], [0], [0], [1], [0, 0, 1, 1], [], []>} : vector<8x128xbf16>, vector<128x128xbf16>, vector<8x128xf32> -> vector<8x128xf32>
    %c0_3 = arith.constant 0 : index
    %c0_4 = arith.constant 0 : index
    %3 = vector.load %arg3[%c0_3, %c0_4] : memref<1x128xf32, #tpu.memory_space<vmem>>, vector<1x128xf32>
    %4 = vector.broadcast %3 : vector<1x128xf32> to vector<8x128xf32>
    %5 = arith.addf %2, %4 : vector<8x128xf32>
    %c0_5 = arith.constant 0 : index
    %c0_6 = arith.constant 0 : index
    %6 = vector.load %arg4[%c0_5, %c0_6] : memref<8x128xbf16, #tpu.memory_space<vmem>>, vector<8x128xbf16>
    %7 = arith.extf %6 : vector<8x128xbf16> to vector<8x128xf32>
    %8 = arith.addf %5, %7 : vector<8x128xf32>
    %cst_7 = arith.constant 0.000000e+00 : f32
    %9 = vector.broadcast %cst_7 : f32 to vector<8x128xf32>
    %10 = arith.maximumf %8, %9 : vector<8x128xf32>
    %11 = arith.truncf %10 : vector<8x128xf32> to vector<8x128xbf16>
    %c0_8 = arith.constant 0 : index
    %c0_9 = arith.constant 0 : index
    %12 = vector.load %arg5[%c0_8, %c0_9] : memref<8x128xbf16, #tpu.memory_space<vmem>>, vector<8x128xbf16>
    tpu.vector_store %arg5[%c0_8, %c0_9], %11 {strides = array<i32>} : memref<8x128xbf16, #tpu.memory_space<vmem>>, vector<8x128xbf16>,
    return
  }
  func.func @transform_0(%arg0: i32) -> (i32, i32) {
    %c0_i32 = arith.constant 0 : i32
    %c0_i32_0 = arith.constant 0 : i32
    return %arg0, %c0_i32 : i32, i32
  }
  func.func @transform_1(%arg0: i32) -> (i32, i32) {
    %c0_i32 = arith.constant 0 : i32
    %c0_i32_0 = arith.constant 0 : i32
    %c0_i32_1 = arith.constant 0 : i32
    return %c0_i32, %c0_i32_0 : i32, i32
  }
  func.func @transform_2(%arg0: i32) -> (i32, i32) {
    %c0_i32 = arith.constant 0 : i32
    %c0_i32_0 = arith.constant 0 : i32
    %c0_i32_1 = arith.constant 0 : i32
    return %c0_i32, %c0_i32_0 : i32, i32
  }
  func.func @transform_3(%arg0: i32) -> (i32, i32) {
    %c0_i32 = arith.constant 0 : i32
    %c0_i32_0 = arith.constant 0 : i32
    return %arg0, %c0_i32 : i32, i32
  }
  func.func @transform_4(%arg0: i32) -> (i32, i32) {
    %c0_i32 = arith.constant 0 : i32
    %c0_i32_0 = arith.constant 0 : i32
    return %arg0, %c0_i32 : i32, i32
  }
}

module attributes {stable_mosaic.version = 11 : i64} {
  func.func @_mm_bias_kernel(%arg0: i32, %arg1: memref<8x128xbf16, #tpu.memory_space<vmem>>, %arg2: memref<128x128xbf16, #tpu.memory_space<vmem>>, %arg3: memref<1x128xf32, #tpu.memory_space<vmem>>, %arg4: memref<8x128xbf16, #tpu.memory_space<vmem>>) attributes {dimension_semantics = [#tpu.dimension_semantics<parallel>], iteration_bounds = array<i64: 1>, scalar_prefetch = 0 : i64, scratch_operands = 0 : i64, tpu.core_type = #tpu.core_type<tc>, window_params = [{transform_indices = @transform_0, window_bounds = array<i64: 8, 128>}, {pipeline_mode = #tpu.pipeline_mode<synchronous>, transform_indices = @transform_1, window_bounds = array<i64: 128, 128>}, {pipeline_mode = #tpu.pipeline_mode<synchronous>, transform_indices = @transform_2, window_bounds = array<i64: 1, 128>}, {transform_indices = @transform_3, window_bounds = array<i64: 8, 128>}]} {
    %c0 = arith.constant 0 : index
    %c0_0 = arith.constant 0 : index
    %0 = vector.load %arg1[%c0, %c0_0] : memref<8x128xbf16, #tpu.memory_space<vmem>>, vector<8x128xbf16>
    %c0_1 = arith.constant 0 : index
    %c0_2 = arith.constant 0 : index
    %1 = vector.load %arg2[%c0_1, %c0_2] : memref<128x128xbf16, #tpu.memory_space<vmem>>, vector<128x128xbf16>
    %cst = arith.constant dense<0.000000e+00> : vector<8x128xf32>
    %2 = tpu.matmul %0, %1, %cst {dimension_numbers = #tpu.dot_dimension_numbers<[1], [0], [0], [1], [0, 0, 1, 1], [], []>} : vector<8x128xbf16>, vector<128x128xbf16>, vector<8x128xf32> -> vector<8x128xf32>
    %c0_3 = arith.constant 0 : index
    %c0_4 = arith.constant 0 : index
    %3 = vector.load %arg3[%c0_3, %c0_4] : memref<1x128xf32, #tpu.memory_space<vmem>>, vector<1x128xf32>
    %4 = vector.broadcast %3 : vector<1x128xf32> to vector<8x128xf32>
    %5 = arith.addf %2, %4 : vector<8x128xf32>
    %cst_5 = arith.constant 0.000000e+00 : f32
    %6 = vector.broadcast %cst_5 : f32 to vector<8x128xf32>
    %7 = arith.maximumf %5, %6 : vector<8x128xf32>
    %8 = arith.truncf %7 : vector<8x128xf32> to vector<8x128xbf16>
    %c0_6 = arith.constant 0 : index
    %c0_7 = arith.constant 0 : index
    %9 = vector.load %arg4[%c0_6, %c0_7] : memref<8x128xbf16, #tpu.memory_space<vmem>>, vector<8x128xbf16>
    tpu.vector_store %arg4[%c0_6, %c0_7], %8 {strides = array<i32>} : memref<8x128xbf16, #tpu.memory_space<vmem>>, vector<8x128xbf16>,
    return
  }
  func.func @transform_0(%arg0: i32) -> (i32, i32) {
    %c0_i32 = arith.constant 0 : i32
    %c0_i32_0 = arith.constant 0 : i32
    return %arg0, %c0_i32 : i32, i32
  }
  func.func @transform_1(%arg0: i32) -> (i32, i32) {
    %c0_i32 = arith.constant 0 : i32
    %c0_i32_0 = arith.constant 0 : i32
    %c0_i32_1 = arith.constant 0 : i32
    return %c0_i32, %c0_i32_0 : i32, i32
  }
  func.func @transform_2(%arg0: i32) -> (i32, i32) {
    %c0_i32 = arith.constant 0 : i32
    %c0_i32_0 = arith.constant 0 : i32
    %c0_i32_1 = arith.constant 0 : i32
    return %c0_i32, %c0_i32_0 : i32, i32
  }
  func.func @transform_3(%arg0: i32) -> (i32, i32) {
    %c0_i32 = arith.constant 0 : i32
    %c0_i32_0 = arith.constant 0 : i32
    return %arg0, %c0_i32 : i32, i32
  }
}

module attributes {stable_mosaic.version = 11 : i64} {
  func.func @_conv3x3_s1_kernel(%arg0: i32, %arg1: memref<1x2x2x128xbf16, #tpu.memory_space<vmem>>, %arg2: memref<9x128x128xbf16, #tpu.memory_space<vmem>>, %arg3: memref<1x128xf32, #tpu.memory_space<vmem>>, %arg4: memref<1x2x2x128xbf16, #tpu.memory_space<vmem>>, %arg5: memref<4x10x128xbf16, #tpu.memory_space<vmem>>) attributes {dimension_semantics = [#tpu.dimension_semantics<parallel>], iteration_bounds = array<i64: 2>, scalar_prefetch = 0 : i64, scratch_operands = 1 : i64, tpu.core_type = #tpu.core_type<tc>, window_params = [{transform_indices = @transform_0, window_bounds = array<i64: 1, 2, 2, 128>}, {pipeline_mode = #tpu.pipeline_mode<synchronous>, transform_indices = @transform_1, window_bounds = array<i64: 9, 128, 128>}, {pipeline_mode = #tpu.pipeline_mode<synchronous>, transform_indices = @transform_2, window_bounds = array<i64: 1, 128>}, {transform_indices = @transform_3, window_bounds = array<i64: 1, 2, 2, 128>}]} {
    %cst = arith.constant 0.000000e+00 : bf16
    %0 = vector.broadcast %cst : bf16 to vector<4x10x128xbf16>
    %c0 = arith.constant 0 : index
    %c0_0 = arith.constant 0 : index
    %c0_1 = arith.constant 0 : index
    %1 = vector.load %arg5[%c0, %c0_0, %c0_1] : memref<4x10x128xbf16, #tpu.memory_space<vmem>>, vector<4x10x128xbf16>
    tpu.vector_store %arg5[%c0, %c0_0, %c0_1], %0 {strides = array<i32>} : memref<4x10x128xbf16, #tpu.memory_space<vmem>>, vector<4x10x128xbf16>,
    %c0_2 = arith.constant 0 : index
    %c0_3 = arith.constant 0 : index
    %c0_4 = arith.constant 0 : index
    %c0_5 = arith.constant 0 : index
    %2 = vector.load %arg1[%c0_2, %c0_3, %c0_4, %c0_5] : memref<1x2x2x128xbf16, #tpu.memory_space<vmem>>, vector<1x2x2x128xbf16>
    %3 = vector.shape_cast %2 : vector<1x2x2x128xbf16> to vector<2x2x128xbf16>
    %c1 = arith.constant 1 : index
    %c1_6 = arith.constant 1 : index
    %c0_7 = arith.constant 0 : index
    %4 = vector.load %arg5[%c1, %c1_6, %c0_7] : memref<4x10x128xbf16, #tpu.memory_space<vmem>>, vector<2x2x128xbf16>
    tpu.vector_store %arg5[%c1, %c1_6, %c0_7], %3 {strides = array<i32>} : memref<4x10x128xbf16, #tpu.memory_space<vmem>>, vector<2x2x128xbf16>,
    %cst_8 = arith.constant 0.000000e+00 : f32
    %5 = vector.broadcast %cst_8 : f32 to vector<16x128xf32>
    %c0_9 = arith.constant 0 : index
    %c0_10 = arith.constant 0 : index
    %c0_11 = arith.constant 0 : index
    %6 = vector.load %arg5[%c0_9, %c0_10, %c0_11] : memref<4x10x128xbf16, #tpu.memory_space<vmem>>, vector<2x10x128xbf16>
    %7 = vector.extract_strided_slice %6 {offsets = [0, 0, 0], sizes = [2, 8, 128], strides = [1, 1, 1]} : vector<2x10x128xbf16> to vector<2x8x128xbf16>
    %8 = vector.shape_cast %7 : vector<2x8x128xbf16> to vector<16x128xbf16>
    %c0_12 = arith.constant 0 : index
    %c0_13 = arith.constant 0 : index
    %c0_14 = arith.constant 0 : index
    %9 = vector.load %arg2[%c0_12, %c0_13, %c0_14] : memref<9x128x128xbf16, #tpu.memory_space<vmem>>, vector<1x128x128xbf16>
    %10 = vector.shape_cast %9 : vector<1x128x128xbf16> to vector<128x128xbf16>
    %cst_15 = arith.constant dense<0.000000e+00> : vector<16x128xf32>
    %11 = tpu.matmul %8, %10, %cst_15 {dimension_numbers = #tpu.dot_dimension_numbers<[1], [0], [0], [1], [0, 0, 1, 1], [], []>} : vector<16x128xbf16>, vector<128x128xbf16>, vector<16x128xf32> -> vector<16x128xf32>
    %12 = arith.addf %5, %11 : vector<16x128xf32>
    %13 = vector.extract_strided_slice %6 {offsets = [0, 1, 0], sizes = [2, 8, 128], strides = [1, 1, 1]} : vector<2x10x128xbf16> to vector<2x8x128xbf16>
    %14 = vector.shape_cast %13 : vector<2x8x128xbf16> to vector<16x128xbf16>
    %c1_16 = arith.constant 1 : index
    %c0_17 = arith.constant 0 : index
    %c0_18 = arith.constant 0 : index
    %15 = vector.load %arg2[%c1_16, %c0_17, %c0_18] : memref<9x128x128xbf16, #tpu.memory_space<vmem>>, vector<1x128x128xbf16>
    %16 = vector.shape_cast %15 : vector<1x128x128xbf16> to vector<128x128xbf16>
    %cst_19 = arith.constant dense<0.000000e+00> : vector<16x128xf32>
    %17 = tpu.matmul %14, %16, %cst_19 {dimension_numbers = #tpu.dot_dimension_numbers<[1], [0], [0], [1], [0, 0, 1, 1], [], []>} : vector<16x128xbf16>, vector<128x128xbf16>, vector<16x128xf32> -> vector<16x128xf32>
    %18 = arith.addf %12, %17 : vector<16x128xf32>
    %19 = vector.extract_strided_slice %6 {offsets = [0, 2, 0], sizes = [2, 8, 128], strides = [1, 1, 1]} : vector<2x10x128xbf16> to vector<2x8x128xbf16>
    %20 = vector.shape_cast %19 : vector<2x8x128xbf16> to vector<16x128xbf16>
    %c2 = arith.constant 2 : index
    %c0_20 = arith.constant 0 : index
    %c0_21 = arith.constant 0 : index
    %21 = vector.load %arg2[%c2, %c0_20, %c0_21] : memref<9x128x128xbf16, #tpu.memory_space<vmem>>, vector<1x128x128xbf16>
    %22 = vector.shape_cast %21 : vector<1x128x128xbf16> to vector<128x128xbf16>
    %cst_22 = arith.constant dense<0.000000e+00> : vector<16x128xf32>
    %23 = tpu.matmul %20, %22, %cst_22 {dimension_numbers = #tpu.dot_dimension_numbers<[1], [0], [0], [1], [0, 0, 1, 1], [], []>} : vector<16x128xbf16>, vector<128x128xbf16>, vector<16x128xf32> -> vector<16x128xf32>
    %24 = arith.addf %18, %23 : vector<16x128xf32>
    %c1_23 = arith.constant 1 : index
    %c0_24 = arith.constant 0 : index
    %c0_25 = arith.constant 0 : index
    %25 = vector.load %arg5[%c1_23, %c0_24, %c0_25] : memref<4x10x128xbf16, #tpu.memory_space<vmem>>, vector<2x10x128xbf16>
    %26 = vector.extract_strided_slice %25 {offsets = [0, 0, 0], sizes = [2, 8, 128], strides = [1, 1, 1]} : vector<2x10x128xbf16> to vector<2x8x128xbf16>
    %27 = vector.shape_cast %26 : vector<2x8x128xbf16> to vector<16x128xbf16>
    %c3 = arith.constant 3 : index
    %c0_26 = arith.constant 0 : index
    %c0_27 = arith.constant 0 : index
    %28 = vector.load %arg2[%c3, %c0_26, %c0_27] : memref<9x128x128xbf16, #tpu.memory_space<vmem>>, vector<1x128x128xbf16>
    %29 = vector.shape_cast %28 : vector<1x128x128xbf16> to vector<128x128xbf16>
    %cst_28 = arith.constant dense<0.000000e+00> : vector<16x128xf32>
    %30 = tpu.matmul %27, %29, %cst_28 {dimension_numbers = #tpu.dot_dimension_numbers<[1], [0], [0], [1], [0, 0, 1, 1], [], []>} : vector<16x128xbf16>, vector<128x128xbf16>, vector<16x128xf32> -> vector<16x128xf32>
    %31 = arith.addf %24, %30 : vector<16x128xf32>
    %32 = vector.extract_strided_slice %25 {offsets = [0, 1, 0], sizes = [2, 8, 128], strides = [1, 1, 1]} : vector<2x10x128xbf16> to vector<2x8x128xbf16>
    %33 = vector.shape_cast %32 : vector<2x8x128xbf16> to vector<16x128xbf16>
    %c4 = arith.constant 4 : index
    %c0_29 = arith.constant 0 : index
    %c0_30 = arith.constant 0 : index
    %34 = vector.load %arg2[%c4, %c0_29, %c0_30] : memref<9x128x128xbf16, #tpu.memory_space<vmem>>, vector<1x128x128xbf16>
    %35 = vector.shape_cast %34 : vector<1x128x128xbf16> to vector<128x128xbf16>
    %cst_31 = arith.constant dense<0.000000e+00> : vector<16x128xf32>
    %36 = tpu.matmul %33, %35, %cst_31 {dimension_numbers = #tpu.dot_dimension_numbers<[1], [0], [0], [1], [0, 0, 1, 1], [], []>} : vector<16x128xbf16>, vector<128x128xbf16>, vector<16x128xf32> -> vector<16x128xf32>
    %37 = arith.addf %31, %36 : vector<16x128xf32>
    %38 = vector.extract_strided_slice %25 {offsets = [0, 2, 0], sizes = [2, 8, 128], strides = [1, 1, 1]} : vector<2x10x128xbf16> to vector<2x8x128xbf16>
    %39 = vector.shape_cast %38 : vector<2x8x128xbf16> to vector<16x128xbf16>
    %c5 = arith.constant 5 : index
    %c0_32 = arith.constant 0 : index
    %c0_33 = arith.constant 0 : index
    %40 = vector.load %arg2[%c5, %c0_32, %c0_33] : memref<9x128x128xbf16, #tpu.memory_space<vmem>>, vector<1x128x128xbf16>
    %41 = vector.shape_cast %40 : vector<1x128x128xbf16> to vector<128x128xbf16>
    %cst_34 = arith.constant dense<0.000000e+00> : vector<16x128xf32>
    %42 = tpu.matmul %39, %41, %cst_34 {dimension_numbers = #tpu.dot_dimension_numbers<[1], [0], [0], [1], [0, 0, 1, 1], [], []>} : vector<16x128xbf16>, vector<128x128xbf16>, vector<16x128xf32> -> vector<16x128xf32>
    %43 = arith.addf %37, %42 : vector<16x128xf32>
    %c2_35 = arith.constant 2 : index
    %c0_36 = arith.constant 0 : index
    %c0_37 = arith.constant 0 : index
    %44 = vector.load %arg5[%c2_35, %c0_36, %c0_37] : memref<4x10x128xbf16, #tpu.memory_space<vmem>>, vector<2x10x128xbf16>
    %45 = vector.extract_strided_slice %44 {offsets = [0, 0, 0], sizes = [2, 8, 128], strides = [1, 1, 1]} : vector<2x10x128xbf16> to vector<2x8x128xbf16>
    %46 = vector.shape_cast %45 : vector<2x8x128xbf16> to vector<16x128xbf16>
    %c6 = arith.constant 6 : index
    %c0_38 = arith.constant 0 : index
    %c0_39 = arith.constant 0 : index
    %47 = vector.load %arg2[%c6, %c0_38, %c0_39] : memref<9x128x128xbf16, #tpu.memory_space<vmem>>, vector<1x128x128xbf16>
    %48 = vector.shape_cast %47 : vector<1x128x128xbf16> to vector<128x128xbf16>
    %cst_40 = arith.constant dense<0.000000e+00> : vector<16x128xf32>
    %49 = tpu.matmul %46, %48, %cst_40 {dimension_numbers = #tpu.dot_dimension_numbers<[1], [0], [0], [1], [0, 0, 1, 1], [], []>} : vector<16x128xbf16>, vector<128x128xbf16>, vector<16x128xf32> -> vector<16x128xf32>
    %50 = arith.addf %43, %49 : vector<16x128xf32>
    %51 = vector.extract_strided_slice %44 {offsets = [0, 1, 0], sizes = [2, 8, 128], strides = [1, 1, 1]} : vector<2x10x128xbf16> to vector<2x8x128xbf16>
    %52 = vector.shape_cast %51 : vector<2x8x128xbf16> to vector<16x128xbf16>
    %c7 = arith.constant 7 : index
    %c0_41 = arith.constant 0 : index
    %c0_42 = arith.constant 0 : index
    %53 = vector.load %arg2[%c7, %c0_41, %c0_42] : memref<9x128x128xbf16, #tpu.memory_space<vmem>>, vector<1x128x128xbf16>
    %54 = vector.shape_cast %53 : vector<1x128x128xbf16> to vector<128x128xbf16>
    %cst_43 = arith.constant dense<0.000000e+00> : vector<16x128xf32>
    %55 = tpu.matmul %52, %54, %cst_43 {dimension_numbers = #tpu.dot_dimension_numbers<[1], [0], [0], [1], [0, 0, 1, 1], [], []>} : vector<16x128xbf16>, vector<128x128xbf16>, vector<16x128xf32> -> vector<16x128xf32>
    %56 = arith.addf %50, %55 : vector<16x128xf32>
    %57 = vector.extract_strided_slice %44 {offsets = [0, 2, 0], sizes = [2, 8, 128], strides = [1, 1, 1]} : vector<2x10x128xbf16> to vector<2x8x128xbf16>
    %58 = vector.shape_cast %57 : vector<2x8x128xbf16> to vector<16x128xbf16>
    %c8 = arith.constant 8 : index
    %c0_44 = arith.constant 0 : index
    %c0_45 = arith.constant 0 : index
    %59 = vector.load %arg2[%c8, %c0_44, %c0_45] : memref<9x128x128xbf16, #tpu.memory_space<vmem>>, vector<1x128x128xbf16>
    %60 = vector.shape_cast %59 : vector<1x128x128xbf16> to vector<128x128xbf16>
    %cst_46 = arith.constant dense<0.000000e+00> : vector<16x128xf32>
    %61 = tpu.matmul %58, %60, %cst_46 {dimension_numbers = #tpu.dot_dimension_numbers<[1], [0], [0], [1], [0, 0, 1, 1], [], []>} : vector<16x128xbf16>, vector<128x128xbf16>, vector<16x128xf32> -> vector<16x128xf32>
    %62 = arith.addf %56, %61 : vector<16x128xf32>
    %63 = vector.shape_cast %62 : vector<16x128xf32> to vector<2x8x128xf32>
    %c0_47 = arith.constant 0 : index
    %c0_48 = arith.constant 0 : index
    %64 = vector.load %arg3[%c0_47, %c0_48] : memref<1x128xf32, #tpu.memory_space<vmem>>, vector<1x128xf32>
    %65 = vector.shape_cast %64 : vector<1x128xf32> to vector<128xf32>
    %66 = vector.shape_cast %65 : vector<128xf32> to vector<1x1x128xf32>
    %67 = vector.broadcast %66 : vector<1x1x128xf32> to vector<2x8x128xf32>
    %68 = arith.addf %63, %67 : vector<2x8x128xf32>
    %cst_49 = arith.constant 0.000000e+00 : f32
    %69 = vector.broadcast %cst_49 : f32 to vector<2x8x128xf32>
    %70 = arith.maximumf %68, %69 : vector<2x8x128xf32>
    %71 = vector.extract_strided_slice %70 {offsets = [0, 0, 0], sizes = [2, 2, 128], strides = [1, 1, 1]} : vector<2x8x128xf32> to vector<2x2x128xf32>
    %72 = arith.truncf %71 : vector<2x2x128xf32> to vector<2x2x128xbf16>
    %c0_50 = arith.constant 0 : index
    %c0_51 = arith.constant 0 : index
    %c0_52 = arith.constant 0 : index
    %c0_53 = arith.constant 0 : index
    %73 = vector.load %arg4[%c0_50, %c0_51, %c0_52, %c0_53] : memref<1x2x2x128xbf16, #tpu.memory_space<vmem>>, vector<1x2x2x128xbf16>
    %74 = vector.shape_cast %73 : vector<1x2x2x128xbf16> to vector<2x2x128xbf16>
    %75 = vector.shape_cast %72 : vector<2x2x128xbf16> to vector<1x2x2x128xbf16>
    tpu.vector_store %arg4[%c0_50, %c0_51, %c0_52, %c0_53], %75 {strides = array<i32>} : memref<1x2x2x128xbf16, #tpu.memory_space<vmem>>, vector<1x2x2x128xbf16>,
    return
  }
  func.func @transform_0(%arg0: i32) -> (i32, i32, i32, i32) {
    %c0_i32 = arith.constant 0 : i32
    %c0_i32_0 = arith.constant 0 : i32
    %c0_i32_1 = arith.constant 0 : i32
    %c0_i32_2 = arith.constant 0 : i32
    return %arg0, %c0_i32, %c0_i32_0, %c0_i32_1 : i32, i32, i32, i32
  }
  func.func @transform_1(%arg0: i32) -> (i32, i32, i32) {
    %c0_i32 = arith.constant 0 : i32
    %c0_i32_0 = arith.constant 0 : i32
    %c0_i32_1 = arith.constant 0 : i32
    %c0_i32_2 = arith.constant 0 : i32
    return %c0_i32, %c0_i32_0, %c0_i32_1 : i32, i32, i32
  }
  func.func @transform_2(%arg0: i32) -> (i32, i32) {
    %c0_i32 = arith.constant 0 : i32
    %c0_i32_0 = arith.constant 0 : i32
    %c0_i32_1 = arith.constant 0 : i32
    return %c0_i32, %c0_i32_0 : i32, i32
  }
  func.func @transform_3(%arg0: i32) -> (i32, i32, i32, i32) {
    %c0_i32 = arith.constant 0 : i32
    %c0_i32_0 = arith.constant 0 : i32
    %c0_i32_1 = arith.constant 0 : i32
    %c0_i32_2 = arith.constant 0 : i32
    return %arg0, %c0_i32, %c0_i32_0, %c0_i32_1 : i32, i32, i32, i32
  }
}

module attributes {stable_mosaic.version = 11 : i64} {
  func.func @_head_kernel(%arg0: i32, %arg1: memref<1x8x256xbf16, #tpu.memory_space<vmem>>, %arg2: memref<4x8xbf16, #tpu.memory_space<vmem>>, %arg3: memref<256x512xbf16, #tpu.memory_space<vmem>>, %arg4: memref<1x4x512xf32, #tpu.memory_space<vmem>>, %arg5: memref<1x4x512xf32, #tpu.memory_space<vmem>>) attributes {dimension_semantics = [#tpu.dimension_semantics<parallel>], iteration_bounds = array<i64: 2>, scalar_prefetch = 0 : i64, scratch_operands = 0 : i64, tpu.core_type = #tpu.core_type<tc>, window_params = [{transform_indices = @transform_0, window_bounds = array<i64: 1, 8, 256>}, {pipeline_mode = #tpu.pipeline_mode<synchronous>, transform_indices = @transform_1, window_bounds = array<i64: 4, 8>}, {pipeline_mode = #tpu.pipeline_mode<synchronous>, transform_indices = @transform_2, window_bounds = array<i64: 256, 512>}, {transform_indices = @transform_3, window_bounds = array<i64: 1, 4, 512>}, {transform_indices = @transform_4, window_bounds = array<i64: 1, 4, 512>}]} {
    %c0 = arith.constant 0 : index
    %c0_0 = arith.constant 0 : index
    %0 = vector.load %arg2[%c0, %c0_0] : memref<4x8xbf16, #tpu.memory_space<vmem>>, vector<4x8xbf16>
    %c0_1 = arith.constant 0 : index
    %c0_2 = arith.constant 0 : index
    %c0_3 = arith.constant 0 : index
    %1 = vector.load %arg1[%c0_1, %c0_2, %c0_3] : memref<1x8x256xbf16, #tpu.memory_space<vmem>>, vector<1x8x256xbf16>
    %2 = vector.shape_cast %1 : vector<1x8x256xbf16> to vector<8x256xbf16>
    %cst = arith.constant dense<0.000000e+00> : vector<4x256xf32>
    %3 = tpu.matmul %0, %2, %cst {dimension_numbers = #tpu.dot_dimension_numbers<[1], [0], [0], [1], [0, 0, 1, 1], [], []>} : vector<4x8xbf16>, vector<8x256xbf16>, vector<4x256xf32> -> vector<4x256xf32>
    %4 = arith.truncf %3 : vector<4x256xf32> to vector<4x256xbf16>
    %c0_4 = arith.constant 0 : index
    %c0_5 = arith.constant 0 : index
    %5 = vector.load %arg3[%c0_4, %c0_5] : memref<256x512xbf16, #tpu.memory_space<vmem>>, vector<256x512xbf16>
    %cst_6 = arith.constant dense<0.000000e+00> : vector<4x512xf32>
    %6 = tpu.matmul %4, %5, %cst_6 {dimension_numbers = #tpu.dot_dimension_numbers<[1], [0], [0], [1], [0, 0, 1, 1], [], []>} : vector<4x256xbf16>, vector<256x512xbf16>, vector<4x512xf32> -> vector<4x512xf32>
    %c0_7 = arith.constant 0 : index
    %c0_8 = arith.constant 0 : index
    %c0_9 = arith.constant 0 : index
    %7 = vector.load %arg4[%c0_7, %c0_8, %c0_9] : memref<1x4x512xf32, #tpu.memory_space<vmem>>, vector<1x4x512xf32>
    %8 = vector.shape_cast %7 : vector<1x4x512xf32> to vector<4x512xf32>
    %9 = arith.addf %6, %8 : vector<4x512xf32>
    %c0_10 = arith.constant 0 : index
    %c0_11 = arith.constant 0 : index
    %c0_12 = arith.constant 0 : index
    %10 = vector.load %arg5[%c0_10, %c0_11, %c0_12] : memref<1x4x512xf32, #tpu.memory_space<vmem>>, vector<1x4x512xf32>
    %11 = vector.shape_cast %10 : vector<1x4x512xf32> to vector<4x512xf32>
    %12 = vector.shape_cast %9 : vector<4x512xf32> to vector<1x4x512xf32>
    tpu.vector_store %arg5[%c0_10, %c0_11, %c0_12], %12 {strides = array<i32>} : memref<1x4x512xf32, #tpu.memory_space<vmem>>, vector<1x4x512xf32>,
    return
  }
  func.func @transform_0(%arg0: i32) -> (i32, i32, i32) {
    %c0_i32 = arith.constant 0 : i32
    %c0_i32_0 = arith.constant 0 : i32
    %c0_i32_1 = arith.constant 0 : i32
    return %arg0, %c0_i32, %c0_i32_0 : i32, i32, i32
  }
  func.func @transform_1(%arg0: i32) -> (i32, i32) {
    %c0_i32 = arith.constant 0 : i32
    %c0_i32_0 = arith.constant 0 : i32
    %c0_i32_1 = arith.constant 0 : i32
    return %c0_i32, %c0_i32_0 : i32, i32
  }
  func.func @transform_2(%arg0: i32) -> (i32, i32) {
    %c0_i32 = arith.constant 0 : i32
    %c0_i32_0 = arith.constant 0 : i32
    %c0_i32_1 = arith.constant 0 : i32
    return %c0_i32, %c0_i32_0 : i32, i32
  }
  func.func @transform_3(%arg0: i32) -> (i32, i32, i32) {
    %c0_i32 = arith.constant 0 : i32
    %c0_i32_0 = arith.constant 0 : i32
    %c0_i32_1 = arith.constant 0 : i32
    return %arg0, %c0_i32, %c0_i32_0 : i32, i32, i32
  }
  func.func @transform_4(%arg0: i32) -> (i32, i32, i32) {
    %c0_i32 = arith.constant 0 : i32
    %c0_i32_0 = arith.constant 0 : i32
    %c0_i32_1 = arith.constant 0 : i32
    return %arg0, %c0_i32, %c0_i32_0 : i32, i32, i32
  }
}

</mosaic_0001>

<bundles_post_ra>
// kernel: _lambda_.25
= control target key start
LH: loop header
LB: loop body
LE: loop exit
PB: predicated region body
PF: predicated region fallthrough
CT: control target
= control target key end

     0   :  { %s1232_s12 = smov 0   ;;  %s1422_s0 = inlined_call_operand.vmem [shape: bf16[512,256], index: 0, kind: input, shape index: {}]   ;;  %s1423_s1 = inlined_call_operand.vmem [shape: bf16[256,128], index: 1, kind: input, shape index: {}]   ;;  %s1424_s2 = inlined_call_operand.vmem [shape: f32[1,128], index: 2, kind: input, shape index: {}]   ;;  %s1425_s3 = inlined_call_operand.vmem [shape: bf16[512,128], index: 3, kind: output, shape index: {}]  }
   0x1 LB: > { %s831_s13 = sadd.s32 4294967295, %s1210_s12   ;;  %p835_p0 = scmp.ge.s32.totalorder %s1210_s12, 1  ;;  %s1210_s12 = sphi %s1232_s12, %s13_s12  }
   0x2   : > { %p139_p1 = scmp.lt.s32.totalorder %s1210_s12, 3 }
   0x4   : > { %p140_p2 = pnand %p835_p0, %p139_p1 }
   0x5   : > { %s836_s26 = sshll.u32 (!%p140_p2), %s831_s13, 5 }
   0x6   : > { %143 = sbr.rel (%p140_p2) target bundleno = 304 (0x130), region = 32  ;;  %p165_p3 = scmp.lt.s32.totalorder (!%p140_p2), %s836_s26, 63 }
   0xb   : > { %v1075_v0 = vld [vmem:[%s1423_s1 + $0x38] sm:$0xff]  ;;  %v1074_v2 = vld [vmem:[%s1423_s1 + $0x30] sm:$0xff]  ;;  %v1073_v4 = vld [vmem:[%s1423_s1 + $0x28] sm:$0xff]  ;;  %s1427_s26 = smov (!%p165_p3, %s836_s26), 63 }
   0xc   : > { %v1083_v1 = vld [vmem:[%s1423_s1 + $0x78] sm:$0xff]  ;;  %501 = vmatpush.bf16.msra.mxu0 %v1075_v0  ;;  %1179 = vmatpush.bf16.msra.mxu2 %v1075_v0  ;;  %v1082_v3 = vld [vmem:[%s1423_s1 + $0x70] sm:$0xff]  ;;  %v1081_v5 = vld [vmem:[%s1423_s1 + $0x68] sm:$0xff]  ;;  %s1035_s13 = sshll.u32 %s1427_s26, 3  ;;  %s840_s28 = sshll.u32 %s1427_s26, 2 }
   0xd   : > { %590 = vmatpush.bf16.msra.mxu1 %v1083_v1  ;;  %1187 = vmatpush.bf16.msra.mxu3 %v1083_v1  ;;  %v1072_v6 = vld [vmem:[%s1423_s1 + $0x20] sm:$0xff]  ;;  %v1071_v8 = vld [vmem:[%s1423_s1 + $0x18] sm:$0xff]  ;;  %v1070_v10 = vld [vmem:[%s1423_s1 + $0x10] sm:$0xff]  ;;  %s1285_s18 = scalar_lea.vmem %s1422_s0, %s1035_s13  ;;  %s1372_s4 = scalar_lea.vmem %s1425_s3, %s840_s28 }
   0xe   : > { %v1080_v7 = vld [vmem:[%s1423_s1 + $0x60] sm:$0xff]  ;;  %v1079_v9 = vld [vmem:[%s1423_s1 + $0x58] sm:$0xff]  ;;  %v1078_v11 = vld [vmem:[%s1423_s1 + $0x50] sm:$0xff] }
   0xf   : > { %v1069_v12 = vld [vmem:[%s1423_s1 + $0x8] sm:$0xff]  ;;  %v1068_v14 = vld [vmem:[%s1423_s1] sm:$0xff]  ;;  %v851_v28 = vld [vmem:[%s1285_s18 + $0x10] sm:$0xf] }
  0x10   : > { %502 = vmatpush.bf16.msra.mxu0 %v1074_v2  ;;  %1180 = vmatpush.bf16.msra.mxu2 %v1074_v2  ;;  %v1077_v13 = vld [vmem:[%s1423_s1 + $0x48] sm:$0xff]  ;;  %v1076_v15 = vld [vmem:[%s1423_s1 + $0x40] sm:$0xff]  ;;  %v1039_v29 = vld [vmem:[%s1285_s18 + $0x14] sm:$0xf0] }
  0x11   : > { %591 = vmatpush.bf16.msra.mxu1 %v1082_v3  ;;  %1188 = vmatpush.bf16.msra.mxu3 %v1082_v3  ;;  %v843_v16 = vld [vmem:[%s1285_s18] sm:$0xf]  ;;  %v1037_v17 = vld [vmem:[%s1285_s18 + $0x4] sm:$0xf0]  ;;  %v1036_v20 = vld [vmem:[%s1285_s18 + $0x4] sm:$0xf]  ;;  %v852_v36 = vor.u32 %v1039_v29, %v851_v28 }
  0x12   : > { %v907_v18 = vld [vmem:[%s1285_s18 + $0x80] sm:$0xf]  ;;  %v1053_v19 = vld [vmem:[%s1285_s18 + $0x84] sm:$0xf0]  ;;  %v845_v21 = vld [vmem:[%s1285_s18 + $0x8] sm:$0xf0]  ;;  %v844_v24 = vor.u32 %v1037_v17, %v843_v16 }
  0x13   : > { %v1052_v22 = vld [vmem:[%s1285_s18 + $0x84] sm:$0xf]  ;;  %v909_v23 = vld [vmem:[%s1285_s18 + $0x88] sm:$0xf0]  ;;  %v908_v25 = vor.u32 %v1053_v19, %v907_v18  ;;  %v848_v26 = vor.u32 %v1036_v20, %v845_v21  ;;  %v915_v30 = vld [vmem:[%s1285_s18 + $0x90] sm:$0xf] }
  0x14   : > { %503 = vmatpush.bf16.msra.mxu0 %v1073_v4  ;;  %1181 = vmatpush.bf16.msra.mxu2 %v1073_v4  ;;  %v912_v27 = vor.u32 %v1052_v22, %v909_v23  ;;  %v1055_v31 = vld [vmem:[%s1285_s18 + $0x94] sm:$0xf0]  ;;  %v1038_v32 = vld [vmem:[%s1285_s18 + $0x14] sm:$0xf]  ;;  %v853_v33 = vld [vmem:[%s1285_s18 + $0x18] sm:$0xf0] }
  0x15   : > { %592 = vmatpush.bf16.msra.mxu1 %v1081_v5  ;;  %1189 = vmatpush.bf16.msra.mxu3 %v1081_v5  ;;  %v1054_v34 = vld [vmem:[%s1285_s18 + $0x94] sm:$0xf]  ;;  %v917_v35 = vld [vmem:[%s1285_s18 + $0x98] sm:$0xf0]  ;;  %v916_v37 = vor.u32 %v1055_v31, %v915_v30  ;;  %v856_v38 = vor.u32 %v1038_v32, %v853_v33  ;;  %v859_v40 = vld [vmem:[%s1285_s18 + $0x20] sm:$0xf] }
  0x16   : > { %v920_v39 = vor.u32 %v1054_v34, %v917_v35  ;;  %v1041_v41 = vld [vmem:[%s1285_s18 + $0x24] sm:$0xf0]  ;;  %v923_v42 = vld [vmem:[%s1285_s18 + $0xa0] sm:$0xf]  ;;  %v1040_v44 = vld [vmem:[%s1285_s18 + $0x24] sm:$0xf] }
  0x17   : > { %v1057_v43 = vld [vmem:[%s1285_s18 + $0xa4] sm:$0xf0]  ;;  %v861_v45 = vld [vmem:[%s1285_s18 + $0x28] sm:$0xf0]  ;;  %v1056_v46 = vld [vmem:[%s1285_s18 + $0xa4] sm:$0xf]  ;;  %v860_v48 = vor.u32 %v1041_v41, %v859_v40 }
  0x18   : > { %504 = vmatpush.bf16.msra.mxu0 %v1072_v6  ;;  %1182 = vmatpush.bf16.msra.mxu2 %v1072_v6  ;;  %v925_v47 = vld [vmem:[%s1285_s18 + $0xa8] sm:$0xf0]  ;;  %v924_v49 = vor.u32 %v1057_v43, %v923_v42  ;;  %v864_v50 = vor.u32 %v1040_v44, %v861_v45  ;;  %v867_v52 = vld [vmem:[%s1285_s18 + $0x30] sm:$0xf]  ;;  %v1043_v53 = vld [vmem:[%s1285_s18 + $0x34] sm:$0xf0] }
  0x19   : > { %593 = vmatpush.bf16.msra.mxu1 %v1080_v7  ;;  %1190 = vmatpush.bf16.msra.mxu3 %v1080_v7  ;;  %v928_v51 = vor.u32 %v1056_v46, %v925_v47  ;;  %v931_v54 = vld [vmem:[%s1285_s18 + $0xb0] sm:$0xf]  ;;  %v1059_v55 = vld [vmem:[%s1285_s18 + $0xb4] sm:$0xf0]  ;;  %v1042_v56 = vld [vmem:[%s1285_s18 + $0x34] sm:$0xf]  ;;  %v868_v60 = vor.u32 %v1043_v53, %v867_v52 }
  0x1a   : > { %v869_v57 = vld [vmem:[%s1285_s18 + $0x38] sm:$0xf0]  ;;  %v1058_v58 = vld [vmem:[%s1285_s18 + $0xb4] sm:$0xf]  ;;  %v932_v61 = vor.u32 %v1059_v55, %v931_v54  ;;  %v875_v0 = vld [vmem:[%s1285_s18 + $0x40] sm:$0xf] }
  0x1b   : > { %v933_v59 = vld [vmem:[%s1285_s18 + $0xb8] sm:$0xf0]  ;;  %v872_v62 = vor.u32 %v1042_v56, %v869_v57  ;;  %v1045_v1 = vld [vmem:[%s1285_s18 + $0x44] sm:$0xf0]  ;;  %v939_v2 = vld [vmem:[%s1285_s18 + $0xc0] sm:$0xf] }
  0x1c   : > { %505 = vmatpush.bf16.msra.mxu0 %v1071_v8  ;;  %1183 = vmatpush.bf16.msra.mxu2 %v1071_v8  ;;  %v936_v63 = vor.u32 %v1058_v58, %v933_v59  ;;  %v1061_v3 = vld [vmem:[%s1285_s18 + $0xc4] sm:$0xf0]  ;;  %v1044_v4 = vld [vmem:[%s1285_s18 + $0x44] sm:$0xf]  ;;  %v877_v5 = vld [vmem:[%s1285_s18 + $0x48] sm:$0xf0]  ;;  %v876_v8 = vor.u32 %v1045_v1, %v875_v0 }
  0x1d   : > { %594 = vmatpush.bf16.msra.mxu1 %v1079_v9  ;;  %1191 = vmatpush.bf16.msra.mxu3 %v1079_v9  ;;  %v1060_v6 = vld [vmem:[%s1285_s18 + $0xc4] sm:$0xf]  ;;  %v941_v7 = vld [vmem:[%s1285_s18 + $0xc8] sm:$0xf0]  ;;  %v940_v9 = vor.u32 %v1061_v3, %v939_v2  ;;  %v1046_v16 = vld [vmem:[%s1285_s18 + $0x54] sm:$0xf] }
  0x1e   : > { %v885_v17 = vld [vmem:[%s1285_s18 + $0x58] sm:$0xf0]  ;;  %v1062_v18 = vld [vmem:[%s1285_s18 + $0xd4] sm:$0xf]  ;;  %v1048_v28 = vld [vmem:[%s1285_s18 + $0x64] sm:$0xf] }
  0x1f   : > { %v949_v19 = vld [vmem:[%s1285_s18 + $0xd8] sm:$0xf0]  ;;  %v888_v22 = vor.u32 %v1046_v16, %v885_v17  ;;  %v893_v29 = vld [vmem:[%s1285_s18 + $0x68] sm:$0xf0]  ;;  %v1064_v30 = vld [vmem:[%s1285_s18 + $0xe4] sm:$0xf] }
  0x20   : > { %506 = vmatpush.bf16.msra.mxu0 %v1070_v10  ;;  %1184 = vmatpush.bf16.msra.mxu2 %v1070_v10  ;;  %v880_v10 = vor.u32 %v1044_v4, %v877_v5  ;;  %v952_v23 = vor.u32 %v1062_v18, %v949_v19  ;;  %v957_v31 = vld [vmem:[%s1285_s18 + $0xe8] sm:$0xf0]  ;;  %v896_v34 = vor.u32 %v1048_v28, %v893_v29  ;;  %v1050_v40 = vld [vmem:[%s1285_s18 + $0x74] sm:$0xf]  ;;  %v901_v41 = vld [vmem:[%s1285_s18 + $0x78] sm:$0xf0] }
  0x21   : > { %595 = vmatpush.bf16.msra.mxu1 %v1078_v11  ;;  %1192 = vmatpush.bf16.msra.mxu3 %v1078_v11  ;;  %v944_v11 = vor.u32 %v1060_v6, %v941_v7  ;;  %v960_v35 = vor.u32 %v1064_v30, %v957_v31  ;;  %v1066_v42 = vld [vmem:[%s1285_s18 + $0xf4] sm:$0xf]  ;;  %v965_v43 = vld [vmem:[%s1285_s18 + $0xf8] sm:$0xf0]  ;;  %v904_v46 = vor.u32 %v1050_v40, %v901_v41 }
  0x22   : > { %v968_v47 = vor.u32 %v1066_v42, %v965_v43 }
  0x24   : > { %507 = vmatpush.bf16.msra.mxu0 %v1069_v12  ;;  %1185 = vmatpush.bf16.msra.mxu2 %v1069_v12  ;;  %v883_v12 = vld [vmem:[%s1285_s18 + $0x50] sm:$0xf] }
  0x25   : > { %596 = vmatpush.bf16.msra.mxu1 %v1077_v13  ;;  %1193 = vmatpush.bf16.msra.mxu3 %v1077_v13  ;;  %v1047_v13 = vld [vmem:[%s1285_s18 + $0x54] sm:$0xf0] }
  0x26   : > { %v884_v20 = vor.u32 %v1047_v13, %v883_v12 }
  0x28   : > { %508 = vmatpush.bf16.msra.mxu0 %v1068_v14  ;;  %1186 = vmatpush.bf16.msra.mxu2 %v1068_v14  ;;  %v947_v14 = vld [vmem:[%s1285_s18 + $0xd0] sm:$0xf] }
  0x29   : > { %597 = vmatpush.bf16.msra.mxu1 %v1076_v15  ;;  %1194 = vmatpush.bf16.msra.mxu3 %v1076_v15  ;;  %v1063_v15 = vld [vmem:[%s1285_s18 + $0xd4] sm:$0xf0] }
  0x2a   : > { %v948_v21 = vor.u32 %v1063_v15, %v947_v14 }
  0x2b   : > { %509 = vmatmul.bf16.vlgmr.msra.gmra.mxu0 %v844_v24  ;;  %549 = vmatmul.bf16.vlgmr.msra.gmra.mxu2 %v908_v25  ;;  %v891_v24 = vld [vmem:[%s1285_s18 + $0x60] sm:$0xf]  ;;  %v1049_v25 = vld [vmem:[%s1285_s18 + $0x64] sm:$0xf0] }
  0x2c   : > { %598 = vmatmul.bf16.vlgmr.msra.gmra.mxu1 %v848_v26  ;;  %638 = vmatmul.bf16.vlgmr.msra.gmra.mxu3 %v912_v27  ;;  %v955_v26 = vld [vmem:[%s1285_s18 + $0xe0] sm:$0xf]  ;;  %v1065_v27 = vld [vmem:[%s1285_s18 + $0xe4] sm:$0xf0]  ;;  %v892_v32 = vor.u32 %v1049_v25, %v891_v24 }
  0x2d   : > { %v956_v33 = vor.u32 %v1065_v27, %v955_v26 }
  0x3b   : > { %514 = vmatmul.bf16.gmra.mxu0 %v852_v36  ;;  %554 = vmatmul.bf16.gmra.mxu2 %v916_v37  ;;  %v899_v36 = vld [vmem:[%s1285_s18 + $0x70] sm:$0xf]  ;;  %v1051_v37 = vld [vmem:[%s1285_s18 + $0x74] sm:$0xf0] }
  0x3c   : > { %603 = vmatmul.bf16.gmra.mxu1 %v856_v38  ;;  %643 = vmatmul.bf16.gmra.mxu3 %v920_v39  ;;  %v963_v38 = vld [vmem:[%s1285_s18 + $0xf0] sm:$0xf]  ;;  %v1067_v39 = vld [vmem:[%s1285_s18 + $0xf4] sm:$0xf0]  ;;  %v900_v44 = vor.u32 %v1051_v37, %v899_v36 }
  0x3d   : > { %v964_v45 = vor.u32 %v1067_v39, %v963_v38 }
  0x4b   : > { %519 = vmatmul.bf16.gmra.mxu0 %v860_v48  ;;  %559 = vmatmul.bf16.gmra.mxu2 %v924_v49  ;;  %v1363_v49 = vld [vmem:[%s1424_s2] ss:$0 sm:$0xff] }
  0x4c   : > { %608 = vmatmul.bf16.gmra.mxu1 %v864_v50  ;;  %648 = vmatmul.bf16.gmra.mxu3 %v928_v51 }
  0x5b   : > { %524 = vmatmul.bf16.gmra.mxu0 %v868_v60  ;;  %564 = vmatmul.bf16.gmra.mxu2 %v932_v61 }
  0x5c   : > { %613 = vmatmul.bf16.gmra.mxu1 %v872_v62  ;;  %653 = vmatmul.bf16.gmra.mxu3 %v936_v63 }
  0x6b   : > { %529 = vmatmul.bf16.gmra.mxu0 %v876_v8  ;;  %569 = vmatmul.bf16.gmra.mxu2 %v940_v9 }
  0x6c   : > { %618 = vmatmul.bf16.gmra.mxu1 %v880_v10  ;;  %658 = vmatmul.bf16.gmra.mxu3 %v944_v11 }
  0x7b   : > { %534 = vmatmul.bf16.gmra.mxu0 %v884_v20  ;;  %574 = vmatmul.bf16.gmra.mxu2 %v948_v21 }
  0x7c   : > { %623 = vmatmul.bf16.gmra.mxu1 %v888_v22  ;;  %663 = vmatmul.bf16.gmra.mxu3 %v952_v23 }
  0x8b   : > { %539 = vmatmul.bf16.gmra.mxu0 %v892_v32  ;;  %579 = vmatmul.bf16.gmra.mxu2 %v956_v33 }
  0x8c   : > { %628 = vmatmul.bf16.gmra.mxu1 %v896_v34  ;;  %668 = vmatmul.bf16.gmra.mxu3 %v960_v35 }
  0x9b   : > { %544 = vmatmul.bf16.gmra.mxu0 %v900_v44  ;;  %584 = vmatmul.bf16.gmra.mxu2 %v964_v45 }
  0x9c   : > { %633 = vmatmul.bf16.gmra.mxu1 %v904_v46  ;;  %673 = vmatmul.bf16.gmra.mxu3 %v968_v47 }
  0xa8   : > { %v510_v48 = vpop.f32.mrf.mxu0 }
  0xa9   : > { %v599_v50 = vpop.f32.mrf.mxu1  ;;  %v511_v51 = vadd.f32 %v1363_v49, %v510_v48 }
  0xab   : > { %v600_v55 = vadd.f32 %v599_v50, %v511_v51 }
  0xad   : > { %v679_v60 = vmax.f32 %v600_v55, 0.0 }
  0xae   : > { %v550_v52 = vpop.f32.mrf.mxu2 }
  0xaf   : > { %v639_v53 = vpop.f32.mrf.mxu3  ;;  %v551_v58 = vadd.f32 %v1363_v49, %v550_v52 }
  0xb0   : > { %v512_v54 = vpop.f32.mrf.mxu0 }
  0xb1   : > { %v513_v56 = vadd.f32 %v1363_v49, %v512_v54  ;;  %v601_v57 = vpop.f32.mrf.mxu1  ;;  %v640_v63 = vadd.f32 %v639_v53, %v551_v58 }
  0xb3   : > { %v602_v59 = vadd.f32 %v601_v57, %v513_v56  ;;  %v695_v6 = vmax.f32 %v640_v63, 0.0 }
  0xb5   : > { %v680_v61 = vmax.f32 %v602_v59, 0.0 }
  0xb6   : > { %v552_v62 = vpop.f32.mrf.mxu2 }
  0xb7   : > { %v1087_v0 = vpack.c.bf16 %v680_v61, %v679_v60  ;;  %v553_v1 = vadd.f32 %v1363_v49, %v552_v62  ;;  %v641_v2 = vpop.f32.mrf.mxu3 }
  0xb8   : > { %v515_v3 = vpop.f32.mrf.mxu0 }
  0xb9   : > { %1088 = vst [vmem:[%s1372_s4] sm:$0xff] %v1087_v0   ;;  %v642_v4 = vadd.f32 %v641_v2, %v553_v1  ;;  %v604_v5 = vpop.f32.mrf.mxu1  ;;  %v516_v9 = vadd.f32 %v1363_v49, %v515_v3 }
  0xbb   : > { %v696_v7 = vmax.f32 %v642_v4, 0.0  ;;  %v605_v13 = vadd.f32 %v604_v5, %v516_v9 }
  0xbd   : > { %v1127_v8 = vpack.c.bf16 %v696_v7, %v695_v6  ;;  %v681_v18 = vmax.f32 %v605_v13, 0.0 }
  0xbe   : > { %v555_v10 = vpop.f32.mrf.mxu2 }
  0xbf   : > { %1171 = vst [vmem:[%s1372_s4 + $0x40] sm:$0xff] %v1127_v8   ;;  %v644_v11 = vpop.f32.mrf.mxu3  ;;  %v556_v16 = vadd.f32 %v1363_v49, %v555_v10 }
  0xc0   : > { %v517_v12 = vpop.f32.mrf.mxu0 }
  0xc1   : > { %v518_v14 = vadd.f32 %v1363_v49, %v517_v12  ;;  %v606_v15 = vpop.f32.mrf.mxu1  ;;  %v645_v21 = vadd.f32 %v644_v11, %v556_v16 }
  0xc3   : > { %v607_v17 = vadd.f32 %v606_v15, %v518_v14  ;;  %v697_v28 = vmax.f32 %v645_v21, 0.0 }
  0xc5   : > { %v682_v19 = vmax.f32 %v607_v17, 0.0 }
  0xc6   : > { %v557_v20 = vpop.f32.mrf.mxu2 }
  0xc7   : > { %v1092_v22 = vpack.c.bf16 %v682_v19, %v681_v18  ;;  %v558_v23 = vadd.f32 %v1363_v49, %v557_v20  ;;  %v646_v24 = vpop.f32.mrf.mxu3 }
  0xc8   : > { %v520_v25 = vpop.f32.mrf.mxu0 }
  0xc9   : > { %1164 = vst [vmem:[%s1372_s4 + $0x8] sm:$0xff] %v1092_v22   ;;  %v647_v26 = vadd.f32 %v646_v24, %v558_v23  ;;  %v609_v27 = vpop.f32.mrf.mxu1  ;;  %v521_v31 = vadd.f32 %v1363_v49, %v520_v25 }
  0xcb   : > { %v698_v29 = vmax.f32 %v647_v26, 0.0  ;;  %v610_v35 = vadd.f32 %v609_v27, %v521_v31 }
  0xcd   : > { %v1132_v30 = vpack.c.bf16 %v698_v29, %v697_v28  ;;  %v683_v40 = vmax.f32 %v610_v35, 0.0 }
  0xce   : > { %v560_v32 = vpop.f32.mrf.mxu2 }
  0xcf   : > { %1172 = vst [vmem:[%s1372_s4 + $0x48] sm:$0xff] %v1132_v30   ;;  %v649_v33 = vpop.f32.mrf.mxu3  ;;  %v561_v38 = vadd.f32 %v1363_v49, %v560_v32 }
  0xd0   : > { %v522_v34 = vpop.f32.mrf.mxu0 }
  0xd1   : > { %v523_v36 = vadd.f32 %v1363_v49, %v522_v34  ;;  %v611_v37 = vpop.f32.mrf.mxu1  ;;  %v650_v43 = vadd.f32 %v649_v33, %v561_v38 }
  0xd3   : > { %v612_v39 = vadd.f32 %v611_v37, %v523_v36  ;;  %v699_v51 = vmax.f32 %v650_v43, 0.0 }
  0xd5   : > { %v684_v41 = vmax.f32 %v612_v39, 0.0 }
  0xd6   : > { %v562_v42 = vpop.f32.mrf.mxu2 }
  0xd7   : > { %v1097_v44 = vpack.c.bf16 %v684_v41, %v683_v40  ;;  %v563_v45 = vadd.f32 %v1363_v49, %v562_v42  ;;  %v651_v46 = vpop.f32.mrf.mxu3 }
  0xd8   : > { %v525_v47 = vpop.f32.mrf.mxu0 }
  0xd9   : > { %1165 = vst [vmem:[%s1372_s4 + $0x10] sm:$0xff] %v1097_v44   ;;  %v652_v48 = vadd.f32 %v651_v46, %v563_v45  ;;  %v614_v50 = vpop.f32.mrf.mxu1  ;;  %v526_v54 = vadd.f32 %v1363_v49, %v525_v47 }
  0xdb   : > { %v700_v52 = vmax.f32 %v652_v48, 0.0  ;;  %v615_v58 = vadd.f32 %v614_v50, %v526_v54 }
  0xdd   : > { %v1137_v53 = vpack.c.bf16 %v700_v52, %v699_v51  ;;  %v685_v63 = vmax.f32 %v615_v58, 0.0 }
  0xde   : > { %v565_v55 = vpop.f32.mrf.mxu2 }
  0xdf   : > { %1173 = vst [vmem:[%s1372_s4 + $0x50] sm:$0xff] %v1137_v53   ;;  %v654_v56 = vpop.f32.mrf.mxu3  ;;  %v566_v61 = vadd.f32 %v1363_v49, %v565_v55 }
  0xe0   : > { %v527_v57 = vpop.f32.mrf.mxu0 }
  0xe1   : > { %v528_v59 = vadd.f32 %v1363_v49, %v527_v57  ;;  %v616_v60 = vpop.f32.mrf.mxu1  ;;  %v655_v2 = vadd.f32 %v654_v56, %v566_v61 }
  0xe3   : > { %v617_v62 = vadd.f32 %v616_v60, %v528_v59  ;;  %v701_v9 = vmax.f32 %v655_v2, 0.0 }
  0xe5   : > { %v686_v0 = vmax.f32 %v617_v62, 0.0 }
  0xe6   : > { %v567_v1 = vpop.f32.mrf.mxu2 }
  0xe7   : > { %v1102_v3 = vpack.c.bf16 %v686_v0, %v685_v63  ;;  %v568_v4 = vadd.f32 %v1363_v49, %v567_v1  ;;  %v656_v5 = vpop.f32.mrf.mxu3 }
  0xe8   : > { %v530_v6 = vpop.f32.mrf.mxu0 }
  0xe9   : > { %1166 = vst [vmem:[%s1372_s4 + $0x18] sm:$0xff] %v1102_v3   ;;  %v657_v7 = vadd.f32 %v656_v5, %v568_v4  ;;  %v619_v8 = vpop.f32.mrf.mxu1  ;;  %v531_v12 = vadd.f32 %v1363_v49, %v530_v6 }
  0xeb   : > { %v702_v10 = vmax.f32 %v657_v7, 0.0  ;;  %v620_v16 = vadd.f32 %v619_v8, %v531_v12 }
  0xed   : > { %v1142_v11 = vpack.c.bf16 %v702_v10, %v701_v9  ;;  %v687_v21 = vmax.f32 %v620_v16, 0.0 }
  0xee   : > { %v570_v13 = vpop.f32.mrf.mxu2 }
  0xef   : > { %1174 = vst [vmem:[%s1372_s4 + $0x58] sm:$0xff] %v1142_v11   ;;  %v659_v14 = vpop.f32.mrf.mxu3  ;;  %v571_v19 = vadd.f32 %v1363_v49, %v570_v13 }
  0xf0   : > { %v532_v15 = vpop.f32.mrf.mxu0 }
  0xf1   : > { %v533_v17 = vadd.f32 %v1363_v49, %v532_v15  ;;  %v621_v18 = vpop.f32.mrf.mxu1  ;;  %v660_v24 = vadd.f32 %v659_v14, %v571_v19 }
  0xf3   : > { %v622_v20 = vadd.f32 %v621_v18, %v533_v17  ;;  %v703_v31 = vmax.f32 %v660_v24, 0.0 }
  0xf5   : > { %v688_v22 = vmax.f32 %v622_v20, 0.0 }
  0xf6   : > { %v572_v23 = vpop.f32.mrf.mxu2 }
  0xf7   : > { %v1107_v25 = vpack.c.bf16 %v688_v22, %v687_v21  ;;  %v573_v26 = vadd.f32 %v1363_v49, %v572_v23  ;;  %v661_v27 = vpop.f32.mrf.mxu3 }
  0xf8   : > { %v535_v28 = vpop.f32.mrf.mxu0 }
  0xf9   : > { %1167 = vst [vmem:[%s1372_s4 + $0x20] sm:$0xff] %v1107_v25   ;;  %v662_v29 = vadd.f32 %v661_v27, %v573_v26  ;;  %v624_v30 = vpop.f32.mrf.mxu1  ;;  %v536_v34 = vadd.f32 %v1363_v49, %v535_v28 }
  0xfb   : > { %v704_v32 = vmax.f32 %v662_v29, 0.0  ;;  %v625_v38 = vadd.f32 %v624_v30, %v536_v34 }
  0xfd   : > { %v1147_v33 = vpack.c.bf16 %v704_v32, %v703_v31  ;;  %v689_v43 = vmax.f32 %v625_v38, 0.0 }
  0xfe   : > { %v575_v35 = vpop.f32.mrf.mxu2 }
  0xff   : > { %1175 = vst [vmem:[%s1372_s4 + $0x60] sm:$0xff] %v1147_v33   ;;  %v664_v36 = vpop.f32.mrf.mxu3  ;;  %v576_v41 = vadd.f32 %v1363_v49, %v575_v35 }
 0x100   : > { %v537_v37 = vpop.f32.mrf.mxu0 }
 0x101   : > { %v538_v39 = vadd.f32 %v1363_v49, %v537_v37  ;;  %v626_v40 = vpop.f32.mrf.mxu1  ;;  %v665_v46 = vadd.f32 %v664_v36, %v576_v41 }
 0x103   : > { %v627_v42 = vadd.f32 %v626_v40, %v538_v39  ;;  %v705_v54 = vmax.f32 %v665_v46, 0.0 }
 0x105   : > { %v690_v44 = vmax.f32 %v627_v42, 0.0 }
 0x106   : > { %v577_v45 = vpop.f32.mrf.mxu2 }
 0x107   : > { %v1112_v47 = vpack.c.bf16 %v690_v44, %v689_v43  ;;  %v578_v48 = vadd.f32 %v1363_v49, %v577_v45  ;;  %v666_v50 = vpop.f32.mrf.mxu3 }
 0x108   : > { %v540_v51 = vpop.f32.mrf.mxu0 }
 0x109   : > { %1168 = vst [vmem:[%s1372_s4 + $0x28] sm:$0xff] %v1112_v47   ;;  %v667_v52 = vadd.f32 %v666_v50, %v578_v48  ;;  %v629_v53 = vpop.f32.mrf.mxu1  ;;  %v541_v57 = vadd.f32 %v1363_v49, %v540_v51 }
 0x10b   : > { %v706_v55 = vmax.f32 %v667_v52, 0.0  ;;  %v630_v61 = vadd.f32 %v629_v53, %v541_v57 }
 0x10d   : > { %v1152_v56 = vpack.c.bf16 %v706_v55, %v705_v54  ;;  %v691_v2 = vmax.f32 %v630_v61, 0.0 }
 0x10e   : > { %v580_v58 = vpop.f32.mrf.mxu2 }
 0x10f   : > { %1176 = vst [vmem:[%s1372_s4 + $0x68] sm:$0xff] %v1152_v56   ;;  %v669_v59 = vpop.f32.mrf.mxu3  ;;  %v581_v0 = vadd.f32 %v1363_v49, %v580_v58 }
 0x110   : > { %v542_v60 = vpop.f32.mrf.mxu0 }
 0x111   : > { %v543_v62 = vadd.f32 %v1363_v49, %v542_v60  ;;  %v631_v63 = vpop.f32.mrf.mxu1  ;;  %v670_v5 = vadd.f32 %v669_v59, %v581_v0 }
 0x113   : > { %v632_v1 = vadd.f32 %v631_v63, %v543_v62  ;;  %v707_v12 = vmax.f32 %v670_v5, 0.0 }
 0x115   : > { %v692_v3 = vmax.f32 %v632_v1, 0.0 }
 0x116   : > { %v582_v4 = vpop.f32.mrf.mxu2 }
 0x117   : > { %v1117_v6 = vpack.c.bf16 %v692_v3, %v691_v2  ;;  %v583_v7 = vadd.f32 %v1363_v49, %v582_v4  ;;  %v671_v8 = vpop.f32.mrf.mxu3 }
 0x118   : > { %v545_v9 = vpop.f32.mrf.mxu0 }
 0x119   : > { %1169 = vst [vmem:[%s1372_s4 + $0x30] sm:$0xff] %v1117_v6   ;;  %v672_v10 = vadd.f32 %v671_v8, %v583_v7  ;;  %v634_v11 = vpop.f32.mrf.mxu1  ;;  %v546_v15 = vadd.f32 %v1363_v49, %v545_v9 }
 0x11b   : > { %v708_v13 = vmax.f32 %v672_v10, 0.0  ;;  %v635_v19 = vadd.f32 %v634_v11, %v546_v15 }
 0x11d   : > { %v1157_v14 = vpack.c.bf16 %v708_v13, %v707_v12  ;;  %v693_v24 = vmax.f32 %v635_v19, 0.0 }
 0x11e   : > { %v585_v16 = vpop.f32.mrf.mxu2 }
 0x11f   : > { %1177 = vst [vmem:[%s1372_s4 + $0x70] sm:$0xff] %v1157_v14   ;;  %v674_v17 = vpop.f32.mrf.mxu3  ;;  %v586_v22 = vadd.f32 %v1363_v49, %v585_v16 }
 0x120   : > { %v547_v18 = vpop.f32.mrf.mxu0 }
 0x121   : > { %v548_v20 = vadd.f32 %v1363_v49, %v547_v18  ;;  %v636_v21 = vpop.f32.mrf.mxu1  ;;  %v675_v27 = vadd.f32 %v674_v17, %v586_v22 }
 0x123   : > { %v637_v23 = vadd.f32 %v636_v21, %v548_v20  ;;  %v709_v32 = vmax.f32 %v675_v27, 0.0 }
 0x125   : > { %v694_v25 = vmax.f32 %v637_v23, 0.0 }
 0x126   : > { %v587_v26 = vpop.f32.mrf.mxu2 }
 0x127   : > { %v1122_v28 = vpack.c.bf16 %v694_v25, %v693_v24  ;;  %v588_v29 = vadd.f32 %v1363_v49, %v587_v26  ;;  %v676_v30 = vpop.f32.mrf.mxu3 }
 0x129   : > { %1170 = vst [vmem:[%s1372_s4 + $0x38] sm:$0xff] %v1122_v28   ;;  %v677_v31 = vadd.f32 %v676_v30, %v588_v29 }
 0x12b   : > { %v710_v33 = vmax.f32 %v677_v31, 0.0 }
 0x12d   : > { %v1162_v34 = vpack.c.bf16 %v710_v33, %v709_v32 }
 0x12f   : > { %1178 = vst [vmem:[%s1372_s4 + $0x78] sm:$0xff] %v1162_v34  }
 0x130 PF: > { %s13_s12 = sadd.s32 1, %s1210_s12  }
 0x131   : > { %p10_p4 = scmp.ge.s32.totalorder %s13_s12, 4  }
 0x133   :  { %12 = sbr.rel (!%p10_p4) target bundleno = 1 (0x1), region = 62 }

// kernel: _lambda_.26
= control target key start
LH: loop header
LB: loop body
LE: loop exit
PB: predicated region body
PF: predicated region fallthrough
CT: control target
= control target key end

     0   :  { %s897_s6 = smov 0   ;;  %s899_s7 = smov 0   ;;  %s1080_s0 = inlined_call_operand.vmem [shape: bf16[2,36,9,128], index: 0, kind: input, shape index: {}]   ;;  %s1081_s1 = inlined_call_operand.vmem [shape: bf16[2,8,8,128], index: 1, kind: output, shape index: {}]  }
   0x1   :  { %s901_s8 = smov 0  }
   0x2 LB: > { %s23_s9 = sadd.s32 1, %s881_s7  ;;  %p752_p0 = scmp.ge.s32.totalorder %s885_s8, 1  ;;  %s885_s8 = sphi %s901_s8, %s11_s8   ;;  %s881_s7 = sphi %s899_s7, %s1083_s7   ;;  %s877_s6 = sphi %s897_s6, %s1082_s6  }
   0x3   : > { %p25_p1 = scmp.ge.s32.totalorder %s23_s9, 2  ;;  %p101_p2 = scmp.lt.s32.totalorder %s885_s8, 3 }
   0x5   : > { %s1085_s9 = smov (%p25_p1, %s23_s9), 0  ;;  %p102_p3 = pnand %p752_p0, %p101_p2 }
   0x6   : > { %p125_p4 = scmp.lt.s32.totalorder (!%p102_p3), %s877_s6, 1 }
   0x7   : > { %105 = sbr.rel (%p102_p3) target bundleno = 76 (0x4c), region = 24 }
   0xc   : > { %s1087_s6 = smov (!%p125_p4, %s877_s6), 1  ;;  %vm192_vm0 = vcmask 1046528  }
   0xd   : > { %s838_s10 = smul.u32 288, %s1087_s6  ;;  %s814_s14 = sshll.u32 %s1087_s6, 5 }
   0xe   : > { %s138_s17 = scalar_lea.vmem %s1081_s1, %s814_s14 }
   0xf   : > { %s921_s13 = scalar_lea.vmem %s1080_s0, %s838_s10 }
  0x10   : > { %v144_v0 = vld [vmem:[%s921_s13] sm:$0xf]  ;;  %v145_v1 = vld [vmem:[%s921_s13 + $0x4] sm:$0x1]  ;;  %v146_v2 = vld [vmem:[%s921_s13 + $0x8] sm:$0xf] }
  0x11   : > { %v147_v3 = vld [vmem:[%s921_s13 + $0xc] sm:$0x1]  ;;  %v148_v4 = vld [vmem:[%s921_s13 + $0x10] sm:$0xf]  ;;  %v149_v5 = vld [vmem:[%s921_s13 + $0x14] sm:$0x1]  ;;  %v160_v6 = vunpack.c.l.bf16 %v144_v0  ;;  %v161_v10 = vunpack.c.l.bf16 %v146_v2  ;;  %v168_v11 = vunpack.c.l.bf16 %v145_v1 }
  0x12   : > { %v150_v7 = vld [vmem:[%s921_s13 + $0x18] sm:$0xf]  ;;  %v151_v8 = vld [vmem:[%s921_s13 + $0x1c] sm:$0x1]  ;;  %v152_v9 = vld [vmem:[%s921_s13 + $0x20] sm:$0xf]  ;;  %v169_v12 = vunpack.c.l.bf16 %v147_v3  ;;  %v162_v16 = vunpack.c.l.bf16 %v148_v4  ;;  %v170_v18 = vunpack.c.l.bf16 %v149_v5 }
  0x13   : > { %v153_v13 = vld [vmem:[%s921_s13 + $0x24] sm:$0x1]  ;;  %v154_v14 = vld [vmem:[%s921_s13 + $0x28] sm:$0xf]  ;;  %v155_v15 = vld [vmem:[%s921_s13 + $0x2c] sm:$0x1]  ;;  %v163_v17 = vunpack.c.l.bf16 %v150_v7  ;;  %v171_v19 = vunpack.c.l.bf16 %v151_v8  ;;  %v164_v23 = vunpack.c.l.bf16 %v152_v9 }
  0x14   : > { %v156_v20 = vld [vmem:[%s921_s13 + $0x30] sm:$0xf]  ;;  %v157_v21 = vld [vmem:[%s921_s13 + $0x34] sm:$0x1]  ;;  %v158_v22 = vld [vmem:[%s921_s13 + $0x38] sm:$0xf]  ;;  %v165_v24 = vunpack.c.l.bf16 %v154_v14  ;;  %v172_v25 = vunpack.c.l.bf16 %v153_v13  ;;  %v173_v26 = vunpack.c.l.bf16 %v155_v15 }
  0x15   : > { %v159_v27 = vld [vmem:[%s921_s13 + $0x3c] sm:$0x1]  ;;  %v166_v28 = vunpack.c.l.bf16 %v156_v20  ;;  %v167_v29 = vunpack.c.l.bf16 %v158_v22  ;;  %v174_v30 = vunpack.c.l.bf16 %v157_v21  ;;  %v193_v31 = vrot.slane %v160_v6, 1  ;;  %v756_v48 = vld [vmem:[%s921_s13 + $0x48] sm:$0xf] }
  0x16   : > { %v175_v32 = vunpack.c.l.bf16 %v159_v27  ;;  %v194_v33 = vrot.slane %v168_v11, 1  ;;  %v196_v34 = vrot.slane %v161_v10, 1  ;;  %v197_v35 = vrot.slane %v169_v12, 1  ;;  %v757_v49 = vld [vmem:[%s921_s13 + $0x50] sm:$0xf] }
  0x17   : > { %v199_v36 = vrot.slane %v162_v16, 1  ;;  %v200_v37 = vrot.slane %v170_v18, 1  ;;  %v202_v38 = vrot.slane %v163_v17, 1  ;;  %v203_v39 = vrot.slane %v171_v19, 1  ;;  %v758_v54 = vld [vmem:[%s921_s13 + $0x58] sm:$0xf] }
  0x18   : > { %v195_v40 = vsel %vm192_vm0, %v193_v31, %v194_v33  ;;  %v198_v41 = vsel %vm192_vm0, %v196_v34, %v197_v35  ;;  %v205_v42 = vrot.slane %v164_v23, 1  ;;  %v206_v43 = vrot.slane %v172_v25, 1  ;;  %v759_v59 = vld [vmem:[%s921_s13 + $0x60] sm:$0xf]  ;;  %v760_v60 = vld [vmem:[%s921_s13 + $0x68] sm:$0xf] }
  0x19   : > { %v201_v44 = vsel %vm192_vm0, %v199_v36, %v200_v37  ;;  %v204_v45 = vsel %vm192_vm0, %v202_v38, %v203_v39  ;;  %v208_v46 = vrot.slane %v165_v24, 1  ;;  %v209_v47 = vrot.slane %v173_v26, 1  ;;  %v761_v1 = vld [vmem:[%s921_s13 + $0x70] sm:$0xf]  ;;  %v762_v2 = vld [vmem:[%s921_s13 + $0x78] sm:$0xf] }
  0x1a   : > { %v207_v50 = vsel %vm192_vm0, %v205_v42, %v206_v43  ;;  %v211_v51 = vrot.slane %v166_v28, 1  ;;  %v212_v52 = vrot.slane %v174_v30, 1  ;;  %v214_v53 = vrot.slane %v167_v29, 1  ;;  %v763_v3 = vld [vmem:[%s921_s13 + $0x80] sm:$0xf] }
  0x1b   : > { %v210_v55 = vsel %vm192_vm0, %v208_v46, %v209_v47  ;;  %v215_v56 = vrot.slane %v175_v32, 1  ;;  %v225_v57 = vmax.f32 %v160_v6, %v195_v40  ;;  %v226_v58 = vmax.f32 %v161_v10, %v198_v41  ;;  %v764_v12 = vld [vmem:[%s921_s13 + $0x90] sm:$0xf]  ;;  %v766_v13 = vld [vmem:[%s921_s13 + $0x98] sm:$0xf] }
  0x1c   : > { %v213_v61 = vsel %vm192_vm0, %v211_v51, %v212_v52  ;;  %v227_v62 = vmax.f32 %v162_v16, %v201_v44  ;;  %v228_v63 = vmax.f32 %v163_v17, %v204_v45  ;;  %v229_v0 = vmax.f32 %v164_v23, %v207_v50  ;;  %v768_v18 = vld [vmem:[%s921_s13 + $0xa0] sm:$0xf]  ;;  %v770_v19 = vld [vmem:[%s921_s13 + $0xa8] sm:$0xf]  ;;  %v772_v20 = vld [vmem:[%s921_s13 + $0xb0] sm:$0xf] }
  0x1d   : > { %v216_v4 = vsel %vm192_vm0, %v214_v53, %v215_v56  ;;  %v230_v5 = vmax.f32 %v165_v24, %v210_v55  ;;  %v231_v6 = vmax.f32 %v166_v28, %v213_v61  ;;  %v261_v7 = vunpack.c.l.bf16 %v756_v48  ;;  %v774_v25 = vld [vmem:[%s921_s13 + $0xb8] sm:$0xf]  ;;  %v776_v26 = vld [vmem:[%s921_s13 + $0xc0] sm:$0xf]  ;;  %v778_v27 = vld [vmem:[%s921_s13 + $0xc8] sm:$0xf] }
  0x1e   : > { %v232_v8 = vmax.f32 %v167_v29, %v216_v4  ;;  %v262_v9 = vunpack.c.l.bf16 %v757_v49  ;;  %v263_v10 = vunpack.c.l.bf16 %v758_v54  ;;  %v264_v11 = vunpack.c.l.bf16 %v759_v59  ;;  %v765_v32 = vld [vmem:[%s921_s13 + $0x94] sm:$0x1]  ;;  %v767_v33 = vld [vmem:[%s921_s13 + $0x9c] sm:$0x1]  ;;  %v769_v38 = vld [vmem:[%s921_s13 + $0xa4] sm:$0x1] }
  0x1f   : > { %v265_v14 = vunpack.c.l.bf16 %v760_v60  ;;  %v266_v15 = vunpack.c.l.bf16 %v761_v1  ;;  %v267_v16 = vunpack.c.l.bf16 %v762_v2  ;;  %v268_v17 = vunpack.c.l.bf16 %v763_v3  ;;  %v771_v39 = vld [vmem:[%s921_s13 + $0xac] sm:$0x1]  ;;  %v773_v40 = vld [vmem:[%s921_s13 + $0xb4] sm:$0x1]  ;;  %v775_v45 = vld [vmem:[%s921_s13 + $0xbc] sm:$0x1] }
  0x20   : > { %v269_v21 = vmax.f32 %v225_v57, %v261_v7  ;;  %v270_v22 = vmax.f32 %v226_v58, %v262_v9  ;;  %v271_v23 = vmax.f32 %v227_v62, %v263_v10  ;;  %v272_v24 = vmax.f32 %v228_v63, %v264_v11  ;;  %v777_v46 = vld [vmem:[%s921_s13 + $0xc4] sm:$0x1]  ;;  %v779_v47 = vld [vmem:[%s921_s13 + $0xcc] sm:$0x1] }
  0x21   : > { %v273_v28 = vmax.f32 %v229_v0, %v265_v14  ;;  %v274_v29 = vmax.f32 %v230_v5, %v266_v15  ;;  %v275_v30 = vmax.f32 %v231_v6, %v267_v16  ;;  %v276_v31 = vmax.f32 %v232_v8, %v268_v17  ;;  %v780_v16 = vld [vmem:[%s921_s13 + $0xd8] sm:$0xf]  ;;  %v781_v17 = vld [vmem:[%s921_s13 + $0xe0] sm:$0xf] }
  0x22   : > { %v313_v34 = vunpack.c.l.bf16 %v764_v12  ;;  %v314_v35 = vunpack.c.l.bf16 %v766_v13  ;;  %v315_v36 = vunpack.c.l.bf16 %v768_v18  ;;  %v316_v37 = vunpack.c.l.bf16 %v770_v19 }
  0x23   : > { %v317_v41 = vunpack.c.l.bf16 %v772_v20  ;;  %v318_v42 = vunpack.c.l.bf16 %v774_v25  ;;  %v319_v43 = vunpack.c.l.bf16 %v776_v26  ;;  %v320_v44 = vunpack.c.l.bf16 %v778_v27  ;;  %v783_v27 = vld [vmem:[%s921_s13 + $0xf0] sm:$0xf] }
  0x24   : > { %v971_v48 = vmax.f32 %v269_v21, %v313_v34  ;;  %v973_v49 = vmax.f32 %v270_v22, %v314_v35  ;;  %v975_v50 = vmax.f32 %v271_v23, %v315_v36  ;;  %v977_v51 = vmax.f32 %v272_v24, %v316_v37  ;;  %v782_v22 = vld [vmem:[%s921_s13 + $0xe8] sm:$0xf] }
  0x25   : > { %v979_v52 = vmax.f32 %v273_v28, %v317_v41  ;;  %v981_v53 = vmax.f32 %v274_v29, %v318_v42  ;;  %v983_v54 = vmax.f32 %v275_v30, %v319_v43  ;;  %v985_v55 = vmax.f32 %v276_v31, %v320_v44  ;;  %v784_v28 = vld [vmem:[%s921_s13 + $0xf8] sm:$0xf] }
  0x26   : > { %v345_v56 = vunpack.c.l.bf16 %v765_v32  ;;  %v346_v57 = vunpack.c.l.bf16 %v767_v33  ;;  %v347_v58 = vunpack.c.l.bf16 %v769_v38  ;;  %v348_v59 = vunpack.c.l.bf16 %v771_v39  ;;  %v785_v33 = vld [vmem:[%s921_s13 + $0x100] sm:$0xf] }
  0x27   : > { %v349_v60 = vunpack.c.l.bf16 %v773_v40  ;;  %v350_v61 = vunpack.c.l.bf16 %v775_v45  ;;  %v351_v62 = vunpack.c.l.bf16 %v777_v46  ;;  %v352_v63 = vunpack.c.l.bf16 %v779_v47  ;;  %v790_v45 = vld [vmem:[%s921_s13 + $0x10] sm:$0xf] }
  0x28   : > { %v369_v0 = vrot.slane %v313_v34, 1  ;;  %v370_v1 = vrot.slane %v345_v56, 1  ;;  %v372_v2 = vrot.slane %v314_v35, 1  ;;  %v373_v3 = vrot.slane %v346_v57, 1  ;;  %v786_v34 = vld [vmem:[%s921_s13 + $0x108] sm:$0xf] }
  0x29   : > { %v375_v4 = vrot.slane %v315_v36, 1  ;;  %v376_v5 = vrot.slane %v347_v58, 1  ;;  %v378_v6 = vrot.slane %v316_v37, 1  ;;  %v379_v7 = vrot.slane %v348_v59, 1  ;;  %v787_v35 = vld [vmem:[%s921_s13 + $0x110] sm:$0xf] }
  0x2a   : > { %v371_v8 = vsel %vm192_vm0, %v369_v0, %v370_v1  ;;  %v374_v9 = vsel %vm192_vm0, %v372_v2, %v373_v3  ;;  %v381_v10 = vrot.slane %v317_v41, 1  ;;  %v382_v11 = vrot.slane %v349_v60, 1  ;;  %v798_v57 = vld [vmem:[%s921_s13 + $0x30] sm:$0xf]  ;;  %v800_v58 = vld [vmem:[%s921_s13 + $0x38] sm:$0xf] }
  0x2b   : > { %v377_v12 = vsel %vm192_vm0, %v375_v4, %v376_v5  ;;  %v380_v13 = vsel %vm192_vm0, %v378_v6, %v379_v7  ;;  %v384_v14 = vrot.slane %v318_v42, 1  ;;  %v385_v15 = vrot.slane %v350_v61, 1  ;;  %v802_v59 = vld [vmem:[%s921_s13 + $0x40] sm:$0xf]  ;;  %v789_v0 = vld [vmem:[%s921_s13 + $0xc] sm:$0x1] }
  0x2c   : > { %v383_v18 = vsel %vm192_vm0, %v381_v10, %v382_v11  ;;  %v387_v19 = vrot.slane %v319_v43, 1  ;;  %v388_v20 = vrot.slane %v351_v62, 1  ;;  %v390_v21 = vrot.slane %v320_v44, 1  ;;  %v788_v44 = vld [vmem:[%s921_s13 + $0x8] sm:$0xf] }
  0x2d   : > { %v386_v23 = vsel %vm192_vm0, %v384_v14, %v385_v15  ;;  %v391_v24 = vrot.slane %v352_v63, 1  ;;  %v401_v25 = vmax.f32 %v971_v48, %v371_v8  ;;  %v402_v26 = vmax.f32 %v973_v49, %v374_v9  ;;  %v791_v1 = vld [vmem:[%s921_s13 + $0x14] sm:$0x1]  ;;  %v793_v6 = vld [vmem:[%s921_s13 + $0x1c] sm:$0x1] }
  0x2e   : > { %v389_v29 = vsel %vm192_vm0, %v387_v19, %v388_v20  ;;  %v403_v30 = vmax.f32 %v975_v50, %v377_v12  ;;  %v404_v31 = vmax.f32 %v977_v51, %v380_v13  ;;  %v405_v32 = vmax.f32 %v979_v52, %v383_v18  ;;  %v792_v50 = vld [vmem:[%s921_s13 + $0x18] sm:$0xf]  ;;  %v794_v51 = vld [vmem:[%s921_s13 + $0x20] sm:$0xf]  ;;  %v796_v52 = vld [vmem:[%s921_s13 + $0x28] sm:$0xf] }
  0x2f   : > { %v392_v36 = vsel %vm192_vm0, %v390_v21, %v391_v24  ;;  %v406_v37 = vmax.f32 %v981_v53, %v386_v23  ;;  %v407_v38 = vmax.f32 %v983_v54, %v389_v29  ;;  %v437_v39 = vunpack.c.l.bf16 %v780_v16  ;;  %v795_v7 = vld [vmem:[%s921_s13 + $0x24] sm:$0x1]  ;;  %v797_v8 = vld [vmem:[%s921_s13 + $0x2c] sm:$0x1]  ;;  %v799_v13 = vld [vmem:[%s921_s13 + $0x34] sm:$0x1] }
  0x30   : > { %v408_v40 = vmax.f32 %v985_v55, %v392_v36  ;;  %v438_v41 = vunpack.c.l.bf16 %v781_v17  ;;  %v439_v42 = vunpack.c.l.bf16 %v782_v22  ;;  %v440_v43 = vunpack.c.l.bf16 %v783_v27  ;;  %v801_v14 = vld [vmem:[%s921_s13 + $0x3c] sm:$0x1]  ;;  %v803_v15 = vld [vmem:[%s921_s13 + $0x44] sm:$0x1] }
  0x31   : > { %v441_v46 = vunpack.c.l.bf16 %v784_v28  ;;  %v442_v47 = vunpack.c.l.bf16 %v785_v33  ;;  %v443_v48 = vunpack.c.l.bf16 %v786_v34  ;;  %v444_v49 = vunpack.c.l.bf16 %v787_v35 }
  0x32   : > { %v445_v53 = vmax.f32 %v401_v25, %v437_v39  ;;  %v446_v54 = vmax.f32 %v402_v26, %v438_v41  ;;  %v447_v55 = vmax.f32 %v403_v30, %v439_v42  ;;  %v448_v56 = vmax.f32 %v404_v31, %v440_v43 }
  0x33   : > { %v449_v60 = vmax.f32 %v405_v32, %v441_v46  ;;  %v450_v61 = vmax.f32 %v406_v37, %v442_v47  ;;  %v451_v62 = vmax.f32 %v407_v38, %v443_v48  ;;  %v452_v63 = vmax.f32 %v408_v40, %v444_v49  ;;  %v804_v48 = vld [vmem:[%s921_s13 + $0x50] sm:$0xf]  ;;  %v805_v49 = vld [vmem:[%s921_s13 + $0x58] sm:$0xf] }
  0x34   : > { %v489_v2 = vunpack.c.l.bf16 %v788_v44  ;;  %v490_v3 = vunpack.c.l.bf16 %v790_v45  ;;  %v491_v4 = vunpack.c.l.bf16 %v792_v50  ;;  %v492_v5 = vunpack.c.l.bf16 %v794_v51 }
  0x35   : > { %v493_v9 = vunpack.c.l.bf16 %v796_v52  ;;  %v494_v10 = vunpack.c.l.bf16 %v798_v57  ;;  %v495_v11 = vunpack.c.l.bf16 %v800_v58  ;;  %v496_v12 = vunpack.c.l.bf16 %v802_v59  ;;  %v807_v59 = vld [vmem:[%s921_s13 + $0x68] sm:$0xf] }
  0x36   : > { %v1027_v16 = vmax.f32 %v445_v53, %v489_v2  ;;  %v1029_v17 = vmax.f32 %v446_v54, %v490_v3  ;;  %v1031_v18 = vmax.f32 %v447_v55, %v491_v4  ;;  %v1033_v19 = vmax.f32 %v448_v56, %v492_v5  ;;  %v806_v54 = vld [vmem:[%s921_s13 + $0x60] sm:$0xf] }
  0x37   : > { %v1035_v20 = vmax.f32 %v449_v60, %v493_v9  ;;  %v1037_v21 = vmax.f32 %v450_v61, %v494_v10  ;;  %v1039_v22 = vmax.f32 %v451_v62, %v495_v11  ;;  %v1041_v23 = vmax.f32 %v452_v63, %v496_v12  ;;  %v808_v60 = vld [vmem:[%s921_s13 + $0x70] sm:$0xf] }
  0x38   : > { %v521_v24 = vunpack.c.l.bf16 %v789_v0  ;;  %v522_v25 = vunpack.c.l.bf16 %v791_v1  ;;  %v523_v26 = vunpack.c.l.bf16 %v793_v6  ;;  %v524_v27 = vunpack.c.l.bf16 %v795_v7  ;;  %v809_v1 = vld [vmem:[%s921_s13 + $0x78] sm:$0xf] }
  0x39   : > { %v525_v28 = vunpack.c.l.bf16 %v797_v8  ;;  %v526_v29 = vunpack.c.l.bf16 %v799_v13  ;;  %v527_v30 = vunpack.c.l.bf16 %v801_v14  ;;  %v528_v31 = vunpack.c.l.bf16 %v803_v15 }
  0x3a   : > { %v545_v32 = vrot.slane %v489_v2, 1  ;;  %v546_v33 = vrot.slane %v521_v24, 1  ;;  %v548_v34 = vrot.slane %v490_v3, 1  ;;  %v549_v35 = vrot.slane %v522_v25, 1  ;;  %v810_v2 = vld [vmem:[%s921_s13 + $0x80] sm:$0xf] }
  0x3b   : > { %v551_v36 = vrot.slane %v491_v4, 1  ;;  %v552_v37 = vrot.slane %v523_v26, 1  ;;  %v554_v38 = vrot.slane %v492_v5, 1  ;;  %v555_v39 = vrot.slane %v524_v27, 1  ;;  %v811_v3 = vld [vmem:[%s921_s13 + $0x88] sm:$0xf] }
  0x3c   : > { %v547_v40 = vsel %vm192_vm0, %v545_v32, %v546_v33  ;;  %v550_v41 = vsel %vm192_vm0, %v548_v34, %v549_v35  ;;  %v557_v42 = vrot.slane %v493_v9, 1  ;;  %v558_v43 = vrot.slane %v525_v28, 1 }
  0x3d   : > { %v553_v44 = vsel %vm192_vm0, %v551_v36, %v552_v37  ;;  %v556_v45 = vsel %vm192_vm0, %v554_v38, %v555_v39  ;;  %v560_v46 = vrot.slane %v494_v10, 1  ;;  %v561_v47 = vrot.slane %v526_v29, 1 }
  0x3e   : > { %v559_v50 = vsel %vm192_vm0, %v557_v42, %v558_v43  ;;  %v563_v51 = vrot.slane %v495_v11, 1  ;;  %v564_v52 = vrot.slane %v527_v30, 1  ;;  %v566_v53 = vrot.slane %v496_v12, 1 }
  0x3f   : > { %v562_v55 = vsel %vm192_vm0, %v560_v46, %v561_v47  ;;  %v567_v56 = vrot.slane %v528_v31, 1  ;;  %v577_v57 = vmax.f32 %v1027_v16, %v547_v40  ;;  %v578_v58 = vmax.f32 %v1029_v17, %v550_v41 }
  0x40   : > { %v565_v61 = vsel %vm192_vm0, %v563_v51, %v564_v52  ;;  %v579_v62 = vmax.f32 %v1031_v18, %v553_v44  ;;  %v580_v63 = vmax.f32 %v1033_v19, %v556_v45  ;;  %v581_v0 = vmax.f32 %v1035_v20, %v559_v50 }
  0x41   : > { %v568_v4 = vsel %vm192_vm0, %v566_v53, %v567_v56  ;;  %v582_v5 = vmax.f32 %v1037_v21, %v562_v55  ;;  %v583_v6 = vmax.f32 %v1039_v22, %v565_v61  ;;  %v613_v7 = vunpack.c.l.bf16 %v804_v48 }
  0x42   : > { %v584_v8 = vmax.f32 %v1041_v23, %v568_v4  ;;  %v614_v9 = vunpack.c.l.bf16 %v805_v49  ;;  %v615_v10 = vunpack.c.l.bf16 %v806_v54  ;;  %v616_v11 = vunpack.c.l.bf16 %v807_v59 }
  0x43   : > { %v617_v12 = vunpack.c.l.bf16 %v808_v60  ;;  %v618_v13 = vunpack.c.l.bf16 %v809_v1  ;;  %v619_v14 = vunpack.c.l.bf16 %v810_v2  ;;  %v620_v15 = vunpack.c.l.bf16 %v811_v3 }
  0x44   : > { %v621_v16 = vmax.f32 %v577_v57, %v613_v7  ;;  %v622_v17 = vmax.f32 %v578_v58, %v614_v9  ;;  %v623_v18 = vmax.f32 %v579_v62, %v615_v10  ;;  %v624_v19 = vmax.f32 %v580_v63, %v616_v11 }
  0x45   : > { %v625_v20 = vmax.f32 %v581_v0, %v617_v12  ;;  %v626_v21 = vmax.f32 %v582_v5, %v618_v13  ;;  %v627_v22 = vmax.f32 %v583_v6, %v619_v14  ;;  %v628_v24 = vmax.f32 %v584_v8, %v620_v15 }
  0x46   : > { %v818_v23 = vpack.c.bf16 %v622_v17, %v621_v16  ;;  %v823_v25 = vpack.c.bf16 %v624_v19, %v623_v18 }
  0x47   : > { %v828_v26 = vpack.c.bf16 %v626_v21, %v625_v20  ;;  %v833_v27 = vpack.c.bf16 %v628_v24, %v627_v22 }
  0x48   : > { %819 = vst [vmem:[%s138_s17] sm:$0xff] %v818_v23  }
  0x49   : > { %835 = vst [vmem:[%s138_s17 + $0x8] sm:$0xff] %v823_v25  }
  0x4a   : > { %836 = vst [vmem:[%s138_s17 + $0x10] sm:$0xff] %v828_v26  }
  0x4b   : > { %837 = vst [vmem:[%s138_s17 + $0x18] sm:$0xff] %v833_v27  }
  0x4c PF: > { %s11_s8 = sadd.s32 1, %s885_s8   ;;  %s1082_s6 = smov %s881_s7 }
  0x4d   : > { %p8_p5 = scmp.ge.s32.totalorder %s11_s8, 4   ;;  %s1083_s7 = smov %s1085_s9 }
  0x4f   :  { %10 = sbr.rel (!%p8_p5) target bundleno = 2 (0x2), region = 60 }

// kernel: _lambda_.29
= control target key start
LH: loop header
LB: loop body
LE: loop exit
PB: predicated region body
PF: predicated region fallthrough
CT: control target
= control target key end

     0   :  { %s530_s12 = smov 0   ;;  %s581_s0 = inlined_call_operand.vmem [shape: bf16[128,128], index: 0, kind: input, shape index: {}]   ;;  %s582_s1 = inlined_call_operand.vmem [shape: bf16[128,128], index: 1, kind: input, shape index: {}]   ;;  %s583_s2 = inlined_call_operand.vmem [shape: f32[1,128], index: 2, kind: input, shape index: {}]   ;;  %s584_s3 = inlined_call_operand.vmem [shape: bf16[128,128], index: 3, kind: output, shape index: {}]  }
   0x1 LB: > { %s375_s13 = sadd.s32 4294967295, %s508_s12   ;;  %p379_p0 = scmp.ge.s32.totalorder %s508_s12, 1  ;;  %s508_s12 = sphi %s530_s12, %s13_s12  }
   0x2   : > { %p138_p1 = scmp.lt.s32.totalorder %s508_s12, 3 }
   0x4   : > { %p139_p2 = pnand %p379_p0, %p138_p1 }
   0x5   : > { %s380_s22 = sshll.u32 (!%p139_p2), %s375_s13, 3 }
   0x6   : > { %142 = sbr.rel (%p139_p2) target bundleno = 190 (0xbe), region = 32  ;;  %p163_p3 = scmp.lt.s32.totalorder (!%p139_p2), %s380_s22, 15 }
   0xb   : > { %v445_v0 = vld [vmem:[%s582_s1 + $0x38] sm:$0xff]  ;;  %v444_v1 = vld [vmem:[%s582_s1 + $0x30] sm:$0xff]  ;;  %v443_v2 = vld [vmem:[%s582_s1 + $0x28] sm:$0xff]  ;;  %s586_s22 = smov (!%p163_p3, %s380_s22), 15 }
   0xc   : > { %274 = vmatpush.bf16.msra.mxu0 %v445_v0  ;;  %469 = vmatpush.bf16.msra.mxu1 %v445_v0  ;;  %v442_v3 = vld [vmem:[%s582_s1 + $0x20] sm:$0xff]  ;;  %v441_v4 = vld [vmem:[%s582_s1 + $0x18] sm:$0xff]  ;;  %v440_v5 = vld [vmem:[%s582_s1 + $0x10] sm:$0xff]  ;;  %s381_s29 = sshll.u32 %s586_s22, 2 }
   0xd   : > { %470 = vmatpush.bf16.msra.mxu2 %v445_v0  ;;  %471 = vmatpush.bf16.msra.mxu3 %v445_v0  ;;  %v439_v6 = vld [vmem:[%s582_s1 + $0x8] sm:$0xff]  ;;  %v438_v7 = vld [vmem:[%s582_s1] sm:$0xff]  ;;  %s166_s7 = scalar_lea.vmem %s581_s0, %s381_s29  ;;  %s172_s13 = scalar_lea.vmem %s584_s3, %s381_s29 }
   0xe   : > { %v434_v8 = vld [vmem:[%s166_s7] sm:$0xff]  ;;  %v435_v9 = vld [vmem:[%s166_s7 + $0x8] sm:$0xff]  ;;  %v436_v10 = vld [vmem:[%s166_s7 + $0x10] sm:$0xff] }
   0xf   : > { %v437_v11 = vld [vmem:[%s166_s7 + $0x18] sm:$0xff]  ;;  %v501_v14 = vld [vmem:[%s583_s2] ss:$0 sm:$0xff] }
  0x10   : > { %275 = vmatpush.bf16.msra.mxu0 %v444_v1  ;;  %472 = vmatpush.bf16.msra.mxu1 %v444_v1 }
  0x11   : > { %473 = vmatpush.bf16.msra.mxu2 %v444_v1  ;;  %474 = vmatpush.bf16.msra.mxu3 %v444_v1 }
  0x14   : > { %276 = vmatpush.bf16.msra.mxu0 %v443_v2  ;;  %475 = vmatpush.bf16.msra.mxu1 %v443_v2 }
  0x15   : > { %476 = vmatpush.bf16.msra.mxu2 %v443_v2  ;;  %477 = vmatpush.bf16.msra.mxu3 %v443_v2 }
  0x18   : > { %277 = vmatpush.bf16.msra.mxu0 %v442_v3  ;;  %478 = vmatpush.bf16.msra.mxu1 %v442_v3 }
  0x19   : > { %479 = vmatpush.bf16.msra.mxu2 %v442_v3  ;;  %480 = vmatpush.bf16.msra.mxu3 %v442_v3 }
  0x1c   : > { %278 = vmatpush.bf16.msra.mxu0 %v441_v4  ;;  %481 = vmatpush.bf16.msra.mxu1 %v441_v4 }
  0x1d   : > { %482 = vmatpush.bf16.msra.mxu2 %v441_v4  ;;  %483 = vmatpush.bf16.msra.mxu3 %v441_v4 }
  0x20   : > { %279 = vmatpush.bf16.msra.mxu0 %v440_v5  ;;  %484 = vmatpush.bf16.msra.mxu1 %v440_v5 }
  0x21   : > { %485 = vmatpush.bf16.msra.mxu2 %v440_v5  ;;  %486 = vmatpush.bf16.msra.mxu3 %v440_v5 }
  0x24   : > { %280 = vmatpush.bf16.msra.mxu0 %v439_v6  ;;  %487 = vmatpush.bf16.msra.mxu1 %v439_v6 }
  0x25   : > { %488 = vmatpush.bf16.msra.mxu2 %v439_v6  ;;  %489 = vmatpush.bf16.msra.mxu3 %v439_v6 }
  0x28   : > { %281 = vmatpush.bf16.msra.mxu0 %v438_v7  ;;  %490 = vmatpush.bf16.msra.mxu1 %v438_v7 }
  0x29   : > { %491 = vmatpush.bf16.msra.mxu2 %v438_v7  ;;  %492 = vmatpush.bf16.msra.mxu3 %v438_v7 }
  0x2b   : > { %282 = vmatmul.bf16.vlgmr.msra.gmra.mxu0 %v434_v8  ;;  %287 = vmatmul.bf16.vlgmr.msra.gmra.mxu1 %v435_v9 }
  0x2c   : > { %292 = vmatmul.bf16.vlgmr.msra.gmra.mxu2 %v436_v10  ;;  %297 = vmatmul.bf16.vlgmr.msra.gmra.mxu3 %v437_v11 }
  0xa8   : > { %v283_v12 = vpop.f32.mrf.mxu0  ;;  %v288_v13 = vpop.f32.mrf.mxu1 }
  0xa9   : > { %v284_v19 = vadd.f32 %v501_v14, %v283_v12  ;;  %v289_v20 = vadd.f32 %v501_v14, %v288_v13 }
  0xaf   : > { %v293_v15 = vpop.f32.mrf.mxu2  ;;  %v298_v16 = vpop.f32.mrf.mxu3 }
  0xb0   : > { %v285_v17 = vpop.f32.mrf.mxu0  ;;  %v290_v18 = vpop.f32.mrf.mxu1  ;;  %v294_v27 = vadd.f32 %v501_v14, %v293_v15  ;;  %v299_v28 = vadd.f32 %v501_v14, %v298_v16 }
  0xb1   : > { %v286_v21 = vadd.f32 %v501_v14, %v285_v17  ;;  %v291_v22 = vadd.f32 %v501_v14, %v290_v18 }
  0xb3   : > { %v449_v23 = vpack.c.bf16 %v286_v21, %v284_v19  ;;  %v454_v24 = vpack.c.bf16 %v291_v22, %v289_v20 }
  0xb5   : > { %450 = vst [vmem:[%s172_s13] sm:$0xff] %v449_v23  }
  0xb6   : > { %466 = vst [vmem:[%s172_s13 + $0x8] sm:$0xff] %v454_v24  }
  0xb7   : > { %v295_v25 = vpop.f32.mrf.mxu2  ;;  %v300_v26 = vpop.f32.mrf.mxu3 }
  0xb8   : > { %v296_v29 = vadd.f32 %v501_v14, %v295_v25  ;;  %v301_v30 = vadd.f32 %v501_v14, %v300_v26 }
  0xba   : > { %v459_v31 = vpack.c.bf16 %v296_v29, %v294_v27  ;;  %v464_v32 = vpack.c.bf16 %v301_v30, %v299_v28 }
  0xbc   : > { %467 = vst [vmem:[%s172_s13 + $0x10] sm:$0xff] %v459_v31  }
  0xbd   : > { %468 = vst [vmem:[%s172_s13 + $0x18] sm:$0xff] %v464_v32  }
  0xbe PF: > { %s13_s12 = sadd.s32 1, %s508_s12  }
  0xbf   : > { %p10_p4 = scmp.ge.s32.totalorder %s13_s12, 4  }
  0xc1   :  { %12 = sbr.rel (!%p10_p4) target bundleno = 1 (0x1), region = 62 }

// kernel: _lambda_.27
= control target key start
LH: loop header
LB: loop body
LE: loop exit
PB: predicated region body
PF: predicated region fallthrough
CT: control target
= control target key end

     0   :  { %s538_s12 = smov 0   ;;  %s589_s0 = inlined_call_operand.vmem [shape: bf16[128,128], index: 0, kind: input, shape index: {}]   ;;  %s590_s1 = inlined_call_operand.vmem [shape: bf16[128,128], index: 1, kind: input, shape index: {}]   ;;  %s591_s2 = inlined_call_operand.vmem [shape: f32[1,128], index: 2, kind: input, shape index: {}]   ;;  %s592_s3 = inlined_call_operand.vmem [shape: bf16[128,128], index: 3, kind: output, shape index: {}]  }
   0x1 LB: > { %s383_s13 = sadd.s32 4294967295, %s516_s12   ;;  %p387_p0 = scmp.ge.s32.totalorder %s516_s12, 1  ;;  %s516_s12 = sphi %s538_s12, %s13_s12  }
   0x2   : > { %p138_p1 = scmp.lt.s32.totalorder %s516_s12, 3 }
   0x4   : > { %p139_p2 = pnand %p387_p0, %p138_p1 }
   0x5   : > { %s388_s22 = sshll.u32 (!%p139_p2), %s383_s13, 3 }
   0x6   : > { %142 = sbr.rel (%p139_p2) target bundleno = 192 (0xc0), region = 32  ;;  %p163_p3 = scmp.lt.s32.totalorder (!%p139_p2), %s388_s22, 15 }
   0xb   : > { %v453_v0 = vld [vmem:[%s590_s1 + $0x38] sm:$0xff]  ;;  %v452_v1 = vld [vmem:[%s590_s1 + $0x30] sm:$0xff]  ;;  %v451_v2 = vld [vmem:[%s590_s1 + $0x28] sm:$0xff]  ;;  %s594_s22 = smov (!%p163_p3, %s388_s22), 15 }
   0xc   : > { %274 = vmatpush.bf16.msra.mxu0 %v453_v0  ;;  %477 = vmatpush.bf16.msra.mxu1 %v453_v0  ;;  %v450_v3 = vld [vmem:[%s590_s1 + $0x20] sm:$0xff]  ;;  %v449_v4 = vld [vmem:[%s590_s1 + $0x18] sm:$0xff]  ;;  %v448_v5 = vld [vmem:[%s590_s1 + $0x10] sm:$0xff]  ;;  %s389_s29 = sshll.u32 %s594_s22, 2 }
   0xd   : > { %478 = vmatpush.bf16.msra.mxu2 %v453_v0  ;;  %479 = vmatpush.bf16.msra.mxu3 %v453_v0  ;;  %v447_v6 = vld [vmem:[%s590_s1 + $0x8] sm:$0xff]  ;;  %v446_v7 = vld [vmem:[%s590_s1] sm:$0xff]  ;;  %s166_s7 = scalar_lea.vmem %s589_s0, %s389_s29  ;;  %s172_s13 = scalar_lea.vmem %s592_s3, %s389_s29 }
   0xe   : > { %v442_v8 = vld [vmem:[%s166_s7] sm:$0xff]  ;;  %v443_v9 = vld [vmem:[%s166_s7 + $0x8] sm:$0xff]  ;;  %v444_v10 = vld [vmem:[%s166_s7 + $0x10] sm:$0xff] }
   0xf   : > { %v445_v11 = vld [vmem:[%s166_s7 + $0x18] sm:$0xff]  ;;  %v509_v14 = vld [vmem:[%s591_s2] ss:$0 sm:$0xff] }
  0x10   : > { %275 = vmatpush.bf16.msra.mxu0 %v452_v1  ;;  %480 = vmatpush.bf16.msra.mxu1 %v452_v1 }
  0x11   : > { %481 = vmatpush.bf16.msra.mxu2 %v452_v1  ;;  %482 = vmatpush.bf16.msra.mxu3 %v452_v1 }
  0x14   : > { %276 = vmatpush.bf16.msra.mxu0 %v451_v2  ;;  %483 = vmatpush.bf16.msra.mxu1 %v451_v2 }
  0x15   : > { %484 = vmatpush.bf16.msra.mxu2 %v451_v2  ;;  %485 = vmatpush.bf16.msra.mxu3 %v451_v2 }
  0x18   : > { %277 = vmatpush.bf16.msra.mxu0 %v450_v3  ;;  %486 = vmatpush.bf16.msra.mxu1 %v450_v3 }
  0x19   : > { %487 = vmatpush.bf16.msra.mxu2 %v450_v3  ;;  %488 = vmatpush.bf16.msra.mxu3 %v450_v3 }
  0x1c   : > { %278 = vmatpush.bf16.msra.mxu0 %v449_v4  ;;  %489 = vmatpush.bf16.msra.mxu1 %v449_v4 }
  0x1d   : > { %490 = vmatpush.bf16.msra.mxu2 %v449_v4  ;;  %491 = vmatpush.bf16.msra.mxu3 %v449_v4 }
  0x20   : > { %279 = vmatpush.bf16.msra.mxu0 %v448_v5  ;;  %492 = vmatpush.bf16.msra.mxu1 %v448_v5 }
  0x21   : > { %493 = vmatpush.bf16.msra.mxu2 %v448_v5  ;;  %494 = vmatpush.bf16.msra.mxu3 %v448_v5 }
  0x24   : > { %280 = vmatpush.bf16.msra.mxu0 %v447_v6  ;;  %495 = vmatpush.bf16.msra.mxu1 %v447_v6 }
  0x25   : > { %496 = vmatpush.bf16.msra.mxu2 %v447_v6  ;;  %497 = vmatpush.bf16.msra.mxu3 %v447_v6 }
  0x28   : > { %281 = vmatpush.bf16.msra.mxu0 %v446_v7  ;;  %498 = vmatpush.bf16.msra.mxu1 %v446_v7 }
  0x29   : > { %499 = vmatpush.bf16.msra.mxu2 %v446_v7  ;;  %500 = vmatpush.bf16.msra.mxu3 %v446_v7 }
  0x2b   : > { %282 = vmatmul.bf16.vlgmr.msra.gmra.mxu0 %v442_v8  ;;  %287 = vmatmul.bf16.vlgmr.msra.gmra.mxu1 %v443_v9 }
  0x2c   : > { %292 = vmatmul.bf16.vlgmr.msra.gmra.mxu2 %v444_v10  ;;  %297 = vmatmul.bf16.vlgmr.msra.gmra.mxu3 %v445_v11 }
  0xa8   : > { %v283_v12 = vpop.f32.mrf.mxu0  ;;  %v288_v13 = vpop.f32.mrf.mxu1 }
  0xa9   : > { %v284_v15 = vadd.f32 %v509_v14, %v283_v12  ;;  %v289_v16 = vadd.f32 %v509_v14, %v288_v13 }
  0xab   : > { %v303_v23 = vmax.f32 %v284_v15, 0.0  ;;  %v305_v24 = vmax.f32 %v289_v16, 0.0 }
  0xaf   : > { %v293_v17 = vpop.f32.mrf.mxu2  ;;  %v298_v18 = vpop.f32.mrf.mxu3 }
  0xb0   : > { %v285_v19 = vpop.f32.mrf.mxu0  ;;  %v290_v20 = vpop.f32.mrf.mxu1  ;;  %v294_v29 = vadd.f32 %v509_v14, %v293_v17  ;;  %v299_v30 = vadd.f32 %v509_v14, %v298_v18 }
  0xb1   : > { %v286_v21 = vadd.f32 %v509_v14, %v285_v19  ;;  %v291_v22 = vadd.f32 %v509_v14, %v290_v20 }
  0xb2   : > { %v307_v35 = vmax.f32 %v294_v29, 0.0  ;;  %v309_v36 = vmax.f32 %v299_v30, 0.0 }
  0xb3   : > { %v304_v25 = vmax.f32 %v286_v21, 0.0  ;;  %v306_v26 = vmax.f32 %v291_v22, 0.0 }
  0xb5   : > { %v457_v27 = vpack.c.bf16 %v304_v25, %v303_v23  ;;  %v462_v28 = vpack.c.bf16 %v306_v26, %v305_v24 }
  0xb7   : > { %458 = vst [vmem:[%s172_s13] sm:$0xff] %v457_v27   ;;  %v295_v31 = vpop.f32.mrf.mxu2  ;;  %v300_v32 = vpop.f32.mrf.mxu3 }
  0xb8   : > { %474 = vst [vmem:[%s172_s13 + $0x8] sm:$0xff] %v462_v28   ;;  %v296_v33 = vadd.f32 %v509_v14, %v295_v31  ;;  %v301_v34 = vadd.f32 %v509_v14, %v300_v32 }
  0xba   : > { %v308_v37 = vmax.f32 %v296_v33, 0.0  ;;  %v310_v38 = vmax.f32 %v301_v34, 0.0 }
  0xbc   : > { %v467_v39 = vpack.c.bf16 %v308_v37, %v307_v35  ;;  %v472_v40 = vpack.c.bf16 %v310_v38, %v309_v36 }
  0xbe   : > { %475 = vst [vmem:[%s172_s13 + $0x10] sm:$0xff] %v467_v39  }
  0xbf   : > { %476 = vst [vmem:[%s172_s13 + $0x18] sm:$0xff] %v472_v40  }
  0xc0 PF: > { %s13_s12 = sadd.s32 1, %s516_s12  }
  0xc1   : > { %p10_p4 = scmp.ge.s32.totalorder %s13_s12, 4  }
  0xc3   :  { %12 = sbr.rel (!%p10_p4) target bundleno = 1 (0x1), region = 62 }

// kernel: _lambda_.36
= control target key start
LH: loop header
LB: loop body
LE: loop exit
PB: predicated region body
PF: predicated region fallthrough
CT: control target
= control target key end

     0   :  { %s422_s12 = smov 0   ;;  %s466_s0 = inlined_call_operand.vmem [shape: bf16[32,128], index: 0, kind: input, shape index: {}]   ;;  %s467_s1 = inlined_call_operand.vmem [shape: bf16[128,128], index: 1, kind: input, shape index: {}]   ;;  %s468_s2 = inlined_call_operand.vmem [shape: f32[1,128], index: 2, kind: input, shape index: {}]   ;;  %s469_s3 = inlined_call_operand.vmem [shape: bf16[32,128], index: 3, kind: output, shape index: {}]  }
   0x1 LB: > { %s324_s13 = sadd.s32 4294967295, %s400_s12   ;;  %p328_p0 = scmp.ge.s32.totalorder %s400_s12, 1  ;;  %s400_s12 = sphi %s422_s12, %s13_s12  }
   0x2   : > { %p138_p1 = scmp.lt.s32.totalorder %s400_s12, 3 }
   0x4   : > { %p139_p2 = pnand %p328_p0, %p138_p1 }
   0x5   : > { %s329_s22 = sshll.u32 (!%p139_p2), %s324_s13, 1 }
   0x6   : > { %142 = sbr.rel (%p139_p2) target bundleno = 182 (0xb6), region = 32  ;;  %p163_p3 = scmp.lt.s32.totalorder (!%p139_p2), %s329_s22, 3 }
   0xb   : > { %v379_v0 = vld [vmem:[%s467_s1 + $0x38] sm:$0xff]  ;;  %v378_v1 = vld [vmem:[%s467_s1 + $0x30] sm:$0xff]  ;;  %v377_v2 = vld [vmem:[%s467_s1 + $0x28] sm:$0xff]  ;;  %s471_s22 = smov (!%p163_p3, %s329_s22), 3 }
   0xc   : > { %250 = vmatpush.bf16.msra.mxu0 %v379_v0  ;;  %v376_v3 = vld [vmem:[%s467_s1 + $0x20] sm:$0xff]  ;;  %v375_v4 = vld [vmem:[%s467_s1 + $0x18] sm:$0xff]  ;;  %v374_v5 = vld [vmem:[%s467_s1 + $0x10] sm:$0xff]  ;;  %s330_s29 = sshll.u32 %s471_s22, 2 }
   0xd   : > { %v373_v6 = vld [vmem:[%s467_s1 + $0x8] sm:$0xff]  ;;  %v372_v7 = vld [vmem:[%s467_s1] sm:$0xff]  ;;  %s166_s7 = scalar_lea.vmem %s466_s0, %s330_s29  ;;  %s172_s13 = scalar_lea.vmem %s469_s3, %s330_s29 }
   0xe   : > { %v371_v8 = vld [vmem:[%s166_s7] sm:$0xff] }
   0xf   : > { %v393_v10 = vld [vmem:[%s468_s2] ss:$0 sm:$0xff] }
  0x10   : > { %251 = vmatpush.bf16.msra.mxu0 %v378_v1 }
  0x14   : > { %252 = vmatpush.bf16.msra.mxu0 %v377_v2 }
  0x18   : > { %253 = vmatpush.bf16.msra.mxu0 %v376_v3 }
  0x1c   : > { %254 = vmatpush.bf16.msra.mxu0 %v375_v4 }
  0x20   : > { %255 = vmatpush.bf16.msra.mxu0 %v374_v5 }
  0x24   : > { %256 = vmatpush.bf16.msra.mxu0 %v373_v6 }
  0x28   : > { %257 = vmatpush.bf16.msra.mxu0 %v372_v7 }
  0x2b   : > { %258 = vmatmul.bf16.vlgmr.msra.gmra.mxu0 %v371_v8 }
  0xa8   : > { %v259_v9 = vpop.f32.mrf.mxu0 }
  0xa9   : > { %v260_v12 = vadd.f32 %v393_v10, %v259_v9 }
  0xb0   : > { %v261_v11 = vpop.f32.mrf.mxu0 }
  0xb1   : > { %v262_v13 = vadd.f32 %v393_v10, %v261_v11 }
  0xb3   : > { %v383_v14 = vpack.c.bf16 %v262_v13, %v260_v12 }
  0xb5   : > { %384 = vst [vmem:[%s172_s13] sm:$0xff] %v383_v14  }
  0xb6 PF: > { %s13_s12 = sadd.s32 1, %s400_s12  }
  0xb7   : > { %p10_p4 = scmp.ge.s32.totalorder %s13_s12, 4  }
  0xb9   :  { %12 = sbr.rel (!%p10_p4) target bundleno = 1 (0x1), region = 62 }

// kernel: _lambda_.30
= control target key start
LH: loop header
LB: loop body
LE: loop exit
PB: predicated region body
PF: predicated region fallthrough
CT: control target
= control target key end

     0   :  { %s649_s15 = smov 0   ;;  %s701_s0 = inlined_call_operand.vmem [shape: bf16[128,128], index: 0, kind: input, shape index: {}]   ;;  %s702_s1 = inlined_call_operand.vmem [shape: bf16[128,128], index: 1, kind: input, shape index: {}]   ;;  %s703_s2 = inlined_call_operand.vmem [shape: f32[1,128], index: 2, kind: input, shape index: {}]   ;;  %s704_s3 = inlined_call_operand.vmem [shape: bf16[128,128], index: 3, kind: input, shape index: {}]   ;;  %s705_s4 = inlined_call_operand.vmem [shape: bf16[128,128], index: 4, kind: output, shape index: {}]  }
   0x1 LB: > { %s468_s16 = sadd.s32 4294967295, %s622_s15   ;;  %p472_p0 = scmp.ge.s32.totalorder %s622_s15, 1  ;;  %s622_s15 = sphi %s649_s15, %s14_s15  }
   0x2   : > { %p174_p1 = scmp.lt.s32.totalorder %s622_s15, 3 }
   0x4   : > { %p175_p2 = pnand %p472_p0, %p174_p1 }
   0x5   : > { %s473_s25 = sshll.u32 (!%p175_p2), %s468_s16, 3 }
   0x6   : > { %178 = sbr.rel (%p175_p2) target bundleno = 194 (0xc2), region = 36  ;;  %p206_p3 = scmp.lt.s32.totalorder (!%p175_p2), %s473_s25, 15 }
   0xb   : > { %v540_v0 = vld [vmem:[%s702_s1 + $0x38] sm:$0xff]  ;;  %v539_v1 = vld [vmem:[%s702_s1 + $0x30] sm:$0xff]  ;;  %v538_v2 = vld [vmem:[%s702_s1 + $0x28] sm:$0xff]  ;;  %s707_s25 = smov (!%p206_p3, %s473_s25), 15 }
   0xc   : > { %323 = vmatpush.bf16.msra.mxu0 %v540_v0  ;;  %583 = vmatpush.bf16.msra.mxu1 %v540_v0  ;;  %v537_v3 = vld [vmem:[%s702_s1 + $0x20] sm:$0xff]  ;;  %v536_v4 = vld [vmem:[%s702_s1 + $0x18] sm:$0xff]  ;;  %v535_v5 = vld [vmem:[%s702_s1 + $0x10] sm:$0xff]  ;;  %s678_s6 = sshll.u32 %s707_s25, 2 }
   0xd   : > { %584 = vmatpush.bf16.msra.mxu2 %v540_v0  ;;  %585 = vmatpush.bf16.msra.mxu3 %v540_v0  ;;  %v534_v6 = vld [vmem:[%s702_s1 + $0x8] sm:$0xff]  ;;  %v533_v7 = vld [vmem:[%s702_s1] sm:$0xff]  ;;  %s209_s11 = scalar_lea.vmem %s701_s0, %s678_s6  ;;  %s215_s14 = scalar_lea.vmem %s704_s3, %s678_s6 }
   0xe   : > { %v529_v8 = vld [vmem:[%s209_s11] sm:$0xff]  ;;  %v530_v9 = vld [vmem:[%s209_s11 + $0x8] sm:$0xff]  ;;  %v531_v10 = vld [vmem:[%s209_s11 + $0x10] sm:$0xff]  ;;  %s221_s20 = scalar_lea.vmem %s705_s4, %s678_s6 }
   0xf   : > { %v532_v11 = vld [vmem:[%s209_s11 + $0x18] sm:$0xff]  ;;  %v615_v14 = vld [vmem:[%s703_s2] ss:$0 sm:$0xff]  ;;  %v577_v16 = vld [vmem:[%s215_s14 + $0x8] sm:$0xff]  }
  0x10   : > { %324 = vmatpush.bf16.msra.mxu0 %v539_v1  ;;  %586 = vmatpush.bf16.msra.mxu1 %v539_v1  ;;  %v542_v15 = vld [vmem:[%s215_s14] sm:$0xff]   ;;  %v547_v20 = vunpack.c.l.bf16 %v577_v16  ;;  %v548_v24 = vunpack.c.h.bf16 %v577_v16  ;;  %v578_v29 = vld [vmem:[%s215_s14 + $0x10] sm:$0xff]   ;;  %v579_v30 = vld [vmem:[%s215_s14 + $0x18] sm:$0xff]  }
  0x11   : > { %587 = vmatpush.bf16.msra.mxu2 %v539_v1  ;;  %588 = vmatpush.bf16.msra.mxu3 %v539_v1  ;;  %v543_v18 = vunpack.c.l.bf16 %v542_v15  ;;  %v544_v23 = vunpack.c.h.bf16 %v542_v15  ;;  %v551_v36 = vunpack.c.l.bf16 %v578_v29  ;;  %v555_v38 = vunpack.c.l.bf16 %v579_v30 }
  0x12   : > { %v552_v43 = vunpack.c.h.bf16 %v578_v29  ;;  %v556_v44 = vunpack.c.h.bf16 %v579_v30 }
  0x14   : > { %325 = vmatpush.bf16.msra.mxu0 %v538_v2  ;;  %589 = vmatpush.bf16.msra.mxu1 %v538_v2 }
  0x15   : > { %590 = vmatpush.bf16.msra.mxu2 %v538_v2  ;;  %591 = vmatpush.bf16.msra.mxu3 %v538_v2 }
  0x18   : > { %326 = vmatpush.bf16.msra.mxu0 %v537_v3  ;;  %592 = vmatpush.bf16.msra.mxu1 %v537_v3 }
  0x19   : > { %593 = vmatpush.bf16.msra.mxu2 %v537_v3  ;;  %594 = vmatpush.bf16.msra.mxu3 %v537_v3 }
  0x1c   : > { %327 = vmatpush.bf16.msra.mxu0 %v536_v4  ;;  %595 = vmatpush.bf16.msra.mxu1 %v536_v4 }
  0x1d   : > { %596 = vmatpush.bf16.msra.mxu2 %v536_v4  ;;  %597 = vmatpush.bf16.msra.mxu3 %v536_v4 }
  0x20   : > { %328 = vmatpush.bf16.msra.mxu0 %v535_v5  ;;  %598 = vmatpush.bf16.msra.mxu1 %v535_v5 }
  0x21   : > { %599 = vmatpush.bf16.msra.mxu2 %v535_v5  ;;  %600 = vmatpush.bf16.msra.mxu3 %v535_v5 }
  0x24   : > { %329 = vmatpush.bf16.msra.mxu0 %v534_v6  ;;  %601 = vmatpush.bf16.msra.mxu1 %v534_v6 }
  0x25   : > { %602 = vmatpush.bf16.msra.mxu2 %v534_v6  ;;  %603 = vmatpush.bf16.msra.mxu3 %v534_v6 }
  0x28   : > { %330 = vmatpush.bf16.msra.mxu0 %v533_v7  ;;  %604 = vmatpush.bf16.msra.mxu1 %v533_v7 }
  0x29   : > { %605 = vmatpush.bf16.msra.mxu2 %v533_v7  ;;  %606 = vmatpush.bf16.msra.mxu3 %v533_v7 }
  0x2b   : > { %331 = vmatmul.bf16.vlgmr.msra.gmra.mxu0 %v529_v8  ;;  %336 = vmatmul.bf16.vlgmr.msra.gmra.mxu1 %v530_v9 }
  0x2c   : > { %341 = vmatmul.bf16.vlgmr.msra.gmra.mxu2 %v531_v10  ;;  %346 = vmatmul.bf16.vlgmr.msra.gmra.mxu3 %v532_v11 }
  0xa8   : > { %v332_v12 = vpop.f32.mrf.mxu0  ;;  %v337_v13 = vpop.f32.mrf.mxu1 }
  0xa9   : > { %v333_v17 = vadd.f32 %v615_v14, %v332_v12  ;;  %v338_v19 = vadd.f32 %v615_v14, %v337_v13 }
  0xab   : > { %v368_v27 = vadd.f32 %v543_v18, %v333_v17  ;;  %v370_v28 = vadd.f32 %v547_v20, %v338_v19 }
  0xad   : > { %v376_v39 = vmax.f32 %v368_v27, 0.0  ;;  %v378_v40 = vmax.f32 %v370_v28, 0.0 }
  0xaf   : > { %v342_v21 = vpop.f32.mrf.mxu2  ;;  %v347_v22 = vpop.f32.mrf.mxu3 }
  0xb0   : > { %v334_v25 = vpop.f32.mrf.mxu0  ;;  %v339_v26 = vpop.f32.mrf.mxu1  ;;  %v343_v35 = vadd.f32 %v615_v14, %v342_v21  ;;  %v348_v37 = vadd.f32 %v615_v14, %v347_v22 }
  0xb1   : > { %v335_v31 = vadd.f32 %v615_v14, %v334_v25  ;;  %v340_v32 = vadd.f32 %v615_v14, %v339_v26 }
  0xb2   : > { %v372_v49 = vadd.f32 %v551_v36, %v343_v35  ;;  %v374_v50 = vadd.f32 %v555_v38, %v348_v37 }
  0xb3   : > { %v369_v33 = vadd.f32 %v544_v23, %v335_v31  ;;  %v371_v34 = vadd.f32 %v548_v24, %v340_v32 }
  0xb4   : > { %v380_v55 = vmax.f32 %v372_v49, 0.0  ;;  %v382_v56 = vmax.f32 %v374_v50, 0.0 }
  0xb5   : > { %v377_v41 = vmax.f32 %v369_v33, 0.0  ;;  %v379_v42 = vmax.f32 %v371_v34, 0.0 }
  0xb7   : > { %v560_v45 = vpack.c.bf16 %v377_v41, %v376_v39  ;;  %v565_v46 = vpack.c.bf16 %v379_v42, %v378_v40  ;;  %v344_v47 = vpop.f32.mrf.mxu2  ;;  %v349_v48 = vpop.f32.mrf.mxu3 }
  0xb8   : > { %v345_v51 = vadd.f32 %v615_v14, %v344_v47  ;;  %v350_v52 = vadd.f32 %v615_v14, %v349_v48 }
  0xb9   : > { %561 = vst [vmem:[%s221_s20] sm:$0xff] %v560_v45  }
  0xba   : > { %580 = vst [vmem:[%s221_s20 + $0x8] sm:$0xff] %v565_v46   ;;  %v373_v53 = vadd.f32 %v552_v43, %v345_v51  ;;  %v375_v54 = vadd.f32 %v556_v44, %v350_v52 }
  0xbc   : > { %v381_v57 = vmax.f32 %v373_v53, 0.0  ;;  %v383_v58 = vmax.f32 %v375_v54, 0.0 }
  0xbe   : > { %v570_v59 = vpack.c.bf16 %v381_v57, %v380_v55  ;;  %v575_v60 = vpack.c.bf16 %v383_v58, %v382_v56 }
  0xc0   : > { %581 = vst [vmem:[%s221_s20 + $0x10] sm:$0xff] %v570_v59  }
  0xc1   : > { %582 = vst [vmem:[%s221_s20 + $0x18] sm:$0xff] %v575_v60  }
  0xc2 PF: > { %s14_s15 = sadd.s32 1, %s622_s15  }
  0xc3   : > { %p11_p4 = scmp.ge.s32.totalorder %s14_s15, 4  }
  0xc5   :  { %13 = sbr.rel (!%p11_p4) target bundleno = 1 (0x1), region = 69 }

// kernel: _lambda_.28
= control target key start
LH: loop header
LB: loop body
LE: loop exit
PB: predicated region body
PF: predicated region fallthrough
CT: control target
= control target key end

     0   :  { %s2669_s12 = smov 0   ;;  %s3350_s0 = inlined_call_operand.vmem [shape: bf16[2,8,8,128], index: 0, kind: input, shape index: {}]   ;;  %s3351_s1 = inlined_call_operand.vmem [shape: bf16[9,128,128], index: 1, kind: input, shape index: {}]   ;;  %s3352_s2 = inlined_call_operand.vmem [shape: f32[1,128], index: 2, kind: input, shape index: {}]   ;;  %s3353_s3 = inlined_call_operand.vmem [shape: bf16[2,8,8,128], index: 3, kind: output, shape index: {}]  }
   0x1 LB: > { %s2006_s13 = sadd.s32 4294967295, %s2646_s12   ;;  %p2010_p0 = scmp.ge.s32.totalorder %s2646_s12, 1  ;;  %s2646_s12 = sphi %s2669_s12, %s13_s12  }
   0x2   : > { %p137_p1 = scmp.lt.s32.totalorder %s2646_s12, 3 }
   0x4   : > { %p138_p2 = pnand %p2010_p0, %p137_p1 }
   0x5   : > { %p161_p3 = scmp.lt.s32.totalorder (!%p138_p2), %s2006_s13, 1 }
   0x6   : > { %141 = sbr.rel (%p138_p2) target bundleno = 342 (0x156), region = 32 }
   0xb   : > { %v2526_v0 = vld [vmem:[%s3351_s1 + $0x78] sm:$0xff]  ;;  %v2648_v2 = vmov 0   ;;  %v2525_v3 = vld [vmem:[%s3351_s1 + $0x70] sm:$0xff]  ;;  %s3363_s13 = smov (!%p161_p3, %s2006_s13), 1  ;;  %v2524_v6 = vld [vmem:[%s3351_s1 + $0x68] sm:$0xff]  ;;  %vm281_vm0 = vcmask 1043456  }
   0xc   : > { %v2534_v1 = vld [vmem:[%s3351_s1 + $0xb8] sm:$0xff]  ;;  %180 = vst [vmem:[#allocation2 + $0x20] sm:$0xf] %v2648_v2  ;;  %2614 = vmatpush.bf16.msra.mxu1 %v2526_v0  ;;  %563 = vmatpush.bf16.msra.mxu0 %v2526_v0  ;;  %v2533_v4 = vld [vmem:[%s3351_s1 + $0xb0] sm:$0xff]  ;;  %s2505_s26 = sshll.u32 %s3363_s13, 5  ;;  %v2532_v7 = vld [vmem:[%s3351_s1 + $0xa8] sm:$0xff] }
   0xd   : > { %181 = vst [vmem:[#allocation2 + $0x24] sm:$0x1] %v2648_v2  ;;  %817 = vmatpush.bf16.msra.mxu2 %v2534_v1  ;;  %v2546_v5 = vld [vmem:[%s3351_s1 + $0xf8] sm:$0xff]  ;;  %v2545_v8 = vld [vmem:[%s3351_s1 + $0xf0] sm:$0xff]  ;;  %s2713_s6 = scalar_lea.vmem %s3350_s0, %s2505_s26  ;;  %vm282_vm1 = vsmask.f32 7938  ;;  %s3329_s24 = scalar_lea.vmem %s3353_s3, %s2505_s26 }
   0xe   : > { %182 = vst [vmem:[#allocation2 + $0x28] sm:$0xf] %v2648_v2  ;;  %959 = vmatpush.bf16.msra.mxu3 %v2546_v5  ;;  %vm287_vm2 = vcmask 1040384   ;;  %v195_v9 = vld [vmem:[%s2713_s6 + $0xc] sm:$0xf]  ;;  %v2523_v15 = vld [vmem:[%s3351_s1 + $0x60] sm:$0xff]  ;;  %vm2730_vm4 = vmand %vm281_vm0, %vm282_vm1 }
   0xf   : > { %183 = vst [vmem:[#allocation2 + $0x2c] sm:$0x1] %v2648_v2  ;;  %v196_v10 = vld [vmem:[%s2713_s6 + $0x10] sm:$0xf]  ;;  %vm288_vm3 = vsmask.f32 256 }
  0x10   : > { %2615 = vmatpush.bf16.msra.mxu1 %v2525_v3  ;;  %564 = vmatpush.bf16.msra.mxu0 %v2525_v3  ;;  %v225_v11 = vshrl.u32 %v195_v9, 16  ;;  %v228_v12 = vshll.u32 %v195_v9, 16  ;;  %v233_v13 = vshrl.u32 %v196_v10, 16  ;;  %v236_v14 = vshll.u32 %v196_v10, 16  ;;  %172 = vst [vmem:[#allocation2] sm:$0xf] %v2648_v2  ;;  %vm2737_vm5 = vmand %vm287_vm2, %vm288_vm3 }
  0x11   : > { %818 = vmatpush.bf16.msra.mxu2 %v2533_v4  ;;  %v2544_v16 = vld [vmem:[%s3351_s1 + $0xe8] sm:$0xff]  ;;  %173 = vst [vmem:[#allocation2 + $0x4] sm:$0x1] %v2648_v2  ;;  %v2531_v17 = vld [vmem:[%s3351_s1 + $0xa0] sm:$0xff]  ;;  %v2522_v30 = vld [vmem:[%s3351_s1 + $0x58] sm:$0xff]  ;;  %vm701_vm8 = vcmask 1042432  }
  0x12   : > { %960 = vmatpush.bf16.msra.mxu3 %v2545_v8  ;;  %v227_v18 = vrot.slane %v225_v11, 7  ;;  %v235_v19 = vrot.slane %v233_v13, 7  ;;  %174 = vst [vmem:[#allocation2 + $0x8] sm:$0xf] %v2648_v2  ;;  %v2530_v31 = vld [vmem:[%s3351_s1 + $0x98] sm:$0xff]  ;;  %v2543_v35 = vld [vmem:[%s3351_s1 + $0xe0] sm:$0xff] }
  0x13   : > { %v305_v21 = vld [vmem:[#allocation2 + $0x20] sm:$0xf]  ;;  %175 = vst [vmem:[#allocation2 + $0xc] sm:$0x1] %v2648_v2  ;;  %v2521_v44 = vld [vmem:[%s3351_s1 + $0x50] sm:$0xff]  ;;  %v2542_v50 = vld [vmem:[%s3351_s1 + $0xd8] sm:$0xff] }
  0x14   : > { %2616 = vmatpush.bf16.msra.mxu1 %v2524_v6  ;;  %565 = vmatpush.bf16.msra.mxu0 %v2524_v6  ;;  %v308_v23 = vld [vmem:[#allocation2 + $0x24] sm:$0x1]  ;;  %v230_v25 = vor.u32 %v228_v12, %v227_v18  ;;  %v231_v26 = vrot.slane %v227_v18, 4  ;;  %v238_v27 = vor.u32 %v236_v14, %v235_v19  ;;  %v239_v28 = vrot.slane %v235_v19, 4  ;;  %176 = vst [vmem:[#allocation2 + $0x10] sm:$0xf] %v2648_v2 }
  0x15   : > { %v311_v24 = vld [vmem:[#allocation2 + $0x28] sm:$0xf]  ;;  %819 = vmatpush.bf16.msra.mxu2 %v2532_v7  ;;  %177 = vst [vmem:[#allocation2 + $0x14] sm:$0x1] %v2648_v2  ;;  %v192_v36 = vld [vmem:[%s2713_s6] sm:$0xf] }
  0x16   : > { %v314_v29 = vld [vmem:[#allocation2 + $0x2c] sm:$0x1]  ;;  %961 = vmatpush.bf16.msra.mxu3 %v2544_v16  ;;  %v306_v32 = vsel %vm2730_vm4, %v230_v25, %v305_v21  ;;  %v309_v33 = vsel %vm2737_vm5, %v231_v26, %v308_v23  ;;  %v312_v34 = vsel %vm2730_vm4, %v238_v27, %v311_v24  ;;  %v201_v38 = vshrl.u32 %v192_v36, 16  ;;  %v2529_v49 = vld [vmem:[%s3351_s1 + $0x90] sm:$0xff]  ;;  %178 = vst [vmem:[#allocation2 + $0x18] sm:$0xf] %v2648_v2 }
  0x17   : > { %307 = vst [vmem:[#allocation2 + $0x20] sm:$0xf] %v306_v32  ;;  %v315_v37 = vsel %vm2737_vm5, %v239_v28, %v314_v29  ;;  %v204_v39 = vshll.u32 %v192_v36, 16  ;;  %v2762_v40 = vld [vmem:[#allocation2] sm:$0xf]  ;;  %v2520_v57 = vld [vmem:[%s3351_s1 + $0x48] sm:$0xff] }
  0x18   : > { %2617 = vmatpush.bf16.msra.mxu1 %v2523_v15  ;;  %566 = vmatpush.bf16.msra.mxu0 %v2523_v15  ;;  %310 = vst [vmem:[#allocation2 + $0x24] sm:$0x1] %v309_v33  ;;  %v2764_v41 = vld [vmem:[#allocation2 + $0x4] sm:$0x1]  ;;  %v371_v42 = vshrl.u32 %v2762_v40, 16  ;;  %v374_v43 = vshll.u32 %v2762_v40, 16 }
  0x19   : > { %820 = vmatpush.bf16.msra.mxu2 %v2531_v17  ;;  %313 = vst [vmem:[#allocation2 + $0x28] sm:$0xf] %v312_v34  ;;  %vm367_vm6 = vsmask.f32 3328  ;;  %v203_v45 = vrot.slane %v201_v38, 7  ;;  %v380_v46 = vshll.u32 %v2764_v41, 16 }
  0x1a   : > { %316 = vst [vmem:[#allocation2 + $0x2c] sm:$0x1] %v315_v37  ;;  %vm368_vm7 = vsmask.f32 7440  ;;  %962 = vmatpush.bf16.msra.mxu3 %v2543_v35  ;;  %v373_v47 = vrot.slane %v371_v42, 4  ;;  %v376_v48 = vrot.slane %v374_v43, 5 }
  0x1b   : > { %v2780_v51 = vld [vmem:[%s2713_s6 + $0x14] sm:$0xf]  ;;  %179 = vst [vmem:[#allocation2 + $0x1c] sm:$0x1] %v2648_v2  ;;  %v2783_v52 = vor.u32 %v204_v39, %v203_v45  ;;  %v207_v53 = vrot.slane %v203_v45, 4  ;;  %v2787_v56 = vrot.slane %v380_v46, 5  ;;  %vm2848_vm10 = vmor %vm367_vm6, %vm368_vm7 }
  0x1c   : > { %2618 = vmatpush.bf16.msra.mxu1 %v2522_v30  ;;  %567 = vmatpush.bf16.msra.mxu0 %v2522_v30  ;;  %v2785_v54 = vld [vmem:[#allocation2 + $0x8] sm:$0xf]  ;;  %v377_v55 = vor.u32 %v376_v48, %v373_v47  ;;  %184 = vst [vmem:[#allocation2 + $0x30] sm:$0xf] %v2648_v2  ;;  %v290_v58 = vld [vmem:[#allocation2 + $0xc] sm:$0x1] }
  0x1d   : > { %821 = vmatpush.bf16.msra.mxu2 %v2530_v31  ;;  %vm702_vm9 = vcmask 1046532   ;;  %v2111_v59 = vrot.slane %v2762_v40, 9  ;;  %v706_v60 = vrot.slane %v2764_v41, 5  ;;  %185 = vst [vmem:[#allocation2 + $0x34] sm:$0x1] %v2648_v2  ;;  %v2528_v62 = vld [vmem:[%s3351_s1 + $0x88] sm:$0xff]  ;;  %v285_v8 = vsel %vm2730_vm4, %v2783_v52, %v2785_v54 }
  0x1e   : > { %v2795_v61 = vld [vmem:[#allocation2 + $0x20] sm:$0xf]  ;;  %963 = vmatpush.bf16.msra.mxu3 %v2542_v50  ;;  %v2541_v63 = vld [vmem:[%s3351_s1 + $0xd0] sm:$0xff]  ;;  %v241_v0 = vshrl.u32 %v2780_v51, 16  ;;  %186 = vst [vmem:[#allocation2 + $0x38] sm:$0xf] %v2648_v2  ;;  %v291_v21 = vsel %vm2737_vm5, %v207_v53, %v290_v58  ;;  %vm2859_vm11 = vmor %vm701_vm8, %vm702_vm9 }
  0x1f   : > { %v2805_v1 = vld [vmem:[#allocation2 + $0x24] sm:$0x1]  ;;  %v427_v3 = vshrl.u32 %v2795_v61, 16  ;;  %v430_v4 = vshll.u32 %v2795_v61, 16  ;;  %v198_v5 = vld [vmem:[%s2713_s6 + $0x18] sm:$0xf] }
  0x20   : > { %2619 = vmatpush.bf16.msra.mxu1 %v2521_v44  ;;  %568 = vmatpush.bf16.msra.mxu0 %v2521_v44  ;;  %v2811_v6 = vld [vmem:[#allocation2 + $0x28] sm:$0xf]  ;;  %v436_v7 = vshll.u32 %v2805_v1, 16  ;;  %187 = vst [vmem:[#allocation2 + $0x3c] sm:$0x1] %v2648_v2  ;;  %v2819_v9 = vrot.slane %v377_v55, 4 }
  0x21   : > { %822 = vmatpush.bf16.msra.mxu2 %v2529_v49  ;;  %v2519_v10 = vld [vmem:[%s3351_s1 + $0x40] sm:$0xff]  ;;  %v2824_v11 = vld [vmem:[#allocation2 + $0x2c] sm:$0x1]  ;;  %v429_v12 = vrot.slane %v427_v3, 4  ;;  %v432_v13 = vrot.slane %v430_v4, 5  ;;  %v441_v14 = vshrl.u32 %v2811_v6, 16 }
  0x22   : > { %v444_v15 = vshll.u32 %v2811_v6, 16  ;;  %v438_v16 = vrot.slane %v436_v7, 5  ;;  %v450_v17 = vshll.u32 %v2824_v11, 16  ;;  %188 = vst [vmem:[#allocation2 + $0x40] sm:$0xf] %v2648_v2  ;;  %v2518_v18 = vld [vmem:[%s3351_s1 + $0x38] sm:$0xff]  ;;  %964 = vmatpush.bf16.msra.mxu3 %v2541_v63  ;;  %v383_v58 = vsel %vm2848_vm10, %v2819_v9, %v2787_v56 }
  0x23   : > { %v2527_v19 = vld [vmem:[%s3351_s1 + $0x80] sm:$0xff]  ;;  %v2540_v23 = vld [vmem:[%s3351_s1 + $0xc8] sm:$0xff]  ;;  %v243_v24 = vrot.slane %v241_v0, 7  ;;  %v433_v25 = vor.u32 %v432_v13, %v429_v12  ;;  %v443_v26 = vrot.slane %v441_v14, 4  ;;  %189 = vst [vmem:[#allocation2 + $0x44] sm:$0x1] %v2648_v2 }
  0x24   : > { %2620 = vmatpush.bf16.msra.mxu1 %v2520_v57  ;;  %569 = vmatpush.bf16.msra.mxu0 %v2520_v57  ;;  %v446_v27 = vrot.slane %v444_v15, 5  ;;  %v2554_v28 = vld [vmem:[%s3351_s1 + $0x138] sm:$0xff]  ;;  %v244_v29 = vshll.u32 %v2780_v51, 16  ;;  %v452_v31 = vrot.slane %v450_v17, 5  ;;  %190 = vst [vmem:[#allocation2 + $0x48] sm:$0xf] %v2648_v2 }
  0x25   : > { %823 = vmatpush.bf16.msra.mxu2 %v2528_v62  ;;  %v247_v32 = vrot.slane %v243_v24, 4  ;;  %v249_v33 = vshrl.u32 %v198_v5, 16  ;;  %v252_v34 = vshll.u32 %v198_v5, 16  ;;  %v434_v35 = vrot.slane %v433_v25, 4  ;;  %191 = vst [vmem:[#allocation2 + $0x4c] sm:$0x1] %v2648_v2 }
  0x26   : > { %v447_v36 = vor.u32 %v446_v27, %v443_v26  ;;  %v246_v37 = vor.u32 %v244_v29, %v243_v24  ;;  %v317_v38 = vld [vmem:[#allocation2 + $0x30] sm:$0xf]  ;;  %v2574_v39 = vld [vmem:[%s3351_s1 + $0x1b8] sm:$0xff]  ;;  %286 = vst [vmem:[#allocation2 + $0x8] sm:$0xf] %v285_v8  ;;  %965 = vmatpush.bf16.msra.mxu3 %v2540_v23  ;;  %v2539_v2 = vld [vmem:[%s3351_s1 + $0xc0] sm:$0xff]  ;;  %v2890_v62 = vsel %vm2859_vm11, %v2111_v59, %v706_v60 }
  0x27   : > { %v251_v43 = vrot.slane %v249_v33, 7  ;;  %v320_v44 = vld [vmem:[#allocation2 + $0x34] sm:$0x1]  ;;  %v439_v45 = vsel %vm2848_vm10, %v434_v35, %v438_v16  ;;  %292 = vst [vmem:[#allocation2 + $0xc] sm:$0x1] %v291_v21  ;;  %v2516_v59 = vld [vmem:[%s3351_s1 + $0x28] sm:$0xff]  ;;  %v753_v12 = vunpack.c.l.b16 %v2890_v62 }
  0x28   : > { %2621 = vmatpush.bf16.msra.mxu1 %v2519_v10  ;;  %v448_v46 = vrot.slane %v447_v36, 4  ;;  %570 = vmatpush.bf16.msra.mxu0 %v2519_v10  ;;  %v2517_v47 = vld [vmem:[%s3351_s1 + $0x30] sm:$0xff]  ;;  %v318_v48 = vsel %vm2730_vm4, %v246_v37, %v317_v38  ;;  %v323_v49 = vld [vmem:[#allocation2 + $0x38] sm:$0xf]  ;;  %v503_v50 = vunpack.c.l.b16 %v439_v45  ;;  %v321_v54 = vsel %vm2737_vm5, %v247_v32, %v320_v44  ;;  %v326_v55 = vld [vmem:[#allocation2 + $0x3c] sm:$0x1] }
  0x29   : > { %824 = vmatpush.bf16.msra.mxu2 %v2527_v19  ;;  %v2553_v51 = vld [vmem:[%s3351_s1 + $0x130] sm:$0xff]  ;;  %v254_v52 = vor.u32 %v252_v34, %v251_v43  ;;  %v255_v53 = vrot.slane %v251_v43, 4  ;;  %319 = vst [vmem:[#allocation2 + $0x30] sm:$0xf] %v318_v48  ;;  %v193_v63 = vld [vmem:[%s2713_s6 + $0x4] sm:$0xf]  ;;  %v2901_v10 = vunpack.c.l.b16 %v383_v58 }
  0x2a   : > { %v453_v57 = vsel %vm2848_vm10, %v448_v46, %v452_v31  ;;  %322 = vst [vmem:[#allocation2 + $0x34] sm:$0x1] %v321_v54  ;;  %v194_v0 = vld [vmem:[%s2713_s6 + $0x8] sm:$0xf]  ;;  %966 = vmatpush.bf16.msra.mxu3 %v2539_v2  ;;  %v209_v5 = vshrl.u32 %v193_v63, 16  ;;  %v212_v41 = vshll.u32 %v193_v63, 16 }
  0x2b   : > { %v504_v3 = vunpack.c.l.b16 %v453_v57  ;;  %v324_v4 = vsel %vm2730_vm4, %v254_v52, %v323_v49  ;;  %v327_v56 = vsel %vm2737_vm5, %v255_v53, %v326_v55  ;;  %v217_v40 = vshrl.u32 %v194_v0, 16  ;;  %v2552_v13 = vld [vmem:[%s3351_s1 + $0x128] sm:$0xff]  ;;  %v2573_v15 = vld [vmem:[%s3351_s1 + $0x1b0] sm:$0xff]  ;;  %v2515_v21 = vld [vmem:[%s3351_s1 + $0x20] sm:$0xff] }
  0x2c   : > { %664 = vmatpush.bf16.msrb.mxu1 %v2518_v18  ;;  %1189 = vmatpush.bf16.msrb.mxu0 %v2554_v28  ;;  %325 = vst [vmem:[#allocation2 + $0x38] sm:$0xf] %v324_v4  ;;  %v220_v7 = vshll.u32 %v194_v0, 16  ;;  %v211_v60 = vrot.slane %v209_v5, 7  ;;  %v293_v24 = vld [vmem:[#allocation2 + $0x10] sm:$0xf] }
  0x2d   : > { %1490 = vmatpush.bf16.msrb.mxu2 %v2574_v39  ;;  %v509_v8 = vpack.c.b16 %v504_v3, %v503_v50  ;;  %328 = vst [vmem:[#allocation2 + $0x3c] sm:$0x1] %v327_v56  ;;  %v337_v9 = vld [vmem:[#allocation2 + $0x8] sm:$0xf]  ;;  %v2907_v14 = vrot.slane %v217_v40, 7  ;;  %v2551_v28 = vld [vmem:[%s3351_s1 + $0x120] sm:$0xff] }
  0x2e   : > { %v338_v16 = vld [vmem:[#allocation2 + $0xc] sm:$0x1]  ;;  %v385_v17 = vshrl.u32 %v337_v9, 16  ;;  %v388_v18 = vshll.u32 %v337_v9, 16  ;;  %v2112_v19 = vrot.slane %v337_v9, 9  ;;  %v214_v23 = vor.u32 %v212_v41, %v211_v60  ;;  %v2582_v45 = vld [vmem:[%s3351_s1 + $0x1f8] sm:$0xff] }
  0x2f   : > { %581 = vmatmul.bf16.vlgmr.msra.gmra.mxu1 %v509_v8  ;;  %v394_v25 = vshll.u32 %v338_v16, 16  ;;  %v710_v26 = vrot.slane %v338_v16, 5  ;;  %v215_v29 = vrot.slane %v211_v60, 4  ;;  %v222_v31 = vor.u32 %v220_v7, %v2907_v14  ;;  %v296_v37 = vld [vmem:[#allocation2 + $0x14] sm:$0x1]  ;;  %1720 = vmatpush.bf16.msrb.mxu3 %v2582_v45  ;;  %v2572_v58 = vld [vmem:[%s3351_s1 + $0x1a8] sm:$0xff] }
  0x30   : > { %665 = vmatpush.bf16.msrb.mxu1 %v2517_v47  ;;  %1190 = vmatpush.bf16.msrb.mxu0 %v2553_v51  ;;  %v2915_v27 = vld [vmem:[#allocation2 + $0x30] sm:$0xf]  ;;  %v387_v32 = vrot.slane %v385_v17, 4  ;;  %v390_v33 = vrot.slane %v388_v18, 5  ;;  %v223_v44 = vrot.slane %v2907_v14, 4  ;;  %v294_v57 = vsel %vm2730_vm4, %v214_v23, %v293_v24  ;;  %v2514_v4 = vld [vmem:[%s3351_s1 + $0x18] sm:$0xff] }
  0x31   : > { %1491 = vmatpush.bf16.msrb.mxu2 %v2573_v15  ;;  %v2921_v34 = vld [vmem:[#allocation2 + $0x34] sm:$0x1]  ;;  %v455_v35 = vshrl.u32 %v2915_v27, 16  ;;  %v458_v36 = vshll.u32 %v2915_v27, 16  ;;  %v396_v38 = vrot.slane %v394_v25, 5  ;;  %v711_v39 = vsel %vm2859_vm11, %v2112_v19, %v710_v26  ;;  %v2550_v7 = vld [vmem:[%s3351_s1 + $0x118] sm:$0xff] }
  0x32   : > { %v464_v43 = vshll.u32 %v2921_v34, 16  ;;  %v299_v2 = vld [vmem:[#allocation2 + $0x18] sm:$0xf]  ;;  %v391_v46 = vor.u32 %v390_v33, %v387_v32  ;;  %v754_v47 = vunpack.c.l.b16 %v711_v39  ;;  %v302_v51 = vld [vmem:[#allocation2 + $0x1c] sm:$0x1]  ;;  %v297_v41 = vsel %vm2737_vm5, %v215_v29, %v296_v37  ;;  %v2513_v15 = vld [vmem:[%s3351_s1 + $0x10] sm:$0xff] }
  0x33   : > { %v2932_v48 = vld [vmem:[#allocation2 + $0x38] sm:$0xf]  ;;  %v457_v49 = vrot.slane %v455_v35, 4  ;;  %v460_v50 = vrot.slane %v458_v36, 5  ;;  %295 = vst [vmem:[#allocation2 + $0x10] sm:$0xf] %v294_v57  ;;  %v300_v40 = vsel %vm2730_vm4, %v222_v31, %v299_v2  ;;  %v303_v60 = vsel %vm2737_vm5, %v223_v44, %v302_v51 }
  0x34   : > { %666 = vmatpush.bf16.msrb.mxu1 %v2516_v59  ;;  %1191 = vmatpush.bf16.msrb.mxu0 %v2552_v13  ;;  %v2934_v52 = vld [vmem:[#allocation2 + $0x3c] sm:$0x1]  ;;  %v466_v53 = vrot.slane %v464_v43, 5  ;;  %v469_v54 = vshrl.u32 %v2932_v48, 16  ;;  %v472_v55 = vshll.u32 %v2932_v48, 16  ;;  %v392_v62 = vrot.slane %v391_v46, 4 }
  0x35   : > { %v761_v63 = vpack.c.b16 %v754_v47, %v753_v12  ;;  %v461_v0 = vor.u32 %v460_v50, %v457_v49  ;;  %v478_v3 = vshll.u32 %v2934_v52, 16  ;;  %1492 = vmatpush.bf16.msrb.mxu2 %v2572_v58  ;;  %298 = vst [vmem:[#allocation2 + $0x14] sm:$0x1] %v297_v41  ;;  %v2963_v16 = vld [vmem:[#allocation2 + $0x8] sm:$0xf]  ;;  %v2581_v36 = vld [vmem:[%s3351_s1 + $0x1f0] sm:$0xff] }
  0x36   : > { %v471_v56 = vrot.slane %v469_v54, 4  ;;  %v474_v5 = vrot.slane %v472_v55, 5  ;;  %v397_v8 = vsel %vm2848_vm10, %v392_v62, %v396_v38  ;;  %301 = vst [vmem:[#allocation2 + $0x18] sm:$0xf] %v300_v40  ;;  %v2185_v19 = vld [vmem:[#allocation2 + $0x8] sm:$0xf]  ;;  %1721 = vmatpush.bf16.msrb.mxu3 %v2581_v36 }
  0x37   : > { %825 = vmatmul.bf16.vlgmr.msra.gmra.mxu2 %v761_v63  ;;  %v462_v59 = vrot.slane %v461_v0, 4  ;;  %v500_v9 = vunpack.c.l.b16 %v397_v8  ;;  %v480_v13 = vrot.slane %v478_v3, 5  ;;  %304 = vst [vmem:[#allocation2 + $0x1c] sm:$0x1] %v303_v60  ;;  %v2548_v35 = vld [vmem:[%s3351_s1 + $0x108] sm:$0xff]  ;;  %v2571_v37 = vld [vmem:[%s3351_s1 + $0x1a0] sm:$0xff] }
  0x38   : > { %667 = vmatpush.bf16.msrb.mxu1 %v2515_v21  ;;  %1192 = vmatpush.bf16.msrb.mxu0 %v2551_v28  ;;  %v475_v12 = vor.u32 %v474_v5, %v471_v56  ;;  %v2549_v21 = vld [vmem:[%s3351_s1 + $0x110] sm:$0xff]  ;;  %v2512_v28 = vld [vmem:[%s3351_s1 + $0x8] sm:$0xff]  ;;  %v1000_v44 = vshll.u32 %v2963_v16, 16  ;;  %v2511_v5 = vld [vmem:[%s3351_s1] sm:$0xff]  ;;  %v2115_v36 = vrot.slane %v2795_v61, 9 }
  0x39   : > { %v467_v14 = vsel %vm2848_vm10, %v462_v59, %v466_v53  ;;  %v507_v17 = vpack.c.b16 %v500_v9, %v2901_v10  ;;  %v997_v10 = vshrl.u32 %v2963_v16, 16  ;;  %1493 = vmatpush.bf16.msrb.mxu2 %v2571_v37  ;;  %v2580_v50 = vld [vmem:[%s3351_s1 + $0x1e8] sm:$0xff]  ;;  %v2547_v41 = vld [vmem:[%s3351_s1 + $0x100] sm:$0xff]  ;;  %v2562_v60 = vld [vmem:[%s3351_s1 + $0x178] sm:$0xff]  ;;  %v722_v37 = vrot.slane %v2805_v1, 5 }
  0x3a   : > { %v476_v18 = vrot.slane %v475_v12, 4  ;;  %v505_v23 = vunpack.c.l.b16 %v467_v14  ;;  %v339_v25 = vld [vmem:[#allocation2 + $0x10] sm:$0xf]  ;;  %v2570_v9 = vld [vmem:[%s3351_s1 + $0x198] sm:$0xff]  ;;  %1722 = vmatpush.bf16.msrb.mxu3 %v2580_v50  ;;  %v2560_v61 = vld [vmem:[%s3351_s1 + $0x168] sm:$0xff] }
  0x3b   : > { %571 = vmatmul.bf16.vlgmr.msra.gmra.mxu0 %v507_v17  ;;  %v2535_v26 = vld [vmem:[#allocation2 + $0xc] sm:$0xf0]  ;;  %v399_v31 = vshrl.u32 %v339_v25, 16  ;;  %v402_v32 = vshll.u32 %v339_v25, 16  ;;  %v2113_v39 = vrot.slane %v339_v25, 9  ;;  %v2588_v22 = vld [vmem:[%s3351_s1 + $0x228] sm:$0xff] }
  0x3c   : > { %668 = vmatpush.bf16.msrb.mxu1 %v2514_v4  ;;  %1193 = vmatpush.bf16.msrb.mxu0 %v2550_v7  ;;  %v481_v24 = vsel %vm2848_vm10, %v476_v18, %v480_v13  ;;  %v2186_v33 = vor.u32 %v2535_v26, %v2185_v19  ;;  %v340_v38 = vld [vmem:[#allocation2 + $0x14] sm:$0x1]  ;;  %v2984_v43 = vld [vmem:[#allocation2 + $0x10] sm:$0xf]  ;;  %v3009_v17 = vld [vmem:[#allocation2 + $0xc] sm:$0x1] }
  0x3d   : > { %v506_v29 = vunpack.c.l.b16 %v481_v24  ;;  %v341_v45 = vld [vmem:[#allocation2 + $0x18] sm:$0xf]  ;;  %v401_v46 = vrot.slane %v399_v31, 4  ;;  %v404_v47 = vrot.slane %v402_v32, 5  ;;  %v408_v49 = vshll.u32 %v340_v38, 16  ;;  %1494 = vmatpush.bf16.msrb.mxu2 %v2570_v9  ;;  %v2561_v32 = vld [vmem:[%s3351_s1 + $0x170] sm:$0xff] }
  0x3e   : > { %967 = vmatmul.bf16.vlgmr.msra.gmra.mxu3 %v2186_v33  ;;  %v342_v51 = vld [vmem:[#allocation2 + $0x1c] sm:$0x1]  ;;  %v413_v53 = vshrl.u32 %v341_v45, 16  ;;  %v416_v54 = vshll.u32 %v341_v45, 16  ;;  %v714_v55 = vrot.slane %v340_v38, 5  ;;  %v2114_v57 = vrot.slane %v341_v45, 9 }
  0x3f   : > { %v510_v2 = vpack.c.b16 %v506_v29, %v505_v23  ;;  %v405_v58 = vor.u32 %v404_v47, %v401_v46  ;;  %v410_v62 = vrot.slane %v408_v49, 5  ;;  %v422_v63 = vshll.u32 %v342_v51, 16  ;;  %v3012_v29 = vld [vmem:[#allocation2 + $0x14] sm:$0x1]  ;;  %v2189_v33 = vld [vmem:[#allocation2 + $0x18] sm:$0xf] }
  0x40   : > { %669 = vmatpush.bf16.msrb.mxu1 %v2513_v15  ;;  %1194 = vmatpush.bf16.msrb.mxu0 %v2549_v21  ;;  %v718_v0 = vrot.slane %v342_v51, 5  ;;  %v415_v3 = vrot.slane %v413_v53, 4  ;;  %v418_v4 = vrot.slane %v416_v54, 5  ;;  %v715_v56 = vsel %vm2859_vm11, %v2113_v39, %v714_v55  ;;  %v2065_v39 = vld [vmem:[#allocation2] sm:$0xf]  ;;  %v2568_v9 = vld [vmem:[%s3351_s1 + $0x188] sm:$0xff] }
  0x41   : > { %586 = vmatmul.bf16.gmra.mxu1 %v510_v2  ;;  %v1011_v40 = vshrl.u32 %v2984_v43, 16  ;;  %v406_v7 = vrot.slane %v405_v58, 4  ;;  %v755_v59 = vunpack.c.l.b16 %v715_v56  ;;  %v424_v13 = vrot.slane %v422_v63, 5  ;;  %v2579_v55 = vld [vmem:[%s3351_s1 + $0x1e0] sm:$0xff]  ;;  %v199_v58 = vld [vmem:[%s2713_s6 + $0x1c] sm:$0xf] }
  0x42   : > { %v719_v8 = vsel %vm2859_vm11, %v2114_v57, %v718_v0  ;;  %v419_v12 = vor.u32 %v418_v4, %v415_v3  ;;  %v999_v18 = vrot.slane %v997_v10, 4  ;;  %v1002_v19 = vrot.slane %v1000_v44, 5  ;;  %v2507_v44 = vld [vmem:[#allocation2 + $0x4] sm:$0xf0]  ;;  %v3038_v57 = vld [vmem:[%s3351_s1 + $0x238] sm:$0xff]  ;;  %v2569_v3 = vld [vmem:[%s3351_s1 + $0x190] sm:$0xff]  ;;  %1723 = vmatpush.bf16.msrb.mxu3 %v2579_v55 }
  0x43   : > { %v756_v14 = vunpack.c.l.b16 %v719_v8  ;;  %v411_v15 = vsel %vm2848_vm10, %v406_v7, %v410_v62  ;;  %v1014_v21 = vshll.u32 %v2984_v43, 16  ;;  %v1013_v25 = vrot.slane %v1011_v40, 4  ;;  %v3041_v0 = vld [vmem:[#allocation2 + $0x18] sm:$0xf]  ;;  %v3046_v4 = vld [vmem:[#allocation2 + $0x20] sm:$0xf]  ;;  %1495 = vmatpush.bf16.msrb.mxu2 %v2569_v3 }
  0x44   : > { %670 = vmatpush.bf16.msrb.mxu1 %v2512_v28  ;;  %1195 = vmatpush.bf16.msrb.mxu0 %v2548_v35  ;;  %v420_v23 = vrot.slane %v419_v12, 4  ;;  %v501_v26 = vunpack.c.l.b16 %v411_v15  ;;  %v2536_v28 = vld [vmem:[#allocation2 + $0x1c] sm:$0xf0]  ;;  %v1006_v35 = vshll.u32 %v3009_v17, 16  ;;  %v1003_v2 = vor.u32 %v1002_v19, %v999_v18  ;;  %v2578_v40 = vld [vmem:[%s3351_s1 + $0x1d8] sm:$0xff]  ;;  %v3058_v7 = vld [vmem:[%s3351_s1 + $0x230] sm:$0xff] }
  0x45   : > { %v762_v24 = vpack.c.b16 %v756_v14, %v755_v59  ;;  %v1016_v31 = vrot.slane %v1014_v21, 5  ;;  %v2116_v45 = vrot.slane %v2811_v6, 9  ;;  %v726_v46 = vrot.slane %v2824_v11, 5  ;;  %v2559_v56 = vld [vmem:[%s3351_s1 + $0x160] sm:$0xff]  ;;  %v2558_v19 = vld [vmem:[%s3351_s1 + $0x158] sm:$0xff] }
  0x46   : > { %v425_v10 = vsel %vm2848_vm10, %v420_v23, %v424_v13  ;;  %v1020_v49 = vshll.u32 %v3012_v29, 16  ;;  %v2190_v51 = vor.u32 %v2536_v28, %v2189_v33  ;;  %v2066_v1 = vor.u32 %v2507_v44, %v2065_v39  ;;  %1724 = vmatpush.bf16.msrb.mxu3 %v2578_v40  ;;  %v2567_v28 = vld [vmem:[%s3351_s1 + $0x180] sm:$0xff] }
  0x47   : > { %830 = vmatmul.bf16.gmra.mxu2 %v762_v24  ;;  %v502_v38 = vunpack.c.l.b16 %v425_v10  ;;  %v1017_v47 = vor.u32 %v1016_v31, %v1013_v25  ;;  %v1004_v53 = vrot.slane %v1003_v2, 4  ;;  %v1008_v54 = vrot.slane %v1006_v35, 5  ;;  %v329_v24 = vld [vmem:[#allocation2 + $0x40] sm:$0xf]  ;;  %v2537_v2 = vld [vmem:[#allocation2 + $0x2c] sm:$0xf0] }
  0x48   : > { %671 = vmatpush.bf16.msrb.mxu1 %v2511_v5  ;;  %1196 = vmatpush.bf16.msrb.mxu0 %v2547_v41  ;;  %v723_v6 = vsel %vm2859_vm11, %v2115_v36, %v722_v37  ;;  %v727_v11 = vsel %vm2859_vm11, %v2116_v45, %v726_v46  ;;  %v1022_v63 = vrot.slane %v1020_v49, 5  ;;  %v257_v8 = vshrl.u32 %v199_v58, 16  ;;  %v3078_v37 = vld [vmem:[#allocation2 + $0x1c] sm:$0x1] }
  0x49   : > { %v508_v50 = vpack.c.b16 %v502_v38, %v501_v26  ;;  %v1018_v62 = vrot.slane %v1017_v47, 4  ;;  %v757_v5 = vunpack.c.l.b16 %v723_v6  ;;  %v758_v41 = vunpack.c.l.b16 %v727_v11  ;;  %1496 = vmatpush.bf16.msrb.mxu2 %v2568_v9  ;;  %v3080_v38 = vld [vmem:[#allocation2 + $0x24] sm:$0x1]  ;;  %v2069_v47 = vld [vmem:[#allocation2 + $0x10] sm:$0xf] }
  0x4a   : > { %v1009_v59 = vsel %vm2848_vm10, %v1004_v53, %v1008_v54  ;;  %v260_v12 = vshll.u32 %v199_v58, 16  ;;  %v1028_v14 = vshll.u32 %v3041_v0, 16  ;;  %v1039_v15 = vshrl.u32 %v3046_v4, 16 }
  0x4b   : > { %576 = vmatmul.bf16.gmra.mxu0 %v508_v50  ;;  %v1023_v13 = vsel %vm2848_vm10, %v1018_v62, %v1022_v63  ;;  %v1042_v18 = vshll.u32 %v3046_v4, 16  ;;  %v259_v21 = vrot.slane %v257_v8, 7  ;;  %v763_v23 = vpack.c.b16 %v758_v41, %v757_v5  ;;  %v2557_v62 = vld [vmem:[%s3351_s1 + $0x150] sm:$0xff] }
  0x4c   : > { %1347 = vmatpush.bf16.msra.mxu1 %v2562_v60  ;;  %1878 = vmatpush.bf16.msra.mxu0 %v3038_v57  ;;  %v1025_v60 = vshrl.u32 %v3041_v0, 16  ;;  %v1125_v25 = vunpack.c.l.b16 %v1009_v59  ;;  %v1126_v26 = vunpack.c.l.b16 %v1023_v13  ;;  %v1030_v33 = vrot.slane %v1028_v14, 5  ;;  %v2556_v13 = vld [vmem:[%s3351_s1 + $0x148] sm:$0xff]  ;;  %v3124_v14 = vld [vmem:[#allocation2 + $0x10] sm:$0xf] }
  0x4d   : > { %v262_v31 = vor.u32 %v260_v12, %v259_v21  ;;  %v1041_v35 = vrot.slane %v1039_v15, 4  ;;  %v1044_v36 = vrot.slane %v1042_v18, 5  ;;  %v263_v39 = vrot.slane %v259_v21, 4  ;;  %1497 = vmatpush.bf16.msrb.mxu2 %v2567_v28  ;;  %v3132_v21 = vld [vmem:[#allocation2 + $0x2c] sm:$0x1] }
  0x4e   : > { %972 = vmatmul.bf16.gmra.mxu3 %v2190_v51  ;;  %v1027_v10 = vrot.slane %v1025_v60, 4  ;;  %v2117_v45 = vrot.slane %v2915_v27, 9  ;;  %v1133_v46 = vpack.c.b16 %v1126_v26, %v1125_v25  ;;  %v730_v49 = vrot.slane %v2921_v34, 5  ;;  %v332_v27 = vld [vmem:[#allocation2 + $0x44] sm:$0x1] }
  0x4f   : > { %v330_v44 = vsel %vm2730_vm4, %v262_v31, %v329_v24  ;;  %v2118_v50 = vrot.slane %v2932_v48, 9  ;;  %v734_v51 = vrot.slane %v2934_v52, 5  ;;  %v1034_v53 = vshll.u32 %v3078_v37, 16  ;;  %v3093_v34 = vld [vmem:[#allocation2 + $0x28] sm:$0xf]  ;;  %v2587_v60 = vld [vmem:[%s3351_s1 + $0x220] sm:$0xff] }
  0x50   : > { %1348 = vmatpush.bf16.msra.mxu1 %v2561_v32  ;;  %1879 = vmatpush.bf16.msra.mxu0 %v3058_v7  ;;  %v2193_v32 = vld [vmem:[#allocation2 + $0x28] sm:$0xf]  ;;  %331 = vst [vmem:[#allocation2 + $0x40] sm:$0xf] %v330_v44  ;;  %v1045_v20 = vor.u32 %v1044_v36, %v1041_v35  ;;  %v1048_v54 = vshll.u32 %v3080_v38, 16  ;;  %v333_v11 = vsel %vm2737_vm5, %v263_v39, %v332_v27  ;;  %v1053_v41 = vshrl.u32 %v3093_v34, 16 }
  0x51   : > { %672 = vmatmul.bf16.vlgmr.msrb.gmra.mxu1 %v2066_v1  ;;  %v1031_v1 = vor.u32 %v1030_v33, %v1027_v10  ;;  %2622 = vmatpush.bf16.msra.mxu2 %v3038_v57  ;;  %v2194_v6 = vor.u32 %v2537_v2, %v2193_v32  ;;  %v3095_v48 = vld [vmem:[#allocation2 + $0x30] sm:$0xf]  ;;  %v731_v55 = vsel %vm2859_vm11, %v2117_v45, %v730_v49  ;;  %v1036_v3 = vrot.slane %v1034_v53, 5  ;;  %v3134_v31 = vld [vmem:[#allocation2 + $0x34] sm:$0x1]  ;;  %v2575_v32 = vld [vmem:[%s3351_s1 + $0x1c0] sm:$0xff] }
  0x52   : > { %v735_v58 = vsel %vm2859_vm11, %v2118_v50, %v734_v51  ;;  %v2577_v57 = vld [vmem:[%s3351_s1 + $0x1d0] sm:$0xff]  ;;  %334 = vst [vmem:[#allocation2 + $0x44] sm:$0x1] %v333_v11  ;;  %v1050_v5 = vrot.slane %v1048_v54, 5  ;;  %v1056_v40 = vshll.u32 %v3093_v34, 16  ;;  %v1067_v8 = vshrl.u32 %v3095_v48, 16 }
  0x53   : > { %v1032_v63 = vrot.slane %v1031_v1, 4  ;;  %v1070_v59 = vshll.u32 %v3095_v48, 16  ;;  %v759_v9 = vunpack.c.l.b16 %v731_v55  ;;  %v760_v12 = vunpack.c.l.b16 %v735_v58  ;;  %1725 = vmatpush.bf16.msrb.mxu3 %v2577_v57  ;;  %v2197_v45 = vld [vmem:[#allocation2 + $0x38] sm:$0xf]  ;;  %v3145_v54 = vld [vmem:[#allocation2 + $0x14] sm:$0x1] }
  0x54   : > { %1349 = vmatpush.bf16.msra.mxu1 %v2560_v61  ;;  %v2508_v61 = vld [vmem:[#allocation2 + $0x14] sm:$0xf0]  ;;  %1880 = vmatpush.bf16.msra.mxu0 %v2588_v22  ;;  %v1058_v24 = vrot.slane %v1056_v40, 5  ;;  %v1069_v25 = vrot.slane %v1067_v8, 4  ;;  %v1528_v10 = vshrl.u32 %v3124_v14, 16  ;;  %v1531_v33 = vshll.u32 %v3124_v14, 16 }
  0x55   : > { %v2070_v52 = vor.u32 %v2508_v61, %v2069_v47  ;;  %2623 = vmatpush.bf16.msra.mxu2 %v3058_v7  ;;  %v2576_v7 = vld [vmem:[%s3351_s1 + $0x1c8] sm:$0xff]  ;;  %v1037_v15 = vsel %vm2848_vm10, %v1032_v63, %v1036_v3  ;;  %v1072_v26 = vrot.slane %v1070_v59, 5  ;;  %v764_v28 = vpack.c.b16 %v760_v12, %v759_v9  ;;  %v3147_v27 = vld [vmem:[#allocation2 + $0x1c] sm:$0x1]  ;;  %v2555_v40 = vld [vmem:[%s3351_s1 + $0x140] sm:$0xff] }
  0x56   : > { %v1127_v35 = vunpack.c.l.b16 %v1037_v15  ;;  %v1062_v44 = vshll.u32 %v3132_v21, 16  ;;  %v1076_v49 = vshll.u32 %v3134_v31, 16  ;;  %v1530_v51 = vrot.slane %v1528_v10, 4  ;;  %v2509_v11 = vld [vmem:[#allocation2 + $0x24] sm:$0xf0] }
  0x57   : > { %835 = vmatmul.bf16.gmra.mxu2 %v763_v23  ;;  %v1055_v23 = vrot.slane %v1053_v41, 4  ;;  %1726 = vmatpush.bf16.msrb.mxu3 %v2576_v7  ;;  %v1073_v47 = vor.u32 %v1072_v26, %v1069_v25  ;;  %v2538_v50 = vld [vmem:[#allocation2 + $0x3c] sm:$0xf0]  ;;  %v1533_v61 = vrot.slane %v1531_v33, 5  ;;  %v1537_v63 = vshll.u32 %v3145_v54, 16 }
  0x58   : > { %1350 = vmatpush.bf16.msra.mxu1 %v2559_v56  ;;  %v1046_v56 = vrot.slane %v1045_v20, 4  ;;  %1881 = vmatpush.bf16.msra.mxu0 %v2587_v60  ;;  %v2198_v55 = vor.u32 %v2538_v50, %v2197_v45  ;;  %v3157_v8 = vld [vmem:[#allocation2 + $0x38] sm:$0xf]  ;;  %v3159_v59 = vld [vmem:[#allocation2 + $0x40] sm:$0xf] }
  0x59   : > { %2624 = vmatpush.bf16.msra.mxu2 %v2588_v22  ;;  %v1074_v57 = vrot.slane %v1073_v47, 4  ;;  %v1078_v22 = vrot.slane %v1076_v49, 5  ;;  %v3168_v7 = vld [vmem:[#allocation2 + $0x20] sm:$0xf]  ;;  %v2353_v15 = vld [vmem:[#allocation2 + $0x10] sm:$0xf] }
  0x5a   : > { %v1051_v18 = vsel %vm2848_vm10, %v1046_v56, %v1050_v5  ;;  %v1551_v56 = vshll.u32 %v3147_v27, 16  ;;  %v2586_v5 = vld [vmem:[%s3351_s1 + $0x218] sm:$0xff]  ;;  %v1095_v10 = vshrl.u32 %v3159_v59, 16  ;;  %v1098_v33 = vshll.u32 %v3159_v59, 16 }
  0x5b   : > { %1197 = vmatmul.bf16.vlgmr.msrb.gmra.mxu0 %v1133_v46  ;;  %v1128_v36 = vunpack.c.l.b16 %v1051_v18  ;;  %v1059_v46 = vor.u32 %v1058_v24, %v1055_v23  ;;  %1727 = vmatpush.bf16.msrb.mxu3 %v2575_v32  ;;  %v1079_v12 = vsel %vm2848_vm10, %v1074_v57, %v1078_v22  ;;  %v1539_v23 = vrot.slane %v1537_v63, 5  ;;  %v2563_v26 = vld [vmem:[#allocation2 + $0x14] sm:$0xf0]  ;;  %v3183_v49 = vld [vmem:[#allocation2 + $0x3c] sm:$0x1] }
  0x5c   : > { %1351 = vmatpush.bf16.msra.mxu1 %v2558_v19  ;;  %v3130_v19 = vld [vmem:[#allocation2 + $0x18] sm:$0xf]  ;;  %1882 = vmatpush.bf16.msra.mxu0 %v2586_v5  ;;  %v1553_v25 = vrot.slane %v1551_v56, 5  ;;  %v1084_v32 = vshll.u32 %v3157_v8, 16  ;;  %v2354_v47 = vor.u32 %v2563_v26, %v2353_v15  ;;  %v3194_v63 = vld [vmem:[#allocation2 + $0x24] sm:$0x1] }
  0x5d   : > { %v1542_v39 = vshrl.u32 %v3130_v19, 16  ;;  %v1545_v2 = vshll.u32 %v3130_v19, 16  ;;  %2625 = vmatpush.bf16.msra.mxu2 %v2587_v60  ;;  %v1134_v20 = vpack.c.b16 %v1128_v36, %v1127_v35  ;;  %v1060_v58 = vrot.slane %v1059_v46, 4  ;;  %v2585_v60 = vld [vmem:[%s3351_s1 + $0x210] sm:$0xff]  ;;  %v2584_v35 = vld [vmem:[%s3351_s1 + $0x208] sm:$0xff] }
  0x5e   : > { %977 = vmatmul.bf16.gmra.mxu3 %v2194_v6  ;;  %v2073_v6 = vld [vmem:[#allocation2 + $0x20] sm:$0xf]  ;;  %v1556_v36 = vshrl.u32 %v3168_v7, 16  ;;  %v1130_v46 = vunpack.c.l.b16 %v1079_v12 }
  0x5f   : > { %v1544_v1 = vrot.slane %v1542_v39, 4  ;;  %v1547_v53 = vrot.slane %v1545_v2, 5  ;;  %v2074_v41 = vor.u32 %v2509_v11, %v2073_v6  ;;  %v1559_v39 = vshll.u32 %v3168_v7, 16  ;;  %v2583_v11 = vld [vmem:[%s3351_s1 + $0x200] sm:$0xff] }
  0x60   : > { %1352 = vmatpush.bf16.msra.mxu1 %v2557_v62  ;;  %v1534_v62 = vor.u32 %v1533_v61, %v1530_v51  ;;  %1883 = vmatpush.bf16.msra.mxu0 %v2585_v60  ;;  %v3189_v61 = vld [vmem:[#allocation2 + $0x44] sm:$0x1]  ;;  %v1100_v6 = vrot.slane %v1098_v33, 5 }
  0x61   : > { %677 = vmatmul.bf16.gmra.mxu1 %v2070_v52  ;;  %v1064_v52 = vrot.slane %v1062_v44, 5  ;;  %v1548_v3 = vor.u32 %v1547_v53, %v1544_v1  ;;  %2626 = vmatpush.bf16.msra.mxu2 %v2586_v5  ;;  %v1086_v53 = vrot.slane %v1084_v32, 5  ;;  %v2077_v5 = vld [vmem:[#allocation2 + $0x30] sm:$0xf]  ;;  %v1104_v12 = vshll.u32 %v3189_v61, 16 }
  0x62   : > { %v1535_v18 = vrot.slane %v1534_v62, 4 }
  0x63   : > { %v1065_v9 = vsel %vm2848_vm10, %v1060_v58, %v1064_v52  ;;  %v1549_v24 = vrot.slane %v1548_v3, 4  ;;  %v1558_v52 = vrot.slane %v1556_v36, 4  ;;  %v3196_v3 = vld [vmem:[#allocation2 + $0x2c] sm:$0x1]  ;;  %v1106_v33 = vrot.slane %v1104_v12, 5 }
  0x64   : > { %1353 = vmatpush.bf16.msra.mxu1 %v2556_v13  ;;  %v3170_v13 = vld [vmem:[#allocation2 + $0x28] sm:$0xf]  ;;  %v1129_v45 = vunpack.c.l.b16 %v1065_v9  ;;  %v1540_v50 = vsel %vm2848_vm10, %v1535_v18, %v1539_v23  ;;  %1884 = vmatpush.bf16.msra.mxu0 %v2584_v35  ;;  %v1565_v18 = vshll.u32 %v3194_v63, 16  ;;  %v3226_v12 = vld [vmem:[#allocation2 + $0x34] sm:$0x1] }
  0x65   : > { %v1570_v44 = vshrl.u32 %v3170_v13, 16  ;;  %v1573_v2 = vshll.u32 %v3170_v13, 16  ;;  %2627 = vmatpush.bf16.msra.mxu2 %v2585_v60  ;;  %v1554_v51 = vsel %vm2848_vm10, %v1549_v24, %v1553_v25  ;;  %v1656_v22 = vunpack.c.l.b16 %v1540_v50 }
  0x66   : > { %v1657_v62 = vunpack.c.l.b16 %v1554_v51  ;;  %v1135_v56 = vpack.c.b16 %v1130_v46, %v1129_v45  ;;  %v1090_v60 = vshll.u32 %v3183_v49, 16  ;;  %v1579_v24 = vshll.u32 %v3196_v3, 16  ;;  %v3204_v45 = vld [vmem:[#allocation2 + $0x38] sm:$0xf] }
  0x67   : > { %840 = vmatmul.bf16.gmra.mxu2 %v764_v28  ;;  %v1081_v28 = vshrl.u32 %v3157_v8, 16  ;;  %v1572_v58 = vrot.slane %v1570_v44, 4  ;;  %v1575_v57 = vrot.slane %v1573_v2, 5  ;;  %v1567_v36 = vrot.slane %v1565_v18, 5  ;;  %v3202_v2 = vld [vmem:[#allocation2 + $0x30] sm:$0xf] }
  0x68   : > { %1354 = vmatpush.bf16.msra.mxu1 %v2555_v40  ;;  %1885 = vmatpush.bf16.msra.mxu0 %v2583_v11  ;;  %v1664_v25 = vpack.c.b16 %v1657_v62, %v1656_v22  ;;  %v1092_v32 = vrot.slane %v1090_v60, 5  ;;  %v1581_v44 = vrot.slane %v1579_v24, 5  ;;  %v1236_v46 = vrot.slane %v3009_v17, 5 }
  0x69   : > { %v1083_v1 = vrot.slane %v1081_v28, 4  ;;  %2628 = vmatpush.bf16.msra.mxu2 %v2584_v35  ;;  %v1576_v23 = vor.u32 %v1575_v57, %v1572_v58  ;;  %v1601_v58 = vshll.u32 %v3204_v45, 16 }
  0x6b   : > { %1202 = vmatmul.bf16.gmra.mxu0 %v1134_v20  ;;  %v1097_v20 = vrot.slane %v1095_v10, 4  ;;  %v1087_v40 = vor.u32 %v1086_v53, %v1083_v1  ;;  %v2357_v1 = vld [vmem:[#allocation2 + $0x20] sm:$0xf]  ;;  %v2564_v53 = vld [vmem:[#allocation2 + $0x24] sm:$0xf0] }
  0x6c   : > { %v2358_v57 = vor.u32 %v2564_v53, %v2357_v1  ;;  %v2361_v1 = vld [vmem:[#allocation2 + $0x30] sm:$0xf]  ;;  %v2565_v53 = vld [vmem:[#allocation2 + $0x34] sm:$0xf0] }
  0x6d   : > { %v1101_v9 = vor.u32 %v1100_v6, %v1097_v20  ;;  %2629 = vmatpush.bf16.msra.mxu2 %v2583_v11  ;;  %v1088_v28 = vrot.slane %v1087_v40, 4  ;;  %v2279_v20 = vrot.slane %v2963_v16, 9  ;;  %v2280_v6 = vrot.slane %v2984_v43, 9 }
  0x6e   : > { %982 = vmatmul.bf16.gmra.mxu3 %v2198_v55  ;;  %v1561_v55 = vrot.slane %v1559_v39, 5  ;;  %v1577_v39 = vrot.slane %v1576_v23, 4 }
  0x6f   : > { %v1102_v10 = vrot.slane %v1101_v9, 4  ;;  %v1093_v50 = vsel %vm2848_vm10, %v1088_v28, %v1092_v32  ;;  %v1237_v16 = vsel %vm2859_vm11, %v2279_v20, %v1236_v46  ;;  %v1603_v9 = vrot.slane %v1601_v58, 5 }
  0x70   : > { %v1562_v15 = vor.u32 %v1561_v55, %v1558_v52  ;;  %v1582_v17 = vsel %vm2848_vm10, %v1577_v39, %v1581_v44  ;;  %v1587_v52 = vshll.u32 %v3202_v2, 16  ;;  %v1598_v55 = vshrl.u32 %v3204_v45, 16 }
  0x71   : > { %682 = vmatmul.bf16.gmra.mxu1 %v2074_v41  ;;  %v2510_v41 = vld [vmem:[#allocation2 + $0x34] sm:$0xf0]  ;;  %v1107_v51 = vsel %vm2848_vm10, %v1102_v10, %v1106_v33  ;;  %v1131_v22 = vunpack.c.l.b16 %v1093_v50  ;;  %v1283_v23 = vunpack.c.l.b16 %v1237_v16  ;;  %v1593_v28 = vshll.u32 %v3226_v12, 16 }
  0x72   : > { %v2078_v26 = vor.u32 %v2510_v41, %v2077_v5  ;;  %v1563_v35 = vrot.slane %v1562_v15, 4  ;;  %v1132_v62 = vunpack.c.l.b16 %v1107_v51  ;;  %v1659_v5 = vunpack.c.l.b16 %v1582_v17  ;;  %v3228_v15 = vld [vmem:[#allocation2 + $0x3c] sm:$0x1] }
  0x73   : > { %v1589_v40 = vrot.slane %v1587_v52, 5  ;;  %v1600_v60 = vrot.slane %v1598_v55, 4  ;;  %v1607_v10 = vshll.u32 %v3228_v15, 16  ;;  %v1767_v33 = vrot.slane %v3145_v54, 5 }
  0x74   : > { %v1568_v11 = vsel %vm2848_vm10, %v1563_v35, %v1567_v36  ;;  %v1136_v18 = vpack.c.b16 %v1132_v62, %v1131_v22  ;;  %v1771_v35 = vrot.slane %v3147_v27, 5  ;;  %v2447_v39 = vrot.slane %v3124_v14, 9  ;;  %v3240_v27 = vld [vmem:[#allocation2 + $0x40] sm:$0xf] }
  0x75   : > { %v1604_v32 = vor.u32 %v1603_v9, %v1600_v60  ;;  %v2448_v44 = vrot.slane %v3130_v19, 9  ;;  %v1609_v51 = vrot.slane %v1607_v10, 5  ;;  %v2281_v14 = vrot.slane %v3041_v0, 9 }
  0x76   : > { %v1768_v20 = vsel %vm2859_vm11, %v2447_v39, %v1767_v33  ;;  %v1244_v19 = vrot.slane %v3078_v37, 5  ;;  %v1248_v17 = vrot.slane %v3080_v38, 5  ;;  %v1612_v58 = vshrl.u32 %v3240_v27, 16 }
  0x77   : > { %1498 = vmatmul.bf16.vlgmr.msrb.gmra.mxu2 %v2354_v47  ;;  %v1240_v47 = vrot.slane %v3012_v29, 5  ;;  %v1584_v29 = vshrl.u32 %v3202_v2, 16  ;;  %v1605_v50 = vrot.slane %v1604_v32, 4  ;;  %v1772_v54 = vsel %vm2859_vm11, %v2448_v44, %v1771_v35 }
  0x78   : > { %v1814_v37 = vunpack.c.l.b16 %v1768_v20  ;;  %v1815_v62 = vunpack.c.l.b16 %v1772_v54  ;;  %v2450_v32 = vrot.slane %v3170_v13, 9  ;;  %v1779_v10 = vrot.slane %v3196_v3, 5  ;;  %v2566_v3 = vld [vmem:[#allocation2 + $0x44] sm:$0xf0] }
  0x79   : > { %v1241_v43 = vsel %vm2859_vm11, %v2280_v6, %v1240_v47  ;;  %v1586_v41 = vrot.slane %v1584_v29, 4  ;;  %v1595_v47 = vrot.slane %v1593_v28, 5  ;;  %v3242_v6 = vld [vmem:[#allocation2 + $0x48] sm:$0xf]  ;;  %v2362_v29 = vor.u32 %v2565_v53, %v2361_v1 }
  0x7a   : > { %v1284_v24 = vunpack.c.l.b16 %v1241_v43  ;;  %v1610_v55 = vsel %vm2848_vm10, %v1605_v50, %v1609_v51  ;;  %v1626_v22 = vshrl.u32 %v3242_v6, 16  ;;  %v1629_v0 = vshll.u32 %v3242_v6, 16 }
  0x7b   : > { %1207 = vmatmul.bf16.gmra.mxu0 %v1135_v56  ;;  %v1658_v56 = vunpack.c.l.b16 %v1568_v11  ;;  %v2282_v11 = vrot.slane %v3046_v4, 9  ;;  %v1245_v4 = vsel %vm2859_vm11, %v2281_v14, %v1244_v19  ;;  %v1661_v43 = vunpack.c.l.b16 %v1610_v55 }
  0x7c   : > { %v1291_v36 = vpack.c.b16 %v1284_v24, %v1283_v23  ;;  %v1822_v60 = vpack.c.b16 %v1815_v62, %v1814_v37  ;;  %v1285_v9 = vunpack.c.l.b16 %v1245_v4  ;;  %v1398_v23 = vld [vmem:[#allocation2 + $0x44] sm:$0x1]  ;;  %v1400_v24 = vld [vmem:[#allocation2 + $0x4c] sm:$0x1]  ;;  %v1775_v28 = vrot.slane %v3194_v63, 5 }
  0x7d   : > { %v1249_v38 = vsel %vm2859_vm11, %v2282_v11, %v1248_v17  ;;  %v1621_v35 = vshll.u32 %v1398_v23, 16  ;;  %v1635_v39 = vshll.u32 %v1400_v24, 16  ;;  %v2283_v1 = vrot.slane %v3093_v34, 9 }
  0x7e   : > { %1728 = vmatmul.bf16.vlgmr.msrb.gmra.mxu3 %v1664_v25  ;;  %v1665_v25 = vpack.c.b16 %v1659_v5, %v1658_v56  ;;  %v1614_v56 = vrot.slane %v1612_v58, 4  ;;  %v1252_v53 = vrot.slane %v3132_v21, 5  ;;  %v2284_v20 = vrot.slane %v3095_v48, 9 }
  0x7f   : > { %v1623_v63 = vrot.slane %v1621_v35, 5  ;;  %v1637_v13 = vrot.slane %v1635_v39, 5  ;;  %v1256_v54 = vrot.slane %v3134_v31, 5  ;;  %v2454_v37 = vrot.slane %v3242_v6, 9 }
  0x81   : > { %687 = vmatmul.bf16.gmra.mxu1 %v2078_v26  ;;  %v1590_v26 = vor.u32 %v1589_v40, %v1586_v41  ;;  %v1628_v41 = vrot.slane %v1626_v22, 4  ;;  %v1631_v40 = vrot.slane %v1629_v0, 5  ;;  %v1257_v34 = vsel %vm2859_vm11, %v2284_v20, %v1256_v54 }
  0x82   : > { %v1288_v58 = vunpack.c.l.b16 %v1257_v34  ;;  %v1795_v22 = vrot.slane %v1400_v24, 5  ;;  %v2453_v0 = vrot.slane %v3240_v27, 9 }
  0x83   : > { %v1591_v46 = vrot.slane %v1590_v26, 4 }
  0x85   : > { %v1596_v52 = vsel %vm2848_vm10, %v1591_v46, %v1595_v47  ;;  %v2365_v47 = vld [vmem:[#allocation2 + $0x40] sm:$0xf] }
  0x86   : > { %v1660_v16 = vunpack.c.l.b16 %v1596_v52  ;;  %v2366_v11 = vor.u32 %v2566_v3, %v2365_v47  ;;  %v1253_v52 = vsel %vm2859_vm11, %v2283_v1, %v1252_v53 }
  0x87   : > { %1503 = vmatmul.bf16.gmra.mxu2 %v2358_v57  ;;  %v1615_v57 = vshll.u32 %v3240_v27, 16  ;;  %v1287_v31 = vunpack.c.l.b16 %v1253_v52  ;;  %v1796_v27 = vsel %vm2859_vm11, %v2454_v37, %v1795_v22 }
  0x88   : > { %v1666_v26 = vpack.c.b16 %v1661_v43, %v1660_v16  ;;  %v1783_v16 = vrot.slane %v3226_v12, 5  ;;  %v2452_v43 = vrot.slane %v3204_v45, 9  ;;  %v2285_v45 = vrot.slane %v3157_v8, 9 }
  0x89   : > { %v1617_v5 = vrot.slane %v1615_v57, 5  ;;  %v1791_v57 = vrot.slane %v1398_v23, 5  ;;  %v1293_v4 = vpack.c.b16 %v1288_v58, %v1287_v31 }
  0x8b   : > { %1212 = vmatmul.bf16.gmra.mxu0 %v1136_v18  ;;  %v1286_v18 = vunpack.c.l.b16 %v1249_v38  ;;  %v1618_v33 = vor.u32 %v1617_v5, %v1614_v56  ;;  %v2451_v38 = vrot.slane %v3202_v2, 9  ;;  %v1787_v56 = vrot.slane %v3228_v15, 5 }
  0x8c   : > { %v1792_v5 = vsel %vm2859_vm11, %v2453_v0, %v1791_v57  ;;  %v1260_v15 = vrot.slane %v3183_v49, 5 }
  0x8d   : > { %v1292_v44 = vpack.c.b16 %v1286_v18, %v1285_v9  ;;  %v1619_v50 = vrot.slane %v1618_v33, 4  ;;  %v1820_v6 = vunpack.c.l.b16 %v1792_v5  ;;  %v1784_v2 = vsel %vm2859_vm11, %v2451_v38, %v1783_v16 }
  0x8e   : > { %1733 = vmatmul.bf16.gmra.mxu3 %v1665_v25  ;;  %v2449_v25 = vrot.slane %v3168_v7, 9  ;;  %v1780_v7 = vsel %vm2859_vm11, %v2450_v32, %v1779_v10  ;;  %v1788_v12 = vsel %vm2859_vm11, %v2452_v43, %v1787_v56  ;;  %v1818_v23 = vunpack.c.l.b16 %v1784_v2 }
  0x8f   : > { %v1817_v19 = vunpack.c.l.b16 %v1780_v7  ;;  %v1624_v17 = vsel %vm2848_vm10, %v1619_v50, %v1623_v63  ;;  %v1819_v24 = vunpack.c.l.b16 %v1788_v12 }
  0x90   : > { %v1776_v46 = vsel %vm2859_vm11, %v2449_v25, %v1775_v28  ;;  %v1662_v21 = vunpack.c.l.b16 %v1624_v17  ;;  %v1261_v25 = vsel %vm2859_vm11, %v2285_v45, %v1260_v15 }
  0x91   : > { %1355 = vmatmul.bf16.vlgmr.msra.gmra.mxu1 %v1291_v36  ;;  %v1632_v36 = vor.u32 %v1631_v40, %v1628_v41  ;;  %v1816_v14 = vunpack.c.l.b16 %v1776_v46  ;;  %v1821_v41 = vunpack.c.l.b16 %v1796_v27  ;;  %v2286_v40 = vrot.slane %v3159_v59, 9 }
  0x92   : > { %v1824_v32 = vpack.c.b16 %v1819_v24, %v1818_v23  ;;  %v1289_v8 = vunpack.c.l.b16 %v1261_v25 }
  0x93   : > { %v1633_v51 = vrot.slane %v1632_v36, 4  ;;  %v1823_v48 = vpack.c.b16 %v1817_v19, %v1816_v14  ;;  %v1825_v18 = vpack.c.b16 %v1821_v41, %v1820_v6 }
  0x97   : > { %1508 = vmatmul.bf16.gmra.mxu2 %v2362_v29  ;;  %v1638_v29 = vsel %vm2848_vm10, %v1633_v51, %v1637_v13 }
  0x98   : > { %v1663_v55 = vunpack.c.l.b16 %v1638_v29 }
  0x9a   : > { %v1667_v30 = vpack.c.b16 %v1663_v55, %v1662_v21 }
  0x9b   : > { %1886 = vmatmul.bf16.vlgmr.msra.gmra.mxu0 %v1822_v60  ;;  %v1264_v60 = vrot.slane %v3189_v61, 5 }
  0x9e   : > { %1738 = vmatmul.bf16.gmra.mxu3 %v1666_v26  ;;  %v1265_v26 = vsel %vm2859_vm11, %v2286_v40, %v1264_v60 }
  0x9f   : > { %v1290_v10 = vunpack.c.l.b16 %v1265_v26 }
  0xa1   : > { %1360 = vmatmul.bf16.gmra.mxu1 %v1292_v44  ;;  %v1294_v59 = vpack.c.b16 %v1290_v10, %v1289_v8 }
  0xa7   : > { %1513 = vmatmul.bf16.gmra.mxu2 %v2366_v11 }
  0xab   : > { %1891 = vmatmul.bf16.gmra.mxu0 %v1823_v48 }
  0xac   : > { %v3282_v62 = vpop.f32.mrf.mxu1 }
  0xae   : > { %1743 = vmatmul.bf16.gmra.mxu3 %v1667_v30 }
  0xb1   : > { %1365 = vmatmul.bf16.gmra.mxu1 %v1293_v4 }
  0xb4   : > { %v584_v9 = vpop.f32.mrf.mxu1 }
  0xb7   : > { %1901 = vmatmul.bf16.vlgmr.msra.gmra.mxu2 %v1825_v18 }
  0xb8   : > { %v572_v28 = vpop.f32.mrf.mxu0 }
  0xba   : > { %v826_v49 = vpop.f32.mrf.mxu2 }
  0xbb   : > { %1896 = vmatmul.bf16.gmra.mxu0 %v1824_v32 }
  0xbe   : > { %v587_v33 = vpop.f32.mrf.mxu1 }
  0xc0   : > { %v574_v61 = vpop.f32.mrf.mxu0 }
  0xc1   : > { %1370 = vmatmul.bf16.gmra.mxu1 %v1294_v59  ;;  %v968_v36 = vpop.f32.mrf.mxu3 }
  0xc2   : > { %v828_v35 = vpop.f32.mrf.mxu2 }
  0xc6   : > { %v589_v39 = vpop.f32.mrf.mxu1 }
  0xc8   : > { %v577_v44 = vpop.f32.mrf.mxu0 }
  0xc9   : > { %v970_v46 = vpop.f32.mrf.mxu3 }
  0xca   : > { %v831_v7 = vpop.f32.mrf.mxu2 }
  0xce   : > { %v673_v47 = vpop.f32.mrf.mxu1 }
  0xcf   : > { %v674_v42 = vadd.f32 %v673_v47, %v572_v28 }
  0xd0   : > { %v579_v63 = vpop.f32.mrf.mxu0 }
  0xd1   : > { %v846_v50 = vadd.f32 %v826_v49, %v674_v42  ;;  %v973_v51 = vpop.f32.mrf.mxu3 }
  0xd2   : > { %v833_v13 = vpop.f32.mrf.mxu2 }
  0xd3   : > { %v988_v3 = vadd.f32 %v968_v36, %v846_v50 }
  0xd6   : > { %v675_v1 = vpop.f32.mrf.mxu1 }
  0xd7   : > { %v676_v53 = vadd.f32 %v675_v1, %v574_v61 }
  0xd8   : > { %v1198_v54 = vpop.f32.mrf.mxu0 }
  0xd9   : > { %v847_v20 = vadd.f32 %v828_v35, %v676_v53  ;;  %v975_v14 = vpop.f32.mrf.mxu3  ;;  %v1218_v19 = vadd.f32 %v1198_v54, %v988_v3  ;;  %v3320_v53 = vld [vmem:[%s3352_s2] ss:$0 sm:$0xff] }
  0xda   : > { %v836_v11 = vpop.f32.mrf.mxu2 }
  0xdb   : > { %v989_v61 = vadd.f32 %v970_v46, %v847_v20 }
  0xde   : > { %v678_v17 = vpop.f32.mrf.mxu1 }
  0xdf   : > { %v679_v29 = vadd.f32 %v678_v17, %v577_v44 }
  0xe0   : > { %v1200_v34 = vpop.f32.mrf.mxu0 }
  0xe1   : > { %v848_v52 = vadd.f32 %v831_v7, %v679_v29  ;;  %v978_v21 = vpop.f32.mrf.mxu3  ;;  %v1219_v44 = vadd.f32 %v1200_v34, %v989_v61 }
  0xe2   : > { %v838_v55 = vpop.f32.mrf.mxu2 }
  0xe3   : > { %v990_v48 = vadd.f32 %v973_v51, %v848_v52 }
  0xe6   : > { %v680_v31 = vpop.f32.mrf.mxu1 }
  0xe7   : > { %v681_v58 = vadd.f32 %v680_v31, %v579_v63 }
  0xe8   : > { %v1203_v22 = vpop.f32.mrf.mxu0 }
  0xe9   : > { %v849_v57 = vadd.f32 %v833_v13, %v681_v58  ;;  %v3304_v0 = vpop.f32.mrf.mxu3  ;;  %v1220_v37 = vadd.f32 %v1203_v22, %v990_v48 }
  0xea   : > { %v841_v30 = vpop.f32.mrf.mxu2 }
  0xeb   : > { %v991_v20 = vadd.f32 %v975_v14, %v849_v57 }
  0xee   : > { %v683_v4 = vpop.f32.mrf.mxu1 }
  0xef   : > { %v684_v38 = vadd.f32 %v683_v4, %v3282_v62 }
  0xf0   : > { %v1205_v43 = vpop.f32.mrf.mxu0 }
  0xf1   : > { %v850_v16 = vadd.f32 %v836_v11, %v684_v38  ;;  %v983_v56 = vpop.f32.mrf.mxu3  ;;  %v1221_v34 = vadd.f32 %v1205_v43, %v991_v20 }
  0xf2   : > { %v843_v5 = vpop.f32.mrf.mxu2 }
  0xf3   : > { %v992_v27 = vadd.f32 %v978_v21, %v850_v16 }
  0xf6   : > { %v685_v6 = vpop.f32.mrf.mxu1 }
  0xf7   : > { %v686_v41 = vadd.f32 %v685_v6, %v584_v9 }
  0xf8   : > { %v1208_v12 = vpop.f32.mrf.mxu0 }
  0xf9   : > { %v851_v2 = vadd.f32 %v838_v55, %v686_v41  ;;  %v3307_v45 = vpop.f32.mrf.mxu3  ;;  %v1222_v15 = vadd.f32 %v1208_v12, %v992_v27 }
  0xfa   : > { %v1499_v40 = vpop.f32.mrf.mxu2 }
  0xfe   : > { %v688_v60 = vpop.f32.mrf.mxu1 }
  0xff   : > { %v689_v18 = vadd.f32 %v688_v60, %v587_v33 }
 0x100   : > { %v1210_v24 = vpop.f32.mrf.mxu0 }
 0x101   : > { %v852_v23 = vadd.f32 %v841_v30, %v689_v18  ;;  %v1729_v26 = vpop.f32.mrf.mxu3 }
 0x102   : > { %v1501_v62 = vpop.f32.mrf.mxu2 }
 0x103   : > { %v3309_v25 = vadd.f32 %v983_v56, %v852_v23 }
 0x106   : > { %v690_v28 = vpop.f32.mrf.mxu1 }
 0x107   : > { %v691_v32 = vadd.f32 %v690_v28, %v589_v39 }
 0x108   : > { %v3313_v10 = vpop.f32.mrf.mxu0 }
 0x109   : > { %v3311_v8 = vadd.f32 %v843_v5, %v691_v32  ;;  %v1731_v59 = vpop.f32.mrf.mxu3  ;;  %v993_v5 = vadd.f32 %v3304_v0, %v851_v2  ;;  %v1224_v61 = vadd.f32 %v3313_v10, %v3309_v25 }
 0x10a   : > { %v1504_v9 = vpop.f32.mrf.mxu2 }
 0x10e   : > { %v1356_v49 = vpop.f32.mrf.mxu1 }
 0x10f   : > { %v1376_v36 = vadd.f32 %v1356_v49, %v1218_v19 }
 0x110   : > { %v3315_v35 = vpop.f32.mrf.mxu0 }
 0x111   : > { %v1519_v47 = vadd.f32 %v1499_v40, %v1376_v36  ;;  %v1734_v50 = vpop.f32.mrf.mxu3  ;;  %v1223_v40 = vadd.f32 %v1210_v24, %v993_v5 }
 0x112   : > { %v1506_v33 = vpop.f32.mrf.mxu2 }
 0x113   : > { %v1749_v51 = vadd.f32 %v1729_v26, %v1519_v47 }
 0x116   : > { %v1358_v7 = vpop.f32.mrf.mxu1 }
 0x117   : > { %v1377_v42 = vadd.f32 %v1358_v7, %v1219_v44  ;;  %v995_v7 = vadd.f32 %v3307_v45, %v3311_v8 }
 0x118   : > { %v1887_v63 = vpop.f32.mrf.mxu0 }
 0x119   : > { %v1520_v39 = vadd.f32 %v1501_v62, %v1377_v42  ;;  %v1907_v1 = vadd.f32 %v1887_v63, %v1749_v51  ;;  %v1736_v19 = vpop.f32.mrf.mxu3 }
 0x11a   : > { %v1509_v13 = vpop.f32.mrf.mxu2 }
 0x11b   : > { %v1750_v46 = vadd.f32 %v1731_v59, %v1520_v39  ;;  %v1919_v11 = vadd.f32 %v3320_v53, %v1907_v1  ;;  %v1225_v39 = vadd.f32 %v3315_v35, %v995_v7 }
 0x11d   : > { %v1927_v48 = vmax.f32 %v1919_v11, 0.0 }
 0x11e   : > { %v1361_v3 = vpop.f32.mrf.mxu1 }
 0x11f   : > { %v1378_v29 = vadd.f32 %v1361_v3, %v1220_v37 }
 0x120   : > { %v1889_v54 = vpop.f32.mrf.mxu0 }
 0x121   : > { %v1908_v17 = vadd.f32 %v1889_v54, %v1750_v46  ;;  %v1521_v58 = vadd.f32 %v1504_v9, %v1378_v29  ;;  %v1739_v4 = vpop.f32.mrf.mxu3 }
 0x122   : > { %v1511_v52 = vpop.f32.mrf.mxu2 }
 0x123   : > { %v1920_v21 = vadd.f32 %v3320_v53, %v1908_v17  ;;  %v1751_v37 = vadd.f32 %v1734_v50, %v1521_v58 }
 0x125   : > { %v1928_v31 = vmax.f32 %v1920_v21, 0.0 }
 0x126   : > { %v1363_v55 = vpop.f32.mrf.mxu1 }
 0x127   : > { %v1379_v22 = vadd.f32 %v1363_v55, %v1221_v34  ;;  %v2594_v14 = vpack.c.bf16 %v1928_v31, %v1927_v48 }
 0x128   : > { %v1892_v57 = vpop.f32.mrf.mxu0 }
 0x129   : > { %2595 = vst [vmem:[%s3329_s24] sm:$0xff] %v2594_v14   ;;  %v1522_v30 = vadd.f32 %v1506_v33, %v1379_v22  ;;  %v1909_v43 = vadd.f32 %v1892_v57, %v1751_v37  ;;  %v1741_v18 = vpop.f32.mrf.mxu3 }
 0x12a   : > { %v1514_v38 = vpop.f32.mrf.mxu2 }
 0x12b   : > { %v1752_v56 = vadd.f32 %v1736_v19, %v1522_v30  ;;  %v1921_v6 = vadd.f32 %v3320_v53, %v1909_v43 }
 0x12d   : > { %v1929_v62 = vmax.f32 %v1921_v6, 0.0 }
 0x12e   : > { %v1366_v16 = vpop.f32.mrf.mxu1 }
 0x12f   : > { %v1380_v12 = vadd.f32 %v1366_v16, %v1222_v15 }
 0x130   : > { %v1894_v27 = vpop.f32.mrf.mxu0 }
 0x131   : > { %v1910_v41 = vadd.f32 %v1894_v27, %v1752_v56  ;;  %v1523_v28 = vadd.f32 %v1509_v13, %v1380_v12  ;;  %v1744_v44 = vpop.f32.mrf.mxu3 }
 0x132   : > { %v1516_v9 = vpop.f32.mrf.mxu2 }
 0x133   : > { %v1922_v60 = vadd.f32 %v3320_v53, %v1910_v41  ;;  %v1753_v0 = vadd.f32 %v1739_v4, %v1523_v28 }
 0x135   : > { %v1930_v26 = vmax.f32 %v1922_v60, 0.0 }
 0x136   : > { %v1368_v23 = vpop.f32.mrf.mxu1 }
 0x137   : > { %v1381_v32 = vadd.f32 %v1368_v23, %v1223_v40  ;;  %v2599_v49 = vpack.c.bf16 %v1930_v26, %v1929_v62 }
 0x138   : > { %v1897_v59 = vpop.f32.mrf.mxu0 }
 0x139   : > { %2611 = vst [vmem:[%s3329_s24 + $0x8] sm:$0xff] %v2599_v49   ;;  %v1524_v2 = vadd.f32 %v1511_v52, %v1381_v32  ;;  %v1911_v15 = vadd.f32 %v1897_v59, %v1753_v0  ;;  %v1746_v8 = vpop.f32.mrf.mxu3 }
 0x13a   : > { %v1902_v50 = vpop.f32.mrf.mxu2 }
 0x13b   : > { %v1754_v24 = vadd.f32 %v1741_v18, %v1524_v2  ;;  %v1923_v63 = vadd.f32 %v3320_v53, %v1911_v15 }
 0x13d   : > { %v1931_v3 = vmax.f32 %v1923_v63, 0.0 }
 0x13e   : > { %v1371_v36 = vpop.f32.mrf.mxu1 }
 0x13f   : > { %v1382_v33 = vadd.f32 %v1371_v36, %v1224_v61 }
 0x140   : > { %v1899_v42 = vpop.f32.mrf.mxu0 }
 0x141   : > { %v1525_v47 = vadd.f32 %v1514_v38, %v1382_v33  ;;  %v1912_v51 = vadd.f32 %v1899_v42, %v1754_v24 }
 0x142   : > { %v1904_v11 = vpop.f32.mrf.mxu2 }
 0x143   : > { %v1924_v13 = vadd.f32 %v3320_v53, %v1912_v51  ;;  %v1755_v25 = vadd.f32 %v1744_v44, %v1525_v47 }
 0x145   : > { %v1932_v1 = vmax.f32 %v1924_v13, 0.0  ;;  %v1913_v54 = vadd.f32 %v1902_v50, %v1755_v25 }
 0x146   : > { %v1373_v10 = vpop.f32.mrf.mxu1 }
 0x147   : > { %v1383_v46 = vadd.f32 %v1373_v10, %v1225_v39  ;;  %v2604_v20 = vpack.c.bf16 %v1932_v1, %v1931_v3  ;;  %v1925_v17 = vadd.f32 %v3320_v53, %v1913_v54 }
 0x149   : > { %v1526_v45 = vadd.f32 %v1516_v9, %v1383_v46  ;;  %2612 = vst [vmem:[%s3329_s24 + $0x10] sm:$0xff] %v2604_v20   ;;  %v1933_v52 = vmax.f32 %v1925_v17, 0.0 }
 0x14b   : > { %v1756_v19 = vadd.f32 %v1746_v8, %v1526_v45 }
 0x14d   : > { %v1914_v29 = vadd.f32 %v1904_v11, %v1756_v19 }
 0x14f   : > { %v1926_v35 = vadd.f32 %v3320_v53, %v1914_v29 }
 0x151   : > { %v1934_v34 = vmax.f32 %v1926_v35, 0.0 }
 0x153   : > { %v2609_v21 = vpack.c.bf16 %v1934_v34, %v1933_v52 }
 0x155   : > { %2613 = vst [vmem:[%s3329_s24 + $0x18] sm:$0xff] %v2609_v21  }
 0x156 PF: > { %s13_s12 = sadd.s32 1, %s2646_s12  }
 0x157   : > { %p10_p4 = scmp.ge.s32.totalorder %s13_s12, 4  }
 0x159   :  { %12 = sbr.rel (!%p10_p4) target bundleno = 1 (0x1), region = 72 }

// kernel: _lambda_.37
= control target key start
LH: loop header
LB: loop body
LE: loop exit
PB: predicated region body
PF: predicated region fallthrough
CT: control target
= control target key end

     0   :  { %s502_s15 = smov 0   ;;  %s549_s0 = inlined_call_operand.vmem [shape: bf16[32,128], index: 0, kind: input, shape index: {}]   ;;  %s550_s1 = inlined_call_operand.vmem [shape: bf16[128,128], index: 1, kind: input, shape index: {}]   ;;  %s551_s2 = inlined_call_operand.vmem [shape: f32[1,128], index: 2, kind: input, shape index: {}]   ;;  %s552_s3 = inlined_call_operand.vmem [shape: bf16[32,128], index: 3, kind: input, shape index: {}]   ;;  %s553_s4 = inlined_call_operand.vmem [shape: bf16[32,128], index: 4, kind: output, shape index: {}]  }
   0x1 LB: > { %s393_s16 = sadd.s32 4294967295, %s475_s15   ;;  %p397_p0 = scmp.ge.s32.totalorder %s475_s15, 1  ;;  %s475_s15 = sphi %s502_s15, %s14_s15  }
   0x2   : > { %p174_p1 = scmp.lt.s32.totalorder %s475_s15, 3 }
   0x4   : > { %p175_p2 = pnand %p397_p0, %p174_p1 }
   0x5   : > { %s398_s25 = sshll.u32 (!%p175_p2), %s393_s16, 1 }
   0x6   : > { %178 = sbr.rel (%p175_p2) target bundleno = 186 (0xba), region = 36  ;;  %p206_p3 = scmp.lt.s32.totalorder (!%p175_p2), %s398_s25, 3 }
   0xb   : > { %v450_v0 = vld [vmem:[%s550_s1 + $0x38] sm:$0xff]  ;;  %v449_v1 = vld [vmem:[%s550_s1 + $0x30] sm:$0xff]  ;;  %v448_v2 = vld [vmem:[%s550_s1 + $0x28] sm:$0xff]  ;;  %s555_s25 = smov (!%p206_p3, %s398_s25), 3 }
   0xc   : > { %299 = vmatpush.bf16.msra.mxu0 %v450_v0  ;;  %v447_v3 = vld [vmem:[%s550_s1 + $0x20] sm:$0xff]  ;;  %v446_v4 = vld [vmem:[%s550_s1 + $0x18] sm:$0xff]  ;;  %v445_v5 = vld [vmem:[%s550_s1 + $0x10] sm:$0xff]  ;;  %s399_s6 = sshll.u32 %s555_s25, 2 }
   0xd   : > { %v444_v6 = vld [vmem:[%s550_s1 + $0x8] sm:$0xff]  ;;  %v443_v7 = vld [vmem:[%s550_s1] sm:$0xff]  ;;  %s209_s11 = scalar_lea.vmem %s549_s0, %s399_s6  ;;  %s215_s14 = scalar_lea.vmem %s552_s3, %s399_s6 }
   0xe   : > { %v442_v8 = vld [vmem:[%s209_s11] sm:$0xff]  ;;  %s221_s20 = scalar_lea.vmem %s553_s4, %s399_s6 }
   0xf   : > { %v468_v10 = vld [vmem:[%s551_s2] ss:$0 sm:$0xff] }
  0x10   : > { %300 = vmatpush.bf16.msra.mxu0 %v449_v1  ;;  %v452_v11 = vld [vmem:[%s215_s14] sm:$0xff]  }
  0x11   : > { %v453_v13 = vunpack.c.l.bf16 %v452_v11  ;;  %v454_v14 = vunpack.c.h.bf16 %v452_v11 }
  0x14   : > { %301 = vmatpush.bf16.msra.mxu0 %v448_v2 }
  0x18   : > { %302 = vmatpush.bf16.msra.mxu0 %v447_v3 }
  0x1c   : > { %303 = vmatpush.bf16.msra.mxu0 %v446_v4 }
  0x20   : > { %304 = vmatpush.bf16.msra.mxu0 %v445_v5 }
  0x24   : > { %305 = vmatpush.bf16.msra.mxu0 %v444_v6 }
  0x28   : > { %306 = vmatpush.bf16.msra.mxu0 %v443_v7 }
  0x2b   : > { %307 = vmatmul.bf16.vlgmr.msra.gmra.mxu0 %v442_v8 }
  0xa8   : > { %v308_v9 = vpop.f32.mrf.mxu0 }
  0xa9   : > { %v309_v12 = vadd.f32 %v468_v10, %v308_v9 }
  0xab   : > { %v317_v16 = vadd.f32 %v453_v13, %v309_v12 }
  0xad   : > { %v319_v19 = vmax.f32 %v317_v16, 0.0 }
  0xb0   : > { %v310_v15 = vpop.f32.mrf.mxu0 }
  0xb1   : > { %v311_v17 = vadd.f32 %v468_v10, %v310_v15 }
  0xb3   : > { %v318_v18 = vadd.f32 %v454_v14, %v311_v17 }
  0xb5   : > { %v320_v20 = vmax.f32 %v318_v18, 0.0 }
  0xb7   : > { %v458_v21 = vpack.c.bf16 %v320_v20, %v319_v19 }
  0xb9   : > { %459 = vst [vmem:[%s221_s20] sm:$0xff] %v458_v21  }
  0xba PF: > { %s14_s15 = sadd.s32 1, %s475_s15  }
  0xbb   : > { %p11_p4 = scmp.ge.s32.totalorder %s14_s15, 4  }
  0xbd   :  { %13 = sbr.rel (!%p11_p4) target bundleno = 1 (0x1), region = 69 }

// kernel: _lambda_.38
= control target key start
LH: loop header
LB: loop body
LE: loop exit
PB: predicated region body
PF: predicated region fallthrough
CT: control target
= control target key end

     0   :  { %s424_s12 = smov 0   ;;  %s468_s0 = inlined_call_operand.vmem [shape: bf16[32,128], index: 0, kind: input, shape index: {}]   ;;  %s469_s1 = inlined_call_operand.vmem [shape: bf16[128,128], index: 1, kind: input, shape index: {}]   ;;  %s470_s2 = inlined_call_operand.vmem [shape: f32[1,128], index: 2, kind: input, shape index: {}]   ;;  %s471_s3 = inlined_call_operand.vmem [shape: bf16[32,128], index: 3, kind: output, shape index: {}]  }
   0x1 LB: > { %s326_s13 = sadd.s32 4294967295, %s402_s12   ;;  %p330_p0 = scmp.ge.s32.totalorder %s402_s12, 1  ;;  %s402_s12 = sphi %s424_s12, %s13_s12  }
   0x2   : > { %p138_p1 = scmp.lt.s32.totalorder %s402_s12, 3 }
   0x4   : > { %p139_p2 = pnand %p330_p0, %p138_p1 }
   0x5   : > { %s331_s22 = sshll.u32 (!%p139_p2), %s326_s13, 1 }
   0x6   : > { %142 = sbr.rel (%p139_p2) target bundleno = 184 (0xb8), region = 32  ;;  %p163_p3 = scmp.lt.s32.totalorder (!%p139_p2), %s331_s22, 3 }
   0xb   : > { %v381_v0 = vld [vmem:[%s469_s1 + $0x38] sm:$0xff]  ;;  %v380_v1 = vld [vmem:[%s469_s1 + $0x30] sm:$0xff]  ;;  %v379_v2 = vld [vmem:[%s469_s1 + $0x28] sm:$0xff]  ;;  %s473_s22 = smov (!%p163_p3, %s331_s22), 3 }
   0xc   : > { %250 = vmatpush.bf16.msra.mxu0 %v381_v0  ;;  %v378_v3 = vld [vmem:[%s469_s1 + $0x20] sm:$0xff]  ;;  %v377_v4 = vld [vmem:[%s469_s1 + $0x18] sm:$0xff]  ;;  %v376_v5 = vld [vmem:[%s469_s1 + $0x10] sm:$0xff]  ;;  %s332_s29 = sshll.u32 %s473_s22, 2 }
   0xd   : > { %v375_v6 = vld [vmem:[%s469_s1 + $0x8] sm:$0xff]  ;;  %v374_v7 = vld [vmem:[%s469_s1] sm:$0xff]  ;;  %s166_s7 = scalar_lea.vmem %s468_s0, %s332_s29  ;;  %s172_s13 = scalar_lea.vmem %s471_s3, %s332_s29 }
   0xe   : > { %v373_v8 = vld [vmem:[%s166_s7] sm:$0xff] }
   0xf   : > { %v395_v10 = vld [vmem:[%s470_s2] ss:$0 sm:$0xff] }
  0x10   : > { %251 = vmatpush.bf16.msra.mxu0 %v380_v1 }
  0x14   : > { %252 = vmatpush.bf16.msra.mxu0 %v379_v2 }
  0x18   : > { %253 = vmatpush.bf16.msra.mxu0 %v378_v3 }
  0x1c   : > { %254 = vmatpush.bf16.msra.mxu0 %v377_v4 }
  0x20   : > { %255 = vmatpush.bf16.msra.mxu0 %v376_v5 }
  0x24   : > { %256 = vmatpush.bf16.msra.mxu0 %v375_v6 }
  0x28   : > { %257 = vmatpush.bf16.msra.mxu0 %v374_v7 }
  0x2b   : > { %258 = vmatmul.bf16.vlgmr.msra.gmra.mxu0 %v373_v8 }
  0xa8   : > { %v259_v9 = vpop.f32.mrf.mxu0 }
  0xa9   : > { %v260_v11 = vadd.f32 %v395_v10, %v259_v9 }
  0xab   : > { %v264_v14 = vmax.f32 %v260_v11, 0.0 }
  0xb0   : > { %v261_v12 = vpop.f32.mrf.mxu0 }
  0xb1   : > { %v262_v13 = vadd.f32 %v395_v10, %v261_v12 }
  0xb3   : > { %v265_v15 = vmax.f32 %v262_v13, 0.0 }
  0xb5   : > { %v385_v16 = vpack.c.bf16 %v265_v15, %v264_v14 }
  0xb7   : > { %386 = vst [vmem:[%s172_s13] sm:$0xff] %v385_v16  }
  0xb8 PF: > { %s13_s12 = sadd.s32 1, %s402_s12  }
  0xb9   : > { %p10_p4 = scmp.ge.s32.totalorder %s13_s12, 4  }
  0xbb   :  { %12 = sbr.rel (!%p10_p4) target bundleno = 1 (0x1), region = 62 }

// kernel: _lambda_.35
= control target key start
LH: loop header
LB: loop body
LE: loop exit
PB: predicated region body
PF: predicated region fallthrough
CT: control target
= control target key end

     0   :  { %s2103_s12 = smov 0   ;;  %s2105_s13 = smov 0   ;;  %s2438_s0 = inlined_call_operand.vmem [shape: bf16[2,20,9,128], index: 0, kind: input, shape index: {}]   ;;  %s2439_s1 = inlined_call_operand.vmem [shape: bf16[9,128,128], index: 1, kind: input, shape index: {}]   ;;  %s2440_s2 = inlined_call_operand.vmem [shape: f32[1,128], index: 2, kind: input, shape index: {}]   ;;  %s2441_s3 = inlined_call_operand.vmem [shape: bf16[2,4,8,128], index: 3, kind: output, shape index: {}]  }
   0x1   :  { %s2107_s14 = smov 0  }
   0x2 LB: > { %s25_s15 = sadd.s32 1, %s2077_s13  ;;  %p1431_p0 = scmp.ge.s32.totalorder %s2081_s14, 1  ;;  %s2081_s14 = sphi %s2107_s14, %s13_s14   ;;  %s2077_s13 = sphi %s2105_s13, %s2445_s13   ;;  %s2073_s12 = sphi %s2103_s12, %s2444_s12  }
   0x3   : > { %p27_p1 = scmp.ge.s32.totalorder %s25_s15, 2  ;;  %p151_p2 = scmp.lt.s32.totalorder %s2081_s14, 3 }
   0x5   : > { %s2447_s15 = smov (%p27_p1, %s25_s15), 0  ;;  %p152_p3 = pnand %p1431_p0, %p151_p2 }
   0x6   : > { %p179_p4 = scmp.lt.s32.totalorder (!%p152_p3), %s2073_s12, 1 }
   0x7   : > { %155 = sbr.rel (%p152_p3) target bundleno = 252 (0xfc), region = 32 }
   0xc   : > { %v1947_v0 = vld [vmem:[%s2439_s1 + $0xb8] sm:$0xff]  ;;  %v1946_v4 = vld [vmem:[%s2439_s1 + $0xb0] sm:$0xff]  ;;  %s2449_s12 = smov (!%p179_p4, %s2073_s12), 1  ;;  %v1945_v8 = vld [vmem:[%s2439_s1 + $0xa8] sm:$0xff]  ;;  %vm222_vm0 = vsmask.f32 3328 }
   0xd   : > { %v1939_v1 = vld [vmem:[%s2439_s1 + $0x38] sm:$0xff]  ;;  %354 = vmatpush.bf16.msra.mxu0 %v1947_v0  ;;  %v1938_v5 = vld [vmem:[%s2439_s1 + $0x30] sm:$0xff]  ;;  %s2033_s5 = smul.u32 160, %s2449_s12  ;;  %v1937_v9 = vld [vmem:[%s2439_s1 + $0x28] sm:$0xff]  ;;  %vm223_vm1 = vsmask.f32 7440 }
   0xe   : > { %v1957_v2 = vld [vmem:[%s2439_s1 + $0x78] sm:$0xff]  ;;  %433 = vmatpush.bf16.msra.mxu1 %v1939_v1  ;;  %v1956_v6 = vld [vmem:[%s2439_s1 + $0x70] sm:$0xff]  ;;  %v1955_v10 = vld [vmem:[%s2439_s1 + $0x68] sm:$0xff] }
   0xf   : > { %v1967_v3 = vld [vmem:[%s2439_s1 + $0xf8] sm:$0xff]  ;;  %537 = vmatpush.bf16.msra.mxu2 %v1957_v2  ;;  %v1966_v7 = vld [vmem:[%s2439_s1 + $0xf0] sm:$0xff]  ;;  %v1965_v11 = vld [vmem:[%s2439_s1 + $0xe8] sm:$0xff]  ;;  %s2163_s20 = scalar_lea.vmem %s2438_s0, %s2033_s5  ;;  %s1929_s5 = sshll.u32 %s2449_s12, 4 }
  0x10   : > { %649 = vmatpush.bf16.msra.mxu3 %v1967_v3  ;;  %v1944_v12 = vld [vmem:[%s2439_s1 + $0xa0] sm:$0xff]  ;;  %v200_v18 = vld [vmem:[%s2163_s20 + $0x8] sm:$0xf]  ;;  %v201_v19 = vld [vmem:[%s2163_s20 + $0xc] sm:$0x1]  ;;  %s192_s8 = scalar_lea.vmem %s2441_s3, %s1929_s5 }
  0x11   : > { %355 = vmatpush.bf16.msra.mxu0 %v1946_v4  ;;  %v1936_v13 = vld [vmem:[%s2439_s1 + $0x20] sm:$0xff]  ;;  %v240_v22 = vshrl.u32 %v200_v18, 16  ;;  %v243_v24 = vshll.u32 %v200_v18, 16  ;;  %v1943_v25 = vld [vmem:[%s2439_s1 + $0x98] sm:$0xff]  ;;  %v249_v30 = vshll.u32 %v201_v19, 16  ;;  %v1942_v36 = vld [vmem:[%s2439_s1 + $0x90] sm:$0xff] }
  0x12   : > { %434 = vmatpush.bf16.msra.mxu1 %v1938_v5  ;;  %v1954_v14 = vld [vmem:[%s2439_s1 + $0x60] sm:$0xff]  ;;  %v1935_v26 = vld [vmem:[%s2439_s1 + $0x18] sm:$0xff]  ;;  %v1934_v37 = vld [vmem:[%s2439_s1 + $0x10] sm:$0xff] }
  0x13   : > { %538 = vmatpush.bf16.msra.mxu2 %v1956_v6  ;;  %v1964_v15 = vld [vmem:[%s2439_s1 + $0xe0] sm:$0xff]  ;;  %v242_v29 = vrot.slane %v240_v22, 4  ;;  %v1953_v31 = vld [vmem:[%s2439_s1 + $0x58] sm:$0xff]  ;;  %v245_v33 = vrot.slane %v243_v24, 5  ;;  %v251_v40 = vrot.slane %v249_v30, 5  ;;  %v1952_v41 = vld [vmem:[%s2439_s1 + $0x50] sm:$0xff] }
  0x14   : > { %650 = vmatpush.bf16.msra.mxu3 %v1966_v7  ;;  %v198_v16 = vld [vmem:[%s2163_s20] sm:$0xf]  ;;  %v199_v17 = vld [vmem:[%s2163_s20 + $0x4] sm:$0x1]  ;;  %v1963_v32 = vld [vmem:[%s2439_s1 + $0xd8] sm:$0xff] }
  0x15   : > { %356 = vmatpush.bf16.msra.mxu0 %v1945_v8  ;;  %v226_v20 = vshrl.u32 %v198_v16, 16  ;;  %v229_v21 = vshll.u32 %v198_v16, 16  ;;  %v235_v23 = vshll.u32 %v199_v17, 16  ;;  %v246_v35 = vor.u32 %v245_v33, %v242_v29  ;;  %v1962_v42 = vld [vmem:[%s2439_s1 + $0xd0] sm:$0xff]  ;;  %vm2206_vm2 = vmor %vm222_vm0, %vm223_vm1  ;;  %v1941_v46 = vld [vmem:[%s2439_s1 + $0x88] sm:$0xff] }
  0x16   : > { %435 = vmatpush.bf16.msra.mxu1 %v1937_v9  ;;  %v202_v45 = vld [vmem:[%s2163_s20 + $0x10] sm:$0xf]  ;;  %v1933_v47 = vld [vmem:[%s2439_s1 + $0x8] sm:$0xff]  ;;  %v204_v50 = vld [vmem:[%s2163_s20 + $0x18] sm:$0xf] }
  0x17   : > { %539 = vmatpush.bf16.msra.mxu2 %v1955_v10  ;;  %v228_v27 = vrot.slane %v226_v20, 4  ;;  %v231_v28 = vrot.slane %v229_v21, 5  ;;  %v237_v39 = vrot.slane %v235_v23, 5  ;;  %v247_v44 = vrot.slane %v246_v35, 4  ;;  %v1951_v53 = vld [vmem:[%s2439_s1 + $0x48] sm:$0xff]  ;;  %v1940_v57 = vld [vmem:[%s2439_s1 + $0x80] sm:$0xff] }
  0x18   : > { %651 = vmatpush.bf16.msra.mxu3 %v1965_v11  ;;  %v254_v51 = vshrl.u32 %v202_v45, 16  ;;  %v257_v52 = vshll.u32 %v202_v45, 16  ;;  %v1961_v54 = vld [vmem:[%s2439_s1 + $0xc8] sm:$0xff]  ;;  %v268_v55 = vshrl.u32 %v204_v50, 16  ;;  %v271_v56 = vshll.u32 %v204_v50, 16  ;;  %v1932_v58 = vld [vmem:[%s2439_s1] sm:$0xff] }
  0x19   : > { %357 = vmatpush.bf16.msra.mxu0 %v1944_v12  ;;  %v232_v34 = vor.u32 %v231_v28, %v228_v27  ;;  %v252_v49 = vsel %vm2206_vm2, %v247_v44, %v251_v40  ;;  %v1950_v61 = vld [vmem:[%s2439_s1 + $0x40] sm:$0xff]  ;;  %v203_v1 = vld [vmem:[%s2163_s20 + $0x14] sm:$0x1]  ;;  %v205_v2 = vld [vmem:[%s2163_s20 + $0x1c] sm:$0x1] }
  0x1a   : > { %436 = vmatpush.bf16.msra.mxu1 %v1936_v13  ;;  %v256_v59 = vrot.slane %v254_v51, 4  ;;  %v259_v60 = vrot.slane %v257_v52, 5  ;;  %v1960_v62 = vld [vmem:[%s2439_s1 + $0xc0] sm:$0xff]  ;;  %v299_v0 = vunpack.c.l.b16 %v252_v49  ;;  %v270_v3 = vrot.slane %v268_v55, 4  ;;  %v1930_v6 = vld [vmem:[%s2163_s20 + $0x4] sm:$0xf0] }
  0x1b   : > { %540 = vmatpush.bf16.msra.mxu2 %v1954_v14  ;;  %v233_v38 = vrot.slane %v232_v34, 4  ;;  %v273_v4 = vrot.slane %v271_v56, 5  ;;  %v1485_v5 = vld [vmem:[%s2163_s20] sm:$0xf]  ;;  %v1545_v7 = vld [vmem:[%s2163_s20 + $0x28] sm:$0xf] }
  0x1c   : > { %652 = vmatpush.bf16.msra.mxu3 %v1964_v15  ;;  %v1948_v8 = vld [vmem:[%s2163_s20 + $0x2c] sm:$0xf0]  ;;  %v1958_v10 = vld [vmem:[%s2163_s20 + $0x54] sm:$0xf0]  ;;  %v260_v13 = vor.u32 %v259_v60, %v256_v59  ;;  %v263_v14 = vshll.u32 %v203_v1, 16  ;;  %v277_v16 = vshll.u32 %v205_v2, 16  ;;  %v1486_v18 = vor.u32 %v1930_v6, %v1485_v5 }
  0x1d   : > { %358 = vmatpush.bf16.msra.mxu0 %v1943_v25  ;;  %v238_v48 = vsel %vm2206_vm2, %v233_v38, %v237_v39  ;;  %v1609_v9 = vld [vmem:[%s2163_s20 + $0x50] sm:$0xf]  ;;  %v1975_v11 = vld [vmem:[%s2439_s1 + $0x178] sm:$0xff]  ;;  %v274_v15 = vor.u32 %v273_v4, %v270_v3  ;;  %v1546_v19 = vor.u32 %v1948_v8, %v1545_v7  ;;  %v1973_v33 = vld [vmem:[%s2439_s1 + $0x168] sm:$0xff] }
  0x1e   : > { %437 = vmatpush.bf16.msra.mxu1 %v1935_v26  ;;  %v298_v63 = vunpack.c.l.b16 %v238_v48  ;;  %v1985_v12 = vld [vmem:[%s2439_s1 + $0x138] sm:$0xff]  ;;  %v1610_v20 = vor.u32 %v1958_v10, %v1609_v9  ;;  %v1974_v23 = vld [vmem:[%s2439_s1 + $0x170] sm:$0xff]  ;;  %v261_v25 = vrot.slane %v260_v13, 4  ;;  %v265_v26 = vrot.slane %v263_v14, 5  ;;  %v1983_v34 = vld [vmem:[%s2439_s1 + $0x128] sm:$0xff] }
  0x1f   : > { %541 = vmatpush.bf16.msra.mxu2 %v1953_v31  ;;  %v1995_v21 = vld [vmem:[%s2439_s1 + $0x1b8] sm:$0xff]  ;;  %v1984_v24 = vld [vmem:[%s2439_s1 + $0x130] sm:$0xff]  ;;  %v275_v27 = vrot.slane %v274_v15, 4  ;;  %v279_v28 = vrot.slane %v277_v16, 5  ;;  %v1993_v38 = vld [vmem:[%s2439_s1 + $0x1a8] sm:$0xff] }
  0x20   : > { %653 = vmatpush.bf16.msra.mxu3 %v1963_v32  ;;  %v302_v17 = vpack.c.b16 %v299_v0, %v298_v63  ;;  %v2003_v22 = vld [vmem:[%s2439_s1 + $0x238] sm:$0xff]  ;;  %v1583_v29 = vld [vmem:[%s2163_s20 + $0x50] sm:$0xf]  ;;  %v266_v35 = vsel %vm2206_vm2, %v261_v25, %v265_v26  ;;  %v2001_v45 = vld [vmem:[%s2439_s1 + $0x228] sm:$0xff] }
  0x21   : > { %359 = vmatpush.bf16.msra.mxu0 %v1942_v36  ;;  %v1585_v30 = vld [vmem:[%s2163_s20 + $0x58] sm:$0xf]  ;;  %v1994_v31 = vld [vmem:[%s2439_s1 + $0x1b0] sm:$0xff]  ;;  %v280_v36 = vsel %vm2206_vm2, %v275_v27, %v279_v28  ;;  %v673_v39 = vshrl.u32 %v1583_v29, 16  ;;  %v676_v40 = vshll.u32 %v1583_v29, 16  ;;  %v300_v55 = vunpack.c.l.b16 %v266_v35  ;;  %v1992_v60 = vld [vmem:[%s2439_s1 + $0x1a0] sm:$0xff] }
  0x22   : > { %438 = vmatpush.bf16.msra.mxu1 %v1934_v37  ;;  %v2002_v32 = vld [vmem:[%s2439_s1 + $0x230] sm:$0xff]  ;;  %v1755_v37 = vld [vmem:[%s2163_s20 + $0x8] sm:$0xf]  ;;  %v1931_v51 = vld [vmem:[%s2163_s20 + $0x14] sm:$0xf0]  ;;  %v301_v56 = vunpack.c.l.b16 %v280_v36 }
  0x23   : > { %542 = vmatpush.bf16.msra.mxu2 %v1952_v41  ;;  %v687_v41 = vshrl.u32 %v1585_v30, 16  ;;  %v1757_v44 = vld [vmem:[%s2163_s20 + $0x10] sm:$0xf]  ;;  %v1045_v48 = vshrl.u32 %v1755_v37, 16  ;;  %v1048_v49 = vshll.u32 %v1755_v37, 16  ;;  %v678_v63 = vrot.slane %v676_v40, 5 }
  0x24   : > { %654 = vmatpush.bf16.msra.mxu3 %v1962_v42  ;;  %v690_v42 = vshll.u32 %v1585_v30, 16  ;;  %v1489_v50 = vld [vmem:[%s2163_s20 + $0x10] sm:$0xf]  ;;  %v1549_v52 = vld [vmem:[%s2163_s20 + $0x38] sm:$0xf]  ;;  %v2000_v7 = vld [vmem:[%s2439_s1 + $0x220] sm:$0xff]  ;;  %v303_v16 = vpack.c.b16 %v301_v56, %v300_v55 }
  0x25   : > { %360 = vmatpush.bf16.msra.mxu0 %v1941_v46  ;;  %v1972_v46 = vld [vmem:[%s2439_s1 + $0x160] sm:$0xff]  ;;  %v1959_v59 = vld [vmem:[%s2163_s20 + $0x64] sm:$0xf0]  ;;  %v689_v0 = vrot.slane %v687_v41, 4  ;;  %v1586_v2 = vld [vmem:[%s2163_s20 + $0x5c] sm:$0x1]  ;;  %v1490_v10 = vor.u32 %v1931_v51, %v1489_v50 }
  0x26   : > { %439 = vmatpush.bf16.msra.mxu1 %v1933_v47  ;;  %v1982_v47 = vld [vmem:[%s2439_s1 + $0x120] sm:$0xff]  ;;  %v692_v1 = vrot.slane %v690_v42, 5  ;;  %v1047_v3 = vrot.slane %v1045_v48, 4  ;;  %v1050_v4 = vrot.slane %v1048_v49, 5  ;;  %v1756_v8 = vld [vmem:[%s2163_s20 + $0xc] sm:$0x1] }
  0x27   : > { %543 = vmatpush.bf16.msra.mxu2 %v1951_v53  ;;  %v1059_v53 = vshrl.u32 %v1757_v44, 16  ;;  %v1758_v9 = vld [vmem:[%s2163_s20 + $0x14] sm:$0x1]  ;;  %v1971_v13 = vld [vmem:[%s2439_s1 + $0x158] sm:$0xff]  ;;  %v1587_v37 = vld [vmem:[%s2163_s20 + $0x60] sm:$0xf] }
  0x28   : > { %655 = vmatpush.bf16.msra.mxu3 %v1961_v54  ;;  %v1062_v54 = vshll.u32 %v1757_v44, 16  ;;  %v1981_v14 = vld [vmem:[%s2439_s1 + $0x118] sm:$0xff]  ;;  %v1970_v26 = vld [vmem:[%s2439_s1 + $0x150] sm:$0xff]  ;;  %v1589_v40 = vld [vmem:[%s2163_s20 + $0x68] sm:$0xf]  ;;  %v704_v48 = vshll.u32 %v1587_v37, 16 }
  0x29   : > { %361 = vmatpush.bf16.msra.mxu0 %v1940_v57  ;;  %v1949_v57 = vld [vmem:[%s2163_s20 + $0x3c] sm:$0xf0]  ;;  %v1061_v5 = vrot.slane %v1059_v53, 4  ;;  %v1999_v25 = vld [vmem:[%s2439_s1 + $0x218] sm:$0xff]  ;;  %v1980_v27 = vld [vmem:[%s2439_s1 + $0x110] sm:$0xff]  ;;  %v718_v53 = vshll.u32 %v1589_v40, 16 }
  0x2a   : > { %440 = vmatpush.bf16.msra.mxu1 %v1932_v58  ;;  %v1613_v58 = vld [vmem:[%s2163_s20 + $0x60] sm:$0xf]  ;;  %v1064_v6 = vrot.slane %v1062_v54, 5  ;;  %v1990_v28 = vld [vmem:[%s2439_s1 + $0x190] sm:$0xff]  ;;  %v1979_v41 = vld [vmem:[%s2439_s1 + $0x108] sm:$0xff] }
  0x2b   : > { %544 = vmatpush.bf16.msra.mxu2 %v1950_v61  ;;  %v1584_v61 = vld [vmem:[%s2163_s20 + $0x54] sm:$0x1]  ;;  %v1759_v42 = vld [vmem:[%s2163_s20 + $0x18] sm:$0xf]  ;;  %v1761_v44 = vld [vmem:[%s2163_s20 + $0x20] sm:$0xf] }
  0x2c   : > { %656 = vmatpush.bf16.msra.mxu3 %v1960_v62  ;;  %362 = vmatmul.bf16.vlgmr.msra.gmra.mxu0 %v302_v17  ;;  %v675_v62 = vrot.slane %v673_v39, 4  ;;  %v682_v15 = vshll.u32 %v1584_v61, 16  ;;  %v1969_v39 = vld [vmem:[%s2439_s1 + $0x148] sm:$0xff]  ;;  %v1968_v55 = vld [vmem:[%s2439_s1 + $0x140] sm:$0xff]  ;;  %v1073_v56 = vshrl.u32 %v1759_v42, 16 }
  0x2d   : > { %801 = vmatpush.bf16.msrb.mxu0 %v1975_v11  ;;  %441 = vmatmul.bf16.vlgmr.msra.gmra.mxu1 %v1486_v18  ;;  %v1550_v11 = vor.u32 %v1949_v57, %v1549_v52  ;;  %v693_v18 = vor.u32 %v692_v1, %v689_v0  ;;  %v1989_v49 = vld [vmem:[%s2439_s1 + $0x188] sm:$0xff]  ;;  %v715_v52 = vshrl.u32 %v1589_v40, 16  ;;  %v1076_v57 = vshll.u32 %v1759_v42, 16  ;;  %v1717_v61 = vld [vmem:[%s2163_s20 + $0x78] sm:$0xf]  ;;  %v1996_v0 = vld [vmem:[%s2439_s1 + $0x200] sm:$0xff] }
  0x2e   : > { %909 = vmatpush.bf16.msrb.mxu1 %v1985_v12  ;;  %545 = vmatmul.bf16.vlgmr.msra.gmra.mxu2 %v1546_v19  ;;  %v1614_v12 = vor.u32 %v1959_v59, %v1613_v58  ;;  %v679_v17 = vor.u32 %v678_v63, %v675_v62  ;;  %v696_v19 = vshll.u32 %v1586_v2, 16  ;;  %v684_v30 = vrot.slane %v682_v15, 5  ;;  %v1997_v54 = vld [vmem:[%s2439_s1 + $0x208] sm:$0xff]  ;;  %v1976_v62 = vld [vmem:[%s2163_s20 + $0x7c] sm:$0xf0] }
  0x2f   : > { %657 = vmatmul.bf16.vlgmr.msra.gmra.mxu3 %v1610_v20  ;;  %1021 = vmatpush.bf16.msrb.mxu2 %v1995_v21  ;;  %v1051_v20 = vor.u32 %v1050_v4, %v1047_v3  ;;  %v1054_v21 = vshll.u32 %v1756_v8, 16  ;;  %v1087_v58 = vshrl.u32 %v1761_v44, 16  ;;  %v1090_v59 = vshll.u32 %v1761_v44, 16  ;;  %v1988_v63 = vld [vmem:[%s2439_s1 + $0x180] sm:$0xff]  ;;  %v1781_v3 = vld [vmem:[%s2163_s20 + $0x8] sm:$0xf] }
  0x30   : > { %1173 = vmatpush.bf16.msrb.mxu3 %v2003_v22  ;;  %v1065_v22 = vor.u32 %v1064_v6, %v1061_v5  ;;  %v680_v29 = vrot.slane %v679_v17, 4  ;;  %v2013_v4 = vld [vmem:[%s2439_s1 + $0x1f8] sm:$0xff]  ;;  %v706_v6 = vrot.slane %v704_v48, 5  ;;  %v1078_v15 = vrot.slane %v1076_v57, 5 }
  0x31   : > { %802 = vmatpush.bf16.msrb.mxu0 %v1974_v23  ;;  %v1068_v23 = vshll.u32 %v1758_v9, 16  ;;  %v1092_v17 = vrot.slane %v1090_v59, 5 }
  0x32   : > { %910 = vmatpush.bf16.msrb.mxu1 %v1984_v24  ;;  %v1991_v24 = vld [vmem:[%s2439_s1 + $0x198] sm:$0xff]  ;;  %v1066_v35 = vrot.slane %v1065_v22, 4 }
  0x33   : > { %1022 = vmatpush.bf16.msrb.mxu2 %v1994_v31  ;;  %v694_v31 = vrot.slane %v693_v18, 4  ;;  %v1070_v36 = vrot.slane %v1068_v23, 5  ;;  %v1760_v18 = vld [vmem:[%s2163_s20 + $0x1c] sm:$0x1] }
  0x34   : > { %1174 = vmatpush.bf16.msrb.mxu3 %v2002_v32  ;;  %v698_v32 = vrot.slane %v696_v19, 5  ;;  %v1762_v19 = vld [vmem:[%s2163_s20 + $0x24] sm:$0x1] }
  0x35   : > { %803 = vmatpush.bf16.msrb.mxu0 %v1973_v33  ;;  %v1052_v33 = vrot.slane %v1051_v20, 4  ;;  %v1071_v51 = vsel %vm2206_vm2, %v1066_v35, %v1070_v36 }
  0x36   : > { %911 = vmatpush.bf16.msrb.mxu1 %v1983_v34  ;;  %v1056_v34 = vrot.slane %v1054_v21, 5  ;;  %v1118_v9 = vunpack.c.l.b16 %v1071_v51  ;;  %v1718_v21 = vor.u32 %v1976_v62, %v1717_v61  ;;  %v1977_v51 = vld [vmem:[%s2163_s20 + $0x8c] sm:$0xf0]  ;;  %v2007_v61 = vld [vmem:[%s2439_s1 + $0x1c8] sm:$0xff]  ;;  %v2006_v62 = vld [vmem:[%s2439_s1 + $0x1c0] sm:$0xff] }
  0x37   : > { %1023 = vmatpush.bf16.msrb.mxu2 %v1993_v38  ;;  %v1998_v38 = vld [vmem:[%s2439_s1 + $0x210] sm:$0xff] }
  0x38   : > { %1175 = vmatpush.bf16.msrb.mxu3 %v2001_v45  ;;  %v685_v45 = vsel %vm2206_vm2, %v680_v29, %v684_v30  ;;  %v1057_v50 = vsel %vm2206_vm2, %v1052_v33, %v1056_v34  ;;  %v1082_v30 = vshll.u32 %v1760_v18, 16 }
  0x39   : > { %804 = vmatpush.bf16.msrb.mxu0 %v1972_v46  ;;  %v699_v46 = vsel %vm2206_vm2, %v694_v31, %v698_v32  ;;  %v745_v1 = vunpack.c.l.b16 %v685_v45  ;;  %v1117_v8 = vunpack.c.l.b16 %v1057_v50  ;;  %v1096_v32 = vshll.u32 %v1762_v19, 16  ;;  %v2010_v45 = vld [vmem:[%s2439_s1 + $0x1e0] sm:$0xff]  ;;  %v1721_v50 = vld [vmem:[%s2163_s20 + $0x88] sm:$0xf] }
  0x3a   : > { %912 = vmatpush.bf16.msrb.mxu1 %v1982_v47  ;;  %v701_v47 = vshrl.u32 %v1587_v37, 16  ;;  %v746_v2 = vunpack.c.l.b16 %v699_v46  ;;  %v2011_v37 = vld [vmem:[%s2439_s1 + $0x1e8] sm:$0xff] }
  0x3b   : > { %1024 = vmatpush.bf16.msrb.mxu2 %v1992_v60  ;;  %v1978_v60 = vld [vmem:[%s2439_s1 + $0x100] sm:$0xff] }
  0x3c   : > { %1176 = vmatpush.bf16.msrb.mxu3 %v2000_v7  ;;  %367 = vmatmul.bf16.gmra.mxu0 %v303_v16  ;;  %v703_v5 = vrot.slane %v701_v47, 4  ;;  %v1986_v7 = vld [vmem:[%s2163_s20 + $0xc] sm:$0xf0]  ;;  %v1089_v16 = vrot.slane %v1087_v58, 4  ;;  %v749_v20 = vpack.c.b16 %v746_v2, %v745_v1  ;;  %v1722_v58 = vor.u32 %v1977_v51, %v1721_v50  ;;  %v1893_v1 = vld [vmem:[%s2163_s20 + $0x40] sm:$0xf] }
  0x3d   : > { %805 = vmatpush.bf16.msrb.mxu0 %v1971_v13  ;;  %446 = vmatmul.bf16.gmra.mxu1 %v1490_v10  ;;  %v1588_v10 = vld [vmem:[%s2163_s20 + $0x64] sm:$0x1]  ;;  %v1590_v13 = vld [vmem:[%s2163_s20 + $0x6c] sm:$0x1]  ;;  %v1782_v22 = vor.u32 %v1986_v7, %v1781_v3  ;;  %v2005_v2 = vld [vmem:[%s2163_s20 + $0x44] sm:$0xf0] }
  0x3e   : > { %913 = vmatpush.bf16.msrb.mxu1 %v1981_v14  ;;  %550 = vmatmul.bf16.gmra.mxu2 %v1550_v11  ;;  %v717_v11 = vrot.slane %v715_v52, 4  ;;  %v1075_v14 = vrot.slane %v1073_v56, 4  ;;  %v710_v23 = vshll.u32 %v1588_v10, 16  ;;  %v1093_v31 = vor.u32 %v1092_v17, %v1089_v16  ;;  %v2009_v56 = vld [vmem:[%s2439_s1 + $0x1d8] sm:$0xff] }
  0x3f   : > { %662 = vmatmul.bf16.gmra.mxu3 %v1614_v12  ;;  %1025 = vmatpush.bf16.msrb.mxu2 %v1991_v24  ;;  %v720_v12 = vrot.slane %v718_v53, 5  ;;  %v1121_v24 = vpack.c.b16 %v1118_v9, %v1117_v8 }
  0x40   : > { %1177 = vmatpush.bf16.msrb.mxu3 %v1999_v25  ;;  %v707_v25 = vor.u32 %v706_v6, %v703_v5  ;;  %v1079_v29 = vor.u32 %v1078_v15, %v1075_v14  ;;  %v712_v34 = vrot.slane %v710_v23, 5  ;;  %v1094_v40 = vrot.slane %v1093_v31, 4 }
  0x41   : > { %806 = vmatpush.bf16.msrb.mxu0 %v1970_v26  ;;  %v721_v26 = vor.u32 %v720_v12, %v717_v11 }
  0x42   : > { %914 = vmatpush.bf16.msrb.mxu1 %v1980_v27  ;;  %v724_v27 = vshll.u32 %v1590_v13, 16  ;;  %v708_v33 = vrot.slane %v707_v25, 4 }
  0x43   : > { %1026 = vmatpush.bf16.msrb.mxu2 %v1990_v28  ;;  %v2012_v28 = vld [vmem:[%s2439_s1 + $0x1f0] sm:$0xff]  ;;  %v722_v35 = vrot.slane %v721_v26, 4 }
  0x44   : > { %1178 = vmatpush.bf16.msrb.mxu3 %v1998_v38  ;;  %v726_v36 = vrot.slane %v724_v27, 5  ;;  %v1080_v38 = vrot.slane %v1079_v29, 4  ;;  %v713_v42 = vsel %vm2206_vm2, %v708_v33, %v712_v34 }
  0x45   : > { %807 = vmatpush.bf16.msrb.mxu0 %v1969_v39  ;;  %v1084_v39 = vrot.slane %v1082_v30, 5  ;;  %v747_v48 = vunpack.c.l.b16 %v713_v42 }
  0x46   : > { %915 = vmatpush.bf16.msrb.mxu1 %v1979_v41  ;;  %v1098_v41 = vrot.slane %v1096_v32, 5  ;;  %v727_v44 = vsel %vm2206_vm2, %v722_v35, %v726_v36 }
  0x47   : > { %1027 = vmatpush.bf16.msrb.mxu2 %v1989_v49  ;;  %v1085_v46 = vsel %vm2206_vm2, %v1080_v38, %v1084_v39  ;;  %v748_v49 = vunpack.c.l.b16 %v727_v44 }
  0x48   : > { %1179 = vmatpush.bf16.msrb.mxu3 %v1997_v54  ;;  %v1099_v47 = vsel %vm2206_vm2, %v1094_v40, %v1098_v41  ;;  %v1119_v52 = vunpack.c.l.b16 %v1085_v46  ;;  %v1785_v54 = vld [vmem:[%s2163_s20 + $0x18] sm:$0xf] }
  0x49   : > { %808 = vmatpush.bf16.msrb.mxu0 %v1968_v55  ;;  %v1120_v53 = vunpack.c.l.b16 %v1099_v47  ;;  %v1987_v55 = vld [vmem:[%s2163_s20 + $0x1c] sm:$0xf0]  ;;  %v750_v57 = vpack.c.b16 %v748_v49, %v747_v48 }
  0x4a   : > { %916 = vmatpush.bf16.msrb.mxu1 %v1978_v60  ;;  %v1786_v59 = vor.u32 %v1987_v55, %v1785_v54  ;;  %v2008_v60 = vld [vmem:[%s2439_s1 + $0x1d0] sm:$0xff] }
  0x4b   : > { %1028 = vmatpush.bf16.msrb.mxu2 %v1988_v63  ;;  %v1122_v43 = vpack.c.b16 %v1120_v53, %v1119_v52  ;;  %v1889_v63 = vld [vmem:[%s2163_s20 + $0x30] sm:$0xf] }
  0x4c   : > { %1180 = vmatpush.bf16.msrb.mxu3 %v1996_v0  ;;  %809 = vmatmul.bf16.vlgmr.msrb.gmra.mxu0 %v749_v20  ;;  %v2004_v0 = vld [vmem:[%s2163_s20 + $0x34] sm:$0xf0] }
  0x4d   : > { %1281 = vmatpush.bf16.msra.mxu0 %v2013_v4  ;;  %917 = vmatmul.bf16.vlgmr.msrb.gmra.mxu1 %v1718_v21  ;;  %v1890_v3 = vor.u32 %v2004_v0, %v1889_v63 }
  0x4e   : > { %2025 = vmatpush.bf16.msra.mxu1 %v2013_v4  ;;  %1029 = vmatmul.bf16.vlgmr.msrb.gmra.mxu2 %v1782_v22  ;;  %v1894_v4 = vor.u32 %v2005_v2, %v1893_v1  ;;  %v2058_v1 = vld [vmem:[%s2440_s2] ss:$0 sm:$0xff] }
  0x4f   : > { %1181 = vmatmul.bf16.vlgmr.msrb.gmra.mxu3 %v1121_v24 }
  0x51   : > { %1282 = vmatpush.bf16.msra.mxu0 %v2012_v28 }
  0x52   : > { %2026 = vmatpush.bf16.msra.mxu1 %v2012_v28 }
  0x55   : > { %1283 = vmatpush.bf16.msra.mxu0 %v2011_v37 }
  0x56   : > { %2027 = vmatpush.bf16.msra.mxu1 %v2011_v37 }
  0x59   : > { %1284 = vmatpush.bf16.msra.mxu0 %v2010_v45 }
  0x5a   : > { %2028 = vmatpush.bf16.msra.mxu1 %v2010_v45 }
  0x5c   : > { %814 = vmatmul.bf16.gmra.mxu0 %v750_v57 }
  0x5d   : > { %1285 = vmatpush.bf16.msra.mxu0 %v2009_v56  ;;  %922 = vmatmul.bf16.gmra.mxu1 %v1722_v58 }
  0x5e   : > { %2029 = vmatpush.bf16.msra.mxu1 %v2009_v56  ;;  %1034 = vmatmul.bf16.gmra.mxu2 %v1786_v59 }
  0x5f   : > { %1186 = vmatmul.bf16.gmra.mxu3 %v1122_v43 }
  0x61   : > { %1286 = vmatpush.bf16.msra.mxu0 %v2008_v60 }
  0x62   : > { %2030 = vmatpush.bf16.msra.mxu1 %v2008_v60 }
  0x65   : > { %1287 = vmatpush.bf16.msra.mxu0 %v2007_v61 }
  0x66   : > { %2031 = vmatpush.bf16.msra.mxu1 %v2007_v61 }
  0x69   : > { %1288 = vmatpush.bf16.msra.mxu0 %v2006_v62 }
  0x6a   : > { %2032 = vmatpush.bf16.msra.mxu1 %v2006_v62 }
  0x6c   : > { %1289 = vmatmul.bf16.vlgmr.msra.gmra.mxu0 %v1890_v3 }
  0x6d   : > { %1294 = vmatmul.bf16.vlgmr.msra.gmra.mxu1 %v1894_v4 }
  0xa9   : > { %v363_v5 = vpop.f32.mrf.mxu0 }
  0xaa   : > { %v442_v6 = vpop.f32.mrf.mxu1 }
  0xab   : > { %v443_v30 = vadd.f32 %v442_v6, %v363_v5 }
  0xb1   : > { %v546_v7 = vpop.f32.mrf.mxu2  ;;  %v365_v9 = vpop.f32.mrf.mxu0 }
  0xb2   : > { %v658_v8 = vpop.f32.mrf.mxu3  ;;  %v444_v10 = vpop.f32.mrf.mxu1  ;;  %v556_v33 = vadd.f32 %v546_v7, %v443_v30 }
  0xb3   : > { %v445_v35 = vadd.f32 %v444_v10, %v365_v9 }
  0xb4   : > { %v668_v37 = vadd.f32 %v658_v8, %v556_v33 }
  0xb9   : > { %v548_v11 = vpop.f32.mrf.mxu2  ;;  %v368_v13 = vpop.f32.mrf.mxu0 }
  0xba   : > { %v660_v12 = vpop.f32.mrf.mxu3  ;;  %v447_v14 = vpop.f32.mrf.mxu1  ;;  %v557_v38 = vadd.f32 %v548_v11, %v445_v35 }
  0xbb   : > { %v448_v31 = vadd.f32 %v447_v14, %v368_v13 }
  0xbc   : > { %v669_v47 = vadd.f32 %v660_v12, %v557_v38 }
  0xc1   : > { %v551_v15 = vpop.f32.mrf.mxu2  ;;  %v370_v17 = vpop.f32.mrf.mxu0 }
  0xc2   : > { %v663_v16 = vpop.f32.mrf.mxu3  ;;  %v449_v18 = vpop.f32.mrf.mxu1  ;;  %v558_v34 = vadd.f32 %v551_v15, %v448_v31 }
  0xc3   : > { %v450_v36 = vadd.f32 %v449_v18, %v370_v17 }
  0xc4   : > { %v670_v39 = vadd.f32 %v663_v16, %v558_v34 }
  0xc9   : > { %v553_v19 = vpop.f32.mrf.mxu2  ;;  %v810_v21 = vpop.f32.mrf.mxu0 }
  0xca   : > { %v665_v20 = vpop.f32.mrf.mxu3  ;;  %v918_v22 = vpop.f32.mrf.mxu1  ;;  %v559_v40 = vadd.f32 %v553_v19, %v450_v36  ;;  %v820_v45 = vadd.f32 %v810_v21, %v668_v37 }
  0xcc   : > { %v671_v48 = vadd.f32 %v665_v20, %v559_v40  ;;  %v928_v50 = vadd.f32 %v918_v22, %v820_v45 }
  0xd1   : > { %v1030_v23 = vpop.f32.mrf.mxu2  ;;  %v812_v25 = vpop.f32.mrf.mxu0 }
  0xd2   : > { %v1182_v24 = vpop.f32.mrf.mxu3  ;;  %v920_v26 = vpop.f32.mrf.mxu1  ;;  %v821_v51 = vadd.f32 %v812_v25, %v669_v47  ;;  %v1040_v54 = vadd.f32 %v1030_v23, %v928_v50 }
  0xd4   : > { %v929_v59 = vadd.f32 %v920_v26, %v821_v51  ;;  %v1192_v60 = vadd.f32 %v1182_v24, %v1040_v54 }
  0xd9   : > { %v1032_v27 = vpop.f32.mrf.mxu2  ;;  %v815_v28 = vpop.f32.mrf.mxu0 }
  0xda   : > { %v923_v29 = vpop.f32.mrf.mxu1  ;;  %v1184_v32 = vpop.f32.mrf.mxu3  ;;  %v822_v46 = vadd.f32 %v815_v28, %v670_v39  ;;  %v1041_v61 = vadd.f32 %v1032_v27, %v929_v59 }
  0xdc   : > { %v930_v52 = vadd.f32 %v923_v29, %v822_v46  ;;  %v1193_v4 = vadd.f32 %v1184_v32, %v1041_v61 }
  0xe1   : > { %v1035_v41 = vpop.f32.mrf.mxu2  ;;  %v817_v42 = vpop.f32.mrf.mxu0 }
  0xe2   : > { %v925_v44 = vpop.f32.mrf.mxu1  ;;  %v1187_v49 = vpop.f32.mrf.mxu3  ;;  %v823_v53 = vadd.f32 %v817_v42, %v671_v48  ;;  %v1042_v55 = vadd.f32 %v1035_v41, %v930_v52 }
  0xe4   : > { %v931_v43 = vadd.f32 %v925_v44, %v823_v53  ;;  %v1194_v62 = vadd.f32 %v1187_v49, %v1042_v55 }
  0xe9   : > { %v1037_v56 = vpop.f32.mrf.mxu2  ;;  %v1290_v57 = vpop.f32.mrf.mxu0 }
  0xea   : > { %v1295_v58 = vpop.f32.mrf.mxu1  ;;  %v1043_v63 = vadd.f32 %v1037_v56, %v931_v43  ;;  %v1300_v0 = vadd.f32 %v1290_v57, %v1192_v60  ;;  %v1189_v3 = vpop.f32.mrf.mxu3 }
  0xeb   : > { %v1302_v2 = vadd.f32 %v1295_v58, %v1194_v62 }
  0xec   : > { %v1195_v5 = vadd.f32 %v1189_v3, %v1043_v63  ;;  %v1308_v8 = vadd.f32 %v2058_v1, %v1300_v0 }
  0xed   : > { %v1310_v9 = vadd.f32 %v2058_v1, %v1302_v2 }
  0xee   : > { %v1312_v14 = vmax.f32 %v1308_v8, 0.0 }
  0xef   : > { %v1314_v15 = vmax.f32 %v1310_v9, 0.0 }
  0xf1   : > { %v1292_v6 = vpop.f32.mrf.mxu0 }
  0xf2   : > { %v1297_v7 = vpop.f32.mrf.mxu1  ;;  %v1301_v10 = vadd.f32 %v1292_v6, %v1193_v4 }
  0xf3   : > { %v1303_v11 = vadd.f32 %v1297_v7, %v1195_v5 }
  0xf4   : > { %v1309_v12 = vadd.f32 %v2058_v1, %v1301_v10 }
  0xf5   : > { %v1311_v13 = vadd.f32 %v2058_v1, %v1303_v11 }
  0xf6   : > { %v1313_v16 = vmax.f32 %v1309_v12, 0.0 }
  0xf7   : > { %v1315_v17 = vmax.f32 %v1311_v13, 0.0 }
  0xf8   : > { %v2017_v18 = vpack.c.bf16 %v1313_v16, %v1312_v14 }
  0xf9   : > { %v2022_v19 = vpack.c.bf16 %v1315_v17, %v1314_v15 }
  0xfa   : > { %2018 = vst [vmem:[%s192_s8] sm:$0xff] %v2017_v18  }
  0xfb   : > { %2024 = vst [vmem:[%s192_s8 + $0x8] sm:$0xff] %v2022_v19  }
  0xfc PF: > { %s13_s14 = sadd.s32 1, %s2081_s14   ;;  %s2444_s12 = smov %s2077_s13 }
  0xfd   : > { %p10_p5 = scmp.ge.s32.totalorder %s13_s14, 4   ;;  %s2445_s13 = smov %s2447_s15 }
  0xff   :  { %12 = sbr.rel (!%p10_p5) target bundleno = 2 (0x2), region = 76 }

// kernel: _lambda_.48
= control target key start
LH: loop header
LB: loop body
LE: loop exit
PB: predicated region body
PF: predicated region fallthrough
CT: control target
= control target key end

     0   :  { %s378_s9 = smov 0   ;;  %s419_s0 = inlined_call_operand.vmem [shape: bf16[32,128], index: 0, kind: input, shape index: {}]   ;;  %s420_s1 = inlined_call_operand.vmem [shape: bf16[128,128], index: 1, kind: input, shape index: {}]   ;;  %s421_s2 = inlined_call_operand.vmem [shape: f32[32,128], index: 2, kind: output, shape index: {}]  }
   0x1 LB: > { %s291_s10 = sadd.s32 4294967295, %s361_s9   ;;  %p295_p0 = scmp.ge.s32.totalorder %s361_s9, 1  ;;  %s361_s9 = sphi %s378_s9, %s12_s9  }
   0x2   : > { %p113_p1 = scmp.lt.s32.totalorder %s361_s9, 3 }
   0x4   : > { %p114_p2 = pnand %p295_p0, %p113_p1 }
   0x5   : > { %s296_s19 = sshll.u32 (!%p114_p2), %s291_s10, 1 }
   0x6   : > { %117 = sbr.rel (%p114_p2) target bundleno = 178 (0xb2), region = 28  ;;  %p136_p3 = scmp.lt.s32.totalorder (!%p114_p2), %s296_s19, 3 }
   0xb   : > { %v346_v0 = vld [vmem:[%s420_s1 + $0x38] sm:$0xff]  ;;  %v345_v1 = vld [vmem:[%s420_s1 + $0x30] sm:$0xff]  ;;  %v344_v2 = vld [vmem:[%s420_s1 + $0x28] sm:$0xff]  ;;  %s423_s19 = smov (!%p136_p3, %s296_s19), 3 }
   0xc   : > { %219 = vmatpush.bf16.msra.mxu0 %v346_v0  ;;  %v343_v3 = vld [vmem:[%s420_s1 + $0x20] sm:$0xff]  ;;  %v342_v4 = vld [vmem:[%s420_s1 + $0x18] sm:$0xff]  ;;  %v341_v5 = vld [vmem:[%s420_s1 + $0x10] sm:$0xff]  ;;  %s297_s26 = sshll.u32 %s423_s19, 2  ;;  %s299_s4 = sshll.u32 %s423_s19, 3 }
   0xd   : > { %v340_v6 = vld [vmem:[%s420_s1 + $0x8] sm:$0xff]  ;;  %v339_v7 = vld [vmem:[%s420_s1] sm:$0xff]  ;;  %s139_s3 = scalar_lea.vmem %s419_s0, %s297_s26  ;;  %s145_s7 = scalar_lea.vmem %s421_s2, %s299_s4 }
   0xe   : > { %v338_v8 = vld [vmem:[%s139_s3] sm:$0xff] }
  0x10   : > { %220 = vmatpush.bf16.msra.mxu0 %v345_v1 }
  0x14   : > { %221 = vmatpush.bf16.msra.mxu0 %v344_v2 }
  0x18   : > { %222 = vmatpush.bf16.msra.mxu0 %v343_v3 }
  0x1c   : > { %223 = vmatpush.bf16.msra.mxu0 %v342_v4 }
  0x20   : > { %224 = vmatpush.bf16.msra.mxu0 %v341_v5 }
  0x24   : > { %225 = vmatpush.bf16.msra.mxu0 %v340_v6 }
  0x28   : > { %226 = vmatpush.bf16.msra.mxu0 %v339_v7 }
  0x2b   : > { %227 = vmatmul.bf16.vlgmr.msra.gmra.mxu0 %v338_v8 }
  0xa8   : > { %v228_v9 = vpop.f32.mrf.mxu0 }
  0xa9   : > { %233 = vst [vmem:[%s145_s7] sm:$0xff] %v228_v9 }
  0xb0   : > { %v230_v10 = vpop.f32.mrf.mxu0 }
  0xb1   : > { %234 = vst [vmem:[%s145_s7 + $0x8] sm:$0xff] %v230_v10 }
  0xb2 PF: > { %s12_s9 = sadd.s32 1, %s361_s9  }
  0xb3   : > { %p9_p4 = scmp.ge.s32.totalorder %s12_s9, 4  }
  0xb5   :  { %11 = sbr.rel (!%p9_p4) target bundleno = 1 (0x1), region = 58 }

// kernel: _lambda_.43
= control target key start
LH: loop header
LB: loop body
LE: loop exit
PB: predicated region body
PF: predicated region fallthrough
CT: control target
= control target key end

     0   :  { %s196_s1 = inlined_call_operand.vmem [shape: bf16[128,128], index: 1, kind: input, shape index: {}]   ;;  %s197_s2 = inlined_call_operand.vmem [shape: f32[1,128], index: 2, kind: input, shape index: {}]   ;;  %s198_s0 = inlined_call_operand.vmem [shape: bf16[8,128], index: 0, kind: input, shape index: {}]   ;;  %s199_s3 = inlined_call_operand.vmem [shape: bf16[8,128], index: 3, kind: output, shape index: {}]  }
   0x1   :  { %v141_v0 = vld [vmem:[%s196_s1 + $0x38] sm:$0xff]  ;;  %v140_v1 = vld [vmem:[%s196_s1 + $0x30] sm:$0xff]  ;;  %v139_v2 = vld [vmem:[%s196_s1 + $0x28] sm:$0xff] }
   0x2   :  { %83 = vmatpush.bf16.msra.mxu0 %v141_v0  ;;  %v138_v3 = vld [vmem:[%s196_s1 + $0x20] sm:$0xff]  ;;  %v137_v4 = vld [vmem:[%s196_s1 + $0x18] sm:$0xff]  ;;  %v136_v5 = vld [vmem:[%s196_s1 + $0x10] sm:$0xff] }
   0x3   :  { %v135_v6 = vld [vmem:[%s196_s1 + $0x8] sm:$0xff]  ;;  %v134_v7 = vld [vmem:[%s196_s1] sm:$0xff] }
   0x4   :  { %v14_v8 = vld [vmem:[%s198_s0] sm:$0xf] }
   0x5   :  { %v142_v9 = vld [vmem:[%s197_s2] ss:$0 sm:$0xff] }
   0x6   :  { %84 = vmatpush.bf16.msra.mxu0 %v140_v1 }
   0xa   :  { %85 = vmatpush.bf16.msra.mxu0 %v139_v2 }
   0xe   :  { %86 = vmatpush.bf16.msra.mxu0 %v138_v3 }
  0x12   :  { %87 = vmatpush.bf16.msra.mxu0 %v137_v4 }
  0x16   :  { %88 = vmatpush.bf16.msra.mxu0 %v136_v5 }
  0x1a   :  { %89 = vmatpush.bf16.msra.mxu0 %v135_v6 }
  0x1e   :  { %90 = vmatpush.bf16.msra.mxu0 %v134_v7 }
  0x21   :  { %91 = vmatmul.bf16.vlgmr.msra.gmra.mxu0 %v14_v8 }
  0x9e   :  { %v92_v10 = vpop.f32.mrf.mxu0 }
  0x9f   :  { %v93_v11 = vadd.f32 %v142_v9, %v92_v10 }
  0xa1   :  { %v96_v12 = vpack.c.bf16 %v93_v11, %v93_v11 }
  0xa3   :  { %97 = vst [vmem:[%s199_s3] sm:$0xf] %v96_v12 }
  0xa6   :  { %v94_v13 = vpop.f32.mrf.mxu0 }

// kernel: _lambda_.39
= control target key start
LH: loop header
LB: loop body
LE: loop exit
PB: predicated region body
PF: predicated region fallthrough
CT: control target
= control target key end

     0   :  { %s2037_s12 = smov 0   ;;  %s2436_s0 = inlined_call_operand.vmem [shape: bf16[2,4,4,128], index: 0, kind: input, shape index: {}]   ;;  %s2437_s1 = inlined_call_operand.vmem [shape: bf16[9,128,128], index: 1, kind: input, shape index: {}]   ;;  %s2438_s2 = inlined_call_operand.vmem [shape: f32[1,128], index: 2, kind: input, shape index: {}]   ;;  %s2439_s3 = inlined_call_operand.vmem [shape: bf16[2,4,4,128], index: 3, kind: output, shape index: {}]  }
   0x1 LB: > { %s1447_s13 = sadd.s32 4294967295, %s2014_s12   ;;  %p1451_p0 = scmp.ge.s32.totalorder %s2014_s12, 1  ;;  %s2014_s12 = sphi %s2037_s12, %s13_s12  }
   0x2   : > { %p137_p1 = scmp.lt.s32.totalorder %s2014_s12, 3 }
   0x4   : > { %p138_p2 = pnand %p1451_p0, %p137_p1 }
   0x5   : > { %p161_p3 = scmp.lt.s32.totalorder (!%p138_p2), %s1447_s13, 1 }
   0x6   : > { %141 = sbr.rel (%p138_p2) target bundleno = 264 (0x108), region = 32 }
   0xb   : > { %v1921_v0 = vld [vmem:[%s2437_s1 + $0x38] sm:$0xff]  ;;  %v2016_v4 = vmov 0   ;;  %v1920_v5 = vld [vmem:[%s2437_s1 + $0x30] sm:$0xff]  ;;  %s2447_s13 = smov (!%p161_p3, %s1447_s13), 1  ;;  %v1919_v9 = vld [vmem:[%s2437_s1 + $0x28] sm:$0xff]  ;;  %vm232_vm0 = vcmask 1042432  }
   0xc   : > { %v1937_v1 = vld [vmem:[%s2437_s1 + $0xb8] sm:$0xff]  ;;  %172 = vst [vmem:[#allocation2] sm:$0xf] %v2016_v4  ;;  %482 = vmatpush.bf16.msra.mxu1 %v1921_v0  ;;  %v1936_v6 = vld [vmem:[%s2437_s1 + $0xb0] sm:$0xff]  ;;  %s1910_s30 = sshll.u32 %s2447_s13, 3  ;;  %v1935_v10 = vld [vmem:[%s2437_s1 + $0xa8] sm:$0xff] }
   0xd   : > { %v1947_v2 = vld [vmem:[%s2437_s1 + $0xf8] sm:$0xff]  ;;  %596 = vmatpush.bf16.msra.mxu2 %v1937_v1  ;;  %174 = vst [vmem:[#allocation2 + $0x8] sm:$0xf] %v2016_v4  ;;  %v1946_v7 = vld [vmem:[%s2437_s1 + $0xf0] sm:$0xff]  ;;  %s2083_s10 = scalar_lea.vmem %s2436_s0, %s1910_s30  ;;  %v1945_v11 = vld [vmem:[%s2437_s1 + $0xe8] sm:$0xff]  ;;  %vm505_vm3 = vcmask 1046532   ;;  %s170_s22 = scalar_lea.vmem %s2439_s3, %s1910_s30 }
   0xe   : > { %v1929_v3 = vld [vmem:[%s2437_s1 + $0x78] sm:$0xff]  ;;  %704 = vmatpush.bf16.msra.mxu3 %v1947_v2  ;;  %v1928_v8 = vld [vmem:[%s2437_s1 + $0x70] sm:$0xff]  ;;  %173 = vst [vmem:[#allocation2 + $0x4] sm:$0x1] %v2016_v4  ;;  %v1927_v12 = vld [vmem:[%s2437_s1 + $0x68] sm:$0xff] }
   0xf   : > { %403 = vmatpush.bf16.msra.mxu0 %v1929_v3  ;;  %175 = vst [vmem:[#allocation2 + $0xc] sm:$0x1] %v2016_v4  ;;  %v184_v13 = vld [vmem:[%s2083_s10] sm:$0x3]  ;;  %v1917_v18 = vld [vmem:[%s2437_s1 + $0x18] sm:$0xff]  ;;  %v1916_v25 = vld [vmem:[%s2437_s1 + $0x10] sm:$0xff] }
  0x10   : > { %483 = vmatpush.bf16.msra.mxu1 %v1920_v5  ;;  %176 = vst [vmem:[#allocation2 + $0x10] sm:$0xf] %v2016_v4  ;;  %v1918_v14 = vld [vmem:[%s2437_s1 + $0x20] sm:$0xff]  ;;  %v1933_v19 = vld [vmem:[%s2437_s1 + $0x98] sm:$0xff]  ;;  %v1932_v26 = vld [vmem:[%s2437_s1 + $0x90] sm:$0xff] }
  0x11   : > { %597 = vmatpush.bf16.msra.mxu2 %v1936_v6  ;;  %177 = vst [vmem:[#allocation2 + $0x14] sm:$0x1] %v2016_v4  ;;  %v1934_v15 = vld [vmem:[%s2437_s1 + $0xa0] sm:$0xff]  ;;  %v1943_v20 = vld [vmem:[%s2437_s1 + $0xd8] sm:$0xff]  ;;  %vm233_vm1 = vsmask.f32 2306  ;;  %vm2172_vm4 = vmor %vm232_vm0, %vm505_vm3 }
  0x12   : > { %705 = vmatpush.bf16.msra.mxu3 %v1946_v7  ;;  %178 = vst [vmem:[#allocation2 + $0x18] sm:$0xf] %v2016_v4  ;;  %v1944_v16 = vld [vmem:[%s2437_s1 + $0xe0] sm:$0xff]  ;;  %v1925_v21 = vld [vmem:[%s2437_s1 + $0x58] sm:$0xff]  ;;  %v1942_v29 = vld [vmem:[%s2437_s1 + $0xd0] sm:$0xff] }
  0x13   : > { %404 = vmatpush.bf16.msra.mxu0 %v1928_v8  ;;  %179 = vst [vmem:[#allocation2 + $0x1c] sm:$0x1] %v2016_v4  ;;  %v1926_v17 = vld [vmem:[%s2437_s1 + $0x60] sm:$0xff]  ;;  %v2117_v23 = vld [vmem:[#allocation2] sm:$0xf]  ;;  %v1924_v30 = vld [vmem:[%s2437_s1 + $0x50] sm:$0xff] }
  0x14   : > { %484 = vmatpush.bf16.msra.mxu1 %v1919_v9  ;;  %189 = vst [vmem:[#allocation1] ss:$2 sm:$0xff] %v184_v13  ;;  %v185_v22 = vld [vmem:[%s2083_s10 + $0x2] sm:$0x3]  ;;  %v275_v31 = vshrl.u32 %v2117_v23, 16  ;;  %v278_v33 = vshll.u32 %v2117_v23, 16  ;;  %vm2135_vm2 = vmand %vm232_vm0, %vm233_vm1 }
  0x15   : > { %598 = vmatpush.bf16.msra.mxu2 %v1935_v10  ;;  %180 = vst [vmem:[#allocation2 + $0x20] sm:$0xf] %v2016_v4  ;;  %v186_v34 = vld [vmem:[%s2083_s10 + $0x4] sm:$0x3]  ;;  %v235_v36 = vld [vmem:[#allocation2 + $0x8] sm:$0x7] }
  0x16   : > { %706 = vmatpush.bf16.msra.mxu3 %v1945_v11  ;;  %181 = vst [vmem:[#allocation2 + $0x24] sm:$0x1] %v2016_v4  ;;  %v1915_v37 = vld [vmem:[%s2437_s1 + $0x8] sm:$0xff]  ;;  %v277_v43 = vrot.slane %v275_v31, 4  ;;  %v1914_v44 = vld [vmem:[%s2437_s1] sm:$0xff]  ;;  %v280_v50 = vrot.slane %v278_v33, 5 }
  0x17   : > { %405 = vmatpush.bf16.msra.mxu0 %v1927_v12  ;;  %182 = vst [vmem:[#allocation2 + $0x28] sm:$0xf] %v2016_v4  ;;  %v1931_v38 = vld [vmem:[%s2437_s1 + $0x88] sm:$0xff]  ;;  %v1930_v46 = vld [vmem:[%s2437_s1 + $0x80] sm:$0xff]  ;;  %v1963_v51 = vld [vmem:[%s2437_s1 + $0x178] sm:$0xff]  ;;  %v1544_v58 = vrot.slane %v2117_v23, 9 }
  0x18   : > { %485 = vmatpush.bf16.msra.mxu1 %v1918_v14  ;;  %183 = vst [vmem:[#allocation2 + $0x2c] sm:$0x1] %v2016_v4  ;;  %v1941_v40 = vld [vmem:[%s2437_s1 + $0xc8] sm:$0xff]  ;;  %v1940_v52 = vld [vmem:[%s2437_s1 + $0xc0] sm:$0xff]  ;;  %v250_v54 = vld [vmem:[#allocation2 + $0xc] sm:$0x1]  ;;  %v281_v1 = vor.u32 %v280_v50, %v277_v43 }
  0x19   : > { %599 = vmatpush.bf16.msra.mxu2 %v1934_v15  ;;  %193 = vst [vmem:[#allocation1 + $0x10] ss:$2 sm:$0xff] %v185_v22  ;;  %v1923_v41 = vld [vmem:[%s2437_s1 + $0x48] sm:$0xff]  ;;  %v187_v53 = vld [vmem:[%s2083_s10 + $0x6] sm:$0x3]  ;;  %v1973_v0 = vld [vmem:[%s2437_s1 + $0x1b8] sm:$0xff] }
  0x1a   : > { %707 = vmatpush.bf16.msra.mxu3 %v1944_v16  ;;  %197 = vst [vmem:[#allocation1 + $0x20] ss:$2 sm:$0xff] %v186_v34  ;;  %v248_v47 = vld [vmem:[#allocation2 + $0x4] sm:$0x1]  ;;  %v1922_v55 = vld [vmem:[%s2437_s1 + $0x40] sm:$0xff]  ;;  %v513_v3 = vrot.slane %v250_v54, 5 }
  0x1b   : > { %406 = vmatpush.bf16.msra.mxu0 %v1926_v17  ;;  %v190_v24 = vld.sshfl [vmem:[#allocation1] sm:$0xff pattern:$0x75643120]  ;;  %v284_v57 = vshll.u32 %v248_v47, 16  ;;  %201 = vst [vmem:[#allocation1 + $0x30] ss:$2 sm:$0xff] %v187_v53 }
  0x1c   : > { %486 = vmatpush.bf16.msra.mxu1 %v1917_v18  ;;  %v203_v27 = vshrl.u32 %v190_v24, 16  ;;  %v206_v28 = vshll.u32 %v190_v24, 16  ;;  %v509_v59 = vrot.slane %v248_v47, 5  ;;  %v238_v60 = vld [vmem:[#allocation2 + $0x10] sm:$0x7]  ;;  %v1962_v7 = vld [vmem:[%s2437_s1 + $0x170] sm:$0xff] }
  0x1d   : > { %600 = vmatpush.bf16.msra.mxu2 %v1933_v19  ;;  %v1506_v61 = vld [vmem:[#allocation2] sm:$0xf]  ;;  %vm271_vm5 = vsmask.f32 3328  ;;  %vm272_vm6 = vsmask.f32 7440 }
  0x1e   : > { %708 = vmatpush.bf16.msra.mxu3 %v1943_v20  ;;  %v205_v32 = vrot.slane %v203_v27, 7  ;;  %v1955_v4 = vld [vmem:[%s2437_s1 + $0x138] sm:$0xff]  ;;  %v2190_v9 = vrot.slane %v284_v57, 5  ;;  %v298_v10 = vshll.u32 %v250_v54, 16  ;;  %v1972_v11 = vld [vmem:[%s2437_s1 + $0x1b0] sm:$0xff]  ;;  %v510_v13 = vsel %vm2172_vm4, %v1544_v58, %v509_v59  ;;  %vm2205_vm7 = vmor %vm271_vm5, %vm272_vm6 }
  0x1f   : > { %407 = vmatpush.bf16.msra.mxu0 %v1925_v21  ;;  %v1981_v5 = vld [vmem:[%s2437_s1 + $0x1f8] sm:$0xff]  ;;  %v1954_v14 = vld [vmem:[%s2437_s1 + $0x130] sm:$0xff]  ;;  %v241_v16 = vld [vmem:[#allocation2 + $0x18] sm:$0x7]  ;;  %v282_v19 = vrot.slane %v281_v1, 4 }
  0x20   : > { %487 = vmatpush.bf16.msra.mxu1 %v1916_v25  ;;  %v208_v39 = vor.u32 %v206_v28, %v205_v32  ;;  %v194_v42 = vld.sshfl [vmem:[#allocation1 + $0x10] sm:$0xff pattern:$0x75643120]  ;;  %v300_v34 = vrot.slane %v298_v10, 5  ;;  %v252_v43 = vld [vmem:[#allocation2 + $0x14] sm:$0x1] }
  0x21   : > { %601 = vmatpush.bf16.msra.mxu2 %v1932_v26  ;;  %v209_v48 = vshrl.u32 %v194_v42, 16  ;;  %v212_v49 = vshll.u32 %v194_v42, 16  ;;  %v198_v2 = vld.sshfl [vmem:[#allocation1 + $0x20] sm:$0xff pattern:$0x75643120]  ;;  %v1980_v20 = vld [vmem:[%s2437_s1 + $0x1f0] sm:$0xff]  ;;  %v540_v26 = vunpack.c.l.b16 %v510_v13 }
  0x22   : > { %709 = vmatpush.bf16.msra.mxu3 %v1942_v29  ;;  %v236_v45 = vsel %vm2135_vm2, %v208_v39, %v235_v36  ;;  %v215_v6 = vshrl.u32 %v198_v2, 16  ;;  %v218_v12 = vshll.u32 %v198_v2, 16  ;;  %v202_v25 = vld.sshfl [vmem:[#allocation1 + $0x30] sm:$0xff pattern:$0x75643120]  ;;  %v1961_v36 = vld [vmem:[%s2437_s1 + $0x168] sm:$0xff] }
  0x23   : > { %408 = vmatpush.bf16.msra.mxu0 %v1924_v30  ;;  %237 = vst [vmem:[#allocation2 + $0x8] sm:$0x7] %v236_v45  ;;  %v211_v56 = vrot.slane %v209_v48, 7  ;;  %v221_v29 = vshrl.u32 %v202_v25, 16  ;;  %v224_v30 = vshll.u32 %v202_v25, 16  ;;  %v1979_v42 = vld [vmem:[%s2437_s1 + $0x1e8] sm:$0xff]  ;;  %v287_v45 = vsel %vm2205_vm7, %v282_v19, %v2190_v9 }
  0x24   : > { %488 = vmatpush.bf16.msra.mxu1 %v1915_v37  ;;  %v217_v15 = vrot.slane %v215_v6, 7  ;;  %v1971_v37 = vld [vmem:[%s2437_s1 + $0x1a8] sm:$0xff]  ;;  %v254_v47 = vld [vmem:[#allocation2 + $0x1c] sm:$0x1]  ;;  %v312_v53 = vshll.u32 %v252_v43, 16  ;;  %v517_v57 = vrot.slane %v252_v43, 5  ;;  %v347_v59 = vunpack.c.l.b16 %v287_v45 }
  0x25   : > { %602 = vmatpush.bf16.msra.mxu2 %v1931_v38  ;;  %v214_v63 = vor.u32 %v212_v49, %v211_v56  ;;  %v244_v48 = vld [vmem:[#allocation2 + $0x20] sm:$0x7]  ;;  %v326_v54 = vshll.u32 %v254_v47, 16  ;;  %v1952_v35 = vld [vmem:[%s2437_s1 + $0x120] sm:$0xff]  ;;  %v2251_v13 = vld [vmem:[#allocation2 + $0xc] sm:$0x1] }
  0x26   : > { %710 = vmatpush.bf16.msra.mxu3 %v1941_v40  ;;  %v220_v28 = vor.u32 %v218_v12, %v217_v15  ;;  %v2247_v10 = vrot.slane %v312_v53, 5  ;;  %v1968_v43 = vld [vmem:[%s2437_s1 + $0x190] sm:$0xff] }
  0x27   : > { %409 = vmatpush.bf16.msra.mxu0 %v1923_v41  ;;  %v239_v8 = vsel %vm2135_vm2, %v214_v63, %v238_v60  ;;  %v1953_v41 = vld [vmem:[%s2437_s1 + $0x128] sm:$0xff]  ;;  %v1960_v60 = vld [vmem:[%s2437_s1 + $0x160] sm:$0xff]  ;;  %v521_v63 = vrot.slane %v254_v47, 5 }
  0x28   : > { %489 = vmatpush.bf16.msra.mxu1 %v1914_v44  ;;  %240 = vst [vmem:[#allocation2 + $0x10] sm:$0x7] %v239_v8  ;;  %v242_v40 = vsel %vm2135_vm2, %v220_v28, %v241_v16  ;;  %v223_v44 = vrot.slane %v221_v29, 7  ;;  %v1978_v8 = vld [vmem:[%s2437_s1 + $0x1e0] sm:$0xff]  ;;  %v1977_v29 = vld [vmem:[%s2437_s1 + $0x1d8] sm:$0xff] }
  0x29   : > { %603 = vmatpush.bf16.msra.mxu2 %v1930_v46  ;;  %243 = vst [vmem:[#allocation2 + $0x18] sm:$0x7] %v242_v40 }
  0x2a   : > { %711 = vmatpush.bf16.msra.mxu3 %v1940_v52  ;;  %v1912_v17 = vld [vmem:[#allocation2 + $0x4] sm:$0xf0]  ;;  %v226_v52 = vor.u32 %v224_v30, %v223_v44  ;;  %v885_v30 = vrot.slane %v2251_v13, 5 }
  0x2b   : > { %v249_v18 = vld [vmem:[#allocation2 + $0x8] sm:$0xf]  ;;  %410 = vmatpush.bf16.msra.mxu0 %v1922_v55  ;;  %v1507_v21 = vor.u32 %v1912_v17, %v1506_v61  ;;  %v1970_v61 = vld [vmem:[%s2437_s1 + $0x1a0] sm:$0xff] }
  0x2c   : > { %972 = vmatpush.bf16.msrb.mxu1 %v1963_v51  ;;  %v1545_v22 = vrot.slane %v249_v18, 9  ;;  %v289_v23 = vshrl.u32 %v249_v18, 16  ;;  %v292_v24 = vshll.u32 %v249_v18, 16  ;;  %v1614_v39 = vld [vmem:[#allocation2 + $0x8] sm:$0xf] }
  0x2d   : > { %1081 = vmatpush.bf16.msrb.mxu2 %v1973_v0  ;;  %490 = vmatmul.bf16.vlgmr.msra.gmra.mxu1 %v1507_v21  ;;  %v245_v0 = vsel %vm2135_vm2, %v226_v52, %v244_v48  ;;  %v1976_v44 = vld [vmem:[%s2437_s1 + $0x1d0] sm:$0xff] }
  0x2e   : > { %1233 = vmatpush.bf16.msrb.mxu3 %v1981_v5  ;;  %v514_v31 = vsel %vm2172_vm4, %v1545_v22, %v513_v3  ;;  %v291_v32 = vrot.slane %v289_v23, 4  ;;  %v294_v33 = vrot.slane %v292_v24, 5  ;;  %246 = vst [vmem:[#allocation2 + $0x20] sm:$0x7] %v245_v0  ;;  %v619_v5 = vld [vmem:[#allocation2 + $0x8] sm:$0xf] }
  0x2f   : > { %856 = vmatpush.bf16.msrb.mxu0 %v1955_v4  ;;  %v541_v38 = vunpack.c.l.b16 %v514_v31  ;;  %v1938_v50 = vld [vmem:[#allocation2 + $0xc] sm:$0xf0]  ;;  %v1700_v19 = vrot.slane %v619_v5, 9  ;;  %v731_v31 = vshll.u32 %v619_v5, 16  ;;  %v1957_v0 = vld [vmem:[%s2437_s1 + $0x148] sm:$0xff] }
  0x30   : > { %973 = vmatpush.bf16.msrb.mxu1 %v1962_v7  ;;  %v295_v46 = vor.u32 %v294_v33, %v291_v32  ;;  %v251_v51 = vld [vmem:[#allocation2 + $0x10] sm:$0xf]  ;;  %v1615_v55 = vor.u32 %v1938_v50, %v1614_v39  ;;  %v1913_v16 = vld [vmem:[#allocation2 + $0x14] sm:$0xf0]  ;;  %v2288_v50 = vld [vmem:[#allocation2 + $0x14] sm:$0x1] }
  0x31   : > { %1082 = vmatpush.bf16.msrb.mxu2 %v1972_v11  ;;  %v544_v49 = vpack.c.b16 %v541_v38, %v540_v26  ;;  %v303_v58 = vshrl.u32 %v251_v51, 16  ;;  %v306_v1 = vshll.u32 %v251_v51, 16  ;;  %v1546_v3 = vrot.slane %v251_v51, 9  ;;  %v1959_v7 = vld [vmem:[%s2437_s1 + $0x158] sm:$0xff]  ;;  %v253_v17 = vld [vmem:[#allocation2 + $0x18] sm:$0xf] }
  0x32   : > { %1234 = vmatpush.bf16.msrb.mxu3 %v1980_v20  ;;  %v296_v56 = vrot.slane %v295_v46, 4  ;;  %v2249_v11 = vrot.slane %v326_v54, 5  ;;  %v1510_v12 = vld [vmem:[#allocation2 + $0x10] sm:$0xf]  ;;  %v728_v20 = vshrl.u32 %v619_v5, 16  ;;  %v1547_v22 = vrot.slane %v253_v17, 9 }
  0x33   : > { %857 = vmatpush.bf16.msrb.mxu0 %v1954_v14  ;;  %604 = vmatmul.bf16.vlgmr.msra.gmra.mxu2 %v544_v49  ;;  %v305_v4 = vrot.slane %v303_v58, 4  ;;  %v308_v9 = vrot.slane %v306_v1, 5  ;;  %v2253_v14 = vld [vmem:[#allocation2 + $0x14] sm:$0x1]  ;;  %v518_v21 = vsel %vm2172_vm4, %v1546_v3, %v517_v57  ;;  %v317_v24 = vshrl.u32 %v253_v17, 16 }
  0x34   : > { %974 = vmatpush.bf16.msrb.mxu1 %v1961_v36  ;;  %712 = vmatmul.bf16.vlgmr.msra.gmra.mxu3 %v1615_v55  ;;  %v301_v2 = vsel %vm2205_vm7, %v296_v56, %v300_v34  ;;  %v1969_v23 = vld [vmem:[%s2437_s1 + $0x198] sm:$0xff]  ;;  %v320_v25 = vshll.u32 %v253_v17, 16  ;;  %v1511_v28 = vor.u32 %v1913_v16, %v1510_v12  ;;  %v522_v33 = vsel %vm2172_vm4, %v1547_v22, %v521_v63  ;;  %v2290_v51 = vld [vmem:[#allocation2 + $0x18] sm:$0xf]  ;;  %v1975_v12 = vld [vmem:[%s2437_s1 + $0x1c8] sm:$0xff] }
  0x35   : > { %1083 = vmatpush.bf16.msrb.mxu2 %v1971_v37  ;;  %v348_v6 = vunpack.c.l.b16 %v301_v2  ;;  %v309_v18 = vor.u32 %v308_v9, %v305_v4  ;;  %v2260_v26 = vld [vmem:[#allocation2 + $0x10] sm:$0xf]  ;;  %v319_v36 = vrot.slane %v317_v24, 4  ;;  %v542_v40 = vunpack.c.l.b16 %v518_v21  ;;  %v1618_v52 = vld [vmem:[#allocation2 + $0x18] sm:$0xf] }
  0x36   : > { %1235 = vmatpush.bf16.msrb.mxu3 %v1979_v42  ;;  %v742_v32 = vshrl.u32 %v2260_v26, 16  ;;  %v322_v37 = vrot.slane %v320_v25, 5  ;;  %v1951_v38 = vld [vmem:[%s2437_s1 + $0x118] sm:$0xff]  ;;  %v1958_v42 = vld [vmem:[%s2437_s1 + $0x150] sm:$0xff]  ;;  %v1701_v45 = vrot.slane %v2260_v26, 9  ;;  %v889_v46 = vrot.slane %v2253_v14, 5 }
  0x37   : > { %858 = vmatpush.bf16.msrb.mxu0 %v1953_v41  ;;  %v351_v15 = vpack.c.b16 %v348_v6, %v347_v59  ;;  %v310_v34 = vrot.slane %v309_v18, 4  ;;  %v2272_v39 = vld [vmem:[#allocation2 + $0x10] sm:$0xf]  ;;  %v543_v41 = vunpack.c.l.b16 %v522_v33  ;;  %v2285_v48 = vrot.slane %v728_v20, 4  ;;  %v1939_v53 = vld [vmem:[#allocation2 + $0x1c] sm:$0xf0] }
  0x38   : > { %975 = vmatpush.bf16.msrb.mxu1 %v1960_v60  ;;  %v323_v47 = vor.u32 %v322_v37, %v319_v36  ;;  %v745_v49 = vshll.u32 %v2260_v26, 16  ;;  %v2294_v54 = vsel %vm2172_vm4, %v1700_v19, %v885_v30  ;;  %v733_v55 = vrot.slane %v731_v31, 5  ;;  %v1950_v59 = vld [vmem:[%s2437_s1 + $0x110] sm:$0xff]  ;;  %v2307_v2 = vld [vmem:[#allocation2 + $0x1c] sm:$0x1] }
  0x39   : > { %1084 = vmatpush.bf16.msrb.mxu2 %v1970_v61  ;;  %411 = vmatmul.bf16.vlgmr.msra.gmra.mxu0 %v351_v15  ;;  %v1105_v56 = vshrl.u32 %v2272_v39, 16  ;;  %v315_v57 = vsel %vm2205_vm7, %v310_v34, %v2247_v10  ;;  %v744_v60 = vrot.slane %v742_v32, 4  ;;  %v1108_v61 = vshll.u32 %v2272_v39, 16  ;;  %v1956_v21 = vld [vmem:[%s2437_s1 + $0x140] sm:$0xff] }
  0x3a   : > { %1236 = vmatpush.bf16.msrb.mxu3 %v1978_v8  ;;  %v324_v58 = vrot.slane %v323_v47, 4  ;;  %v545_v63 = vpack.c.b16 %v543_v41, %v542_v40  ;;  %v747_v1 = vrot.slane %v745_v49, 5  ;;  %v1119_v4 = vshrl.u32 %v2290_v51, 16  ;;  %v1966_v26 = vld [vmem:[%s2437_s1 + $0x180] sm:$0xff]  ;;  %v1988_v40 = vld [vmem:[%s2437_s1 + $0x230] sm:$0xff] }
  0x3b   : > { %859 = vmatpush.bf16.msrb.mxu0 %v1952_v35  ;;  %v1107_v3 = vrot.slane %v1105_v56, 4  ;;  %v1619_v5 = vor.u32 %v1939_v53, %v1618_v52  ;;  %v1110_v35 = vrot.slane %v1108_v61, 5  ;;  %v1114_v8 = vshll.u32 %v2288_v50, 16  ;;  %v1974_v30 = vld [vmem:[%s2437_s1 + $0x1c0] sm:$0xff]  ;;  %v2351_v47 = vld [vmem:[#allocation2 + $0x20] sm:$0xf] }
  0x3c   : > { %976 = vmatpush.bf16.msrb.mxu1 %v1959_v7  ;;  %v329_v6 = vsel %vm2205_vm7, %v324_v58, %v2249_v11  ;;  %v1967_v7 = vld [vmem:[%s2437_s1 + $0x188] sm:$0xff]  ;;  %v349_v9 = vunpack.c.l.b16 %v315_v57  ;;  %v1121_v15 = vrot.slane %v1119_v4, 4  ;;  %v1122_v16 = vshll.u32 %v2290_v51, 16  ;;  %v1948_v36 = vld [vmem:[%s2437_s1 + $0x100] sm:$0xff]  ;;  %v2361_v56 = vld [vmem:[#allocation2 + $0x28] sm:$0xf] }
  0x3d   : > { %1085 = vmatpush.bf16.msrb.mxu2 %v1969_v23  ;;  %495 = vmatmul.bf16.gmra.mxu1 %v1511_v28  ;;  %v350_v10 = vunpack.c.l.b16 %v329_v6  ;;  %v1949_v11 = vld [vmem:[%s2437_s1 + $0x108] sm:$0xff]  ;;  %v734_v17 = vor.u32 %v733_v55, %v2285_v48  ;;  %v737_v18 = vshll.u32 %v2251_v13, 16  ;;  %v1111_v19 = vor.u32 %v1110_v35, %v1107_v3  ;;  %v1989_v13 = vld [vmem:[%s2437_s1 + $0x238] sm:$0xff] }
  0x3e   : > { %1237 = vmatpush.bf16.msrb.mxu3 %v1977_v29  ;;  %v1128_v20 = vshll.u32 %v2307_v2, 16  ;;  %v890_v22 = vsel %vm2172_vm4, %v1701_v45, %v889_v46  ;;  %v748_v23 = vor.u32 %v747_v1, %v744_v60  ;;  %v751_v24 = vshll.u32 %v2253_v14, 16  ;;  %v2349_v45 = vld [vmem:[#allocation2 + $0x1c] sm:$0x1]  ;;  %v625_v46 = vld [vmem:[#allocation2 + $0x20] sm:$0xf] }
  0x3f   : > { %860 = vmatpush.bf16.msrb.mxu0 %v1951_v38  ;;  %v1124_v25 = vrot.slane %v1122_v16, 5  ;;  %v1116_v28 = vrot.slane %v1114_v8, 5  ;;  %v352_v29 = vpack.c.b16 %v350_v10, %v349_v9  ;;  %v1112_v31 = vrot.slane %v1111_v19, 4  ;;  %v2357_v52 = vld [vmem:[#allocation2 + $0x24] sm:$0x1] }
  0x40   : > { %977 = vmatpush.bf16.msrb.mxu1 %v1958_v42  ;;  %v1130_v32 = vrot.slane %v1128_v20, 5  ;;  %v916_v33 = vunpack.c.l.b16 %v2294_v54  ;;  %v917_v34 = vunpack.c.l.b16 %v890_v22  ;;  %v735_v37 = vrot.slane %v734_v17, 4  ;;  %v1770_v57 = vld [vmem:[#allocation2 + $0x10] sm:$0xf]  ;;  %v1987_v3 = vld [vmem:[%s2437_s1 + $0x228] sm:$0xff]  ;;  %v1986_v22 = vld [vmem:[%s2437_s1 + $0x220] sm:$0xff] }
  0x41   : > { %1086 = vmatpush.bf16.msrb.mxu2 %v1968_v43  ;;  %v1125_v14 = vor.u32 %v1124_v25, %v1121_v15  ;;  %v739_v38 = vrot.slane %v737_v18, 5  ;;  %v749_v41 = vrot.slane %v748_v23, 4  ;;  %v753_v42 = vrot.slane %v751_v24, 5  ;;  %v2372_v35 = vld [vmem:[#allocation2 + $0x24] sm:$0x1] }
  0x42   : > { %1238 = vmatpush.bf16.msrb.mxu3 %v1976_v44  ;;  %v623_v44 = vld [vmem:[#allocation2 + $0x18] sm:$0xf]  ;;  %v1117_v48 = vsel %vm2205_vm7, %v1112_v31, %v1116_v28  ;;  %v920_v53 = vpack.c.b16 %v917_v34, %v916_v33  ;;  %v1703_v60 = vrot.slane %v625_v46, 9  ;;  %v1133_v61 = vshrl.u32 %v2351_v47, 16  ;;  %v2375_v15 = vld [vmem:[#allocation2 + $0x2c] sm:$0x1] }
  0x43   : > { %861 = vmatpush.bf16.msrb.mxu0 %v1950_v59  ;;  %609 = vmatmul.bf16.gmra.mxu2 %v545_v63  ;;  %v1126_v43 = vrot.slane %v1125_v14, 4  ;;  %v740_v54 = vsel %vm2205_vm7, %v735_v37, %v739_v38  ;;  %v1702_v55 = vrot.slane %v623_v44, 9  ;;  %v754_v58 = vsel %vm2205_vm7, %v749_v41, %v753_v42  ;;  %v1964_v63 = vld [vmem:[#allocation2 + $0x14] sm:$0xf0]  ;;  %v1985_v37 = vld [vmem:[%s2437_s1 + $0x218] sm:$0xff] }
  0x44   : > { %978 = vmatpush.bf16.msrb.mxu1 %v1957_v0  ;;  %717 = vmatmul.bf16.gmra.mxu3 %v1619_v5  ;;  %v893_v59 = vrot.slane %v2349_v45, 5  ;;  %v1177_v0 = vunpack.c.l.b16 %v1117_v48  ;;  %v897_v4 = vrot.slane %v2357_v52, 5  ;;  %v1136_v5 = vshll.u32 %v2351_v47, 16 }
  0x45   : > { %1087 = vmatpush.bf16.msrb.mxu2 %v1967_v7  ;;  %v1131_v49 = vsel %vm2205_vm7, %v1126_v43, %v1130_v32  ;;  %v756_v6 = vshrl.u32 %v623_v44, 16  ;;  %v759_v7 = vshll.u32 %v623_v44, 16  ;;  %v1135_v8 = vrot.slane %v1133_v61, 4 }
  0x46   : > { %1239 = vmatpush.bf16.msrb.mxu3 %v1975_v12  ;;  %v1178_v1 = vunpack.c.l.b16 %v1131_v49  ;;  %v1147_v9 = vshrl.u32 %v2361_v56, 16  ;;  %v770_v10 = vshrl.u32 %v625_v46, 16  ;;  %v773_v12 = vshll.u32 %v625_v46, 16  ;;  %v1984_v49 = vld [vmem:[%s2437_s1 + $0x210] sm:$0xff] }
  0x47   : > { %862 = vmatpush.bf16.msrb.mxu0 %v1949_v11  ;;  %v1138_v16 = vrot.slane %v1136_v5, 5  ;;  %v1150_v11 = vshll.u32 %v2361_v56, 16  ;;  %v1771_v17 = vor.u32 %v1964_v63, %v1770_v57  ;;  %v800_v18 = vunpack.c.l.b16 %v740_v54 }
  0x48   : > { %979 = vmatpush.bf16.msrb.mxu1 %v1956_v21  ;;  %v801_v19 = vunpack.c.l.b16 %v754_v58  ;;  %v1149_v20 = vrot.slane %v1147_v9, 4  ;;  %v1181_v21 = vpack.c.b16 %v1178_v1, %v1177_v0  ;;  %v894_v23 = vsel %vm2172_vm4, %v1702_v55, %v893_v59  ;;  %v1983_v0 = vld [vmem:[%s2437_s1 + $0x208] sm:$0xff] }
  0x49   : > { %1088 = vmatpush.bf16.msrb.mxu2 %v1966_v26  ;;  %416 = vmatmul.bf16.gmra.mxu0 %v352_v29  ;;  %v898_v24 = vsel %vm2172_vm4, %v1703_v60, %v897_v4  ;;  %v1152_v25 = vrot.slane %v1150_v11, 5  ;;  %v1139_v26 = vor.u32 %v1138_v16, %v1135_v8  ;;  %v1142_v28 = vshll.u32 %v2372_v35, 16  ;;  %v1774_v60 = vld [vmem:[#allocation2 + $0x20] sm:$0xf] }
  0x4a   : > { %1240 = vmatpush.bf16.msrb.mxu3 %v1974_v30  ;;  %v1156_v29 = vshll.u32 %v2375_v15, 16  ;;  %v761_v30 = vrot.slane %v759_v7, 5  ;;  %v772_v31 = vrot.slane %v770_v10, 4  ;;  %v775_v14 = vrot.slane %v773_v12, 5  ;;  %v1982_v10 = vld [vmem:[%s2437_s1 + $0x200] sm:$0xff] }
  0x4b   : > { %863 = vmatpush.bf16.msrb.mxu0 %v1948_v36  ;;  %v1153_v32 = vor.u32 %v1152_v25, %v1149_v20  ;;  %v804_v33 = vpack.c.b16 %v801_v19, %v800_v18  ;;  %v918_v34 = vunpack.c.l.b16 %v894_v23  ;;  %v919_v36 = vunpack.c.l.b16 %v898_v24 }
  0x4c   : > { %1990 = vmatpush.bf16.msra.mxu1 %v1989_v13  ;;  %v1140_v38 = vrot.slane %v1139_v26, 4  ;;  %v1158_v42 = vrot.slane %v1156_v29, 5  ;;  %v765_v44 = vshll.u32 %v2349_v45, 16  ;;  %v776_v46 = vor.u32 %v775_v14, %v772_v31 }
  0x4d   : > { %980 = vmatmul.bf16.vlgmr.msrb.gmra.mxu1 %v920_v53  ;;  %v1154_v41 = vrot.slane %v1153_v32, 4  ;;  %v779_v48 = vshll.u32 %v2357_v52, 16  ;;  %v921_v53 = vpack.c.b16 %v919_v36, %v918_v34  ;;  %v1965_v52 = vld [vmem:[#allocation2 + $0x24] sm:$0xf0]  ;;  %v1270_v5 = vrot.slane %v2372_v35, 5 }
  0x4e   : > { %v767_v58 = vrot.slane %v765_v44, 5  ;;  %v777_v45 = vrot.slane %v776_v46, 4  ;;  %v1775_v1 = vor.u32 %v1965_v52, %v1774_v60  ;;  %v1858_v7 = vrot.slane %v2351_v47, 9 }
  0x4f   : > { %1349 = vmatpush.bf16.msra.mxu0 %v1989_v13  ;;  %v758_v13 = vrot.slane %v756_v6, 4  ;;  %v1159_v55 = vsel %vm2205_vm7, %v1154_v41, %v1158_v42  ;;  %v781_v59 = vrot.slane %v779_v48, 5  ;;  %v1274_v6 = vrot.slane %v2375_v15, 5 }
  0x50   : > { %1991 = vmatpush.bf16.msra.mxu1 %v1988_v40  ;;  %v1180_v63 = vunpack.c.l.b16 %v1159_v55  ;;  %v1859_v8 = vrot.slane %v2361_v56, 9  ;;  %v1271_v27 = vsel %vm2172_vm4, %v1858_v7, %v1270_v5  ;;  %v1262_v11 = vrot.slane %v2288_v50, 5 }
  0x51   : > { %v762_v43 = vor.u32 %v761_v30, %v758_v13  ;;  %v782_v4 = vsel %vm2205_vm7, %v777_v45, %v781_v59  ;;  %v1295_v56 = vunpack.c.l.b16 %v1271_v27  ;;  %v1856_v19 = vrot.slane %v2272_v39, 9 }
  0x52   : > { %v803_v16 = vunpack.c.l.b16 %v782_v4  ;;  %v1275_v35 = vsel %vm2172_vm4, %v1859_v8, %v1274_v6  ;;  %v1857_v20 = vrot.slane %v2290_v51, 9 }
  0x53   : > { %1350 = vmatpush.bf16.msra.mxu0 %v1988_v40  ;;  %1089 = vmatmul.bf16.vlgmr.msrb.gmra.mxu2 %v1771_v17  ;;  %v1144_v40 = vrot.slane %v1142_v28, 5  ;;  %v763_v57 = vrot.slane %v762_v43, 4  ;;  %v1296_v15 = vunpack.c.l.b16 %v1275_v35  ;;  %v1266_v17 = vrot.slane %v2307_v2, 5 }
  0x54   : > { %1992 = vmatpush.bf16.msra.mxu1 %v1987_v3  ;;  %1241 = vmatmul.bf16.vlgmr.msrb.gmra.mxu3 %v1181_v21  ;;  %v1263_v21 = vsel %vm2172_vm4, %v1856_v19, %v1262_v11 }
  0x55   : > { %v1145_v54 = vsel %vm2205_vm7, %v1140_v38, %v1144_v40  ;;  %v1298_v18 = vpack.c.b16 %v1296_v15, %v1295_v56  ;;  %v1293_v23 = vunpack.c.l.b16 %v1263_v21 }
  0x56   : > { %v1179_v61 = vunpack.c.l.b16 %v1145_v54 }
  0x57   : > { %1351 = vmatpush.bf16.msra.mxu0 %v1987_v3  ;;  %v768_v3 = vsel %vm2205_vm7, %v763_v57, %v767_v58 }
  0x58   : > { %1993 = vmatpush.bf16.msra.mxu1 %v1986_v22  ;;  %v1182_v9 = vpack.c.b16 %v1180_v63, %v1179_v61  ;;  %v802_v12 = vunpack.c.l.b16 %v768_v3 }
  0x59   : > { %864 = vmatmul.bf16.vlgmr.msrb.gmra.mxu0 %v804_v33 }
  0x5a   : > { %v805_v47 = vpack.c.b16 %v803_v16, %v802_v12  ;;  %v2007_v12 = vld [vmem:[%s2438_s2] ss:$0 sm:$0xff] }
  0x5b   : > { %1352 = vmatpush.bf16.msra.mxu0 %v1986_v22  ;;  %v1267_v22 = vsel %vm2172_vm4, %v1857_v20, %v1266_v17 }
  0x5c   : > { %1994 = vmatpush.bf16.msra.mxu1 %v1985_v37  ;;  %v1294_v24 = vunpack.c.l.b16 %v1267_v22 }
  0x5d   : > { %985 = vmatmul.bf16.gmra.mxu1 %v921_v53 }
  0x5e   : > { %v1297_v25 = vpack.c.b16 %v1294_v24, %v1293_v23 }
  0x5f   : > { %1353 = vmatpush.bf16.msra.mxu0 %v1985_v37 }
  0x60   : > { %1995 = vmatpush.bf16.msra.mxu1 %v1984_v49 }
  0x63   : > { %1354 = vmatpush.bf16.msra.mxu0 %v1984_v49  ;;  %1094 = vmatmul.bf16.gmra.mxu2 %v1775_v1 }
  0x64   : > { %1996 = vmatpush.bf16.msra.mxu1 %v1983_v0  ;;  %1246 = vmatmul.bf16.gmra.mxu3 %v1182_v9 }
  0x67   : > { %1355 = vmatpush.bf16.msra.mxu0 %v1983_v0 }
  0x68   : > { %1997 = vmatpush.bf16.msra.mxu1 %v1982_v10 }
  0x69   : > { %869 = vmatmul.bf16.gmra.mxu0 %v805_v47 }
  0x6b   : > { %1356 = vmatpush.bf16.msra.mxu0 %v1982_v10 }
  0x6d   : > { %1362 = vmatmul.bf16.vlgmr.msra.gmra.mxu1 %v1298_v18 }
  0x79   : > { %1357 = vmatmul.bf16.vlgmr.msra.gmra.mxu0 %v1297_v25 }
  0xaa   : > { %v491_v50 = vpop.f32.mrf.mxu1 }
  0xb2   : > { %v493_v13 = vpop.f32.mrf.mxu1 }
  0xb6   : > { %v412_v26 = vpop.f32.mrf.mxu0  ;;  %v605_v2 = vpop.f32.mrf.mxu2 }
  0xb7   : > { %v713_v28 = vpop.f32.mrf.mxu3  ;;  %v492_v49 = vadd.f32 %v491_v50, %v412_v26 }
  0xb9   : > { %v615_v55 = vadd.f32 %v605_v2, %v492_v49 }
  0xba   : > { %v496_v29 = vpop.f32.mrf.mxu1 }
  0xbb   : > { %v723_v52 = vadd.f32 %v713_v28, %v615_v55 }
  0xbe   : > { %v414_v39 = vpop.f32.mrf.mxu0  ;;  %v607_v30 = vpop.f32.mrf.mxu2 }
  0xbf   : > { %v715_v51 = vpop.f32.mrf.mxu3  ;;  %v494_v61 = vadd.f32 %v493_v13, %v414_v39 }
  0xc1   : > { %v616_v5 = vadd.f32 %v607_v30, %v494_v61 }
  0xc2   : > { %v498_v31 = vpop.f32.mrf.mxu1 }
  0xc3   : > { %v724_v27 = vadd.f32 %v715_v51, %v616_v5 }
  0xc6   : > { %v417_v14 = vpop.f32.mrf.mxu0  ;;  %v610_v32 = vpop.f32.mrf.mxu2 }
  0xc7   : > { %v718_v33 = vpop.f32.mrf.mxu3  ;;  %v497_v44 = vadd.f32 %v496_v29, %v417_v14 }
  0xc9   : > { %v617_v54 = vadd.f32 %v610_v32, %v497_v44 }
  0xca   : > { %v981_v34 = vpop.f32.mrf.mxu1 }
  0xcb   : > { %v725_v58 = vadd.f32 %v718_v33, %v617_v54 }
  0xce   : > { %v419_v62 = vpop.f32.mrf.mxu0  ;;  %v612_v36 = vpop.f32.mrf.mxu2 }
  0xcf   : > { %v720_v37 = vpop.f32.mrf.mxu3  ;;  %v499_v45 = vadd.f32 %v498_v31, %v419_v62 }
  0xd1   : > { %v618_v1 = vadd.f32 %v612_v36, %v499_v45 }
  0xd2   : > { %v983_v38 = vpop.f32.mrf.mxu1 }
  0xd3   : > { %v726_v8 = vadd.f32 %v720_v37, %v618_v1 }
  0xd6   : > { %v865_v40 = vpop.f32.mrf.mxu0  ;;  %v1090_v41 = vpop.f32.mrf.mxu2 }
  0xd7   : > { %v1242_v42 = vpop.f32.mrf.mxu3  ;;  %v875_v3 = vadd.f32 %v865_v40, %v723_v52 }
  0xd9   : > { %v991_v9 = vadd.f32 %v981_v34, %v875_v3 }
  0xda   : > { %v986_v43 = vpop.f32.mrf.mxu1 }
  0xdb   : > { %v1100_v15 = vadd.f32 %v1090_v41, %v991_v9 }
  0xdd   : > { %v1252_v23 = vadd.f32 %v1242_v42, %v1100_v15 }
  0xde   : > { %v867_v46 = vpop.f32.mrf.mxu0  ;;  %v1092_v48 = vpop.f32.mrf.mxu2 }
  0xdf   : > { %v1244_v53 = vpop.f32.mrf.mxu3  ;;  %v876_v11 = vadd.f32 %v867_v46, %v724_v27 }
  0xe1   : > { %v992_v24 = vadd.f32 %v983_v38, %v876_v11 }
  0xe2   : > { %v988_v57 = vpop.f32.mrf.mxu1 }
  0xe3   : > { %v1101_v28 = vadd.f32 %v1092_v48, %v992_v24 }
  0xe5   : > { %v1253_v31 = vadd.f32 %v1244_v53, %v1101_v28 }
  0xe6   : > { %v870_v59 = vpop.f32.mrf.mxu0  ;;  %v1095_v60 = vpop.f32.mrf.mxu2 }
  0xe7   : > { %v877_v63 = vadd.f32 %v870_v59, %v725_v58  ;;  %v1247_v0 = vpop.f32.mrf.mxu3 }
  0xe9   : > { %v993_v4 = vadd.f32 %v986_v43, %v877_v63 }
  0xea   : > { %v1363_v7 = vpop.f32.mrf.mxu1 }
  0xeb   : > { %v1102_v6 = vadd.f32 %v1095_v60, %v993_v4 }
  0xed   : > { %v1254_v10 = vadd.f32 %v1247_v0, %v1102_v6 }
  0xee   : > { %v872_v16 = vpop.f32.mrf.mxu0  ;;  %v1097_v56 = vpop.f32.mrf.mxu2 }
  0xef   : > { %v878_v35 = vadd.f32 %v872_v16, %v726_v8  ;;  %v1370_v47 = vadd.f32 %v1363_v7, %v1254_v10  ;;  %v1249_v19 = vpop.f32.mrf.mxu3 }
  0xf1   : > { %v1378_v17 = vadd.f32 %v2007_v12, %v1370_v47  ;;  %v994_v18 = vadd.f32 %v988_v57, %v878_v35 }
  0xf2   : > { %v1365_v22 = vpop.f32.mrf.mxu1 }
  0xf3   : > { %v1382_v20 = vmax.f32 %v1378_v17, 0.0  ;;  %v1103_v21 = vadd.f32 %v1097_v56, %v994_v18 }
  0xf5   : > { %v1386_v25 = vpack.c.bf16 %v1382_v20, %v1382_v20  ;;  %v1255_v50 = vadd.f32 %v1249_v19, %v1103_v21 }
  0xf6   : > { %v1358_v13 = vpop.f32.mrf.mxu0 }
  0xf7   : > { %1390 = vst [vmem:[%s170_s22 + $0x4] sm:$0x3] %v1386_v25  ;;  %v1368_v26 = vadd.f32 %v1358_v13, %v1252_v23  ;;  %v1371_v2 = vadd.f32 %v1365_v22, %v1255_v50 }
  0xf9   : > { %v1376_v29 = vadd.f32 %v2007_v12, %v1368_v26  ;;  %v1379_v39 = vadd.f32 %v2007_v12, %v1371_v2 }
  0xfb   : > { %v1380_v30 = vmax.f32 %v1376_v29, 0.0  ;;  %v1383_v51 = vmax.f32 %v1379_v39, 0.0 }
  0xfd   : > { %v1384_v14 = vpack.c.bf16 %v1380_v30, %v1380_v30  ;;  %v1387_v32 = vpack.c.bf16 %v1383_v51, %v1383_v51 }
  0xfe   : > { %v1360_v33 = vpop.f32.mrf.mxu0 }
  0xff   : > { %1388 = vst [vmem:[%s170_s22] sm:$0x3] %v1384_v14  ;;  %v1369_v34 = vadd.f32 %v1360_v33, %v1253_v31 }
 0x100   : > { %1391 = vst [vmem:[%s170_s22 + $0x6] sm:$0x3] %v1387_v32 }
 0x101   : > { %v1377_v62 = vadd.f32 %v2007_v12, %v1369_v34 }
 0x103   : > { %v1381_v36 = vmax.f32 %v1377_v62, 0.0 }
 0x105   : > { %v1385_v37 = vpack.c.bf16 %v1381_v36, %v1381_v36 }
 0x107   : > { %1389 = vst [vmem:[%s170_s22 + $0x2] sm:$0x3] %v1385_v37 }
 0x108 PF: > { %s13_s12 = sadd.s32 1, %s2014_s12  }
 0x109   : > { %p10_p4 = scmp.ge.s32.totalorder %s13_s12, 4  }
 0x10b   :  { %12 = sbr.rel (!%p10_p4) target bundleno = 1 (0x1), region = 75 }

// kernel: _lambda_.44
= control target key start
LH: loop header
LB: loop body
LE: loop exit
PB: predicated region body
PF: predicated region fallthrough
CT: control target
= control target key end

     0   :  { %s211_s1 = inlined_call_operand.vmem [shape: bf16[128,128], index: 1, kind: input, shape index: {}]   ;;  %s212_s2 = inlined_call_operand.vmem [shape: f32[1,128], index: 2, kind: input, shape index: {}]   ;;  %s213_s0 = inlined_call_operand.vmem [shape: bf16[8,128], index: 0, kind: input, shape index: {}]   ;;  %s214_s3 = inlined_call_operand.vmem [shape: bf16[8,128], index: 3, kind: input, shape index: {}]   ;;  %s215_s4 = inlined_call_operand.vmem [shape: bf16[8,128], index: 4, kind: output, shape index: {}]  }
   0x1   :  { %v148_v0 = vld [vmem:[%s211_s1 + $0x38] sm:$0xff]  ;;  %v147_v1 = vld [vmem:[%s211_s1 + $0x30] sm:$0xff]  ;;  %v146_v2 = vld [vmem:[%s211_s1 + $0x28] sm:$0xff] }
   0x2   :  { %86 = vmatpush.bf16.msra.mxu0 %v148_v0  ;;  %v145_v3 = vld [vmem:[%s211_s1 + $0x20] sm:$0xff]  ;;  %v144_v4 = vld [vmem:[%s211_s1 + $0x18] sm:$0xff]  ;;  %v143_v5 = vld [vmem:[%s211_s1 + $0x10] sm:$0xff] }
   0x3   :  { %v142_v6 = vld [vmem:[%s211_s1 + $0x8] sm:$0xff]  ;;  %v141_v7 = vld [vmem:[%s211_s1] sm:$0xff] }
   0x4   :  { %v17_v8 = vld [vmem:[%s213_s0] sm:$0xf] }
   0x5   :  { %v99_v9 = vld [vmem:[%s214_s3] sm:$0xf] }
   0x6   :  { %87 = vmatpush.bf16.msra.mxu0 %v147_v1  ;;  %v149_v10 = vld [vmem:[%s212_s2] ss:$0 sm:$0xff]  ;;  %v100_v11 = vunpack.c.l.bf16 %v99_v9 }
   0xa   :  { %88 = vmatpush.bf16.msra.mxu0 %v146_v2 }
   0xe   :  { %89 = vmatpush.bf16.msra.mxu0 %v145_v3 }
  0x12   :  { %90 = vmatpush.bf16.msra.mxu0 %v144_v4 }
  0x16   :  { %91 = vmatpush.bf16.msra.mxu0 %v143_v5 }
  0x1a   :  { %92 = vmatpush.bf16.msra.mxu0 %v142_v6 }
  0x1e   :  { %93 = vmatpush.bf16.msra.mxu0 %v141_v7 }
  0x21   :  { %94 = vmatmul.bf16.vlgmr.msra.gmra.mxu0 %v17_v8 }
  0x9e   :  { %v95_v12 = vpop.f32.mrf.mxu0 }
  0x9f   :  { %v96_v13 = vadd.f32 %v149_v10, %v95_v12 }
  0xa1   :  { %v101_v14 = vadd.f32 %v100_v11, %v96_v13 }
  0xa3   :  { %v102_v15 = vmax.f32 %v101_v14, 0.0 }
  0xa5   :  { %v103_v16 = vpack.c.bf16 %v102_v15, %v102_v15 }
  0xa6   :  { %v97_v17 = vpop.f32.mrf.mxu0 }
  0xa7   :  { %104 = vst [vmem:[%s215_s4] sm:$0xf] %v103_v16 }

// kernel: _lambda_.45
= control target key start
LH: loop header
LB: loop body
LE: loop exit
PB: predicated region body
PF: predicated region fallthrough
CT: control target
= control target key end

     0   :  { %s197_s1 = inlined_call_operand.vmem [shape: bf16[128,128], index: 1, kind: input, shape index: {}]   ;;  %s198_s2 = inlined_call_operand.vmem [shape: f32[1,128], index: 2, kind: input, shape index: {}]   ;;  %s199_s0 = inlined_call_operand.vmem [shape: bf16[8,128], index: 0, kind: input, shape index: {}]   ;;  %s200_s3 = inlined_call_operand.vmem [shape: bf16[8,128], index: 3, kind: output, shape index: {}]  }
   0x1   :  { %v142_v0 = vld [vmem:[%s197_s1 + $0x38] sm:$0xff]  ;;  %v141_v1 = vld [vmem:[%s197_s1 + $0x30] sm:$0xff]  ;;  %v140_v2 = vld [vmem:[%s197_s1 + $0x28] sm:$0xff] }
   0x2   :  { %83 = vmatpush.bf16.msra.mxu0 %v142_v0  ;;  %v139_v3 = vld [vmem:[%s197_s1 + $0x20] sm:$0xff]  ;;  %v138_v4 = vld [vmem:[%s197_s1 + $0x18] sm:$0xff]  ;;  %v137_v5 = vld [vmem:[%s197_s1 + $0x10] sm:$0xff] }
   0x3   :  { %v136_v6 = vld [vmem:[%s197_s1 + $0x8] sm:$0xff]  ;;  %v135_v7 = vld [vmem:[%s197_s1] sm:$0xff] }
   0x4   :  { %v14_v8 = vld [vmem:[%s199_s0] sm:$0xf] }
   0x5   :  { %v143_v9 = vld [vmem:[%s198_s2] ss:$0 sm:$0xff] }
   0x6   :  { %84 = vmatpush.bf16.msra.mxu0 %v141_v1 }
   0xa   :  { %85 = vmatpush.bf16.msra.mxu0 %v140_v2 }
   0xe   :  { %86 = vmatpush.bf16.msra.mxu0 %v139_v3 }
  0x12   :  { %87 = vmatpush.bf16.msra.mxu0 %v138_v4 }
  0x16   :  { %88 = vmatpush.bf16.msra.mxu0 %v137_v5 }
  0x1a   :  { %89 = vmatpush.bf16.msra.mxu0 %v136_v6 }
  0x1e   :  { %90 = vmatpush.bf16.msra.mxu0 %v135_v7 }
  0x21   :  { %91 = vmatmul.bf16.vlgmr.msra.gmra.mxu0 %v14_v8 }
  0x9e   :  { %v92_v10 = vpop.f32.mrf.mxu0 }
  0x9f   :  { %v93_v11 = vadd.f32 %v143_v9, %v92_v10 }
  0xa1   :  { %v96_v12 = vmax.f32 %v93_v11, 0.0 }
  0xa3   :  { %v97_v13 = vpack.c.bf16 %v96_v12, %v96_v12 }
  0xa5   :  { %98 = vst [vmem:[%s200_s3] sm:$0xf] %v97_v13 }
  0xa6   :  { %v94_v14 = vpop.f32.mrf.mxu0 }

// kernel: _lambda_.42
= control target key start
LH: loop header
LB: loop body
LE: loop exit
PB: predicated region body
PF: predicated region fallthrough
CT: control target
= control target key end

     0   :  { %s1828_s12 = smov 0   ;;  %s1830_s13 = smov 0   ;;  %s2127_s0 = inlined_call_operand.vmem [shape: bf16[2,12,9,128], index: 0, kind: input, shape index: {}]   ;;  %s2128_s1 = inlined_call_operand.vmem [shape: bf16[9,128,128], index: 1, kind: input, shape index: {}]   ;;  %s2129_s2 = inlined_call_operand.vmem [shape: f32[1,128], index: 2, kind: input, shape index: {}]   ;;  %s2130_s3 = inlined_call_operand.vmem [shape: bf16[2,2,8,128], index: 3, kind: output, shape index: {}]  }
   0x1   :  { %s1832_s14 = smov 0  }
   0x2 LB: > { %s25_s15 = sadd.s32 1, %s1802_s13  ;;  %p1214_p0 = scmp.ge.s32.totalorder %s1806_s14, 1  ;;  %s1806_s14 = sphi %s1832_s14, %s13_s14   ;;  %s1802_s13 = sphi %s1830_s13, %s2134_s13   ;;  %s1798_s12 = sphi %s1828_s12, %s2133_s12  }
   0x3   : > { %p27_p1 = scmp.ge.s32.totalorder %s25_s15, 2  ;;  %p151_p2 = scmp.lt.s32.totalorder %s1806_s14, 3 }
   0x5   : > { %s2136_s15 = smov (%p27_p1, %s25_s15), 0  ;;  %p152_p3 = pnand %p1214_p0, %p151_p2 }
   0x6   : > { %p179_p4 = scmp.lt.s32.totalorder (!%p152_p3), %s1798_s12, 1 }
   0x7   : > { %155 = sbr.rel (%p152_p3) target bundleno = 251 (0xfb), region = 32 }
   0xc   : > { %v1691_v0 = vld [vmem:[%s2128_s1 + $0xb8] sm:$0xff]  ;;  %v1690_v4 = vld [vmem:[%s2128_s1 + $0xb0] sm:$0xff]  ;;  %s2138_s12 = smov (!%p179_p4, %s1798_s12), 1  ;;  %v1689_v8 = vld [vmem:[%s2128_s1 + $0xa8] sm:$0xff]  ;;  %vm218_vm0 = vsmask.f32 3328 }
   0xd   : > { %v1700_v1 = vld [vmem:[%s2128_s1 + $0x78] sm:$0xff]  ;;  %318 = vmatpush.bf16.msra.mxu0 %v1691_v0  ;;  %v1699_v5 = vld [vmem:[%s2128_s1 + $0x70] sm:$0xff]  ;;  %v1698_v9 = vld [vmem:[%s2128_s1 + $0x68] sm:$0xff]  ;;  %s1758_s17 = smul.u32 96, %s2138_s12  ;;  %vm219_vm1 = vsmask.f32 7440 }
   0xe   : > { %v1683_v2 = vld [vmem:[%s2128_s1 + $0x38] sm:$0xff]  ;;  %477 = vmatpush.bf16.msra.mxu2 %v1700_v1  ;;  %v1682_v6 = vld [vmem:[%s2128_s1 + $0x30] sm:$0xff]  ;;  %v1681_v10 = vld [vmem:[%s2128_s1 + $0x28] sm:$0xff]  ;;  %s1674_s5 = sshll.u32 %s2138_s12, 3 }
   0xf   : > { %v1709_v3 = vld [vmem:[%s2128_s1 + $0xf8] sm:$0xff]  ;;  %386 = vmatpush.bf16.msra.mxu1 %v1683_v2  ;;  %v1708_v7 = vld [vmem:[%s2128_s1 + $0xf0] sm:$0xff]  ;;  %v1707_v11 = vld [vmem:[%s2128_s1 + $0xe8] sm:$0xff]  ;;  %s1900_s28 = scalar_lea.vmem %s2127_s0, %s1758_s17  ;;  %s192_s8 = scalar_lea.vmem %s2130_s3, %s1674_s5 }
  0x10   : > { %572 = vmatpush.bf16.msra.mxu3 %v1709_v3  ;;  %v1688_v12 = vld [vmem:[%s2128_s1 + $0xa0] sm:$0xff]  ;;  %v1687_v16 = vld [vmem:[%s2128_s1 + $0x98] sm:$0xff]  ;;  %v1686_v20 = vld [vmem:[%s2128_s1 + $0x90] sm:$0xff] }
  0x11   : > { %319 = vmatpush.bf16.msra.mxu0 %v1690_v4  ;;  %v1697_v13 = vld [vmem:[%s2128_s1 + $0x60] sm:$0xff]  ;;  %v1696_v17 = vld [vmem:[%s2128_s1 + $0x58] sm:$0xff]  ;;  %v200_v23 = vld [vmem:[%s1900_s28 + $0x8] sm:$0xf] }
  0x12   : > { %478 = vmatpush.bf16.msra.mxu2 %v1699_v5  ;;  %v1680_v14 = vld [vmem:[%s2128_s1 + $0x20] sm:$0xff]  ;;  %v1679_v18 = vld [vmem:[%s2128_s1 + $0x18] sm:$0xff]  ;;  %v201_v24 = vld [vmem:[%s1900_s28 + $0xc] sm:$0x1]  ;;  %v236_v28 = vshrl.u32 %v200_v23, 16  ;;  %v239_v31 = vshll.u32 %v200_v23, 16 }
  0x13   : > { %387 = vmatpush.bf16.msra.mxu1 %v1682_v6  ;;  %v1706_v15 = vld [vmem:[%s2128_s1 + $0xe0] sm:$0xff]  ;;  %v1705_v19 = vld [vmem:[%s2128_s1 + $0xd8] sm:$0xff]  ;;  %v1695_v29 = vld [vmem:[%s2128_s1 + $0x50] sm:$0xff]  ;;  %v245_v32 = vshll.u32 %v201_v24, 16 }
  0x14   : > { %573 = vmatpush.bf16.msra.mxu3 %v1708_v7  ;;  %v198_v21 = vld [vmem:[%s1900_s28] sm:$0xf]  ;;  %v199_v22 = vld [vmem:[%s1900_s28 + $0x4] sm:$0x1]  ;;  %v1678_v30 = vld [vmem:[%s2128_s1 + $0x10] sm:$0xff]  ;;  %v238_v36 = vrot.slane %v236_v28, 4 }
  0x15   : > { %320 = vmatpush.bf16.msra.mxu0 %v1689_v8  ;;  %v222_v25 = vshrl.u32 %v198_v21, 16  ;;  %v225_v26 = vshll.u32 %v198_v21, 16  ;;  %v231_v27 = vshll.u32 %v199_v22, 16  ;;  %v1704_v33 = vld [vmem:[%s2128_s1 + $0xd0] sm:$0xff]  ;;  %v241_v37 = vrot.slane %v239_v31, 5  ;;  %v1685_v40 = vld [vmem:[%s2128_s1 + $0x88] sm:$0xff]  ;;  %vm1937_vm2 = vmor %vm218_vm0, %vm219_vm1 }
  0x16   : > { %479 = vmatpush.bf16.msra.mxu2 %v1698_v9  ;;  %v1694_v41 = vld [vmem:[%s2128_s1 + $0x48] sm:$0xff]  ;;  %v247_v44 = vrot.slane %v245_v32, 5  ;;  %v1684_v49 = vld [vmem:[%s2128_s1 + $0x80] sm:$0xff]  ;;  %v1717_v52 = vld [vmem:[%s2128_s1 + $0x178] sm:$0xff] }
  0x17   : > { %388 = vmatpush.bf16.msra.mxu1 %v1681_v10  ;;  %v224_v34 = vrot.slane %v222_v25, 4  ;;  %v227_v35 = vrot.slane %v225_v26, 5  ;;  %v233_v39 = vrot.slane %v231_v27, 5  ;;  %v242_v43 = vor.u32 %v241_v37, %v238_v36  ;;  %v1677_v45 = vld [vmem:[%s2128_s1 + $0x8] sm:$0xff]  ;;  %v1693_v50 = vld [vmem:[%s2128_s1 + $0x40] sm:$0xff]  ;;  %v1735_v53 = vld [vmem:[%s2128_s1 + $0x1b8] sm:$0xff] }
  0x18   : > { %574 = vmatpush.bf16.msra.mxu3 %v1707_v11  ;;  %v1703_v46 = vld [vmem:[%s2128_s1 + $0xc8] sm:$0xff]  ;;  %v1676_v54 = vld [vmem:[%s2128_s1] sm:$0xff]  ;;  %v1322_v59 = vld [vmem:[%s1900_s28 + $0x18] sm:$0xf] }
  0x19   : > { %321 = vmatpush.bf16.msra.mxu0 %v1688_v12  ;;  %v228_v38 = vor.u32 %v227_v35, %v224_v34  ;;  %v243_v48 = vrot.slane %v242_v43, 4  ;;  %v1702_v57 = vld [vmem:[%s2128_s1 + $0xc0] sm:$0xff]  ;;  %v1726_v61 = vld [vmem:[%s2128_s1 + $0x138] sm:$0xff]  ;;  %v1675_v0 = vld [vmem:[%s1900_s28 + $0x4] sm:$0xf0] }
  0x1a   : > { %480 = vmatpush.bf16.msra.mxu2 %v1697_v13  ;;  %v1692_v60 = vld [vmem:[%s1900_s28 + $0x1c] sm:$0xf0]  ;;  %v1743_v62 = vld [vmem:[%s2128_s1 + $0x238] sm:$0xff]  ;;  %v1378_v1 = vld [vmem:[%s1900_s28 + $0x30] sm:$0xf] }
  0x1b   : > { %389 = vmatpush.bf16.msra.mxu1 %v1680_v14  ;;  %v229_v47 = vrot.slane %v228_v38, 4  ;;  %v248_v55 = vsel %vm1937_vm2, %v243_v48, %v247_v44  ;;  %v1268_v63 = vld [vmem:[%s1900_s28] sm:$0xf]  ;;  %v1701_v2 = vld [vmem:[%s1900_s28 + $0x34] sm:$0xf0]  ;;  %v1323_v4 = vor.u32 %v1692_v60, %v1322_v59  ;;  %v1716_v5 = vld [vmem:[%s2128_s1 + $0x170] sm:$0xff] }
  0x1c   : > { %575 = vmatpush.bf16.msra.mxu3 %v1706_v15  ;;  %v267_v58 = vunpack.c.l.b16 %v248_v55  ;;  %v1734_v6 = vld [vmem:[%s2128_s1 + $0x1b0] sm:$0xff]  ;;  %v1269_v7 = vor.u32 %v1675_v0, %v1268_v63  ;;  %v1379_v8 = vor.u32 %v1701_v2, %v1378_v1  ;;  %v1358_v10 = vld [vmem:[%s1900_s28 + $0x38] sm:$0xf]  ;;  %v1514_v13 = vld [vmem:[%s1900_s28 + $0x8] sm:$0xf] }
  0x1d   : > { %322 = vmatpush.bf16.msra.mxu0 %v1687_v16  ;;  %v234_v51 = vsel %vm1937_vm2, %v229_v47, %v233_v39  ;;  %v1356_v9 = vld [vmem:[%s1900_s28 + $0x30] sm:$0xf]  ;;  %v1715_v15 = vld [vmem:[%s2128_s1 + $0x168] sm:$0xff]  ;;  %v890_v23 = vshrl.u32 %v1514_v13, 16  ;;  %v893_v24 = vshll.u32 %v1514_v13, 16  ;;  %v1714_v27 = vld [vmem:[%s2128_s1 + $0x160] sm:$0xff] }
  0x1e   : > { %481 = vmatpush.bf16.msra.mxu2 %v1696_v17  ;;  %v266_v56 = vunpack.c.l.b16 %v234_v51  ;;  %v1725_v11 = vld [vmem:[%s2128_s1 + $0x130] sm:$0xff]  ;;  %v1733_v16 = vld [vmem:[%s2128_s1 + $0x1a8] sm:$0xff]  ;;  %v589_v17 = vshrl.u32 %v1356_v9, 16  ;;  %v1732_v28 = vld [vmem:[%s2128_s1 + $0x1a0] sm:$0xff] }
  0x1f   : > { %390 = vmatpush.bf16.msra.mxu1 %v1679_v18  ;;  %v1742_v12 = vld [vmem:[%s2128_s1 + $0x230] sm:$0xff]  ;;  %v592_v18 = vshll.u32 %v1356_v9, 16  ;;  %v1724_v21 = vld [vmem:[%s2128_s1 + $0x128] sm:$0xff]  ;;  %v1359_v34 = vld [vmem:[%s1900_s28 + $0x3c] sm:$0x1]  ;;  %v892_v37 = vrot.slane %v890_v23, 4 }
  0x20   : > { %576 = vmatpush.bf16.msra.mxu3 %v1705_v19  ;;  %v268_v3 = vpack.c.b16 %v267_v58, %v266_v56  ;;  %v1516_v14 = vld [vmem:[%s1900_s28 + $0x10] sm:$0xf]  ;;  %v603_v19 = vshrl.u32 %v1358_v10, 16  ;;  %v1741_v22 = vld [vmem:[%s2128_s1 + $0x228] sm:$0xff]  ;;  %v1723_v35 = vld [vmem:[%s2128_s1 + $0x120] sm:$0xff]  ;;  %v895_v38 = vrot.slane %v893_v24, 5 }
  0x21   : > { %323 = vmatpush.bf16.msra.mxu0 %v1686_v20  ;;  %v606_v20 = vshll.u32 %v1358_v10, 16  ;;  %v904_v25 = vshrl.u32 %v1516_v14, 16  ;;  %v907_v26 = vshll.u32 %v1516_v14, 16  ;;  %v1740_v36 = vld [vmem:[%s2128_s1 + $0x220] sm:$0xff]  ;;  %v1517_v43 = vld [vmem:[%s1900_s28 + $0x14] sm:$0x1] }
  0x22   : > { %482 = vmatpush.bf16.msra.mxu2 %v1695_v29  ;;  %v591_v29 = vrot.slane %v589_v17, 4  ;;  %v605_v31 = vrot.slane %v603_v19, 4  ;;  %v1713_v44 = vld [vmem:[%s2128_s1 + $0x158] sm:$0xff]  ;;  %v913_v55 = vshll.u32 %v1517_v43, 16  ;;  %v1712_v56 = vld [vmem:[%s2128_s1 + $0x150] sm:$0xff]  ;;  %v1737_v9 = vld [vmem:[%s2128_s1 + $0x208] sm:$0xff] }
  0x23   : > { %391 = vmatpush.bf16.msra.mxu1 %v1678_v30  ;;  %v594_v30 = vrot.slane %v592_v18, 5  ;;  %v608_v32 = vrot.slane %v606_v20, 5  ;;  %v906_v39 = vrot.slane %v904_v25, 4  ;;  %v1739_v51 = vld [vmem:[%s2128_s1 + $0x218] sm:$0xff]  ;;  %v1738_v63 = vld [vmem:[%s2128_s1 + $0x210] sm:$0xff]  ;;  %v1719_v18 = vld [vmem:[%s2128_s1 + $0x100] sm:$0xff] }
  0x24   : > { %577 = vmatpush.bf16.msra.mxu3 %v1704_v33  ;;  %v1357_v33 = vld [vmem:[%s1900_s28 + $0x34] sm:$0x1]  ;;  %v1727_v17 = vld [vmem:[%s1900_s28 + $0xc] sm:$0xf0]  ;;  %v1752_v42 = vld [vmem:[%s2128_s1 + $0x1f8] sm:$0xff] }
  0x25   : > { %324 = vmatpush.bf16.msra.mxu0 %v1685_v40  ;;  %v909_v40 = vrot.slane %v907_v26, 5  ;;  %v598_v47 = vshll.u32 %v1357_v33, 16  ;;  %v609_v48 = vor.u32 %v608_v32, %v605_v31  ;;  %v1718_v23 = vld [vmem:[%s1900_s28 + $0x4c] sm:$0xf0]  ;;  %v1748_v31 = vld [vmem:[%s2128_s1 + $0x1d8] sm:$0xff]  ;;  %v1746_v33 = vld [vmem:[%s2128_s1 + $0x1c8] sm:$0xff] }
  0x26   : > { %483 = vmatpush.bf16.msra.mxu2 %v1694_v41  ;;  %v1515_v41 = vld [vmem:[%s1900_s28 + $0xc] sm:$0x1]  ;;  %v1747_v32 = vld [vmem:[%s2128_s1 + $0x1d0] sm:$0xff] }
  0x27   : > { %392 = vmatpush.bf16.msra.mxu1 %v1677_v45  ;;  %v1731_v45 = vld [vmem:[%s2128_s1 + $0x198] sm:$0xff]  ;;  %v600_v59 = vrot.slane %v598_v47, 5  ;;  %v610_v60 = vrot.slane %v609_v48, 4 }
  0x28   : > { %578 = vmatpush.bf16.msra.mxu3 %v1703_v46  ;;  %v595_v46 = vor.u32 %v594_v30, %v591_v29  ;;  %v1750_v29 = vld [vmem:[%s2128_s1 + $0x1e8] sm:$0xff]  ;;  %v1749_v30 = vld [vmem:[%s2128_s1 + $0x1e0] sm:$0xff] }
  0x29   : > { %325 = vmatpush.bf16.msra.mxu0 %v1684_v49  ;;  %v612_v49 = vshll.u32 %v1359_v34, 16  ;;  %v1745_v34 = vld [vmem:[%s2128_s1 + $0x1c0] sm:$0xff] }
  0x2a   : > { %484 = vmatpush.bf16.msra.mxu2 %v1693_v50  ;;  %v1722_v50 = vld [vmem:[%s2128_s1 + $0x118] sm:$0xff]  ;;  %v596_v58 = vrot.slane %v595_v46, 4 }
  0x2b   : > { %393 = vmatpush.bf16.msra.mxu1 %v1676_v54  ;;  %v910_v54 = vor.u32 %v909_v40, %v906_v39 }
  0x2c   : > { %579 = vmatpush.bf16.msra.mxu3 %v1702_v57  ;;  %326 = vmatmul.bf16.vlgmr.msra.gmra.mxu0 %v268_v3  ;;  %v1730_v57 = vld [vmem:[%s2128_s1 + $0x190] sm:$0xff]  ;;  %v915_v3 = vrot.slane %v913_v55, 5 }
  0x2d   : > { %685 = vmatpush.bf16.msrb.mxu0 %v1717_v52  ;;  %485 = vmatmul.bf16.vlgmr.msra.gmra.mxu2 %v1323_v4  ;;  %v896_v52 = vor.u32 %v895_v38, %v892_v37  ;;  %v911_v2 = vrot.slane %v910_v54, 4  ;;  %v1711_v4 = vld [vmem:[%s2128_s1 + $0x148] sm:$0xff] }
  0x2e   : > { %873 = vmatpush.bf16.msrb.mxu2 %v1735_v53  ;;  %394 = vmatmul.bf16.vlgmr.msra.gmra.mxu1 %v1269_v7  ;;  %v899_v53 = vshll.u32 %v1515_v41, 16 }
  0x2f   : > { %778 = vmatpush.bf16.msrb.mxu1 %v1726_v61  ;;  %580 = vmatmul.bf16.vlgmr.msra.gmra.mxu3 %v1379_v8  ;;  %v614_v61 = vrot.slane %v612_v49, 5  ;;  %v897_v0 = vrot.slane %v896_v52, 4  ;;  %v1720_v8 = vld [vmem:[%s2128_s1 + $0x108] sm:$0xff] }
  0x30   : > { %986 = vmatpush.bf16.msrb.mxu3 %v1743_v62  ;;  %v1721_v62 = vld [vmem:[%s2128_s1 + $0x110] sm:$0xff]  ;;  %v901_v1 = vrot.slane %v899_v53, 5 }
  0x31   : > { %686 = vmatpush.bf16.msrb.mxu0 %v1716_v5  ;;  %v1729_v5 = vld [vmem:[%s2128_s1 + $0x188] sm:$0xff]  ;;  %v615_v7 = vsel %vm1937_vm2, %v610_v60, %v614_v61 }
  0x32   : > { %874 = vmatpush.bf16.msrb.mxu2 %v1734_v6  ;;  %v601_v6 = vsel %vm1937_vm2, %v596_v58, %v600_v59  ;;  %v902_v10 = vsel %vm1937_vm2, %v897_v0, %v901_v1  ;;  %v634_v14 = vunpack.c.l.b16 %v615_v7 }
  0x33   : > { %779 = vmatpush.bf16.msrb.mxu1 %v1725_v11  ;;  %v916_v11 = vsel %vm1937_vm2, %v911_v2, %v915_v3  ;;  %v633_v13 = vunpack.c.l.b16 %v601_v6  ;;  %v934_v19 = vunpack.c.l.b16 %v902_v10  ;;  %v1783_v6 = vld [vmem:[%s2129_s2] ss:$0 sm:$0xff] }
  0x34   : > { %987 = vmatpush.bf16.msrb.mxu3 %v1742_v12  ;;  %v1710_v12 = vld [vmem:[%s2128_s1 + $0x140] sm:$0xff]  ;;  %v935_v20 = vunpack.c.l.b16 %v916_v11 }
  0x35   : > { %687 = vmatpush.bf16.msrb.mxu0 %v1715_v15  ;;  %v1728_v15 = vld [vmem:[%s2128_s1 + $0x180] sm:$0xff]  ;;  %v635_v24 = vpack.c.b16 %v634_v14, %v633_v13 }
  0x36   : > { %875 = vmatpush.bf16.msrb.mxu2 %v1733_v16  ;;  %v1536_v16 = vld [vmem:[%s1900_s28 + $0x8] sm:$0xf] }
  0x37   : > { %780 = vmatpush.bf16.msrb.mxu1 %v1724_v21  ;;  %v1736_v21 = vld [vmem:[%s2128_s1 + $0x200] sm:$0xff]  ;;  %v1537_v25 = vor.u32 %v1727_v17, %v1536_v16 }
  0x38   : > { %988 = vmatpush.bf16.msrb.mxu3 %v1741_v22  ;;  %v1480_v22 = vld [vmem:[%s1900_s28 + $0x48] sm:$0xf] }
  0x39   : > { %688 = vmatpush.bf16.msrb.mxu0 %v1714_v27  ;;  %v1481_v26 = vor.u32 %v1718_v23, %v1480_v22  ;;  %v936_v27 = vpack.c.b16 %v935_v20, %v934_v19 }
  0x3a   : > { %876 = vmatpush.bf16.msrb.mxu2 %v1732_v28  ;;  %v1751_v28 = vld [vmem:[%s2128_s1 + $0x1f0] sm:$0xff] }
  0x3b   : > { %781 = vmatpush.bf16.msrb.mxu1 %v1723_v35  ;;  %v1638_v35 = vld [vmem:[%s1900_s28 + $0x20] sm:$0xf] }
  0x3c   : > { %989 = vmatpush.bf16.msrb.mxu3 %v1740_v36  ;;  %v1744_v36 = vld [vmem:[%s1900_s28 + $0x24] sm:$0xf0] }
  0x3d   : > { %689 = vmatpush.bf16.msrb.mxu0 %v1713_v44  ;;  %v1639_v37 = vor.u32 %v1744_v36, %v1638_v35 }
  0x3e   : > { %877 = vmatpush.bf16.msrb.mxu2 %v1731_v45 }
  0x3f   : > { %782 = vmatpush.bf16.msrb.mxu1 %v1722_v50 }
  0x40   : > { %990 = vmatpush.bf16.msrb.mxu3 %v1739_v51 }
  0x41   : > { %690 = vmatpush.bf16.msrb.mxu0 %v1712_v56 }
  0x42   : > { %878 = vmatpush.bf16.msrb.mxu2 %v1730_v57 }
  0x43   : > { %783 = vmatpush.bf16.msrb.mxu1 %v1721_v62 }
  0x44   : > { %991 = vmatpush.bf16.msrb.mxu3 %v1738_v63 }
  0x45   : > { %691 = vmatpush.bf16.msrb.mxu0 %v1711_v4 }
  0x46   : > { %879 = vmatpush.bf16.msrb.mxu2 %v1729_v5 }
  0x47   : > { %784 = vmatpush.bf16.msrb.mxu1 %v1720_v8 }
  0x48   : > { %992 = vmatpush.bf16.msrb.mxu3 %v1737_v9 }
  0x49   : > { %692 = vmatpush.bf16.msrb.mxu0 %v1710_v12 }
  0x4a   : > { %880 = vmatpush.bf16.msrb.mxu2 %v1728_v15 }
  0x4b   : > { %785 = vmatpush.bf16.msrb.mxu1 %v1719_v18 }
  0x4c   : > { %993 = vmatpush.bf16.msrb.mxu3 %v1736_v21  ;;  %693 = vmatmul.bf16.vlgmr.msrb.gmra.mxu0 %v635_v24 }
  0x4d   : > { %1079 = vmatpush.bf16.msra.mxu0 %v1752_v42  ;;  %881 = vmatmul.bf16.vlgmr.msrb.gmra.mxu2 %v1537_v25 }
  0x4e   : > { %786 = vmatmul.bf16.vlgmr.msrb.gmra.mxu1 %v1481_v26 }
  0x4f   : > { %994 = vmatmul.bf16.vlgmr.msrb.gmra.mxu3 %v936_v27 }
  0x51   : > { %1080 = vmatpush.bf16.msra.mxu0 %v1751_v28 }
  0x55   : > { %1081 = vmatpush.bf16.msra.mxu0 %v1750_v29 }
  0x59   : > { %1082 = vmatpush.bf16.msra.mxu0 %v1749_v30 }
  0x5d   : > { %1083 = vmatpush.bf16.msra.mxu0 %v1748_v31 }
  0x61   : > { %1084 = vmatpush.bf16.msra.mxu0 %v1747_v32 }
  0x65   : > { %1085 = vmatpush.bf16.msra.mxu0 %v1746_v33 }
  0x69   : > { %1086 = vmatpush.bf16.msra.mxu0 %v1745_v34 }
  0x6c   : > { %1087 = vmatmul.bf16.vlgmr.msra.gmra.mxu0 %v1639_v37 }
  0xa9   : > { %v327_v38 = vpop.f32.mrf.mxu0 }
  0xab   : > { %v395_v39 = vpop.f32.mrf.mxu1 }
  0xac   : > { %v396_v45 = vadd.f32 %v395_v39, %v327_v38 }
  0xb0   : > { %v486_v40 = vpop.f32.mrf.mxu2 }
  0xb1   : > { %v329_v41 = vpop.f32.mrf.mxu0  ;;  %v491_v48 = vadd.f32 %v486_v40, %v396_v45 }
  0xb2   : > { %v581_v43 = vpop.f32.mrf.mxu3 }
  0xb3   : > { %v397_v44 = vpop.f32.mrf.mxu1  ;;  %v586_v50 = vadd.f32 %v581_v43, %v491_v48 }
  0xb4   : > { %v398_v51 = vadd.f32 %v397_v44, %v329_v41 }
  0xb8   : > { %v488_v46 = vpop.f32.mrf.mxu2 }
  0xb9   : > { %v492_v54 = vadd.f32 %v488_v46, %v398_v51 }
  0xba   : > { %v583_v49 = vpop.f32.mrf.mxu3 }
  0xbb   : > { %v587_v58 = vadd.f32 %v583_v49, %v492_v54 }
  0xc9   : > { %v694_v47 = vpop.f32.mrf.mxu0 }
  0xca   : > { %v699_v55 = vadd.f32 %v694_v47, %v586_v50 }
  0xcb   : > { %v787_v52 = vpop.f32.mrf.mxu1 }
  0xcc   : > { %v792_v59 = vadd.f32 %v787_v52, %v699_v55 }
  0xd0   : > { %v882_v53 = vpop.f32.mrf.mxu2 }
  0xd1   : > { %v696_v56 = vpop.f32.mrf.mxu0  ;;  %v887_v62 = vadd.f32 %v882_v53, %v792_v59 }
  0xd2   : > { %v995_v57 = vpop.f32.mrf.mxu3  ;;  %v700_v60 = vadd.f32 %v696_v56, %v587_v58 }
  0xd3   : > { %v789_v61 = vpop.f32.mrf.mxu1  ;;  %v1000_v2 = vadd.f32 %v995_v57, %v887_v62 }
  0xd4   : > { %v793_v1 = vadd.f32 %v789_v61, %v700_v60 }
  0xd8   : > { %v884_v63 = vpop.f32.mrf.mxu2 }
  0xd9   : > { %v888_v3 = vadd.f32 %v884_v63, %v793_v1 }
  0xda   : > { %v997_v4 = vpop.f32.mrf.mxu3 }
  0xdb   : > { %v1001_v7 = vadd.f32 %v997_v4, %v888_v3 }
  0xe9   : > { %v1088_v0 = vpop.f32.mrf.mxu0 }
  0xea   : > { %v1093_v5 = vadd.f32 %v1088_v0, %v1000_v2 }
  0xec   : > { %v1099_v9 = vadd.f32 %v1783_v6, %v1093_v5 }
  0xee   : > { %v1101_v12 = vmax.f32 %v1099_v9, 0.0 }
  0xf1   : > { %v1090_v8 = vpop.f32.mrf.mxu0 }
  0xf2   : > { %v1094_v10 = vadd.f32 %v1090_v8, %v1001_v7 }
  0xf4   : > { %v1100_v11 = vadd.f32 %v1783_v6, %v1094_v10 }
  0xf6   : > { %v1102_v13 = vmax.f32 %v1100_v11, 0.0 }
  0xf8   : > { %v1756_v14 = vpack.c.bf16 %v1102_v13, %v1101_v12 }
  0xfa   : > { %1757 = vst [vmem:[%s192_s8] sm:$0xff] %v1756_v14  }
  0xfb PF: > { %s13_s14 = sadd.s32 1, %s1806_s14   ;;  %s2133_s12 = smov %s1802_s13 }
  0xfc   : > { %p10_p5 = scmp.ge.s32.totalorder %s13_s14, 4   ;;  %s2134_s13 = smov %s2136_s15 }
  0xfe   :  { %12 = sbr.rel (!%p10_p5) target bundleno = 2 (0x2), region = 76 }

// kernel: _lambda_.49
= control target key start
LH: loop header
LB: loop body
LE: loop exit
PB: predicated region body
PF: predicated region fallthrough
CT: control target
= control target key end

     0   :  { %s1226_s15 = smov 0   ;;  %s1647_s0 = inlined_call_operand.vmem [shape: bf16[2,8,256], index: 0, kind: input, shape index: {}]   ;;  %s1648_s1 = inlined_call_operand.vmem [shape: bf16[4,8], index: 1, kind: input, shape index: {}]   ;;  %s1649_s2 = inlined_call_operand.vmem [shape: bf16[256,512], index: 2, kind: input, shape index: {}]   ;;  %s1650_s3 = inlined_call_operand.vmem [shape: f32[2,4,512], index: 3, kind: input, shape index: {}]   ;;  %s1651_s4 = inlined_call_operand.vmem [shape: f32[2,4,512], index: 4, kind: output, shape index: {}]  }
   0x1 LB: > { %s847_s16 = sadd.s32 4294967295, %s1199_s15   ;;  %p851_p0 = scmp.ge.s32.totalorder %s1199_s15, 1  ;;  %s1199_s15 = sphi %s1226_s15, %s14_s15  }
   0x2   : > { %p172_p1 = scmp.lt.s32.totalorder %s1199_s15, 3 }
   0x4   : > { %p173_p2 = pnand %p851_p0, %p172_p1 }
   0x5   : > { %p203_p3 = scmp.lt.s32.totalorder (!%p173_p2), %s847_s16, 1 }
   0x6   : > { %176 = sbr.rel (%p173_p2) target bundleno = 309 (0x135), region = 36 }
   0xb   : > { %v974_v0 = vld [vmem:[%s1649_s2 + $0xe0] sm:$0xf]  ;;  %v1151_v1 = vld [vmem:[%s1649_s2 + $0xec] sm:$0xf0]  ;;  %s1653_s16 = smov (!%p203_p3, %s847_s16), 1  ;;  %vm230_vm0 = vcmask 1043456  }
   0xc   : > { %v1102_v2 = vld [vmem:[%s1649_s2 + $0x1e0] sm:$0xf]  ;;  %v975_v3 = vor.u32 %v1151_v1, %v974_v0  ;;  %v1183_v4 = vld [vmem:[%s1649_s2 + $0x1ec] sm:$0xf0]  ;;  %s1118_s25 = sshll.u32 %s1653_s16, 3  ;;  %s1119_s26 = sshll.u32 %s1653_s16, 4 }
   0xd   : > { %v1103_v5 = vor.u32 %v1183_v4, %v1102_v2  ;;  %v1149_v6 = vld [vmem:[%s1649_s2 + $0xe4] sm:$0xf]  ;;  %v976_v7 = vld [vmem:[%s1649_s2 + $0xf0] sm:$0xf0]  ;;  %v958_v9 = vld [vmem:[%s1649_s2 + $0xc0] sm:$0xf]  ;;  %s207_s13 = scalar_lea.vmem %s1647_s0, %s1118_s25  ;;  %s212_s18 = scalar_lea.vmem %s1650_s3, %s1119_s26 }
   0xe   : > { %664 = vmatpush.bf16.msra.mxu2 %v975_v3  ;;  %v1181_v8 = vld [vmem:[%s1649_s2 + $0x1e4] sm:$0xf]  ;;  %v1147_v10 = vld [vmem:[%s1649_s2 + $0xcc] sm:$0xf0]  ;;  %v1104_v11 = vld [vmem:[%s1649_s2 + $0x1f0] sm:$0xf0]  ;;  %v979_v25 = vor.u32 %v1149_v6, %v976_v7  ;;  %s217_s6 = scalar_lea.vmem %s1651_s4, %s1119_s26 }
   0xf   : > { %677 = vmatpush.bf16.msra.mxu3 %v1103_v5  ;;  %v959_v12 = vor.u32 %v1147_v10, %v958_v9  ;;  %v1086_v13 = vld [vmem:[%s1649_s2 + $0x1c0] sm:$0xf]  ;;  %v1179_v14 = vld [vmem:[%s1649_s2 + $0x1cc] sm:$0xf0]  ;;  %v330_v17 = vld [vmem:[%s212_s18 + $0x8] sm:$0xff]  ;;  %v1107_v26 = vor.u32 %v1181_v8, %v1104_v11  ;;  %vm226_vm1 = vcmask 64512  }
  0x10   : > { %v220_v15 = vld [vmem:[%s207_s13] sm:$0xff]  ;;  %v1087_v18 = vor.u32 %v1179_v14, %v1086_v13  ;;  %655 = vst [vmem:[#allocation1 + $0x10] ss:$2 sm:$0xff] %v330_v17  ;;  %v1143_v27 = vld [vmem:[%s1649_s2 + $0xac] sm:$0xf0] }
  0x11   : > { %v329_v16 = vld [vmem:[%s212_s18] sm:$0xff]  ;;  %v222_v19 = vunpack.c.l.b16 %v220_v15  ;;  %v223_v20 = vunpack.c.h.b16 %v220_v15  ;;  %v1175_v29 = vld [vmem:[%s1649_s2 + $0x1ac] sm:$0xf0]  ;;  %v960_v31 = vld [vmem:[%s1649_s2 + $0xd0] sm:$0xf0] }
  0x12   : > { %653 = vst [vmem:[#allocation1] ss:$2 sm:$0xff] %v329_v16  ;;  %665 = vmatpush.bf16.msra.mxu2 %v959_v12  ;;  %v1145_v21 = vld [vmem:[%s1649_s2 + $0xc4] sm:$0xf]  ;;  %v942_v22 = vld [vmem:[%s1649_s2 + $0xa0] sm:$0xf] }
  0x13   : > { %v224_v23 = vpack.c.b16 %v222_v19, %v222_v19  ;;  %v225_v24 = vpack.c.b16 %v223_v20, %v223_v20  ;;  %678 = vmatpush.bf16.msra.mxu3 %v1087_v18  ;;  %v1070_v28 = vld [vmem:[%s1649_s2 + $0x1a0] sm:$0xf]  ;;  %v1177_v32 = vld [vmem:[%s1649_s2 + $0x1c4] sm:$0xf]  ;;  %v1088_v33 = vld [vmem:[%s1649_s2 + $0x1d0] sm:$0xf0]  ;;  %v943_v34 = vor.u32 %v1143_v27, %v942_v22  ;;  %v963_v42 = vor.u32 %v1145_v21, %v960_v31 }
  0x14   : > { %v219_v30 = vld [vmem:[%s1648_s1] sm:$0x3]  ;;  %v1071_v35 = vor.u32 %v1175_v29, %v1070_v28  ;;  %v1139_v39 = vld [vmem:[%s1649_s2 + $0x8c] sm:$0xf0]  ;;  %v1091_v43 = vor.u32 %v1177_v32, %v1088_v33  ;;  %v1141_v44 = vld [vmem:[%s1649_s2 + $0xa4] sm:$0xf] }
  0x15   : > { %v232_v36 = vsel %vm230_vm0, %v224_v23, 0  ;;  %v235_v37 = vsel %vm230_vm0, %v225_v24, 0  ;;  %v926_v38 = vld [vmem:[%s1649_s2 + $0x80] sm:$0xf]  ;;  %v1171_v41 = vld [vmem:[%s1649_s2 + $0x18c] sm:$0xf0] }
  0x16   : > { %244 = vmatpush.bf16.msra.mxu0 %v232_v36  ;;  %257 = vmatpush.bf16.msra.mxu1 %v235_v37  ;;  %v1054_v40 = vld [vmem:[%s1649_s2 + $0x180] sm:$0xf]  ;;  %v944_v45 = vld [vmem:[%s1649_s2 + $0xb0] sm:$0xf0]  ;;  %v1173_v46 = vld [vmem:[%s1649_s2 + $0x1a4] sm:$0xf]  ;;  %v927_v48 = vor.u32 %v1139_v39, %v926_v38 }
  0x17   : > { %666 = vmatpush.bf16.msra.mxu2 %v943_v34  ;;  %679 = vmatpush.bf16.msra.mxu3 %v1071_v35  ;;  %v1072_v47 = vld [vmem:[%s1649_s2 + $0x1b0] sm:$0xf0]  ;;  %v1055_v49 = vor.u32 %v1171_v41, %v1054_v40  ;;  %v910_v50 = vld [vmem:[%s1649_s2 + $0x60] sm:$0xf]  ;;  %v1135_v51 = vld [vmem:[%s1649_s2 + $0x6c] sm:$0xf0]  ;;  %v947_v54 = vor.u32 %v1141_v44, %v944_v45 }
  0x18   : > { %v1038_v52 = vld [vmem:[%s1649_s2 + $0x160] sm:$0xf]  ;;  %v1167_v53 = vld [vmem:[%s1649_s2 + $0x16c] sm:$0xf0]  ;;  %v1075_v55 = vor.u32 %v1173_v46, %v1072_v47  ;;  %v1137_v56 = vld [vmem:[%s1649_s2 + $0x84] sm:$0xf]  ;;  %v911_v60 = vor.u32 %v1135_v51, %v910_v50 }
  0x19   : > { %858 = vmatmul.msk.bf16.vlgmr.msra.gmra.mxu0 %vm226_vm1, %v219_v30  ;;  %859 = vmatmul.msk.bf16.vlgmr.msra.gmra.mxu1 %vm226_vm1, %v219_v30  ;;  %v928_v57 = vld [vmem:[%s1649_s2 + $0x90] sm:$0xf0]  ;;  %v1169_v58 = vld [vmem:[%s1649_s2 + $0x184] sm:$0xf]  ;;  %v1039_v61 = vor.u32 %v1167_v53, %v1038_v52  ;;  %v894_v62 = vld [vmem:[%s1649_s2 + $0x40] sm:$0xf] }
  0x1a   : > { %690 = vmatpush.bf16.msrb.mxu0 %v979_v25  ;;  %703 = vmatpush.bf16.msrb.mxu1 %v1107_v26  ;;  %v1056_v59 = vld [vmem:[%s1649_s2 + $0x190] sm:$0xf0]  ;;  %v1131_v63 = vld [vmem:[%s1649_s2 + $0x4c] sm:$0xf0]  ;;  %v1022_v0 = vld [vmem:[%s1649_s2 + $0x140] sm:$0xf]  ;;  %v931_v2 = vor.u32 %v1137_v56, %v928_v57 }
  0x1b   : > { %667 = vmatpush.bf16.msra.mxu2 %v927_v48  ;;  %680 = vmatpush.bf16.msra.mxu3 %v1055_v49  ;;  %v1163_v1 = vld [vmem:[%s1649_s2 + $0x14c] sm:$0xf0]  ;;  %v1059_v3 = vor.u32 %v1169_v58, %v1056_v59  ;;  %v1133_v4 = vld [vmem:[%s1649_s2 + $0x64] sm:$0xf]  ;;  %v912_v5 = vld [vmem:[%s1649_s2 + $0x70] sm:$0xf0]  ;;  %v895_v8 = vor.u32 %v1131_v63, %v894_v62 }
  0x1c   : > { %v1165_v6 = vld [vmem:[%s1649_s2 + $0x164] sm:$0xf]  ;;  %v1040_v7 = vld [vmem:[%s1649_s2 + $0x170] sm:$0xf0]  ;;  %v1023_v9 = vor.u32 %v1163_v1, %v1022_v0  ;;  %v878_v10 = vld [vmem:[%s1649_s2 + $0x20] sm:$0xf]  ;;  %v915_v14 = vor.u32 %v1133_v4, %v912_v5 }
  0x1d   : > { %v1127_v11 = vld [vmem:[%s1649_s2 + $0x2c] sm:$0xf0]  ;;  %v1006_v12 = vld [vmem:[%s1649_s2 + $0x120] sm:$0xf]  ;;  %v1043_v15 = vor.u32 %v1165_v6, %v1040_v7  ;;  %v1129_v16 = vld [vmem:[%s1649_s2 + $0x44] sm:$0xf] }
  0x1e   : > { %691 = vmatpush.bf16.msrb.mxu0 %v963_v42  ;;  %704 = vmatpush.bf16.msrb.mxu1 %v1091_v43  ;;  %v1159_v13 = vld [vmem:[%s1649_s2 + $0x12c] sm:$0xf0]  ;;  %v896_v17 = vld [vmem:[%s1649_s2 + $0x50] sm:$0xf0]  ;;  %v1161_v18 = vld [vmem:[%s1649_s2 + $0x144] sm:$0xf]  ;;  %v879_v20 = vor.u32 %v1127_v11, %v878_v10 }
  0x1f   : > { %668 = vmatpush.bf16.msra.mxu2 %v911_v60  ;;  %681 = vmatpush.bf16.msra.mxu3 %v1039_v61  ;;  %v1024_v19 = vld [vmem:[%s1649_s2 + $0x150] sm:$0xf0]  ;;  %v1007_v21 = vor.u32 %v1159_v13, %v1006_v12  ;;  %v862_v22 = vld [vmem:[%s1649_s2] sm:$0xf]  ;;  %v1123_v23 = vld [vmem:[%s1649_s2 + $0xc] sm:$0xf0]  ;;  %v899_v30 = vor.u32 %v1129_v16, %v896_v17 }
  0x20   : > { %v990_v24 = vld [vmem:[%s1649_s2 + $0x100] sm:$0xf]  ;;  %v1155_v25 = vld [vmem:[%s1649_s2 + $0x10c] sm:$0xf0]  ;;  %v982_v26 = vld [vmem:[%s1649_s2 + $0xe8] sm:$0xf]  ;;  %v1027_v31 = vor.u32 %v1161_v18, %v1024_v19  ;;  %v863_v36 = vor.u32 %v1123_v23, %v862_v22 }
  0x21   : > { %v1152_v27 = vld [vmem:[%s1649_s2 + $0xf4] sm:$0xf0]  ;;  %v1110_v28 = vld [vmem:[%s1649_s2 + $0x1e8] sm:$0xf]  ;;  %v1125_v32 = vld [vmem:[%s1649_s2 + $0x24] sm:$0xf]  ;;  %v991_v37 = vor.u32 %v1155_v25, %v990_v24 }
  0x22   : > { %692 = vmatpush.bf16.msrb.mxu0 %v947_v54  ;;  %705 = vmatpush.bf16.msrb.mxu1 %v1075_v55  ;;  %v1184_v29 = vld [vmem:[%s1649_s2 + $0x1f4] sm:$0xf0]  ;;  %v880_v33 = vld [vmem:[%s1649_s2 + $0x30] sm:$0xf0]  ;;  %v1157_v34 = vld [vmem:[%s1649_s2 + $0x124] sm:$0xf]  ;;  %v983_v38 = vor.u32 %v1152_v27, %v982_v26 }
  0x23   : > { %669 = vmatpush.bf16.msra.mxu2 %v895_v8  ;;  %682 = vmatpush.bf16.msra.mxu3 %v1023_v9  ;;  %v1008_v35 = vld [vmem:[%s1649_s2 + $0x130] sm:$0xf0]  ;;  %v1111_v39 = vor.u32 %v1184_v29, %v1110_v28  ;;  %v966_v40 = vld [vmem:[%s1649_s2 + $0xc8] sm:$0xf]  ;;  %v1148_v41 = vld [vmem:[%s1649_s2 + $0xd4] sm:$0xf0]  ;;  %v883_v44 = vor.u32 %v1125_v32, %v880_v33 }
  0x24   : > { %v1094_v42 = vld [vmem:[%s1649_s2 + $0x1c8] sm:$0xf]  ;;  %v1180_v43 = vld [vmem:[%s1649_s2 + $0x1d4] sm:$0xf0]  ;;  %v1011_v45 = vor.u32 %v1157_v34, %v1008_v35  ;;  %v1121_v46 = vld [vmem:[%s1649_s2 + $0x4] sm:$0xf]  ;;  %v967_v54 = vor.u32 %v1148_v41, %v966_v40 }
  0x25   : > { %v864_v47 = vld [vmem:[%s1649_s2 + $0x10] sm:$0xf0]  ;;  %v1153_v48 = vld [vmem:[%s1649_s2 + $0x104] sm:$0xf]  ;;  %v1150_v50 = vld [vmem:[%s1649_s2 + $0xec] sm:$0xf]  ;;  %v1095_v55 = vor.u32 %v1180_v43, %v1094_v42 }
  0x26   : > { %693 = vmatpush.bf16.msrb.mxu0 %v931_v2  ;;  %706 = vmatpush.bf16.msrb.mxu1 %v1059_v3  ;;  %v992_v49 = vld [vmem:[%s1649_s2 + $0x110] sm:$0xf0]  ;;  %v984_v51 = vld [vmem:[%s1649_s2 + $0xf8] sm:$0xf0]  ;;  %v1182_v52 = vld [vmem:[%s1649_s2 + $0x1ec] sm:$0xf]  ;;  %v867_v60 = vor.u32 %v1121_v46, %v864_v47 }
  0x27   : > { %670 = vmatpush.bf16.msra.mxu2 %v879_v20  ;;  %683 = vmatpush.bf16.msra.mxu3 %v1007_v21  ;;  %v1112_v53 = vld [vmem:[%s1649_s2 + $0x1f8] sm:$0xf0]  ;;  %v950_v56 = vld [vmem:[%s1649_s2 + $0xa8] sm:$0xf]  ;;  %v1144_v57 = vld [vmem:[%s1649_s2 + $0xb4] sm:$0xf0]  ;;  %v995_v61 = vor.u32 %v1153_v48, %v992_v49  ;;  %v987_v62 = vor.u32 %v1150_v50, %v984_v51 }
  0x28   : > { %v1078_v58 = vld [vmem:[%s1649_s2 + $0x1a8] sm:$0xf]  ;;  %v1176_v59 = vld [vmem:[%s1649_s2 + $0x1b4] sm:$0xf0]  ;;  %v1115_v63 = vor.u32 %v1182_v52, %v1112_v53  ;;  %v1146_v0 = vld [vmem:[%s1649_s2 + $0xcc] sm:$0xf]  ;;  %v951_v4 = vor.u32 %v1144_v57, %v950_v56 }
  0x29   : > { %v968_v1 = vld [vmem:[%s1649_s2 + $0xd8] sm:$0xf0]  ;;  %v1178_v2 = vld [vmem:[%s1649_s2 + $0x1cc] sm:$0xf]  ;;  %v1079_v5 = vor.u32 %v1176_v59, %v1078_v58  ;;  %v1062_v16 = vld [vmem:[%s1649_s2 + $0x188] sm:$0xf] }
  0x2a   : > { %694 = vmatpush.bf16.msrb.mxu0 %v915_v14  ;;  %707 = vmatpush.bf16.msrb.mxu1 %v1043_v15  ;;  %v1096_v3 = vld [vmem:[%s1649_s2 + $0x1d8] sm:$0xf0]  ;;  %v971_v6 = vor.u32 %v1146_v0, %v968_v1  ;;  %v1142_v8 = vld [vmem:[%s1649_s2 + $0xac] sm:$0xf]  ;;  %v934_v14 = vld [vmem:[%s1649_s2 + $0x88] sm:$0xf] }
  0x2b   : > { %671 = vmatpush.bf16.msra.mxu2 %v863_v36  ;;  %684 = vmatpush.bf16.msra.mxu3 %v991_v37  ;;  %v1099_v7 = vor.u32 %v1178_v2, %v1096_v3  ;;  %v952_v9 = vld [vmem:[%s1649_s2 + $0xb8] sm:$0xf0]  ;;  %v1174_v10 = vld [vmem:[%s1649_s2 + $0x1ac] sm:$0xf]  ;;  %v1140_v15 = vld [vmem:[%s1649_s2 + $0x94] sm:$0xf0] }
  0x2c   : > { %v1080_v11 = vld [vmem:[%s1649_s2 + $0x1b8] sm:$0xf0]  ;;  %v955_v12 = vor.u32 %v1142_v8, %v952_v9  ;;  %v935_v17 = vor.u32 %v1140_v15, %v934_v14  ;;  %v1172_v18 = vld [vmem:[%s1649_s2 + $0x194] sm:$0xf0]  ;;  %v1138_v19 = vld [vmem:[%s1649_s2 + $0x8c] sm:$0xf] }
  0x2d   : > { %v1083_v13 = vor.u32 %v1174_v10, %v1080_v11  ;;  %v936_v20 = vld [vmem:[%s1649_s2 + $0x98] sm:$0xf0]  ;;  %v1063_v21 = vor.u32 %v1172_v18, %v1062_v16  ;;  %v1170_v23 = vld [vmem:[%s1649_s2 + $0x18c] sm:$0xf]  ;;  %v918_v26 = vld [vmem:[%s1649_s2 + $0x68] sm:$0xf] }
  0x2e   : > { %695 = vmatpush.bf16.msrb.mxu0 %v899_v30  ;;  %708 = vmatpush.bf16.msrb.mxu1 %v1027_v31  ;;  %v939_v22 = vor.u32 %v1138_v19, %v936_v20  ;;  %v1064_v24 = vld [vmem:[%s1649_s2 + $0x198] sm:$0xf0]  ;;  %v1136_v27 = vld [vmem:[%s1649_s2 + $0x74] sm:$0xf0]  ;;  %v1046_v28 = vld [vmem:[%s1649_s2 + $0x168] sm:$0xf] }
  0x2f   : > { %716 = vmatpush.bf16.msrb.mxu2 %v983_v38  ;;  %729 = vmatpush.bf16.msrb.mxu3 %v1111_v39  ;;  %v1067_v25 = vor.u32 %v1170_v23, %v1064_v24  ;;  %v919_v29 = vor.u32 %v1136_v27, %v918_v26  ;;  %v1168_v30 = vld [vmem:[%s1649_s2 + $0x174] sm:$0xf0]  ;;  %v1134_v31 = vld [vmem:[%s1649_s2 + $0x6c] sm:$0xf]  ;;  %v920_v32 = vld [vmem:[%s1649_s2 + $0x78] sm:$0xf0] }
  0x30   : > { %v1047_v33 = vor.u32 %v1168_v30, %v1046_v28  ;;  %v923_v34 = vor.u32 %v1134_v31, %v920_v32  ;;  %v1166_v35 = vld [vmem:[%s1649_s2 + $0x16c] sm:$0xf]  ;;  %v1048_v36 = vld [vmem:[%s1649_s2 + $0x178] sm:$0xf0]  ;;  %v902_v38 = vld [vmem:[%s1649_s2 + $0x48] sm:$0xf] }
  0x31   : > { %v1051_v37 = vor.u32 %v1166_v35, %v1048_v36  ;;  %v1132_v39 = vld [vmem:[%s1649_s2 + $0x54] sm:$0xf0]  ;;  %v1030_v40 = vld [vmem:[%s1649_s2 + $0x148] sm:$0xf]  ;;  %v1130_v43 = vld [vmem:[%s1649_s2 + $0x4c] sm:$0xf] }
  0x32   : > { %696 = vmatpush.bf16.msrb.mxu0 %v883_v44  ;;  %709 = vmatpush.bf16.msrb.mxu1 %v1011_v45  ;;  %v903_v41 = vor.u32 %v1132_v39, %v902_v38  ;;  %v1164_v42 = vld [vmem:[%s1649_s2 + $0x154] sm:$0xf0]  ;;  %v904_v44 = vld [vmem:[%s1649_s2 + $0x58] sm:$0xf0]  ;;  %v1162_v47 = vld [vmem:[%s1649_s2 + $0x14c] sm:$0xf] }
  0x33   : > { %717 = vmatpush.bf16.msrb.mxu2 %v967_v54  ;;  %730 = vmatpush.bf16.msrb.mxu3 %v1095_v55  ;;  %v1031_v45 = vor.u32 %v1164_v42, %v1030_v40  ;;  %v907_v46 = vor.u32 %v1130_v43, %v904_v44  ;;  %v1032_v48 = vld [vmem:[%s1649_s2 + $0x158] sm:$0xf0]  ;;  %v886_v49 = vld [vmem:[%s1649_s2 + $0x28] sm:$0xf]  ;;  %v1128_v51 = vld [vmem:[%s1649_s2 + $0x34] sm:$0xf0] }
  0x34   : > { %v1035_v50 = vor.u32 %v1162_v47, %v1032_v48  ;;  %v1014_v52 = vld [vmem:[%s1649_s2 + $0x128] sm:$0xf]  ;;  %v1160_v53 = vld [vmem:[%s1649_s2 + $0x134] sm:$0xf0]  ;;  %v887_v54 = vor.u32 %v1128_v51, %v886_v49  ;;  %v1126_v56 = vld [vmem:[%s1649_s2 + $0x2c] sm:$0xf] }
  0x35   : > { %v1015_v55 = vor.u32 %v1160_v53, %v1014_v52  ;;  %v888_v57 = vld [vmem:[%s1649_s2 + $0x38] sm:$0xf0]  ;;  %v1158_v58 = vld [vmem:[%s1649_s2 + $0x12c] sm:$0xf]  ;;  %v998_v0 = vld [vmem:[%s1649_s2 + $0x108] sm:$0xf] }
  0x36   : > { %697 = vmatpush.bf16.msrb.mxu0 %v867_v60  ;;  %710 = vmatpush.bf16.msrb.mxu1 %v995_v61  ;;  %v891_v59 = vor.u32 %v1126_v56, %v888_v57  ;;  %v1016_v60 = vld [vmem:[%s1649_s2 + $0x138] sm:$0xf0]  ;;  %v870_v61 = vld [vmem:[%s1649_s2 + $0x8] sm:$0xf]  ;;  %v1156_v1 = vld [vmem:[%s1649_s2 + $0x114] sm:$0xf0] }
  0x37   : > { %718 = vmatpush.bf16.msrb.mxu2 %v951_v4  ;;  %731 = vmatpush.bf16.msrb.mxu3 %v1079_v5  ;;  %v1122_v2 = vld [vmem:[%s1649_s2 + $0xc] sm:$0xf]  ;;  %v872_v4 = vld [vmem:[%s1649_s2 + $0x18] sm:$0xf0] }
  0x38   : > { %v1154_v5 = vld [vmem:[%s1649_s2 + $0x10c] sm:$0xf]  ;;  %v875_v8 = vor.u32 %v1122_v2, %v872_v4  ;;  %v656_v20 = vld.sshfl [vmem:[#allocation1] sm:$0xff pattern:$0x75316420] }
  0x39   : > { %v657_v16 = vld.sshfl [vmem:[#allocation1 + $0x8] sm:$0xff pattern:$0x75316420]  ;;  %v659_v32 = vld.sshfl [vmem:[#allocation1 + $0x18] sm:$0xff pattern:$0x75316420] }
  0x3a   : > { %742 = vmatpush.bf16.msra.mxu0 %v987_v62  ;;  %755 = vmatpush.bf16.msra.mxu1 %v1115_v63  ;;  %v1124_v62 = vld [vmem:[%s1649_s2 + $0x14] sm:$0xf0]  ;;  %v1019_v63 = vor.u32 %v1158_v58, %v1016_v60  ;;  %v658_v36 = vld.sshfl [vmem:[#allocation1 + $0x10] sm:$0xff pattern:$0x75316420] }
  0x3b   : > { %719 = vmatpush.bf16.msrb.mxu2 %v935_v17  ;;  %732 = vmatpush.bf16.msrb.mxu3 %v1063_v21  ;;  %v871_v3 = vor.u32 %v1124_v62, %v870_v61 }
  0x3e   : > { %743 = vmatpush.bf16.msra.mxu0 %v971_v6  ;;  %756 = vmatpush.bf16.msra.mxu1 %v1099_v7  ;;  %v1000_v6 = vld [vmem:[%s1649_s2 + $0x118] sm:$0xf0]  ;;  %v999_v7 = vor.u32 %v1156_v1, %v998_v0 }
  0x3f   : > { %720 = vmatpush.bf16.msrb.mxu2 %v919_v29  ;;  %733 = vmatpush.bf16.msrb.mxu3 %v1047_v33  ;;  %v1003_v9 = vor.u32 %v1154_v5, %v1000_v6 }
  0x42   : > { %744 = vmatpush.bf16.msra.mxu0 %v955_v12  ;;  %757 = vmatpush.bf16.msra.mxu1 %v1083_v13 }
  0x43   : > { %721 = vmatpush.bf16.msrb.mxu2 %v903_v41  ;;  %734 = vmatpush.bf16.msrb.mxu3 %v1031_v45 }
  0x46   : > { %745 = vmatpush.bf16.msra.mxu0 %v939_v22  ;;  %758 = vmatpush.bf16.msra.mxu1 %v1067_v25 }
  0x47   : > { %722 = vmatpush.bf16.msrb.mxu2 %v887_v54  ;;  %735 = vmatpush.bf16.msrb.mxu3 %v1015_v55 }
  0x4a   : > { %746 = vmatpush.bf16.msra.mxu0 %v923_v34  ;;  %759 = vmatpush.bf16.msra.mxu1 %v1051_v37 }
  0x4b   : > { %723 = vmatpush.bf16.msrb.mxu2 %v871_v3  ;;  %736 = vmatpush.bf16.msrb.mxu3 %v999_v7 }
  0x4e   : > { %747 = vmatpush.bf16.msra.mxu0 %v907_v46  ;;  %760 = vmatpush.bf16.msra.mxu1 %v1035_v50 }
  0x52   : > { %748 = vmatpush.bf16.msra.mxu0 %v891_v59  ;;  %761 = vmatpush.bf16.msra.mxu1 %v1019_v63 }
  0x56   : > { %749 = vmatpush.bf16.msra.mxu0 %v875_v8  ;;  %762 = vmatpush.bf16.msra.mxu1 %v1003_v9 }
  0x96   : > { %v246_v10 = vpop.f32.mrf.mxu0  ;;  %v259_v11 = vpop.f32.mrf.mxu1 }
  0x97   : > { %v263_v12 = vpack.c.bf16 %v246_v10, %v246_v10  ;;  %v264_v13 = vpack.c.bf16 %v259_v11, %v259_v11 }
  0x99   : > { %672 = vmatmul.bf16.vlgmr.msra.gmra.mxu2 %v263_v12  ;;  %685 = vmatmul.bf16.vlgmr.msra.gmra.mxu3 %v264_v13 }
  0x9a   : > { %698 = vmatmul.bf16.vlgmr.msrb.gmra.mxu0 %v263_v12  ;;  %711 = vmatmul.bf16.vlgmr.msrb.gmra.mxu1 %v264_v13 }
  0x9e   : > { %v248_v14 = vpop.f32.mrf.mxu0  ;;  %v261_v15 = vpop.f32.mrf.mxu1 }
  0xa9   : > { %724 = vmatmul.bf16.vlgmr.msrb.gmra.mxu2 %v263_v12  ;;  %737 = vmatmul.bf16.vlgmr.msrb.gmra.mxu3 %v264_v13 }
  0xaa   : > { %750 = vmatmul.bf16.vlgmr.msra.gmra.mxu0 %v263_v12  ;;  %763 = vmatmul.bf16.vlgmr.msra.gmra.mxu1 %v264_v13 }
 0x117   : > { %v699_v17 = vpop.f32.mrf.mxu0  ;;  %v712_v18 = vpop.f32.mrf.mxu1 }
 0x118   : > { %v700_v19 = vadd.f32 %v699_v17, %v657_v16 }
 0x11a   : > { %v713_v21 = vadd.f32 %v712_v18, %v700_v19 }
 0x11c   : > { %v673_v22 = vpop.f32.mrf.mxu2  ;;  %v686_v23 = vpop.f32.mrf.mxu3  ;;  %v772_v25 = vrot.slane %v713_v21, 4 }
 0x11d   : > { %v674_v24 = vadd.f32 %v673_v22, %v656_v20 }
 0x11f   : > { %v687_v26 = vadd.f32 %v686_v23, %v674_v24  ;;  %v701_v27 = vpop.f32.mrf.mxu0  ;;  %v714_v28 = vpop.f32.mrf.mxu1 }
 0x121   : > { %v774_v29 = vsel %vm230_vm0, %v687_v26, %v772_v25 }
 0x122   : > { %778 = vst [vmem:[%s217_s6] sm:$0xff] %v774_v29 }
 0x124   : > { %v675_v30 = vpop.f32.mrf.mxu2  ;;  %v688_v31 = vpop.f32.mrf.mxu3 }
 0x127   : > { %v751_v33 = vpop.f32.mrf.mxu0  ;;  %v764_v34 = vpop.f32.mrf.mxu1 }
 0x128   : > { %v752_v35 = vadd.f32 %v751_v33, %v659_v32 }
 0x12a   : > { %v765_v37 = vadd.f32 %v764_v34, %v752_v35 }
 0x12c   : > { %v725_v38 = vpop.f32.mrf.mxu2  ;;  %v738_v39 = vpop.f32.mrf.mxu3  ;;  %v773_v41 = vrot.slane %v765_v37, 4 }
 0x12d   : > { %v726_v40 = vadd.f32 %v725_v38, %v658_v36 }
 0x12f   : > { %v739_v42 = vadd.f32 %v738_v39, %v726_v40  ;;  %v753_v43 = vpop.f32.mrf.mxu0  ;;  %v766_v44 = vpop.f32.mrf.mxu1 }
 0x131   : > { %v775_v45 = vsel %vm230_vm0, %v739_v42, %v773_v41 }
 0x132   : > { %779 = vst [vmem:[%s217_s6 + $0x8] sm:$0xff] %v775_v45 }
 0x134   : > { %v727_v46 = vpop.f32.mrf.mxu2  ;;  %v740_v47 = vpop.f32.mrf.mxu3 }
 0x135 PF: > { %s14_s15 = sadd.s32 1, %s1199_s15  }
 0x136   : > { %p11_p4 = scmp.ge.s32.totalorder %s14_s15, 4  }
 0x138   :  { %13 = sbr.rel (!%p11_p4) target bundleno = 1 (0x1), region = 70 }

// kernel: _lambda_.46
= control target key start
LH: loop header
LB: loop body
LE: loop exit
PB: predicated region body
PF: predicated region fallthrough
CT: control target
= control target key end

     0   :  { %s1729_s12 = smov 0   ;;  %s2052_s0 = inlined_call_operand.vmem [shape: bf16[2,2,2,128], index: 0, kind: input, shape index: {}]   ;;  %s2053_s1 = inlined_call_operand.vmem [shape: bf16[9,128,128], index: 1, kind: input, shape index: {}]   ;;  %s2054_s2 = inlined_call_operand.vmem [shape: f32[1,128], index: 2, kind: input, shape index: {}]   ;;  %s2055_s3 = inlined_call_operand.vmem [shape: bf16[2,2,2,128], index: 3, kind: output, shape index: {}]  }
   0x1 LB: > { %s1172_s13 = sadd.s32 4294967295, %s1706_s12   ;;  %p1176_p0 = scmp.ge.s32.totalorder %s1706_s12, 1  ;;  %s1706_s12 = sphi %s1729_s12, %s13_s12  }
   0x2   : > { %p136_p1 = scmp.lt.s32.totalorder %s1706_s12, 3 }
   0x4   : > { %p137_p2 = pnand %p1176_p0, %p136_p1 }
   0x5   : > { %p158_p3 = scmp.lt.s32.totalorder (!%p137_p2), %s1172_s13, 1 }
   0x6   : > { %140 = sbr.rel (%p137_p2) target bundleno = 250 (0xfa), region = 32 }
   0xb   : > { %v1631_v0 = vld [vmem:[%s2053_s1 + $0x78] sm:$0xff]  ;;  %v1708_v4 = vmov 0   ;;  %v1630_v5 = vld [vmem:[%s2053_s1 + $0x70] sm:$0xff]  ;;  %v1629_v9 = vld [vmem:[%s2053_s1 + $0x68] sm:$0xff]  ;;  %s2063_s13 = smov (!%p158_p3, %s1172_s13), 1  ;;  %vm199_vm0 = vcmask 1041408  }
   0xc   : > { %v1639_v1 = vld [vmem:[%s2053_s1 + $0xb8] sm:$0xff]  ;;  %167 = vst [vmem:[#allocation2] sm:$0xf] %v1708_v4  ;;  %328 = vmatpush.bf16.msra.mxu0 %v1631_v0  ;;  %v1638_v6 = vld [vmem:[%s2053_s1 + $0xb0] sm:$0xff]  ;;  %v1637_v10 = vld [vmem:[%s2053_s1 + $0xa8] sm:$0xff]  ;;  %s1177_s17 = sshll.u32 %s2063_s13, 1 }
   0xd   : > { %v1623_v2 = vld [vmem:[%s2053_s1 + $0x38] sm:$0xff]  ;;  %492 = vmatpush.bf16.msra.mxu2 %v1639_v1  ;;  %168 = vst [vmem:[#allocation2 + $0x4] sm:$0x1] %v1708_v4  ;;  %v1622_v7 = vld [vmem:[%s2053_s1 + $0x30] sm:$0xff]  ;;  %v1621_v11 = vld [vmem:[%s2053_s1 + $0x28] sm:$0xff]  ;;  %s161_s24 = scalar_lea.vmem %s2052_s0, %s1177_s17  ;;  %vm412_vm3 = vcmask 1042432   ;;  %s165_s21 = scalar_lea.vmem %s2055_s3, %s1177_s17 }
   0xe   : > { %v1648_v3 = vld [vmem:[%s2053_s1 + $0xf8] sm:$0xff]  ;;  %396 = vmatpush.bf16.msra.mxu1 %v1623_v2  ;;  %v1647_v8 = vld [vmem:[%s2053_s1 + $0xf0] sm:$0xff]  ;;  %169 = vst [vmem:[#allocation2 + $0x8] sm:$0xf] %v1708_v4  ;;  %v1646_v12 = vld [vmem:[%s2053_s1 + $0xe8] sm:$0xff]  ;;  %vm413_vm4 = vcmask 1046532  }
   0xf   : > { %583 = vmatpush.bf16.msra.mxu3 %v1648_v3  ;;  %170 = vst [vmem:[#allocation2 + $0xc] sm:$0x1] %v1708_v4  ;;  %v1628_v13 = vld [vmem:[%s2053_s1 + $0x60] sm:$0xff]  ;;  %v1627_v17 = vld [vmem:[%s2053_s1 + $0x58] sm:$0xff]  ;;  %v1626_v22 = vld [vmem:[%s2053_s1 + $0x50] sm:$0xff] }
  0x10   : > { %329 = vmatpush.bf16.msra.mxu0 %v1630_v5  ;;  %171 = vst [vmem:[#allocation2 + $0x10] sm:$0xf] %v1708_v4  ;;  %v1636_v14 = vld [vmem:[%s2053_s1 + $0xa0] sm:$0xff]  ;;  %v1635_v18 = vld [vmem:[%s2053_s1 + $0x98] sm:$0xff]  ;;  %v1634_v23 = vld [vmem:[%s2053_s1 + $0x90] sm:$0xff] }
  0x11   : > { %493 = vmatpush.bf16.msra.mxu2 %v1638_v6  ;;  %172 = vst [vmem:[#allocation2 + $0x14] sm:$0x1] %v1708_v4  ;;  %v1620_v15 = vld [vmem:[%s2053_s1 + $0x20] sm:$0xff]  ;;  %v1619_v19 = vld [vmem:[%s2053_s1 + $0x18] sm:$0xff]  ;;  %v1618_v24 = vld [vmem:[%s2053_s1 + $0x10] sm:$0xff] }
  0x12   : > { %397 = vmatpush.bf16.msra.mxu1 %v1622_v7  ;;  %173 = vst [vmem:[#allocation2 + $0x18] sm:$0xf] %v1708_v4  ;;  %v1645_v16 = vld [vmem:[%s2053_s1 + $0xe0] sm:$0xff]  ;;  %v1644_v20 = vld [vmem:[%s2053_s1 + $0xd8] sm:$0xff]  ;;  %v1643_v25 = vld [vmem:[%s2053_s1 + $0xd0] sm:$0xff] }
  0x13   : > { %584 = vmatpush.bf16.msra.mxu3 %v1647_v8  ;;  %174 = vst [vmem:[#allocation2 + $0x1c] sm:$0x1] %v1708_v4  ;;  %v175_v21 = vld [vmem:[%s161_s24] sm:$0x1]  ;;  %v176_v26 = vld [vmem:[%s161_s24 + $0x1] sm:$0x1]  ;;  %vm1887_vm7 = vmor %vm412_vm3, %vm413_vm4 }
  0x14   : > { %330 = vmatpush.bf16.msra.mxu0 %v1629_v9  ;;  %178 = vst [vmem:[#allocation1] ss:$4 sm:$0xff] %v175_v21  ;;  %v1817_v27 = vld [vmem:[#allocation2] sm:$0xf]  ;;  %vm200_vm1 = vsmask.f32 1282 }
  0x15   : > { %494 = vmatpush.bf16.msra.mxu2 %v1637_v10  ;;  %182 = vst [vmem:[#allocation1 + $0x20] ss:$4 sm:$0xff] %v176_v26  ;;  %v1625_v28 = vld [vmem:[%s2053_s1 + $0x48] sm:$0xff]  ;;  %v232_v32 = vshrl.u32 %v1817_v27, 16  ;;  %v235_v33 = vshll.u32 %v1817_v27, 16  ;;  %v1624_v35 = vld [vmem:[%s2053_s1 + $0x40] sm:$0xff]  ;;  %vm1852_vm2 = vmand %vm199_vm0, %vm200_vm1 }
  0x16   : > { %398 = vmatpush.bf16.msra.mxu1 %v1621_v11  ;;  %v1633_v29 = vld [vmem:[%s2053_s1 + $0x88] sm:$0xff]  ;;  %v1632_v36 = vld [vmem:[%s2053_s1 + $0x80] sm:$0xff]  ;;  %v1656_v39 = vld [vmem:[%s2053_s1 + $0x138] sm:$0xff]  ;;  %vm228_vm5 = vsmask.f32 3328  ;;  %v1263_v2 = vrot.slane %v1817_v27, 9 }
  0x17   : > { %585 = vmatpush.bf16.msra.mxu3 %v1646_v12  ;;  %v1617_v30 = vld [vmem:[%s2053_s1 + $0x8] sm:$0xff]  ;;  %v1673_v40 = vld [vmem:[%s2053_s1 + $0x1b8] sm:$0xff]  ;;  %v1616_v41 = vld [vmem:[%s2053_s1] sm:$0xff]  ;;  %v234_v45 = vrot.slane %v232_v32, 4  ;;  %v237_v46 = vrot.slane %v235_v33, 5 }
  0x18   : > { %331 = vmatpush.bf16.msra.mxu0 %v1628_v13  ;;  %v1642_v31 = vld [vmem:[%s2053_s1 + $0xc8] sm:$0xff]  ;;  %v1641_v42 = vld [vmem:[%s2053_s1 + $0xc0] sm:$0xff]  ;;  %v202_v47 = vld [vmem:[#allocation2 + $0x8] sm:$0x3]  ;;  %vm229_vm6 = vsmask.f32 7440 }
  0x19   : > { %495 = vmatpush.bf16.msra.mxu2 %v1636_v14  ;;  %v209_v48 = vld [vmem:[#allocation2 + $0x4] sm:$0x1]  ;;  %v1664_v50 = vld [vmem:[%s2053_s1 + $0x178] sm:$0xff]  ;;  %v1655_v55 = vld [vmem:[%s2053_s1 + $0x130] sm:$0xff]  ;;  %v238_v58 = vor.u32 %v237_v46, %v234_v45 }
  0x1a   : > { %399 = vmatpush.bf16.msra.mxu1 %v1620_v15  ;;  %v1681_v51 = vld [vmem:[%s2053_s1 + $0x1f8] sm:$0xff]  ;;  %v1672_v56 = vld [vmem:[%s2053_s1 + $0x1b0] sm:$0xff]  ;;  %v241_v59 = vshll.u32 %v209_v48, 16  ;;  %v1654_v1 = vld [vmem:[%s2053_s1 + $0x128] sm:$0xff]  ;;  %v417_v3 = vrot.slane %v209_v48, 5 }
  0x1b   : > { %586 = vmatpush.bf16.msra.mxu3 %v1645_v16  ;;  %v179_v34 = vld [vmem:[#allocation1] sm:$0xff]  ;;  %v205_v61 = vld [vmem:[#allocation2 + $0x10] sm:$0x3]  ;;  %v1663_v62 = vld [vmem:[%s2053_s1 + $0x170] sm:$0xff]  ;;  %v239_v7 = vrot.slane %v238_v58, 4 }
  0x1c   : > { %332 = vmatpush.bf16.msra.mxu0 %v1627_v17  ;;  %v184_v37 = vshrl.u32 %v179_v34, 16  ;;  %v187_v38 = vshll.u32 %v179_v34, 16  ;;  %v183_v49 = vld [vmem:[#allocation1 + $0x20] sm:$0xff]  ;;  %v1680_v63 = vld [vmem:[%s2053_s1 + $0x1f0] sm:$0xff]  ;;  %v1671_v5 = vld [vmem:[%s2053_s1 + $0x1a8] sm:$0xff]  ;;  %v243_v8 = vrot.slane %v241_v59, 5 }
  0x1d   : > { %496 = vmatpush.bf16.msra.mxu2 %v1635_v18  ;;  %v190_v53 = vshrl.u32 %v183_v49, 16  ;;  %v193_v54 = vshll.u32 %v183_v49, 16  ;;  %v1880_v4 = vld [vmem:[#allocation2 + $0x18] sm:$0xf]  ;;  %v211_v6 = vld [vmem:[#allocation2 + $0xc] sm:$0x1]  ;;  %vm1894_vm8 = vmor %vm228_vm5, %vm229_vm6 }
  0x1e   : > { %400 = vmatpush.bf16.msra.mxu1 %v1619_v19  ;;  %v186_v43 = vrot.slane %v184_v37, 7  ;;  %v1662_v12 = vld [vmem:[%s2053_s1 + $0x168] sm:$0xff]  ;;  %v914_v15 = vshrl.u32 %v1880_v4, 16  ;;  %v917_v16 = vshll.u32 %v1880_v4, 16  ;;  %v1653_v17 = vld [vmem:[%s2053_s1 + $0x120] sm:$0xff]  ;;  %v255_v19 = vshll.u32 %v211_v6, 16 }
  0x1f   : > { %587 = vmatpush.bf16.msra.mxu3 %v1644_v20  ;;  %v192_v60 = vrot.slane %v190_v53, 7  ;;  %v1679_v13 = vld [vmem:[%s2053_s1 + $0x1e8] sm:$0xff]  ;;  %v1670_v18 = vld [vmem:[%s2053_s1 + $0x1a0] sm:$0xff]  ;;  %v418_v20 = vsel %vm1887_vm7, %v1263_v2, %v417_v3  ;;  %v421_v21 = vrot.slane %v211_v6, 5  ;;  %v1919_v26 = vld [vmem:[#allocation2 + $0xc] sm:$0x1] }
  0x20   : > { %333 = vmatpush.bf16.msra.mxu0 %v1626_v22  ;;  %v189_v52 = vor.u32 %v187_v38, %v186_v43  ;;  %v1229_v14 = vld [vmem:[#allocation2] sm:$0xf]  ;;  %v1661_v22 = vld [vmem:[%s2053_s1 + $0x160] sm:$0xff]  ;;  %v440_v33 = vunpack.c.l.b16 %v418_v20  ;;  %v1652_v34 = vld [vmem:[%s2053_s1 + $0x118] sm:$0xff]  ;;  %v916_v37 = vrot.slane %v914_v15, 4  ;;  %v919_v38 = vrot.slane %v917_v16, 5 }
  0x21   : > { %497 = vmatpush.bf16.msra.mxu2 %v1634_v23  ;;  %v195_v0 = vor.u32 %v193_v54, %v192_v60  ;;  %v1678_v27 = vld [vmem:[%s2053_s1 + $0x1e0] sm:$0xff]  ;;  %v1935_v43 = vld [vmem:[#allocation2 + $0x14] sm:$0x1]  ;;  %v257_v46 = vrot.slane %v255_v19, 5  ;;  %v716_v15 = vrot.slane %v1919_v26, 5  ;;  %v1687_v11 = vld [vmem:[%s2053_s1 + $0x228] sm:$0xff] }
  0x22   : > { %401 = vmatpush.bf16.msra.mxu1 %v1618_v24  ;;  %v203_v57 = vsel %vm1852_vm2, %v189_v52, %v202_v47  ;;  %v244_v24 = vsel %vm1894_vm8, %v239_v7, %v243_v8  ;;  %v1938_v45 = vld [vmem:[#allocation2 + $0x1c] sm:$0x1]  ;;  %v1660_v59 = vld [vmem:[%s2053_s1 + $0x158] sm:$0xff]  ;;  %v623_v6 = vshll.u32 %v1935_v43, 16  ;;  %v720_v16 = vrot.slane %v1935_v43, 5 }
  0x23   : > { %588 = vmatpush.bf16.msra.mxu3 %v1643_v25  ;;  %204 = vst [vmem:[#allocation2 + $0x8] sm:$0x3] %v203_v57  ;;  %v206_v10 = vsel %vm1852_vm2, %v195_v0, %v205_v61  ;;  %v276_v47 = vunpack.c.l.b16 %v244_v24  ;;  %v1943_v57 = vld [vmem:[#allocation2 + $0x14] sm:$0x1]  ;;  %v1666_v43 = vld [vmem:[%s2053_s1 + $0x180] sm:$0xff] }
  0x24   : > { %334 = vmatpush.bf16.msra.mxu0 %v1625_v28  ;;  %207 = vst [vmem:[#allocation2 + $0x10] sm:$0x3] %v206_v10  ;;  %v1677_v60 = vld [vmem:[%s2053_s1 + $0x1d8] sm:$0xff]  ;;  %v909_v10 = vshll.u32 %v1943_v57, 16 }
  0x25   : > { %498 = vmatpush.bf16.msra.mxu2 %v1633_v29 }
  0x26   : > { %402 = vmatpush.bf16.msra.mxu1 %v1617_v30 }
  0x27   : > { %589 = vmatpush.bf16.msra.mxu3 %v1642_v31 }
  0x28   : > { %335 = vmatpush.bf16.msra.mxu0 %v1624_v35 }
  0x29   : > { %499 = vmatpush.bf16.msra.mxu2 %v1632_v36 }
  0x2a   : > { %403 = vmatpush.bf16.msra.mxu1 %v1616_v41  ;;  %v210_v23 = vld [vmem:[#allocation2 + $0x8] sm:$0xf] }
  0x2b   : > { %590 = vmatpush.bf16.msra.mxu3 %v1641_v42  ;;  %v1615_v25 = vld [vmem:[#allocation2 + $0x4] sm:$0xf0]  ;;  %v246_v28 = vshrl.u32 %v210_v23, 16  ;;  %v249_v29 = vshll.u32 %v210_v23, 16  ;;  %v1264_v30 = vrot.slane %v210_v23, 9  ;;  %v1669_v42 = vld [vmem:[%s2053_s1 + $0x198] sm:$0xff] }
  0x2c   : > { %696 = vmatpush.bf16.msrb.mxu0 %v1656_v39  ;;  %v1230_v31 = vor.u32 %v1615_v25, %v1229_v14  ;;  %v1924_v32 = vld [vmem:[#allocation2 + $0x8] sm:$0xf]  ;;  %v1640_v49 = vld [vmem:[#allocation2 + $0xc] sm:$0xf0] }
  0x2d   : > { %883 = vmatpush.bf16.msrb.mxu2 %v1673_v40  ;;  %v1331_v35 = vld [vmem:[#allocation2 + $0x8] sm:$0xf]  ;;  %v600_v36 = vshrl.u32 %v1924_v32, 16  ;;  %v248_v39 = vrot.slane %v246_v28, 4  ;;  %v251_v40 = vrot.slane %v249_v29, 5  ;;  %v422_v41 = vsel %vm1887_vm7, %v1264_v30, %v421_v21  ;;  %v1650_v28 = vld [vmem:[%s2053_s1 + $0x108] sm:$0xff] }
  0x2e   : > { %791 = vmatpush.bf16.msrb.mxu1 %v1664_v50  ;;  %v603_v44 = vshll.u32 %v1924_v32, 16  ;;  %v441_v48 = vunpack.c.l.b16 %v422_v41  ;;  %v510_v50 = vld [vmem:[#allocation2 + $0x10] sm:$0xf]  ;;  %v1332_v53 = vor.u32 %v1640_v49, %v1331_v35  ;;  %v1413_v14 = vrot.slane %v1924_v32, 9  ;;  %v1658_v32 = vld [vmem:[%s2053_s1 + $0x148] sm:$0xff] }
  0x2f   : > { %996 = vmatpush.bf16.msrb.mxu3 %v1681_v51  ;;  %404 = vmatmul.bf16.vlgmr.msra.gmra.mxu1 %v1230_v31  ;;  %v609_v51 = vshll.u32 %v1919_v26, 16  ;;  %v252_v52 = vor.u32 %v251_v40, %v248_v39  ;;  %v614_v54 = vshrl.u32 %v510_v50, 16  ;;  %v602_v61 = vrot.slane %v600_v36, 4  ;;  %v1667_v31 = vld [vmem:[%s2053_s1 + $0x188] sm:$0xff] }
  0x30   : > { %697 = vmatpush.bf16.msrb.mxu0 %v1655_v55  ;;  %v617_v55 = vshll.u32 %v510_v50, 16  ;;  %v442_v58 = vpack.c.b16 %v441_v48, %v440_v33  ;;  %591 = vmatmul.bf16.vlgmr.msra.gmra.mxu3 %v1332_v53  ;;  %v1414_v19 = vrot.slane %v510_v50, 9  ;;  %v911_v30 = vrot.slane %v909_v10, 5  ;;  %v1665_v48 = vld [vmem:[#allocation2 + $0x14] sm:$0xf0] }
  0x31   : > { %884 = vmatpush.bf16.msrb.mxu2 %v1672_v56  ;;  %v1941_v56 = vld [vmem:[#allocation2 + $0x10] sm:$0xf]  ;;  %v253_v0 = vrot.slane %v252_v52, 4  ;;  %v616_v2 = vrot.slane %v614_v54, 4  ;;  %v611_v33 = vrot.slane %v609_v51, 5  ;;  %v625_v40 = vrot.slane %v623_v6, 5 }
  0x32   : > { %792 = vmatpush.bf16.msrb.mxu1 %v1663_v62  ;;  %v920_v62 = vor.u32 %v919_v38, %v916_v37  ;;  %v619_v3 = vrot.slane %v617_v55, 5  ;;  %500 = vmatmul.bf16.vlgmr.msra.gmra.mxu2 %v442_v58  ;;  %v900_v7 = vshrl.u32 %v1941_v56, 16  ;;  %v903_v8 = vshll.u32 %v1941_v56, 16  ;;  %v1675_v37 = vld [vmem:[%s2053_s1 + $0x1c8] sm:$0xff]  ;;  %v1657_v51 = vld [vmem:[%s2053_s1 + $0x140] sm:$0xff] }
  0x33   : > { %997 = vmatpush.bf16.msrb.mxu3 %v1680_v63  ;;  %v923_v63 = vshll.u32 %v1938_v45, 16  ;;  %v721_v35 = vsel %vm1887_vm7, %v1414_v19, %v720_v16  ;;  %v1674_v54 = vld [vmem:[%s2053_s1 + $0x1c0] sm:$0xff]  ;;  %v1020_v6 = vrot.slane %v1938_v45, 5  ;;  %v1564_v10 = vrot.slane %v1880_v4, 9 }
  0x34   : > { %698 = vmatpush.bf16.msrb.mxu0 %v1654_v1  ;;  %v605_v1 = vrot.slane %v603_v44, 5  ;;  %v902_v20 = vrot.slane %v900_v7, 4  ;;  %v905_v21 = vrot.slane %v903_v8, 5  ;;  %v620_v24 = vor.u32 %v619_v3, %v616_v2  ;;  %v1686_v2 = vld [vmem:[%s2053_s1 + $0x220] sm:$0xff]  ;;  %v1685_v3 = vld [vmem:[%s2053_s1 + $0x218] sm:$0xff]  ;;  %v1684_v7 = vld [vmem:[%s2053_s1 + $0x210] sm:$0xff] }
  0x35   : > { %885 = vmatpush.bf16.msrb.mxu2 %v1671_v5  ;;  %v1651_v5 = vld [vmem:[%s2053_s1 + $0x110] sm:$0xff]  ;;  %v921_v25 = vrot.slane %v920_v62, 4  ;;  %v925_v26 = vrot.slane %v923_v63, 5  ;;  %v740_v50 = vunpack.c.l.b16 %v721_v35  ;;  %v1563_v8 = vrot.slane %v1941_v56, 9  ;;  %v1682_v56 = vld [vmem:[%s2053_s1 + $0x200] sm:$0xff] }
  0x36   : > { %793 = vmatpush.bf16.msrb.mxu1 %v1662_v12  ;;  %v258_v12 = vsel %vm1894_vm8, %v253_v0, %v257_v46  ;;  %v606_v23 = vor.u32 %v605_v1, %v602_v61  ;;  %v906_v29 = vor.u32 %v905_v21, %v902_v20  ;;  %v621_v39 = vrot.slane %v620_v24, 4  ;;  %v1689_v46 = vld [vmem:[%s2053_s1 + $0x238] sm:$0xff]  ;;  %v1688_v61 = vld [vmem:[%s2053_s1 + $0x230] sm:$0xff] }
  0x37   : > { %998 = vmatpush.bf16.msrb.mxu3 %v1679_v13  ;;  %v1668_v13 = vld [vmem:[%s2053_s1 + $0x190] sm:$0xff]  ;;  %v926_v41 = vsel %vm1894_vm8, %v921_v25, %v925_v26  ;;  %v1021_v45 = vsel %vm1887_vm7, %v1564_v10, %v1020_v6 }
  0x38   : > { %699 = vmatpush.bf16.msrb.mxu0 %v1653_v17  ;;  %v277_v17 = vunpack.c.l.b16 %v258_v12  ;;  %v907_v36 = vrot.slane %v906_v29, 4  ;;  %v607_v38 = vrot.slane %v606_v23, 4  ;;  %v945_v53 = vunpack.c.l.b16 %v926_v41  ;;  %v1683_v12 = vld [vmem:[%s2053_s1 + $0x208] sm:$0xff] }
  0x39   : > { %886 = vmatpush.bf16.msrb.mxu2 %v1670_v18  ;;  %v1659_v18 = vld [vmem:[%s2053_s1 + $0x150] sm:$0xff]  ;;  %v626_v58 = vsel %vm1894_vm8, %v621_v39, %v625_v40  ;;  %v1699_v39 = vld [vmem:[%s2054_s2] ss:$0 sm:$0xff] }
  0x3a   : > { %794 = vmatpush.bf16.msrb.mxu1 %v1661_v22  ;;  %v1676_v22 = vld [vmem:[%s2053_s1 + $0x1d0] sm:$0xff]  ;;  %v912_v44 = vsel %vm1894_vm8, %v907_v36, %v911_v30  ;;  %v612_v55 = vsel %vm1894_vm8, %v607_v38, %v611_v33  ;;  %v645_v63 = vunpack.c.l.b16 %v626_v58 }
  0x3b   : > { %999 = vmatpush.bf16.msrb.mxu3 %v1678_v27  ;;  %v278_v27 = vpack.c.b16 %v277_v17, %v276_v47  ;;  %v1481_v47 = vld [vmem:[#allocation2 + $0x10] sm:$0xf]  ;;  %v944_v52 = vunpack.c.l.b16 %v912_v44  ;;  %v644_v62 = vunpack.c.l.b16 %v612_v55 }
  0x3c   : > { %700 = vmatpush.bf16.msrb.mxu0 %v1652_v34  ;;  %v717_v34 = vsel %vm1887_vm7, %v1413_v14, %v716_v15  ;;  %v1040_v14 = vunpack.c.l.b16 %v1021_v45 }
  0x3d   : > { %887 = vmatpush.bf16.msrb.mxu2 %v1669_v42  ;;  %336 = vmatmul.bf16.vlgmr.msra.gmra.mxu0 %v278_v27  ;;  %v1649_v42 = vld [vmem:[%s2053_s1 + $0x100] sm:$0xff]  ;;  %v739_v49 = vunpack.c.l.b16 %v717_v34  ;;  %v946_v0 = vpack.c.b16 %v945_v53, %v944_v52  ;;  %v646_v1 = vpack.c.b16 %v645_v63, %v644_v62 }
  0x3e   : > { %795 = vmatpush.bf16.msrb.mxu1 %v1660_v59  ;;  %v1482_v59 = vor.u32 %v1665_v48, %v1481_v47 }
  0x3f   : > { %1000 = vmatpush.bf16.msrb.mxu3 %v1677_v60  ;;  %v741_v60 = vpack.c.b16 %v740_v50, %v739_v49 }
  0x40   : > { %701 = vmatpush.bf16.msrb.mxu0 %v1651_v5  ;;  %v1016_v5 = vrot.slane %v1943_v57, 5 }
  0x41   : > { %888 = vmatpush.bf16.msrb.mxu2 %v1668_v13 }
  0x42   : > { %796 = vmatpush.bf16.msrb.mxu1 %v1659_v18  ;;  %v1017_v13 = vsel %vm1887_vm7, %v1563_v8, %v1016_v5 }
  0x43   : > { %1001 = vmatpush.bf16.msrb.mxu3 %v1676_v22  ;;  %v1039_v57 = vunpack.c.l.b16 %v1017_v13 }
  0x44   : > { %702 = vmatpush.bf16.msrb.mxu0 %v1650_v28 }
  0x45   : > { %889 = vmatpush.bf16.msrb.mxu2 %v1667_v31  ;;  %v1041_v15 = vpack.c.b16 %v1040_v14, %v1039_v57 }
  0x46   : > { %797 = vmatpush.bf16.msrb.mxu1 %v1658_v32 }
  0x47   : > { %1002 = vmatpush.bf16.msrb.mxu3 %v1675_v37 }
  0x48   : > { %703 = vmatpush.bf16.msrb.mxu0 %v1649_v42 }
  0x49   : > { %890 = vmatpush.bf16.msrb.mxu2 %v1666_v43 }
  0x4a   : > { %798 = vmatpush.bf16.msrb.mxu1 %v1657_v51 }
  0x4b   : > { %1003 = vmatpush.bf16.msrb.mxu3 %v1674_v54 }
  0x4c   : > { %1091 = vmatpush.bf16.msra.mxu0 %v1689_v46  ;;  %891 = vmatmul.bf16.vlgmr.msrb.gmra.mxu2 %v1482_v59 }
  0x4d   : > { %799 = vmatmul.bf16.vlgmr.msrb.gmra.mxu1 %v741_v60  ;;  %704 = vmatmul.bf16.vlgmr.msrb.gmra.mxu0 %v646_v1 }
  0x4e   : > { %1004 = vmatmul.bf16.vlgmr.msrb.gmra.mxu3 %v946_v0 }
  0x50   : > { %1092 = vmatpush.bf16.msra.mxu0 %v1688_v61 }
  0x54   : > { %1093 = vmatpush.bf16.msra.mxu0 %v1687_v11 }
  0x58   : > { %1094 = vmatpush.bf16.msra.mxu0 %v1686_v2 }
  0x5c   : > { %1095 = vmatpush.bf16.msra.mxu0 %v1685_v3 }
  0x60   : > { %1096 = vmatpush.bf16.msra.mxu0 %v1684_v7 }
  0x64   : > { %1097 = vmatpush.bf16.msra.mxu0 %v1683_v12 }
  0x68   : > { %1098 = vmatpush.bf16.msra.mxu0 %v1682_v56 }
  0x6b   : > { %1099 = vmatmul.bf16.vlgmr.msra.gmra.mxu0 %v1041_v15 }
  0xac   : > { %v405_v16 = vpop.f32.mrf.mxu1 }
  0xb3   : > { %v592_v19 = vpop.f32.mrf.mxu3 }
  0xb4   : > { %v407_v21 = vpop.f32.mrf.mxu1 }
  0xb5   : > { %v501_v17 = vpop.f32.mrf.mxu2 }
  0xba   : > { %v337_v4 = vpop.f32.mrf.mxu0 }
  0xbb   : > { %v406_v20 = vadd.f32 %v405_v16, %v337_v4  ;;  %v594_v25 = vpop.f32.mrf.mxu3 }
  0xbd   : > { %v506_v22 = vadd.f32 %v501_v17, %v406_v20  ;;  %v503_v9 = vpop.f32.mrf.mxu2 }
  0xbf   : > { %v597_v24 = vadd.f32 %v592_v19, %v506_v22 }
  0xc2   : > { %v339_v18 = vpop.f32.mrf.mxu0 }
  0xc3   : > { %v408_v26 = vadd.f32 %v407_v21, %v339_v18 }
  0xc5   : > { %v507_v30 = vadd.f32 %v503_v9, %v408_v26 }
  0xc7   : > { %v598_v34 = vadd.f32 %v594_v25, %v507_v30 }
  0xca   : > { %v705_v23 = vpop.f32.mrf.mxu0  ;;  %v800_v28 = vpop.f32.mrf.mxu1 }
  0xcb   : > { %v710_v27 = vadd.f32 %v705_v23, %v597_v24 }
  0xcd   : > { %v805_v31 = vadd.f32 %v800_v28, %v710_v27 }
  0xcf   : > { %v892_v29 = vpop.f32.mrf.mxu2 }
  0xd0   : > { %v897_v35 = vadd.f32 %v892_v29, %v805_v31 }
  0xd1   : > { %v1005_v33 = vpop.f32.mrf.mxu3 }
  0xd2   : > { %v707_v32 = vpop.f32.mrf.mxu0  ;;  %v802_v37 = vpop.f32.mrf.mxu1  ;;  %v1010_v38 = vadd.f32 %v1005_v33, %v897_v35 }
  0xd3   : > { %v711_v36 = vadd.f32 %v707_v32, %v598_v34 }
  0xd5   : > { %v806_v42 = vadd.f32 %v802_v37, %v711_v36 }
  0xd7   : > { %v894_v40 = vpop.f32.mrf.mxu2 }
  0xd8   : > { %v898_v44 = vadd.f32 %v894_v40, %v806_v42 }
  0xd9   : > { %v1007_v47 = vpop.f32.mrf.mxu3 }
  0xda   : > { %v1011_v49 = vadd.f32 %v1007_v47, %v898_v44 }
  0xe8   : > { %v1100_v41 = vpop.f32.mrf.mxu0 }
  0xe9   : > { %v1105_v43 = vadd.f32 %v1100_v41, %v1010_v38 }
  0xeb   : > { %v1111_v46 = vadd.f32 %v1699_v39, %v1105_v43 }
  0xed   : > { %v1113_v48 = vmax.f32 %v1111_v46, 0.0 }
  0xef   : > { %v1115_v50 = vpack.c.bf16 %v1113_v48, %v1113_v48 }
  0xf0   : > { %v1102_v51 = vpop.f32.mrf.mxu0 }
  0xf1   : > { %1117 = vst [vmem:[%s165_s21] sm:$0x1] %v1115_v50  ;;  %v1106_v52 = vadd.f32 %v1102_v51, %v1011_v49 }
  0xf3   : > { %v1112_v53 = vadd.f32 %v1699_v39, %v1106_v52 }
  0xf5   : > { %v1114_v54 = vmax.f32 %v1112_v53, 0.0 }
  0xf7   : > { %v1116_v55 = vpack.c.bf16 %v1114_v54, %v1114_v54 }
  0xf9   : > { %1118 = vst [vmem:[%s165_s21 + $0x1] sm:$0x1] %v1116_v55 }
  0xfa PF: > { %s13_s12 = sadd.s32 1, %s1706_s12  }
  0xfb   : > { %p10_p4 = scmp.ge.s32.totalorder %s13_s12, 4  }
  0xfd   :  { %12 = sbr.rel (!%p10_p4) target bundleno = 1 (0x1), region = 73 }

</bundles_post_ra>
